<compile_context>
chip_gen: v5e
topology: v5e:2x2
jax: 0.10.0
libtpu: 0.0.40
codegen_flags: <defaults>
</compile_context>

<pallas_src>
import functools

import jax
import jax.numpy as jnp
from jax import lax
from jax.experimental import pallas as pl
from jax.experimental.pallas import tpu as pltpu

LEAKY_SLOPE = 0.2
BN_EPS = 1e-5


def _vmem_limit_bytes():
    # Generation-aware scoped-VMEM limit: ~3/4 of physical, capped at 100 MiB.
    try:
        cap = int(pltpu.get_tpu_info().vmem_capacity_bytes)
    except Exception:
        cap = 64 * 1024 * 1024
    return max(32 * 1024 * 1024, min((cap * 3) // 4, 100 * 1024 * 1024))


def _num_tensorcores():
    # Conservative: only report >1 if the runtime exposes it (v7x has 2 TCs).
    try:
        info = pltpu.get_tpu_info()
        for attr in ("num_cores", "core_count", "num_tensorcores"):
            v = getattr(info, attr, None)
            if v:
                return int(v)
    except Exception:
        pass
    return 1


VMEM_LIMIT = _vmem_limit_bytes()


def _pick_tile(dim, candidates):
    # Falls back to the full dim (always a legal block) if nothing divides.
    for c in candidates:
        if dim % c == 0:
            return c
    return dim


def _full_spec(shape):
    nd = len(shape)
    return pl.BlockSpec(shape, lambda i, _nd=nd: (0,) * _nd)


# ---------------------------- Pallas kernels ---------------------------------

def _pdist_kernel(xq_ref, xk_ref, qn_ref, kn_ref, out_ref):
    # xq_ref: (TN, C) query tile, xk_ref: (N, C) all points of this batch.
    # qn_ref: (TN, 1), kn_ref: (1, N) precomputed squared norms (no in-kernel
    # cross-lane reduce / transpose).
    inner = lax.dot_general(xq_ref[...], xk_ref[...], (((1,), (1,)), ((), ())),
                            preferred_element_type=jnp.float32)      # (TN, N)
    out_ref[...] = 2.0 * inner - qn_ref[...] - kn_ref[...]


def pairwise_neg_sqdist(xt):
    """xt: (B, N, C) f32, C % 8 == 0 -> (B, N, N) f32 negative sq. distances."""
    B, N, C = xt.shape
    sq = jnp.sum(xt * xt, axis=-1)                       # (B, N), cheap XLA op
    qn = sq[:, :, None]                                  # (B, N, 1)
    kn = sq[:, None, :]                                  # (B, 1, N)
    tn = _pick_tile(N, (512, 256, 128, 64, 32, 16, 8))
    return pl.pallas_call(
        _pdist_kernel,
        out_shape=jax.ShapeDtypeStruct((B, N, N), jnp.float32),
        grid=(B, N // tn),
        in_specs=[
            pl.BlockSpec((None, tn, C), lambda b, i: (b, i, 0)),
            pl.BlockSpec((None, N, C), lambda b, i: (b, 0, 0)),
            pl.BlockSpec((None, tn, 1), lambda b, i: (b, i, 0)),
            pl.BlockSpec((None, 1, N), lambda b, i: (b, 0, 0)),
        ],
        out_specs=pl.BlockSpec((None, tn, N), lambda b, i: (b, i, 0)),
        compiler_params=pltpu.CompilerParams(
            dimension_semantics=("parallel", "parallel"),
            vmem_limit_bytes=VMEM_LIMIT),
    )(xt, xt, qn, kn)


def _edgeconv_kernel(neigh_ref, center_ref, wt_ref, wc_ref, bias_ref, out_ref,
                     *, slope, kb):
    # neigh_ref : (kb, TM, Cin) bf16  -- kb neighbour slices for TM points
    # center_ref: (TM, Cin)     bf16  -- the points themselves (K-invariant)
    # wt_ref    : (Cin, Cout)   bf16  -- BN-folded W_top
    # wc_ref    : (Cin, Cout)   bf16  -- BN-folded (W_bot - W_top)
    # bias_ref  : (1, Cout)     f32   -- folded BN bias
    # out_ref   : (TM, Cout)    f32   -- running max accumulator over K chunks
    j = pl.program_id(1)

    @pl.when(j == 0)
    def _():
        out_ref[...] = jnp.full_like(out_ref, -jnp.inf)

    acc = out_ref[...]
    for q in range(kb):                                   # kb is static
        y = jnp.dot(neigh_ref[q], wt_ref[...],
                    preferred_element_type=jnp.float32)
        acc = jnp.maximum(acc, y)
    out_ref[...] = acc

    @pl.when(j == pl.num_programs(1) - 1)
    def _():
        # K-invariant center term + bias + LeakyReLU applied once (hoisted).
        c = jnp.dot(center_ref[...], wc_ref[...],
                    preferred_element_type=jnp.float32)
        y = out_ref[...] + c + bias_ref[...]
        out_ref[...] = jnp.where(y > 0, y, slope * y)


def edgeconv(neigh, center, w_top, w_c, bias, *, slope=LEAKY_SLOPE):
    """Fused (W-split 1x1 conv -> folded BN -> max over K -> LeakyReLU).

    neigh: (K, M, Cin) bf16, center: (M, Cin) bf16,
    w_top/w_c: (C, Cout) bf16, bias: (1, Cout) f32.  Returns (M, Cout) f32.
    """
    K, M, Cin = neigh.shape
    c0 = w_top.shape[0]
    if c0 != Cin:                                         # match channel padding
        w_top = jnp.pad(w_top, ((0, Cin - c0), (0, 0)))
        w_c = jnp.pad(w_c, ((0, Cin - c0), (0, 0)))
    Cout = w_top.shape[-1]
    tm = _pick_tile(M, (2048, 1024, 512, 256, 128, 64, 32, 16, 8))
    # Block as many neighbours per grid step as fit the VMEM budget (whole K
    # for the small-Cin layers -> removes per-grid-step overhead).
    budget = VMEM_LIMIT // 4
    kb = K
    while kb > 1 and 2 * kb * tm * Cin * 2 > budget:
        kb -= 1
        while K % kb != 0:
            kb -= 1
    kern = functools.partial(_edgeconv_kernel, slope=slope, kb=kb)
    return pl.pallas_call(
        kern,
        out_shape=jax.ShapeDtypeStruct((M, Cout), jnp.float32),
        grid=(M // tm, K // kb),
        in_specs=[
            pl.BlockSpec((kb, tm, Cin), lambda i, j: (j, i, 0)),
            pl.BlockSpec((tm, Cin), lambda i, j: (i, 0)),
            pl.BlockSpec((Cin, Cout), lambda i, j: (0, 0)),
            pl.BlockSpec((Cin, Cout), lambda i, j: (0, 0)),
            pl.BlockSpec((1, Cout), lambda i, j: (0, 0)),
        ],
        out_specs=pl.BlockSpec((tm, Cout), lambda i, j: (i, 0)),
        compiler_params=pltpu.CompilerParams(
            dimension_semantics=("parallel", "arbitrary"),
            vmem_limit_bytes=VMEM_LIMIT),
    )(neigh, center, w_top, w_c, bias)


def _conv5_kernel(x1_ref, x2_ref, x3_ref, x4_ref,
                  w1_ref, w2_ref, w3_ref, w4_ref, b_ref, out_ref, *, slope):
    # x*_ref: (TN, Ci) f32 point tiles (one batch element), w*_ref: (Ci, TC)
    # bf16 row blocks of w5, out_ref: (1, TC) f32 running max over N tiles.
    j = pl.program_id(2)

    @pl.when(j == 0)
    def _():
        out_ref[...] = jnp.full_like(out_ref, -jnp.inf)

    def part(x_ref, w_ref):
        return jnp.dot(x_ref[...].astype(w_ref.dtype), w_ref[...],
                       preferred_element_type=jnp.float32)      # (TN, TC)

    y = (part(x1_ref, w1_ref) + part(x2_ref, w2_ref)
         + part(x3_ref, w3_ref) + part(x4_ref, w4_ref))
    out_ref[...] = jnp.maximum(out_ref[...], jnp.max(y, axis=0, keepdims=True))

    @pl.when(j == pl.num_programs(2) - 1)
    def _():
        o = out_ref[...] + b_ref[...]                    # bias/LReLU hoisted
        out_ref[...] = jnp.where(o > 0, o, slope * o)


def conv5_pool(xs, ws, bias, *, slope=LEAKY_SLOPE):
    """Fused conv5 (split-input 1x1 conv + folded BN + LReLU) + global max-pool.

    xs: 4 arrays (B, N, Ci) f32 (Ci = 64/64/128/256); ws: 4 row blocks of w5
    (Ci, 1024) bf16; bias (1, 1024) f32.  Returns (B, 1024) f32.
    """
    B, N, _ = xs[0].shape
    Cout = ws[0].shape[-1]
    # Column-split Cout only when >1 TensorCore per chip (v7x) — the split
    # re-reads x once per column block, a loss on single-TC chips.
    tc = Cout // 2 if (_num_tensorcores() >= 2 and Cout % 256 == 0) else Cout
    # Bound the f32 post-matmul intermediate (tn*tc*4 B) independent of B.
    tn = N
    for cand in (1024, 512, 256, 128, 64, 32, 16, 8):
        if N % cand == 0 and cand * tc * 4 <= 8 * 1024 * 1024:
            tn = cand
            break
    kern = functools.partial(_conv5_kernel, slope=slope)
    in_specs = (
        [pl.BlockSpec((None, tn, x.shape[-1]), lambda c, b, j: (b, j, 0))
         for x in xs]
        + [pl.BlockSpec((w.shape[0], tc), lambda c, b, j: (0, c)) for w in ws]
        + [pl.BlockSpec((1, tc), lambda c, b, j: (0, c))]
    )
    out = pl.pallas_call(
        kern,
        out_shape=jax.ShapeDtypeStruct((B, 1, Cout), jnp.float32),
        grid=(Cout // tc, B, N // tn),
        in_specs=in_specs,
        out_specs=pl.BlockSpec((None, 1, tc), lambda c, b, j: (b, 0, c)),
        compiler_params=pltpu.CompilerParams(
            dimension_semantics=("parallel", "parallel", "arbitrary"),
            vmem_limit_bytes=VMEM_LIMIT),
    )(*xs, *ws, bias)
    return out.reshape(B, Cout)


def _classifier_kernel(x_ref, w1_ref, b1_ref, w2_ref, b2_ref, w3_ref, b3_ref,
                       out_ref, *, slope):
    h = jnp.dot(x_ref[...], w1_ref[...], preferred_element_type=jnp.float32)
    h = h + b1_ref[...]
    h = jnp.where(h > 0, h, slope * h)
    h = jnp.dot(h.astype(w2_ref.dtype), w2_ref[...],
                preferred_element_type=jnp.float32)
    h = h + b2_ref[...]
    h = jnp.where(h > 0, h, slope * h)
    y = jnp.dot(h.astype(w3_ref.dtype), w3_ref[...],
                preferred_element_type=jnp.float32)
    out_ref[...] = y + b3_ref[...]


def classifier(x, w1, b1, w2, b2, w3, b3, *, slope=LEAKY_SLOPE):
    """Fused fc1+BN+LReLU -> fc2+BN+LReLU -> fc3+bias.  All weights in VMEM."""
    # TODO(synk): Dropout is an eval-mode identity and is omitted.
    B = x.shape[0]
    C = w3.shape[-1]
    args = (x, w1, b1, w2, b2, w3, b3)
    return pl.pallas_call(
        functools.partial(_classifier_kernel, slope=slope),
        out_shape=jax.ShapeDtypeStruct((B, C), jnp.float32),
        grid=(1,),
        in_specs=[_full_spec(a.shape) for a in args],
        out_specs=pl.BlockSpec((B, C), lambda i: (0, 0)),
        compiler_params=pltpu.CompilerParams(vmem_limit_bytes=VMEM_LIMIT),
    )(*args)


# ------------------------------ JAX glue --------------------------------------

def get_graph_feature(xt, k, *, use_approx_knn=False):
    """xt: (B, N, C) f32 -> (neigh (k, B*N, Cp) bf16, center (B*N, Cp) bf16)."""
    # TODO(synk): fuse this kNN gather into edgeconv via scalar-prefetched idx +
    # manual DMA so the (k, B*N, C) neighbour tensor never hits HBM.
    B, N, C = xt.shape
    if C % 8:
        xt = jnp.pad(xt, ((0, 0), (0, 0), (0, 8 - C % 8)))   # zeros: distances unchanged
        C = xt.shape[-1]
    pd = pairwise_neg_sqdist(xt)                              # Pallas, f32 (B,N,N)
    if use_approx_knn:
        _, idx = lax.approx_max_k(pd, k)                      # TPU-optimized partial top-k
    else:
        _, idx = lax.top_k(pd, k)                             # exact, matches reference
    x_flat = xt.reshape(B * N, C).astype(jnp.bfloat16)
    idx = idx + (jnp.arange(B, dtype=idx.dtype)[:, None, None] * N)   # (B, N, k)
    idx_t = jnp.transpose(idx, (2, 0, 1)).reshape(k, B * N)           # (k, B*N)
    neigh = x_flat[idx_t]                                             # (k, B*N, C)
    return neigh, x_flat


def fold_bn(w, cout):
    """Fold eval-mode BatchNorm (deterministic stats: gamma=1, beta=0, 0/1)."""
    # TODO(synk): plug real running statistics here when porting trained weights.
    gamma = jnp.ones((cout,), jnp.float32)
    beta = jnp.zeros((cout,), jnp.float32)
    mean = jnp.zeros((cout,), jnp.float32)
    var = jnp.ones((cout,), jnp.float32)
    scale = gamma * jax.lax.rsqrt(var + BN_EPS)
    bias = (beta - mean * scale)[None, :]
    return w * scale[None, :], bias


def init_params(key, num_classes=10):
    ks = jax.random.split(key, 9)

    def dense(rk, cin, cout):
        return jax.random.normal(rk, (cin, cout), jnp.float32) / jnp.sqrt(float(cin))

    def edge(rk, c, cout):
        w, bias = fold_bn(dense(rk, 2 * c, cout), cout)       # (2C, Cout)
        w_top = w[:c].astype(jnp.bfloat16)                    # acts on neigh
        w_c = (w[c:] - w[:c]).astype(jnp.bfloat16)            # acts on center
        return w_top, w_c, bias

    p = {}
    p["ec1"] = edge(ks[0], 3, 64)
    p["ec2"] = edge(ks[1], 64, 64)
    p["ec3"] = edge(ks[2], 64, 128)
    p["ec4"] = edge(ks[3], 128, 256)

    w5, b5 = fold_bn(dense(ks[4], 512, 1024), 1024)
    splits = (0, 64, 128, 256, 512)
    p["w5"] = tuple(w5[splits[i]:splits[i + 1]].astype(jnp.bfloat16)
                    for i in range(4))
    p["b5"] = b5

    fc1, bf1 = fold_bn(dense(ks[5], 1024, 512), 512)
    fc2, bf2 = fold_bn(dense(ks[6], 512, 256), 256)
    fc3 = dense(ks[7], 256, num_classes)
    fc3_b = jax.random.normal(ks[8], (1, num_classes), jnp.float32) * 0.01
    p["fc"] = (fc1.astype(jnp.bfloat16), bf1,
               fc2.astype(jnp.bfloat16), bf2,
               fc3.astype(jnp.bfloat16), fc3_b)
    return p


def dgcnn_forward(params, x, *, k, use_approx_knn=False):
    """x: (B, 3, N) — same interface as the PyTorch module."""
    B, _, N = x.shape
    xt = jnp.transpose(x, (0, 2, 1)).astype(jnp.float32)        # (B, N, 3)

    def edge_block(xt_in, layer):
        neigh, center = get_graph_feature(xt_in, k, use_approx_knn=use_approx_knn)
        w_top, w_c, b = params[layer]
        out = edgeconv(neigh, center, w_top, w_c, b)            # (B*N, Cout) f32
        return out.reshape(B, N, -1)

    x1 = edge_block(xt, "ec1")                                  # (B, N, 64)
    x2 = edge_block(x1, "ec2")                                  # (B, N, 64)
    x3 = edge_block(x2, "ec3")                                  # (B, N, 128)
    x4 = edge_block(x3, "ec4")                                  # (B, N, 256)

    # conv5 + adaptive_max_pool1d; x1..x4 are consumed directly (no xcat).
    x5 = conv5_pool((x1, x2, x3, x4), params["w5"], params["b5"])   # (B, 1024)

    return classifier(x5.astype(jnp.bfloat16), *params["fc"])       # (B, classes)


if __name__ == "__main__":
    key = jax.random.PRNGKey(0)
    pkey, xkey = jax.random.split(key)

    NUM_CLASSES = 10
    B, N, K = 2, 16, 4                 # small shapes: 2 clouds of 16 points, k=4
    params = init_params(pkey, num_classes=NUM_CLASSES)
    x = jax.random.normal(xkey, (B, 3, N), jnp.float32)

    fwd = jax.jit(functools.partial(dgcnn_forward, k=K))
    out = fwd(params, x)
    jax.block_until_ready(out)
    assert out.shape == (B, NUM_CLASSES), out.shape
    assert bool(jnp.all(jnp.isfinite(out)))
    print("KERNEL_OK")
</pallas_src>

<mosaic_0001>
module attributes {stable_mosaic.version = 11 : i64} {
  func.func @_pdist_kernel(%arg0: i32, %arg1: i32, %arg2: memref<1x16x8xf32, #tpu.memory_space<vmem>>, %arg3: memref<1x16x8xf32, #tpu.memory_space<vmem>>, %arg4: memref<1x16x1xf32, #tpu.memory_space<vmem>>, %arg5: memref<1x1x16xf32, #tpu.memory_space<vmem>>, %arg6: memref<1x16x16xf32, #tpu.memory_space<vmem>>) attributes {dimension_semantics = [#tpu.dimension_semantics<parallel>, #tpu.dimension_semantics<parallel>], iteration_bounds = array<i64: 2, 1>, scalar_prefetch = 0 : i64, scratch_operands = 0 : i64, tpu.core_type = #tpu.core_type<tc>, window_params = [{transform_indices = @transform_0, window_bounds = array<i64: 1, 16, 8>}, {transform_indices = @transform_1, window_bounds = array<i64: 1, 16, 8>}, {transform_indices = @transform_2, window_bounds = array<i64: 1, 16, 1>}, {transform_indices = @transform_3, window_bounds = array<i64: 1, 1, 16>}, {transform_indices = @transform_4, window_bounds = array<i64: 1, 16, 16>}]} {
    %c0 = arith.constant 0 : index
    %c0_0 = arith.constant 0 : index
    %c0_1 = arith.constant 0 : index
    %0 = vector.load %arg2[%c0, %c0_0, %c0_1] : memref<1x16x8xf32, #tpu.memory_space<vmem>>, vector<1x16x8xf32>
    %1 = vector.shape_cast %0 : vector<1x16x8xf32> to vector<16x8xf32>
    %c0_2 = arith.constant 0 : index
    %c0_3 = arith.constant 0 : index
    %c0_4 = arith.constant 0 : index
    %2 = vector.load %arg3[%c0_2, %c0_3, %c0_4] : memref<1x16x8xf32, #tpu.memory_space<vmem>>, vector<1x16x8xf32>
    %3 = vector.shape_cast %2 : vector<1x16x8xf32> to vector<16x8xf32>
    %cst = arith.constant dense<0.000000e+00> : vector<16x16xf32>
    %4 = tpu.matmul %1, %3, %cst {dimension_numbers = #tpu.dot_dimension_numbers<[1], [1], [0], [0], [0, 0, 1, 0], [], []>} : vector<16x8xf32>, vector<16x8xf32>, vector<16x16xf32> -> vector<16x16xf32>
    %cst_5 = arith.constant 2.000000e+00 : f32
    %5 = vector.broadcast %cst_5 : f32 to vector<16x16xf32>
    %6 = arith.mulf %5, %4 : vector<16x16xf32>
    %c0_6 = arith.constant 0 : index
    %c0_7 = arith.constant 0 : index
    %c0_8 = arith.constant 0 : index
    %7 = vector.load %arg4[%c0_6, %c0_7, %c0_8] : memref<1x16x1xf32, #tpu.memory_space<vmem>>, vector<1x16x1xf32>
    %8 = vector.shape_cast %7 : vector<1x16x1xf32> to vector<16x1xf32>
    %9 = vector.broadcast %8 : vector<16x1xf32> to vector<16x16xf32>
    %10 = arith.subf %6, %9 : vector<16x16xf32>
    %c0_9 = arith.constant 0 : index
    %c0_10 = arith.constant 0 : index
    %c0_11 = arith.constant 0 : index
    %11 = vector.load %arg5[%c0_9, %c0_10, %c0_11] : memref<1x1x16xf32, #tpu.memory_space<vmem>>, vector<1x1x16xf32>
    %12 = vector.shape_cast %11 : vector<1x1x16xf32> to vector<1x16xf32>
    %13 = vector.broadcast %12 : vector<1x16xf32> to vector<16x16xf32>
    %14 = arith.subf %10, %13 : vector<16x16xf32>
    %c0_12 = arith.constant 0 : index
    %c0_13 = arith.constant 0 : index
    %c0_14 = arith.constant 0 : index
    %15 = vector.load %arg6[%c0_12, %c0_13, %c0_14] : memref<1x16x16xf32, #tpu.memory_space<vmem>>, vector<1x16x16xf32>
    %16 = vector.shape_cast %15 : vector<1x16x16xf32> to vector<16x16xf32>
    %17 = vector.shape_cast %14 : vector<16x16xf32> to vector<1x16x16xf32>
    tpu.vector_store %arg6[%c0_12, %c0_13, %c0_14], %17 {strides = array<i32>} : memref<1x16x16xf32, #tpu.memory_space<vmem>>, vector<1x16x16xf32>,
    return
  }
  func.func @transform_0(%arg0: i32, %arg1: i32) -> (i32, i32, i32) {
    %c0_i32 = arith.constant 0 : i32
    %c0_i32_0 = arith.constant 0 : i32
    return %arg0, %arg1, %c0_i32 : i32, i32, i32
  }
  func.func @transform_1(%arg0: i32, %arg1: i32) -> (i32, i32, i32) {
    %c0_i32 = arith.constant 0 : i32
    %c0_i32_0 = arith.constant 0 : i32
    %c0_i32_1 = arith.constant 0 : i32
    return %arg0, %c0_i32, %c0_i32_0 : i32, i32, i32
  }
  func.func @transform_2(%arg0: i32, %arg1: i32) -> (i32, i32, i32) {
    %c0_i32 = arith.constant 0 : i32
    %c0_i32_0 = arith.constant 0 : i32
    return %arg0, %arg1, %c0_i32 : i32, i32, i32
  }
  func.func @transform_3(%arg0: i32, %arg1: i32) -> (i32, i32, i32) {
    %c0_i32 = arith.constant 0 : i32
    %c0_i32_0 = arith.constant 0 : i32
    %c0_i32_1 = arith.constant 0 : i32
    return %arg0, %c0_i32, %c0_i32_0 : i32, i32, i32
  }
  func.func @transform_4(%arg0: i32, %arg1: i32) -> (i32, i32, i32) {
    %c0_i32 = arith.constant 0 : i32
    %c0_i32_0 = arith.constant 0 : i32
    return %arg0, %arg1, %c0_i32 : i32, i32, i32
  }
}

module attributes {stable_mosaic.version = 11 : i64} {
  func.func @_edgeconv_kernel(%arg0: i32, %arg1: i32, %arg2: memref<4x32x8xbf16, #tpu.memory_space<vmem>>, %arg3: memref<32x8xbf16, #tpu.memory_space<vmem>>, %arg4: memref<8x64xbf16, #tpu.memory_space<vmem>>, %arg5: memref<8x64xbf16, #tpu.memory_space<vmem>>, %arg6: memref<1x64xf32, #tpu.memory_space<vmem>>, %arg7: memref<32x64xf32, #tpu.memory_space<vmem>>) attributes {dimension_semantics = [#tpu.dimension_semantics<parallel>, #tpu.dimension_semantics<arbitrary>], iteration_bounds = array<i64: 1, 1>, scalar_prefetch = 0 : i64, scratch_operands = 0 : i64, tpu.core_type = #tpu.core_type<tc>, window_params = [{transform_indices = @transform_0, window_bounds = array<i64: 4, 32, 8>}, {transform_indices = @transform_1, window_bounds = array<i64: 32, 8>}, {pipeline_mode = #tpu.pipeline_mode<synchronous>, transform_indices = @transform_2, window_bounds = array<i64: 8, 64>}, {pipeline_mode = #tpu.pipeline_mode<synchronous>, transform_indices = @transform_3, window_bounds = array<i64: 8, 64>}, {pipeline_mode = #tpu.pipeline_mode<synchronous>, transform_indices = @transform_4, window_bounds = array<i64: 1, 64>}, {transform_indices = @transform_5, window_bounds = array<i64: 32, 64>}]} {
    %c0_i32 = arith.constant 0 : i32
    %0 = arith.cmpi eq, %arg1, %c0_i32 : i32
    %1 = arith.extui %0 : i1 to i32
    %c0_i32_0 = arith.constant 0 : i32
    %2 = arith.cmpi ne, %1, %c0_i32_0 : i32
    scf.if %2 {
      %cst_26 = arith.constant 0xFF800000 : f32
      %28 = vector.broadcast %cst_26 : f32 to vector<32x64xf32>
      %c0_27 = arith.constant 0 : index
      %c0_28 = arith.constant 0 : index
      %29 = vector.load %arg7[%c0_27, %c0_28] : memref<32x64xf32, #tpu.memory_space<vmem>>, vector<32x64xf32>
      tpu.vector_store %arg7[%c0_27, %c0_28], %28 {strides = array<i32>} : memref<32x64xf32, #tpu.memory_space<vmem>>, vector<32x64xf32>,
    } else {
    }
    %c0 = arith.constant 0 : index
    %c0_1 = arith.constant 0 : index
    %3 = vector.load %arg7[%c0, %c0_1] : memref<32x64xf32, #tpu.memory_space<vmem>>, vector<32x64xf32>
    %c0_2 = arith.constant 0 : index
    %c0_3 = arith.constant 0 : index
    %c0_4 = arith.constant 0 : index
    %4 = vector.load %arg2[%c0_2, %c0_3, %c0_4] : memref<4x32x8xbf16, #tpu.memory_space<vmem>>, vector<1x32x8xbf16>
    %5 = vector.shape_cast %4 : vector<1x32x8xbf16> to vector<32x8xbf16>
    %c0_5 = arith.constant 0 : index
    %c0_6 = arith.constant 0 : index
    %6 = vector.load %arg4[%c0_5, %c0_6] : memref<8x64xbf16, #tpu.memory_space<vmem>>, vector<8x64xbf16>
    %cst = arith.constant dense<0.000000e+00> : vector<32x64xf32>
    %7 = tpu.matmul %5, %6, %cst {dimension_numbers = #tpu.dot_dimension_numbers<[1], [0], [0], [1], [0, 0, 1, 1], [], []>} : vector<32x8xbf16>, vector<8x64xbf16>, vector<32x64xf32> -> vector<32x64xf32>
    %8 = arith.maximumf %3, %7 : vector<32x64xf32>
    %c1 = arith.constant 1 : index
    %c0_7 = arith.constant 0 : index
    %c0_8 = arith.constant 0 : index
    %9 = vector.load %arg2[%c1, %c0_7, %c0_8] : memref<4x32x8xbf16, #tpu.memory_space<vmem>>, vector<1x32x8xbf16>
    %10 = vector.shape_cast %9 : vector<1x32x8xbf16> to vector<32x8xbf16>
    %c0_9 = arith.constant 0 : index
    %c0_10 = arith.constant 0 : index
    %11 = vector.load %arg4[%c0_9, %c0_10] : memref<8x64xbf16, #tpu.memory_space<vmem>>, vector<8x64xbf16>
    %cst_11 = arith.constant dense<0.000000e+00> : vector<32x64xf32>
    %12 = tpu.matmul %10, %11, %cst_11 {dimension_numbers = #tpu.dot_dimension_numbers<[1], [0], [0], [1], [0, 0, 1, 1], [], []>} : vector<32x8xbf16>, vector<8x64xbf16>, vector<32x64xf32> -> vector<32x64xf32>
    %13 = arith.maximumf %8, %12 : vector<32x64xf32>
    %c2 = arith.constant 2 : index
    %c0_12 = arith.constant 0 : index
    %c0_13 = arith.constant 0 : index
    %14 = vector.load %arg2[%c2, %c0_12, %c0_13] : memref<4x32x8xbf16, #tpu.memory_space<vmem>>, vector<1x32x8xbf16>
    %15 = vector.shape_cast %14 : vector<1x32x8xbf16> to vector<32x8xbf16>
    %c0_14 = arith.constant 0 : index
    %c0_15 = arith.constant 0 : index
    %16 = vector.load %arg4[%c0_14, %c0_15] : memref<8x64xbf16, #tpu.memory_space<vmem>>, vector<8x64xbf16>
    %cst_16 = arith.constant dense<0.000000e+00> : vector<32x64xf32>
    %17 = tpu.matmul %15, %16, %cst_16 {dimension_numbers = #tpu.dot_dimension_numbers<[1], [0], [0], [1], [0, 0, 1, 1], [], []>} : vector<32x8xbf16>, vector<8x64xbf16>, vector<32x64xf32> -> vector<32x64xf32>
    %18 = arith.maximumf %13, %17 : vector<32x64xf32>
    %c3 = arith.constant 3 : index
    %c0_17 = arith.constant 0 : index
    %c0_18 = arith.constant 0 : index
    %19 = vector.load %arg2[%c3, %c0_17, %c0_18] : memref<4x32x8xbf16, #tpu.memory_space<vmem>>, vector<1x32x8xbf16>
    %20 = vector.shape_cast %19 : vector<1x32x8xbf16> to vector<32x8xbf16>
    %c0_19 = arith.constant 0 : index
    %c0_20 = arith.constant 0 : index
    %21 = vector.load %arg4[%c0_19, %c0_20] : memref<8x64xbf16, #tpu.memory_space<vmem>>, vector<8x64xbf16>
    %cst_21 = arith.constant dense<0.000000e+00> : vector<32x64xf32>
    %22 = tpu.matmul %20, %21, %cst_21 {dimension_numbers = #tpu.dot_dimension_numbers<[1], [0], [0], [1], [0, 0, 1, 1], [], []>} : vector<32x8xbf16>, vector<8x64xbf16>, vector<32x64xf32> -> vector<32x64xf32>
    %23 = arith.maximumf %18, %22 : vector<32x64xf32>
    %c0_22 = arith.constant 0 : index
    %c0_23 = arith.constant 0 : index
    %24 = vector.load %arg7[%c0_22, %c0_23] : memref<32x64xf32, #tpu.memory_space<vmem>>, vector<32x64xf32>
    tpu.vector_store %arg7[%c0_22, %c0_23], %23 {strides = array<i32>} : memref<32x64xf32, #tpu.memory_space<vmem>>, vector<32x64xf32>,
    %c0_i32_24 = arith.constant 0 : i32
    %25 = arith.cmpi eq, %arg1, %c0_i32_24 : i32
    %26 = arith.extui %25 : i1 to i32
    %c0_i32_25 = arith.constant 0 : i32
    %27 = arith.cmpi ne, %26, %c0_i32_25 : i32
    scf.if %27 {
      %c0_26 = arith.constant 0 : index
      %c0_27 = arith.constant 0 : index
      %28 = vector.load %arg3[%c0_26, %c0_27] : memref<32x8xbf16, #tpu.memory_space<vmem>>, vector<32x8xbf16>
      %c0_28 = arith.constant 0 : index
      %c0_29 = arith.constant 0 : index
      %29 = vector.load %arg5[%c0_28, %c0_29] : memref<8x64xbf16, #tpu.memory_space<vmem>>, vector<8x64xbf16>
      %cst_30 = arith.constant dense<0.000000e+00> : vector<32x64xf32>
      %30 = tpu.matmul %28, %29, %cst_30 {dimension_numbers = #tpu.dot_dimension_numbers<[1], [0], [0], [1], [0, 0, 1, 1], [], []>} : vector<32x8xbf16>, vector<8x64xbf16>, vector<32x64xf32> -> vector<32x64xf32>
      %c0_31 = arith.constant 0 : index
      %c0_32 = arith.constant 0 : index
      %31 = vector.load %arg7[%c0_31, %c0_32] : memref<32x64xf32, #tpu.memory_space<vmem>>, vector<32x64xf32>
      %32 = arith.addf %31, %30 : vector<32x64xf32>
      %c0_33 = arith.constant 0 : index
      %c0_34 = arith.constant 0 : index
      %33 = vector.load %arg6[%c0_33, %c0_34] : memref<1x64xf32, #tpu.memory_space<vmem>>, vector<1x64xf32>
      %34 = vector.broadcast %33 : vector<1x64xf32> to vector<32x64xf32>
      %35 = arith.addf %32, %34 : vector<32x64xf32>
      %cst_35 = arith.constant 0.000000e+00 : f32
      %36 = vector.broadcast %cst_35 : f32 to vector<32x64xf32>
      %37 = arith.cmpf ogt, %35, %36 : vector<32x64xf32>
      %cst_36 = arith.constant 2.000000e-01 : f32
      %38 = vector.broadcast %cst_36 : f32 to vector<32x64xf32>
      %39 = arith.mulf %38, %35 : vector<32x64xf32>
      %40 = arith.select %37, %35, %39 : vector<32x64xi1>, vector<32x64xf32>
      %c0_37 = arith.constant 0 : index
      %c0_38 = arith.constant 0 : index
      %41 = vector.load %arg7[%c0_37, %c0_38] : memref<32x64xf32, #tpu.memory_space<vmem>>, vector<32x64xf32>
      tpu.vector_store %arg7[%c0_37, %c0_38], %40 {strides = array<i32>} : memref<32x64xf32, #tpu.memory_space<vmem>>, vector<32x64xf32>,
    } else {
    }
    return
  }
  func.func @transform_0(%arg0: i32, %arg1: i32) -> (i32, i32, i32) {
    %c0_i32 = arith.constant 0 : i32
    %c0_i32_0 = arith.constant 0 : i32
    return %arg1, %arg0, %c0_i32 : i32, i32, i32
  }
  func.func @transform_1(%arg0: i32, %arg1: i32) -> (i32, i32) {
    %c0_i32 = arith.constant 0 : i32
    %c0_i32_0 = arith.constant 0 : i32
    return %arg0, %c0_i32 : i32, i32
  }
  func.func @transform_2(%arg0: i32, %arg1: i32) -> (i32, i32) {
    %c0_i32 = arith.constant 0 : i32
    %c0_i32_0 = arith.constant 0 : i32
    %c0_i32_1 = arith.constant 0 : i32
    return %c0_i32, %c0_i32_0 : i32, i32
  }
  func.func @transform_3(%arg0: i32, %arg1: i32) -> (i32, i32) {
    %c0_i32 = arith.constant 0 : i32
    %c0_i32_0 = arith.constant 0 : i32
    %c0_i32_1 = arith.constant 0 : i32
    return %c0_i32, %c0_i32_0 : i32, i32
  }
  func.func @transform_4(%arg0: i32, %arg1: i32) -> (i32, i32) {
    %c0_i32 = arith.constant 0 : i32
    %c0_i32_0 = arith.constant 0 : i32
    %c0_i32_1 = arith.constant 0 : i32
    return %c0_i32, %c0_i32_0 : i32, i32
  }
  func.func @transform_5(%arg0: i32, %arg1: i32) -> (i32, i32) {
    %c0_i32 = arith.constant 0 : i32
    %c0_i32_0 = arith.constant 0 : i32
    return %arg0, %c0_i32 : i32, i32
  }
}

module attributes {stable_mosaic.version = 11 : i64} {
  func.func @_pdist_kernel(%arg0: i32, %arg1: i32, %arg2: memref<1x16x64xf32, #tpu.memory_space<vmem>>, %arg3: memref<1x16x64xf32, #tpu.memory_space<vmem>>, %arg4: memref<1x16x1xf32, #tpu.memory_space<vmem>>, %arg5: memref<1x1x16xf32, #tpu.memory_space<vmem>>, %arg6: memref<1x16x16xf32, #tpu.memory_space<vmem>>) attributes {dimension_semantics = [#tpu.dimension_semantics<parallel>, #tpu.dimension_semantics<parallel>], iteration_bounds = array<i64: 2, 1>, scalar_prefetch = 0 : i64, scratch_operands = 0 : i64, tpu.core_type = #tpu.core_type<tc>, window_params = [{transform_indices = @transform_0, window_bounds = array<i64: 1, 16, 64>}, {transform_indices = @transform_1, window_bounds = array<i64: 1, 16, 64>}, {transform_indices = @transform_2, window_bounds = array<i64: 1, 16, 1>}, {transform_indices = @transform_3, window_bounds = array<i64: 1, 1, 16>}, {transform_indices = @transform_4, window_bounds = array<i64: 1, 16, 16>}]} {
    %c0 = arith.constant 0 : index
    %c0_0 = arith.constant 0 : index
    %c0_1 = arith.constant 0 : index
    %0 = vector.load %arg2[%c0, %c0_0, %c0_1] : memref<1x16x64xf32, #tpu.memory_space<vmem>>, vector<1x16x64xf32>
    %1 = vector.shape_cast %0 : vector<1x16x64xf32> to vector<16x64xf32>
    %c0_2 = arith.constant 0 : index
    %c0_3 = arith.constant 0 : index
    %c0_4 = arith.constant 0 : index
    %2 = vector.load %arg3[%c0_2, %c0_3, %c0_4] : memref<1x16x64xf32, #tpu.memory_space<vmem>>, vector<1x16x64xf32>
    %3 = vector.shape_cast %2 : vector<1x16x64xf32> to vector<16x64xf32>
    %cst = arith.constant dense<0.000000e+00> : vector<16x16xf32>
    %4 = tpu.matmul %1, %3, %cst {dimension_numbers = #tpu.dot_dimension_numbers<[1], [1], [0], [0], [0, 0, 1, 0], [], []>} : vector<16x64xf32>, vector<16x64xf32>, vector<16x16xf32> -> vector<16x16xf32>
    %cst_5 = arith.constant 2.000000e+00 : f32
    %5 = vector.broadcast %cst_5 : f32 to vector<16x16xf32>
    %6 = arith.mulf %5, %4 : vector<16x16xf32>
    %c0_6 = arith.constant 0 : index
    %c0_7 = arith.constant 0 : index
    %c0_8 = arith.constant 0 : index
    %7 = vector.load %arg4[%c0_6, %c0_7, %c0_8] : memref<1x16x1xf32, #tpu.memory_space<vmem>>, vector<1x16x1xf32>
    %8 = vector.shape_cast %7 : vector<1x16x1xf32> to vector<16x1xf32>
    %9 = vector.broadcast %8 : vector<16x1xf32> to vector<16x16xf32>
    %10 = arith.subf %6, %9 : vector<16x16xf32>
    %c0_9 = arith.constant 0 : index
    %c0_10 = arith.constant 0 : index
    %c0_11 = arith.constant 0 : index
    %11 = vector.load %arg5[%c0_9, %c0_10, %c0_11] : memref<1x1x16xf32, #tpu.memory_space<vmem>>, vector<1x1x16xf32>
    %12 = vector.shape_cast %11 : vector<1x1x16xf32> to vector<1x16xf32>
    %13 = vector.broadcast %12 : vector<1x16xf32> to vector<16x16xf32>
    %14 = arith.subf %10, %13 : vector<16x16xf32>
    %c0_12 = arith.constant 0 : index
    %c0_13 = arith.constant 0 : index
    %c0_14 = arith.constant 0 : index
    %15 = vector.load %arg6[%c0_12, %c0_13, %c0_14] : memref<1x16x16xf32, #tpu.memory_space<vmem>>, vector<1x16x16xf32>
    %16 = vector.shape_cast %15 : vector<1x16x16xf32> to vector<16x16xf32>
    %17 = vector.shape_cast %14 : vector<16x16xf32> to vector<1x16x16xf32>
    tpu.vector_store %arg6[%c0_12, %c0_13, %c0_14], %17 {strides = array<i32>} : memref<1x16x16xf32, #tpu.memory_space<vmem>>, vector<1x16x16xf32>,
    return
  }
  func.func @transform_0(%arg0: i32, %arg1: i32) -> (i32, i32, i32) {
    %c0_i32 = arith.constant 0 : i32
    %c0_i32_0 = arith.constant 0 : i32
    return %arg0, %arg1, %c0_i32 : i32, i32, i32
  }
  func.func @transform_1(%arg0: i32, %arg1: i32) -> (i32, i32, i32) {
    %c0_i32 = arith.constant 0 : i32
    %c0_i32_0 = arith.constant 0 : i32
    %c0_i32_1 = arith.constant 0 : i32
    return %arg0, %c0_i32, %c0_i32_0 : i32, i32, i32
  }
  func.func @transform_2(%arg0: i32, %arg1: i32) -> (i32, i32, i32) {
    %c0_i32 = arith.constant 0 : i32
    %c0_i32_0 = arith.constant 0 : i32
    return %arg0, %arg1, %c0_i32 : i32, i32, i32
  }
  func.func @transform_3(%arg0: i32, %arg1: i32) -> (i32, i32, i32) {
    %c0_i32 = arith.constant 0 : i32
    %c0_i32_0 = arith.constant 0 : i32
    %c0_i32_1 = arith.constant 0 : i32
    return %arg0, %c0_i32, %c0_i32_0 : i32, i32, i32
  }
  func.func @transform_4(%arg0: i32, %arg1: i32) -> (i32, i32, i32) {
    %c0_i32 = arith.constant 0 : i32
    %c0_i32_0 = arith.constant 0 : i32
    return %arg0, %arg1, %c0_i32 : i32, i32, i32
  }
}

module attributes {stable_mosaic.version = 11 : i64} {
  func.func @_edgeconv_kernel(%arg0: i32, %arg1: i32, %arg2: memref<4x32x64xbf16, #tpu.memory_space<vmem>>, %arg3: memref<32x64xbf16, #tpu.memory_space<vmem>>, %arg4: memref<64x64xbf16, #tpu.memory_space<vmem>>, %arg5: memref<64x64xbf16, #tpu.memory_space<vmem>>, %arg6: memref<1x64xf32, #tpu.memory_space<vmem>>, %arg7: memref<32x64xf32, #tpu.memory_space<vmem>>) attributes {dimension_semantics = [#tpu.dimension_semantics<parallel>, #tpu.dimension_semantics<arbitrary>], iteration_bounds = array<i64: 1, 1>, scalar_prefetch = 0 : i64, scratch_operands = 0 : i64, tpu.core_type = #tpu.core_type<tc>, window_params = [{transform_indices = @transform_0, window_bounds = array<i64: 4, 32, 64>}, {transform_indices = @transform_1, window_bounds = array<i64: 32, 64>}, {pipeline_mode = #tpu.pipeline_mode<synchronous>, transform_indices = @transform_2, window_bounds = array<i64: 64, 64>}, {pipeline_mode = #tpu.pipeline_mode<synchronous>, transform_indices = @transform_3, window_bounds = array<i64: 64, 64>}, {pipeline_mode = #tpu.pipeline_mode<synchronous>, transform_indices = @transform_4, window_bounds = array<i64: 1, 64>}, {transform_indices = @transform_5, window_bounds = array<i64: 32, 64>}]} {
    %c0_i32 = arith.constant 0 : i32
    %0 = arith.cmpi eq, %arg1, %c0_i32 : i32
    %1 = arith.extui %0 : i1 to i32
    %c0_i32_0 = arith.constant 0 : i32
    %2 = arith.cmpi ne, %1, %c0_i32_0 : i32
    scf.if %2 {
      %cst_26 = arith.constant 0xFF800000 : f32
      %28 = vector.broadcast %cst_26 : f32 to vector<32x64xf32>
      %c0_27 = arith.constant 0 : index
      %c0_28 = arith.constant 0 : index
      %29 = vector.load %arg7[%c0_27, %c0_28] : memref<32x64xf32, #tpu.memory_space<vmem>>, vector<32x64xf32>
      tpu.vector_store %arg7[%c0_27, %c0_28], %28 {strides = array<i32>} : memref<32x64xf32, #tpu.memory_space<vmem>>, vector<32x64xf32>,
    } else {
    }
    %c0 = arith.constant 0 : index
    %c0_1 = arith.constant 0 : index
    %3 = vector.load %arg7[%c0, %c0_1] : memref<32x64xf32, #tpu.memory_space<vmem>>, vector<32x64xf32>
    %c0_2 = arith.constant 0 : index
    %c0_3 = arith.constant 0 : index
    %c0_4 = arith.constant 0 : index
    %4 = vector.load %arg2[%c0_2, %c0_3, %c0_4] : memref<4x32x64xbf16, #tpu.memory_space<vmem>>, vector<1x32x64xbf16>
    %5 = vector.shape_cast %4 : vector<1x32x64xbf16> to vector<32x64xbf16>
    %c0_5 = arith.constant 0 : index
    %c0_6 = arith.constant 0 : index
    %6 = vector.load %arg4[%c0_5, %c0_6] : memref<64x64xbf16, #tpu.memory_space<vmem>>, vector<64x64xbf16>
    %cst = arith.constant dense<0.000000e+00> : vector<32x64xf32>
    %7 = tpu.matmul %5, %6, %cst {dimension_numbers = #tpu.dot_dimension_numbers<[1], [0], [0], [1], [0, 0, 1, 1], [], []>} : vector<32x64xbf16>, vector<64x64xbf16>, vector<32x64xf32> -> vector<32x64xf32>
    %8 = arith.maximumf %3, %7 : vector<32x64xf32>
    %c1 = arith.constant 1 : index
    %c0_7 = arith.constant 0 : index
    %c0_8 = arith.constant 0 : index
    %9 = vector.load %arg2[%c1, %c0_7, %c0_8] : memref<4x32x64xbf16, #tpu.memory_space<vmem>>, vector<1x32x64xbf16>
    %10 = vector.shape_cast %9 : vector<1x32x64xbf16> to vector<32x64xbf16>
    %c0_9 = arith.constant 0 : index
    %c0_10 = arith.constant 0 : index
    %11 = vector.load %arg4[%c0_9, %c0_10] : memref<64x64xbf16, #tpu.memory_space<vmem>>, vector<64x64xbf16>
    %cst_11 = arith.constant dense<0.000000e+00> : vector<32x64xf32>
    %12 = tpu.matmul %10, %11, %cst_11 {dimension_numbers = #tpu.dot_dimension_numbers<[1], [0], [0], [1], [0, 0, 1, 1], [], []>} : vector<32x64xbf16>, vector<64x64xbf16>, vector<32x64xf32> -> vector<32x64xf32>
    %13 = arith.maximumf %8, %12 : vector<32x64xf32>
    %c2 = arith.constant 2 : index
    %c0_12 = arith.constant 0 : index
    %c0_13 = arith.constant 0 : index
    %14 = vector.load %arg2[%c2, %c0_12, %c0_13] : memref<4x32x64xbf16, #tpu.memory_space<vmem>>, vector<1x32x64xbf16>
    %15 = vector.shape_cast %14 : vector<1x32x64xbf16> to vector<32x64xbf16>
    %c0_14 = arith.constant 0 : index
    %c0_15 = arith.constant 0 : index
    %16 = vector.load %arg4[%c0_14, %c0_15] : memref<64x64xbf16, #tpu.memory_space<vmem>>, vector<64x64xbf16>
    %cst_16 = arith.constant dense<0.000000e+00> : vector<32x64xf32>
    %17 = tpu.matmul %15, %16, %cst_16 {dimension_numbers = #tpu.dot_dimension_numbers<[1], [0], [0], [1], [0, 0, 1, 1], [], []>} : vector<32x64xbf16>, vector<64x64xbf16>, vector<32x64xf32> -> vector<32x64xf32>
    %18 = arith.maximumf %13, %17 : vector<32x64xf32>
    %c3 = arith.constant 3 : index
    %c0_17 = arith.constant 0 : index
    %c0_18 = arith.constant 0 : index
    %19 = vector.load %arg2[%c3, %c0_17, %c0_18] : memref<4x32x64xbf16, #tpu.memory_space<vmem>>, vector<1x32x64xbf16>
    %20 = vector.shape_cast %19 : vector<1x32x64xbf16> to vector<32x64xbf16>
    %c0_19 = arith.constant 0 : index
    %c0_20 = arith.constant 0 : index
    %21 = vector.load %arg4[%c0_19, %c0_20] : memref<64x64xbf16, #tpu.memory_space<vmem>>, vector<64x64xbf16>
    %cst_21 = arith.constant dense<0.000000e+00> : vector<32x64xf32>
    %22 = tpu.matmul %20, %21, %cst_21 {dimension_numbers = #tpu.dot_dimension_numbers<[1], [0], [0], [1], [0, 0, 1, 1], [], []>} : vector<32x64xbf16>, vector<64x64xbf16>, vector<32x64xf32> -> vector<32x64xf32>
    %23 = arith.maximumf %18, %22 : vector<32x64xf32>
    %c0_22 = arith.constant 0 : index
    %c0_23 = arith.constant 0 : index
    %24 = vector.load %arg7[%c0_22, %c0_23] : memref<32x64xf32, #tpu.memory_space<vmem>>, vector<32x64xf32>
    tpu.vector_store %arg7[%c0_22, %c0_23], %23 {strides = array<i32>} : memref<32x64xf32, #tpu.memory_space<vmem>>, vector<32x64xf32>,
    %c0_i32_24 = arith.constant 0 : i32
    %25 = arith.cmpi eq, %arg1, %c0_i32_24 : i32
    %26 = arith.extui %25 : i1 to i32
    %c0_i32_25 = arith.constant 0 : i32
    %27 = arith.cmpi ne, %26, %c0_i32_25 : i32
    scf.if %27 {
      %c0_26 = arith.constant 0 : index
      %c0_27 = arith.constant 0 : index
      %28 = vector.load %arg3[%c0_26, %c0_27] : memref<32x64xbf16, #tpu.memory_space<vmem>>, vector<32x64xbf16>
      %c0_28 = arith.constant 0 : index
      %c0_29 = arith.constant 0 : index
      %29 = vector.load %arg5[%c0_28, %c0_29] : memref<64x64xbf16, #tpu.memory_space<vmem>>, vector<64x64xbf16>
      %cst_30 = arith.constant dense<0.000000e+00> : vector<32x64xf32>
      %30 = tpu.matmul %28, %29, %cst_30 {dimension_numbers = #tpu.dot_dimension_numbers<[1], [0], [0], [1], [0, 0, 1, 1], [], []>} : vector<32x64xbf16>, vector<64x64xbf16>, vector<32x64xf32> -> vector<32x64xf32>
      %c0_31 = arith.constant 0 : index
      %c0_32 = arith.constant 0 : index
      %31 = vector.load %arg7[%c0_31, %c0_32] : memref<32x64xf32, #tpu.memory_space<vmem>>, vector<32x64xf32>
      %32 = arith.addf %31, %30 : vector<32x64xf32>
      %c0_33 = arith.constant 0 : index
      %c0_34 = arith.constant 0 : index
      %33 = vector.load %arg6[%c0_33, %c0_34] : memref<1x64xf32, #tpu.memory_space<vmem>>, vector<1x64xf32>
      %34 = vector.broadcast %33 : vector<1x64xf32> to vector<32x64xf32>
      %35 = arith.addf %32, %34 : vector<32x64xf32>
      %cst_35 = arith.constant 0.000000e+00 : f32
      %36 = vector.broadcast %cst_35 : f32 to vector<32x64xf32>
      %37 = arith.cmpf ogt, %35, %36 : vector<32x64xf32>
      %cst_36 = arith.constant 2.000000e-01 : f32
      %38 = vector.broadcast %cst_36 : f32 to vector<32x64xf32>
      %39 = arith.mulf %38, %35 : vector<32x64xf32>
      %40 = arith.select %37, %35, %39 : vector<32x64xi1>, vector<32x64xf32>
      %c0_37 = arith.constant 0 : index
      %c0_38 = arith.constant 0 : index
      %41 = vector.load %arg7[%c0_37, %c0_38] : memref<32x64xf32, #tpu.memory_space<vmem>>, vector<32x64xf32>
      tpu.vector_store %arg7[%c0_37, %c0_38], %40 {strides = array<i32>} : memref<32x64xf32, #tpu.memory_space<vmem>>, vector<32x64xf32>,
    } else {
    }
    return
  }
  func.func @transform_0(%arg0: i32, %arg1: i32) -> (i32, i32, i32) {
    %c0_i32 = arith.constant 0 : i32
    %c0_i32_0 = arith.constant 0 : i32
    return %arg1, %arg0, %c0_i32 : i32, i32, i32
  }
  func.func @transform_1(%arg0: i32, %arg1: i32) -> (i32, i32) {
    %c0_i32 = arith.constant 0 : i32
    %c0_i32_0 = arith.constant 0 : i32
    return %arg0, %c0_i32 : i32, i32
  }
  func.func @transform_2(%arg0: i32, %arg1: i32) -> (i32, i32) {
    %c0_i32 = arith.constant 0 : i32
    %c0_i32_0 = arith.constant 0 : i32
    %c0_i32_1 = arith.constant 0 : i32
    return %c0_i32, %c0_i32_0 : i32, i32
  }
  func.func @transform_3(%arg0: i32, %arg1: i32) -> (i32, i32) {
    %c0_i32 = arith.constant 0 : i32
    %c0_i32_0 = arith.constant 0 : i32
    %c0_i32_1 = arith.constant 0 : i32
    return %c0_i32, %c0_i32_0 : i32, i32
  }
  func.func @transform_4(%arg0: i32, %arg1: i32) -> (i32, i32) {
    %c0_i32 = arith.constant 0 : i32
    %c0_i32_0 = arith.constant 0 : i32
    %c0_i32_1 = arith.constant 0 : i32
    return %c0_i32, %c0_i32_0 : i32, i32
  }
  func.func @transform_5(%arg0: i32, %arg1: i32) -> (i32, i32) {
    %c0_i32 = arith.constant 0 : i32
    %c0_i32_0 = arith.constant 0 : i32
    return %arg0, %c0_i32 : i32, i32
  }
}

module attributes {stable_mosaic.version = 11 : i64} {
  func.func @_edgeconv_kernel(%arg0: i32, %arg1: i32, %arg2: memref<4x32x64xbf16, #tpu.memory_space<vmem>>, %arg3: memref<32x64xbf16, #tpu.memory_space<vmem>>, %arg4: memref<64x128xbf16, #tpu.memory_space<vmem>>, %arg5: memref<64x128xbf16, #tpu.memory_space<vmem>>, %arg6: memref<1x128xf32, #tpu.memory_space<vmem>>, %arg7: memref<32x128xf32, #tpu.memory_space<vmem>>) attributes {dimension_semantics = [#tpu.dimension_semantics<parallel>, #tpu.dimension_semantics<arbitrary>], iteration_bounds = array<i64: 1, 1>, scalar_prefetch = 0 : i64, scratch_operands = 0 : i64, tpu.core_type = #tpu.core_type<tc>, window_params = [{transform_indices = @transform_0, window_bounds = array<i64: 4, 32, 64>}, {transform_indices = @transform_1, window_bounds = array<i64: 32, 64>}, {pipeline_mode = #tpu.pipeline_mode<synchronous>, transform_indices = @transform_2, window_bounds = array<i64: 64, 128>}, {pipeline_mode = #tpu.pipeline_mode<synchronous>, transform_indices = @transform_3, window_bounds = array<i64: 64, 128>}, {pipeline_mode = #tpu.pipeline_mode<synchronous>, transform_indices = @transform_4, window_bounds = array<i64: 1, 128>}, {transform_indices = @transform_5, window_bounds = array<i64: 32, 128>}]} {
    %c0_i32 = arith.constant 0 : i32
    %0 = arith.cmpi eq, %arg1, %c0_i32 : i32
    %1 = arith.extui %0 : i1 to i32
    %c0_i32_0 = arith.constant 0 : i32
    %2 = arith.cmpi ne, %1, %c0_i32_0 : i32
    scf.if %2 {
      %cst_26 = arith.constant 0xFF800000 : f32
      %28 = vector.broadcast %cst_26 : f32 to vector<32x128xf32>
      %c0_27 = arith.constant 0 : index
      %c0_28 = arith.constant 0 : index
      %29 = vector.load %arg7[%c0_27, %c0_28] : memref<32x128xf32, #tpu.memory_space<vmem>>, vector<32x128xf32>
      tpu.vector_store %arg7[%c0_27, %c0_28], %28 {strides = array<i32>} : memref<32x128xf32, #tpu.memory_space<vmem>>, vector<32x128xf32>,
    } else {
    }
    %c0 = arith.constant 0 : index
    %c0_1 = arith.constant 0 : index
    %3 = vector.load %arg7[%c0, %c0_1] : memref<32x128xf32, #tpu.memory_space<vmem>>, vector<32x128xf32>
    %c0_2 = arith.constant 0 : index
    %c0_3 = arith.constant 0 : index
    %c0_4 = arith.constant 0 : index
    %4 = vector.load %arg2[%c0_2, %c0_3, %c0_4] : memref<4x32x64xbf16, #tpu.memory_space<vmem>>, vector<1x32x64xbf16>
    %5 = vector.shape_cast %4 : vector<1x32x64xbf16> to vector<32x64xbf16>
    %c0_5 = arith.constant 0 : index
    %c0_6 = arith.constant 0 : index
    %6 = vector.load %arg4[%c0_5, %c0_6] : memref<64x128xbf16, #tpu.memory_space<vmem>>, vector<64x128xbf16>
    %cst = arith.constant dense<0.000000e+00> : vector<32x128xf32>
    %7 = tpu.matmul %5, %6, %cst {dimension_numbers = #tpu.dot_dimension_numbers<[1], [0], [0], [1], [0, 0, 1, 1], [], []>} : vector<32x64xbf16>, vector<64x128xbf16>, vector<32x128xf32> -> vector<32x128xf32>
    %8 = arith.maximumf %3, %7 : vector<32x128xf32>
    %c1 = arith.constant 1 : index
    %c0_7 = arith.constant 0 : index
    %c0_8 = arith.constant 0 : index
    %9 = vector.load %arg2[%c1, %c0_7, %c0_8] : memref<4x32x64xbf16, #tpu.memory_space<vmem>>, vector<1x32x64xbf16>
    %10 = vector.shape_cast %9 : vector<1x32x64xbf16> to vector<32x64xbf16>
    %c0_9 = arith.constant 0 : index
    %c0_10 = arith.constant 0 : index
    %11 = vector.load %arg4[%c0_9, %c0_10] : memref<64x128xbf16, #tpu.memory_space<vmem>>, vector<64x128xbf16>
    %cst_11 = arith.constant dense<0.000000e+00> : vector<32x128xf32>
    %12 = tpu.matmul %10, %11, %cst_11 {dimension_numbers = #tpu.dot_dimension_numbers<[1], [0], [0], [1], [0, 0, 1, 1], [], []>} : vector<32x64xbf16>, vector<64x128xbf16>, vector<32x128xf32> -> vector<32x128xf32>
    %13 = arith.maximumf %8, %12 : vector<32x128xf32>
    %c2 = arith.constant 2 : index
    %c0_12 = arith.constant 0 : index
    %c0_13 = arith.constant 0 : index
    %14 = vector.load %arg2[%c2, %c0_12, %c0_13] : memref<4x32x64xbf16, #tpu.memory_space<vmem>>, vector<1x32x64xbf16>
    %15 = vector.shape_cast %14 : vector<1x32x64xbf16> to vector<32x64xbf16>
    %c0_14 = arith.constant 0 : index
    %c0_15 = arith.constant 0 : index
    %16 = vector.load %arg4[%c0_14, %c0_15] : memref<64x128xbf16, #tpu.memory_space<vmem>>, vector<64x128xbf16>
    %cst_16 = arith.constant dense<0.000000e+00> : vector<32x128xf32>
    %17 = tpu.matmul %15, %16, %cst_16 {dimension_numbers = #tpu.dot_dimension_numbers<[1], [0], [0], [1], [0, 0, 1, 1], [], []>} : vector<32x64xbf16>, vector<64x128xbf16>, vector<32x128xf32> -> vector<32x128xf32>
    %18 = arith.maximumf %13, %17 : vector<32x128xf32>
    %c3 = arith.constant 3 : index
    %c0_17 = arith.constant 0 : index
    %c0_18 = arith.constant 0 : index
    %19 = vector.load %arg2[%c3, %c0_17, %c0_18] : memref<4x32x64xbf16, #tpu.memory_space<vmem>>, vector<1x32x64xbf16>
    %20 = vector.shape_cast %19 : vector<1x32x64xbf16> to vector<32x64xbf16>
    %c0_19 = arith.constant 0 : index
    %c0_20 = arith.constant 0 : index
    %21 = vector.load %arg4[%c0_19, %c0_20] : memref<64x128xbf16, #tpu.memory_space<vmem>>, vector<64x128xbf16>
    %cst_21 = arith.constant dense<0.000000e+00> : vector<32x128xf32>
    %22 = tpu.matmul %20, %21, %cst_21 {dimension_numbers = #tpu.dot_dimension_numbers<[1], [0], [0], [1], [0, 0, 1, 1], [], []>} : vector<32x64xbf16>, vector<64x128xbf16>, vector<32x128xf32> -> vector<32x128xf32>
    %23 = arith.maximumf %18, %22 : vector<32x128xf32>
    %c0_22 = arith.constant 0 : index
    %c0_23 = arith.constant 0 : index
    %24 = vector.load %arg7[%c0_22, %c0_23] : memref<32x128xf32, #tpu.memory_space<vmem>>, vector<32x128xf32>
    tpu.vector_store %arg7[%c0_22, %c0_23], %23 {strides = array<i32>} : memref<32x128xf32, #tpu.memory_space<vmem>>, vector<32x128xf32>,
    %c0_i32_24 = arith.constant 0 : i32
    %25 = arith.cmpi eq, %arg1, %c0_i32_24 : i32
    %26 = arith.extui %25 : i1 to i32
    %c0_i32_25 = arith.constant 0 : i32
    %27 = arith.cmpi ne, %26, %c0_i32_25 : i32
    scf.if %27 {
      %c0_26 = arith.constant 0 : index
      %c0_27 = arith.constant 0 : index
      %28 = vector.load %arg3[%c0_26, %c0_27] : memref<32x64xbf16, #tpu.memory_space<vmem>>, vector<32x64xbf16>
      %c0_28 = arith.constant 0 : index
      %c0_29 = arith.constant 0 : index
      %29 = vector.load %arg5[%c0_28, %c0_29] : memref<64x128xbf16, #tpu.memory_space<vmem>>, vector<64x128xbf16>
      %cst_30 = arith.constant dense<0.000000e+00> : vector<32x128xf32>
      %30 = tpu.matmul %28, %29, %cst_30 {dimension_numbers = #tpu.dot_dimension_numbers<[1], [0], [0], [1], [0, 0, 1, 1], [], []>} : vector<32x64xbf16>, vector<64x128xbf16>, vector<32x128xf32> -> vector<32x128xf32>
      %c0_31 = arith.constant 0 : index
      %c0_32 = arith.constant 0 : index
      %31 = vector.load %arg7[%c0_31, %c0_32] : memref<32x128xf32, #tpu.memory_space<vmem>>, vector<32x128xf32>
      %32 = arith.addf %31, %30 : vector<32x128xf32>
      %c0_33 = arith.constant 0 : index
      %c0_34 = arith.constant 0 : index
      %33 = vector.load %arg6[%c0_33, %c0_34] : memref<1x128xf32, #tpu.memory_space<vmem>>, vector<1x128xf32>
      %34 = vector.broadcast %33 : vector<1x128xf32> to vector<32x128xf32>
      %35 = arith.addf %32, %34 : vector<32x128xf32>
      %cst_35 = arith.constant 0.000000e+00 : f32
      %36 = vector.broadcast %cst_35 : f32 to vector<32x128xf32>
      %37 = arith.cmpf ogt, %35, %36 : vector<32x128xf32>
      %cst_36 = arith.constant 2.000000e-01 : f32
      %38 = vector.broadcast %cst_36 : f32 to vector<32x128xf32>
      %39 = arith.mulf %38, %35 : vector<32x128xf32>
      %40 = arith.select %37, %35, %39 : vector<32x128xi1>, vector<32x128xf32>
      %c0_37 = arith.constant 0 : index
      %c0_38 = arith.constant 0 : index
      %41 = vector.load %arg7[%c0_37, %c0_38] : memref<32x128xf32, #tpu.memory_space<vmem>>, vector<32x128xf32>
      tpu.vector_store %arg7[%c0_37, %c0_38], %40 {strides = array<i32>} : memref<32x128xf32, #tpu.memory_space<vmem>>, vector<32x128xf32>,
    } else {
    }
    return
  }
  func.func @transform_0(%arg0: i32, %arg1: i32) -> (i32, i32, i32) {
    %c0_i32 = arith.constant 0 : i32
    %c0_i32_0 = arith.constant 0 : i32
    return %arg1, %arg0, %c0_i32 : i32, i32, i32
  }
  func.func @transform_1(%arg0: i32, %arg1: i32) -> (i32, i32) {
    %c0_i32 = arith.constant 0 : i32
    %c0_i32_0 = arith.constant 0 : i32
    return %arg0, %c0_i32 : i32, i32
  }
  func.func @transform_2(%arg0: i32, %arg1: i32) -> (i32, i32) {
    %c0_i32 = arith.constant 0 : i32
    %c0_i32_0 = arith.constant 0 : i32
    %c0_i32_1 = arith.constant 0 : i32
    return %c0_i32, %c0_i32_0 : i32, i32
  }
  func.func @transform_3(%arg0: i32, %arg1: i32) -> (i32, i32) {
    %c0_i32 = arith.constant 0 : i32
    %c0_i32_0 = arith.constant 0 : i32
    %c0_i32_1 = arith.constant 0 : i32
    return %c0_i32, %c0_i32_0 : i32, i32
  }
  func.func @transform_4(%arg0: i32, %arg1: i32) -> (i32, i32) {
    %c0_i32 = arith.constant 0 : i32
    %c0_i32_0 = arith.constant 0 : i32
    %c0_i32_1 = arith.constant 0 : i32
    return %c0_i32, %c0_i32_0 : i32, i32
  }
  func.func @transform_5(%arg0: i32, %arg1: i32) -> (i32, i32) {
    %c0_i32 = arith.constant 0 : i32
    %c0_i32_0 = arith.constant 0 : i32
    return %arg0, %c0_i32 : i32, i32
  }
}

module attributes {stable_mosaic.version = 11 : i64} {
  func.func @_pdist_kernel(%arg0: i32, %arg1: i32, %arg2: memref<1x16x128xf32, #tpu.memory_space<vmem>>, %arg3: memref<1x16x128xf32, #tpu.memory_space<vmem>>, %arg4: memref<1x16x1xf32, #tpu.memory_space<vmem>>, %arg5: memref<1x1x16xf32, #tpu.memory_space<vmem>>, %arg6: memref<1x16x16xf32, #tpu.memory_space<vmem>>) attributes {dimension_semantics = [#tpu.dimension_semantics<parallel>, #tpu.dimension_semantics<parallel>], iteration_bounds = array<i64: 2, 1>, scalar_prefetch = 0 : i64, scratch_operands = 0 : i64, tpu.core_type = #tpu.core_type<tc>, window_params = [{transform_indices = @transform_0, window_bounds = array<i64: 1, 16, 128>}, {transform_indices = @transform_1, window_bounds = array<i64: 1, 16, 128>}, {transform_indices = @transform_2, window_bounds = array<i64: 1, 16, 1>}, {transform_indices = @transform_3, window_bounds = array<i64: 1, 1, 16>}, {transform_indices = @transform_4, window_bounds = array<i64: 1, 16, 16>}]} {
    %c0 = arith.constant 0 : index
    %c0_0 = arith.constant 0 : index
    %c0_1 = arith.constant 0 : index
    %0 = vector.load %arg2[%c0, %c0_0, %c0_1] : memref<1x16x128xf32, #tpu.memory_space<vmem>>, vector<1x16x128xf32>
    %1 = vector.shape_cast %0 : vector<1x16x128xf32> to vector<16x128xf32>
    %c0_2 = arith.constant 0 : index
    %c0_3 = arith.constant 0 : index
    %c0_4 = arith.constant 0 : index
    %2 = vector.load %arg3[%c0_2, %c0_3, %c0_4] : memref<1x16x128xf32, #tpu.memory_space<vmem>>, vector<1x16x128xf32>
    %3 = vector.shape_cast %2 : vector<1x16x128xf32> to vector<16x128xf32>
    %cst = arith.constant dense<0.000000e+00> : vector<16x16xf32>
    %4 = tpu.matmul %1, %3, %cst {dimension_numbers = #tpu.dot_dimension_numbers<[1], [1], [0], [0], [0, 0, 1, 0], [], []>} : vector<16x128xf32>, vector<16x128xf32>, vector<16x16xf32> -> vector<16x16xf32>
    %cst_5 = arith.constant 2.000000e+00 : f32
    %5 = vector.broadcast %cst_5 : f32 to vector<16x16xf32>
    %6 = arith.mulf %5, %4 : vector<16x16xf32>
    %c0_6 = arith.constant 0 : index
    %c0_7 = arith.constant 0 : index
    %c0_8 = arith.constant 0 : index
    %7 = vector.load %arg4[%c0_6, %c0_7, %c0_8] : memref<1x16x1xf32, #tpu.memory_space<vmem>>, vector<1x16x1xf32>
    %8 = vector.shape_cast %7 : vector<1x16x1xf32> to vector<16x1xf32>
    %9 = vector.broadcast %8 : vector<16x1xf32> to vector<16x16xf32>
    %10 = arith.subf %6, %9 : vector<16x16xf32>
    %c0_9 = arith.constant 0 : index
    %c0_10 = arith.constant 0 : index
    %c0_11 = arith.constant 0 : index
    %11 = vector.load %arg5[%c0_9, %c0_10, %c0_11] : memref<1x1x16xf32, #tpu.memory_space<vmem>>, vector<1x1x16xf32>
    %12 = vector.shape_cast %11 : vector<1x1x16xf32> to vector<1x16xf32>
    %13 = vector.broadcast %12 : vector<1x16xf32> to vector<16x16xf32>
    %14 = arith.subf %10, %13 : vector<16x16xf32>
    %c0_12 = arith.constant 0 : index
    %c0_13 = arith.constant 0 : index
    %c0_14 = arith.constant 0 : index
    %15 = vector.load %arg6[%c0_12, %c0_13, %c0_14] : memref<1x16x16xf32, #tpu.memory_space<vmem>>, vector<1x16x16xf32>
    %16 = vector.shape_cast %15 : vector<1x16x16xf32> to vector<16x16xf32>
    %17 = vector.shape_cast %14 : vector<16x16xf32> to vector<1x16x16xf32>
    tpu.vector_store %arg6[%c0_12, %c0_13, %c0_14], %17 {strides = array<i32>} : memref<1x16x16xf32, #tpu.memory_space<vmem>>, vector<1x16x16xf32>,
    return
  }
  func.func @transform_0(%arg0: i32, %arg1: i32) -> (i32, i32, i32) {
    %c0_i32 = arith.constant 0 : i32
    %c0_i32_0 = arith.constant 0 : i32
    return %arg0, %arg1, %c0_i32 : i32, i32, i32
  }
  func.func @transform_1(%arg0: i32, %arg1: i32) -> (i32, i32, i32) {
    %c0_i32 = arith.constant 0 : i32
    %c0_i32_0 = arith.constant 0 : i32
    %c0_i32_1 = arith.constant 0 : i32
    return %arg0, %c0_i32, %c0_i32_0 : i32, i32, i32
  }
  func.func @transform_2(%arg0: i32, %arg1: i32) -> (i32, i32, i32) {
    %c0_i32 = arith.constant 0 : i32
    %c0_i32_0 = arith.constant 0 : i32
    return %arg0, %arg1, %c0_i32 : i32, i32, i32
  }
  func.func @transform_3(%arg0: i32, %arg1: i32) -> (i32, i32, i32) {
    %c0_i32 = arith.constant 0 : i32
    %c0_i32_0 = arith.constant 0 : i32
    %c0_i32_1 = arith.constant 0 : i32
    return %arg0, %c0_i32, %c0_i32_0 : i32, i32, i32
  }
  func.func @transform_4(%arg0: i32, %arg1: i32) -> (i32, i32, i32) {
    %c0_i32 = arith.constant 0 : i32
    %c0_i32_0 = arith.constant 0 : i32
    return %arg0, %arg1, %c0_i32 : i32, i32, i32
  }
}

module attributes {stable_mosaic.version = 11 : i64} {
  func.func @_edgeconv_kernel(%arg0: i32, %arg1: i32, %arg2: memref<4x32x128xbf16, #tpu.memory_space<vmem>>, %arg3: memref<32x128xbf16, #tpu.memory_space<vmem>>, %arg4: memref<128x256xbf16, #tpu.memory_space<vmem>>, %arg5: memref<128x256xbf16, #tpu.memory_space<vmem>>, %arg6: memref<1x256xf32, #tpu.memory_space<vmem>>, %arg7: memref<32x256xf32, #tpu.memory_space<vmem>>) attributes {dimension_semantics = [#tpu.dimension_semantics<parallel>, #tpu.dimension_semantics<arbitrary>], iteration_bounds = array<i64: 1, 1>, scalar_prefetch = 0 : i64, scratch_operands = 0 : i64, tpu.core_type = #tpu.core_type<tc>, window_params = [{transform_indices = @transform_0, window_bounds = array<i64: 4, 32, 128>}, {transform_indices = @transform_1, window_bounds = array<i64: 32, 128>}, {pipeline_mode = #tpu.pipeline_mode<synchronous>, transform_indices = @transform_2, window_bounds = array<i64: 128, 256>}, {pipeline_mode = #tpu.pipeline_mode<synchronous>, transform_indices = @transform_3, window_bounds = array<i64: 128, 256>}, {pipeline_mode = #tpu.pipeline_mode<synchronous>, transform_indices = @transform_4, window_bounds = array<i64: 1, 256>}, {transform_indices = @transform_5, window_bounds = array<i64: 32, 256>}]} {
    %c0_i32 = arith.constant 0 : i32
    %0 = arith.cmpi eq, %arg1, %c0_i32 : i32
    %1 = arith.extui %0 : i1 to i32
    %c0_i32_0 = arith.constant 0 : i32
    %2 = arith.cmpi ne, %1, %c0_i32_0 : i32
    scf.if %2 {
      %cst_26 = arith.constant 0xFF800000 : f32
      %28 = vector.broadcast %cst_26 : f32 to vector<32x256xf32>
      %c0_27 = arith.constant 0 : index
      %c0_28 = arith.constant 0 : index
      %29 = vector.load %arg7[%c0_27, %c0_28] : memref<32x256xf32, #tpu.memory_space<vmem>>, vector<32x256xf32>
      tpu.vector_store %arg7[%c0_27, %c0_28], %28 {strides = array<i32>} : memref<32x256xf32, #tpu.memory_space<vmem>>, vector<32x256xf32>,
    } else {
    }
    %c0 = arith.constant 0 : index
    %c0_1 = arith.constant 0 : index
    %3 = vector.load %arg7[%c0, %c0_1] : memref<32x256xf32, #tpu.memory_space<vmem>>, vector<32x256xf32>
    %c0_2 = arith.constant 0 : index
    %c0_3 = arith.constant 0 : index
    %c0_4 = arith.constant 0 : index
    %4 = vector.load %arg2[%c0_2, %c0_3, %c0_4] : memref<4x32x128xbf16, #tpu.memory_space<vmem>>, vector<1x32x128xbf16>
    %5 = vector.shape_cast %4 : vector<1x32x128xbf16> to vector<32x128xbf16>
    %c0_5 = arith.constant 0 : index
    %c0_6 = arith.constant 0 : index
    %6 = vector.load %arg4[%c0_5, %c0_6] : memref<128x256xbf16, #tpu.memory_space<vmem>>, vector<128x256xbf16>
    %cst = arith.constant dense<0.000000e+00> : vector<32x256xf32>
    %7 = tpu.matmul %5, %6, %cst {dimension_numbers = #tpu.dot_dimension_numbers<[1], [0], [0], [1], [0, 0, 1, 1], [], []>} : vector<32x128xbf16>, vector<128x256xbf16>, vector<32x256xf32> -> vector<32x256xf32>
    %8 = arith.maximumf %3, %7 : vector<32x256xf32>
    %c1 = arith.constant 1 : index
    %c0_7 = arith.constant 0 : index
    %c0_8 = arith.constant 0 : index
    %9 = vector.load %arg2[%c1, %c0_7, %c0_8] : memref<4x32x128xbf16, #tpu.memory_space<vmem>>, vector<1x32x128xbf16>
    %10 = vector.shape_cast %9 : vector<1x32x128xbf16> to vector<32x128xbf16>
    %c0_9 = arith.constant 0 : index
    %c0_10 = arith.constant 0 : index
    %11 = vector.load %arg4[%c0_9, %c0_10] : memref<128x256xbf16, #tpu.memory_space<vmem>>, vector<128x256xbf16>
    %cst_11 = arith.constant dense<0.000000e+00> : vector<32x256xf32>
    %12 = tpu.matmul %10, %11, %cst_11 {dimension_numbers = #tpu.dot_dimension_numbers<[1], [0], [0], [1], [0, 0, 1, 1], [], []>} : vector<32x128xbf16>, vector<128x256xbf16>, vector<32x256xf32> -> vector<32x256xf32>
    %13 = arith.maximumf %8, %12 : vector<32x256xf32>
    %c2 = arith.constant 2 : index
    %c0_12 = arith.constant 0 : index
    %c0_13 = arith.constant 0 : index
    %14 = vector.load %arg2[%c2, %c0_12, %c0_13] : memref<4x32x128xbf16, #tpu.memory_space<vmem>>, vector<1x32x128xbf16>
    %15 = vector.shape_cast %14 : vector<1x32x128xbf16> to vector<32x128xbf16>
    %c0_14 = arith.constant 0 : index
    %c0_15 = arith.constant 0 : index
    %16 = vector.load %arg4[%c0_14, %c0_15] : memref<128x256xbf16, #tpu.memory_space<vmem>>, vector<128x256xbf16>
    %cst_16 = arith.constant dense<0.000000e+00> : vector<32x256xf32>
    %17 = tpu.matmul %15, %16, %cst_16 {dimension_numbers = #tpu.dot_dimension_numbers<[1], [0], [0], [1], [0, 0, 1, 1], [], []>} : vector<32x128xbf16>, vector<128x256xbf16>, vector<32x256xf32> -> vector<32x256xf32>
    %18 = arith.maximumf %13, %17 : vector<32x256xf32>
    %c3 = arith.constant 3 : index
    %c0_17 = arith.constant 0 : index
    %c0_18 = arith.constant 0 : index
    %19 = vector.load %arg2[%c3, %c0_17, %c0_18] : memref<4x32x128xbf16, #tpu.memory_space<vmem>>, vector<1x32x128xbf16>
    %20 = vector.shape_cast %19 : vector<1x32x128xbf16> to vector<32x128xbf16>
    %c0_19 = arith.constant 0 : index
    %c0_20 = arith.constant 0 : index
    %21 = vector.load %arg4[%c0_19, %c0_20] : memref<128x256xbf16, #tpu.memory_space<vmem>>, vector<128x256xbf16>
    %cst_21 = arith.constant dense<0.000000e+00> : vector<32x256xf32>
    %22 = tpu.matmul %20, %21, %cst_21 {dimension_numbers = #tpu.dot_dimension_numbers<[1], [0], [0], [1], [0, 0, 1, 1], [], []>} : vector<32x128xbf16>, vector<128x256xbf16>, vector<32x256xf32> -> vector<32x256xf32>
    %23 = arith.maximumf %18, %22 : vector<32x256xf32>
    %c0_22 = arith.constant 0 : index
    %c0_23 = arith.constant 0 : index
    %24 = vector.load %arg7[%c0_22, %c0_23] : memref<32x256xf32, #tpu.memory_space<vmem>>, vector<32x256xf32>
    tpu.vector_store %arg7[%c0_22, %c0_23], %23 {strides = array<i32>} : memref<32x256xf32, #tpu.memory_space<vmem>>, vector<32x256xf32>,
    %c0_i32_24 = arith.constant 0 : i32
    %25 = arith.cmpi eq, %arg1, %c0_i32_24 : i32
    %26 = arith.extui %25 : i1 to i32
    %c0_i32_25 = arith.constant 0 : i32
    %27 = arith.cmpi ne, %26, %c0_i32_25 : i32
    scf.if %27 {
      %c0_26 = arith.constant 0 : index
      %c0_27 = arith.constant 0 : index
      %28 = vector.load %arg3[%c0_26, %c0_27] : memref<32x128xbf16, #tpu.memory_space<vmem>>, vector<32x128xbf16>
      %c0_28 = arith.constant 0 : index
      %c0_29 = arith.constant 0 : index
      %29 = vector.load %arg5[%c0_28, %c0_29] : memref<128x256xbf16, #tpu.memory_space<vmem>>, vector<128x256xbf16>
      %cst_30 = arith.constant dense<0.000000e+00> : vector<32x256xf32>
      %30 = tpu.matmul %28, %29, %cst_30 {dimension_numbers = #tpu.dot_dimension_numbers<[1], [0], [0], [1], [0, 0, 1, 1], [], []>} : vector<32x128xbf16>, vector<128x256xbf16>, vector<32x256xf32> -> vector<32x256xf32>
      %c0_31 = arith.constant 0 : index
      %c0_32 = arith.constant 0 : index
      %31 = vector.load %arg7[%c0_31, %c0_32] : memref<32x256xf32, #tpu.memory_space<vmem>>, vector<32x256xf32>
      %32 = arith.addf %31, %30 : vector<32x256xf32>
      %c0_33 = arith.constant 0 : index
      %c0_34 = arith.constant 0 : index
      %33 = vector.load %arg6[%c0_33, %c0_34] : memref<1x256xf32, #tpu.memory_space<vmem>>, vector<1x256xf32>
      %34 = vector.broadcast %33 : vector<1x256xf32> to vector<32x256xf32>
      %35 = arith.addf %32, %34 : vector<32x256xf32>
      %cst_35 = arith.constant 0.000000e+00 : f32
      %36 = vector.broadcast %cst_35 : f32 to vector<32x256xf32>
      %37 = arith.cmpf ogt, %35, %36 : vector<32x256xf32>
      %cst_36 = arith.constant 2.000000e-01 : f32
      %38 = vector.broadcast %cst_36 : f32 to vector<32x256xf32>
      %39 = arith.mulf %38, %35 : vector<32x256xf32>
      %40 = arith.select %37, %35, %39 : vector<32x256xi1>, vector<32x256xf32>
      %c0_37 = arith.constant 0 : index
      %c0_38 = arith.constant 0 : index
      %41 = vector.load %arg7[%c0_37, %c0_38] : memref<32x256xf32, #tpu.memory_space<vmem>>, vector<32x256xf32>
      tpu.vector_store %arg7[%c0_37, %c0_38], %40 {strides = array<i32>} : memref<32x256xf32, #tpu.memory_space<vmem>>, vector<32x256xf32>,
    } else {
    }
    return
  }
  func.func @transform_0(%arg0: i32, %arg1: i32) -> (i32, i32, i32) {
    %c0_i32 = arith.constant 0 : i32
    %c0_i32_0 = arith.constant 0 : i32
    return %arg1, %arg0, %c0_i32 : i32, i32, i32
  }
  func.func @transform_1(%arg0: i32, %arg1: i32) -> (i32, i32) {
    %c0_i32 = arith.constant 0 : i32
    %c0_i32_0 = arith.constant 0 : i32
    return %arg0, %c0_i32 : i32, i32
  }
  func.func @transform_2(%arg0: i32, %arg1: i32) -> (i32, i32) {
    %c0_i32 = arith.constant 0 : i32
    %c0_i32_0 = arith.constant 0 : i32
    %c0_i32_1 = arith.constant 0 : i32
    return %c0_i32, %c0_i32_0 : i32, i32
  }
  func.func @transform_3(%arg0: i32, %arg1: i32) -> (i32, i32) {
    %c0_i32 = arith.constant 0 : i32
    %c0_i32_0 = arith.constant 0 : i32
    %c0_i32_1 = arith.constant 0 : i32
    return %c0_i32, %c0_i32_0 : i32, i32
  }
  func.func @transform_4(%arg0: i32, %arg1: i32) -> (i32, i32) {
    %c0_i32 = arith.constant 0 : i32
    %c0_i32_0 = arith.constant 0 : i32
    %c0_i32_1 = arith.constant 0 : i32
    return %c0_i32, %c0_i32_0 : i32, i32
  }
  func.func @transform_5(%arg0: i32, %arg1: i32) -> (i32, i32) {
    %c0_i32 = arith.constant 0 : i32
    %c0_i32_0 = arith.constant 0 : i32
    return %arg0, %c0_i32 : i32, i32
  }
}

module attributes {stable_mosaic.version = 11 : i64} {
  func.func @_conv5_kernel(%arg0: i32, %arg1: i32, %arg2: i32, %arg3: memref<1x16x64xf32, #tpu.memory_space<vmem>>, %arg4: memref<1x16x64xf32, #tpu.memory_space<vmem>>, %arg5: memref<1x16x128xf32, #tpu.memory_space<vmem>>, %arg6: memref<1x16x256xf32, #tpu.memory_space<vmem>>, %arg7: memref<64x1024xbf16, #tpu.memory_space<vmem>>, %arg8: memref<64x1024xbf16, #tpu.memory_space<vmem>>, %arg9: memref<128x1024xbf16, #tpu.memory_space<vmem>>, %arg10: memref<256x1024xbf16, #tpu.memory_space<vmem>>, %arg11: memref<1x1024xf32, #tpu.memory_space<vmem>>, %arg12: memref<1x1x1024xf32, #tpu.memory_space<vmem>>) attributes {dimension_semantics = [#tpu.dimension_semantics<parallel>, #tpu.dimension_semantics<parallel>, #tpu.dimension_semantics<arbitrary>], iteration_bounds = array<i64: 1, 2, 1>, scalar_prefetch = 0 : i64, scratch_operands = 0 : i64, tpu.core_type = #tpu.core_type<tc>, window_params = [{transform_indices = @transform_0, window_bounds = array<i64: 1, 16, 64>}, {transform_indices = @transform_1, window_bounds = array<i64: 1, 16, 64>}, {transform_indices = @transform_2, window_bounds = array<i64: 1, 16, 128>}, {transform_indices = @transform_3, window_bounds = array<i64: 1, 16, 256>}, {transform_indices = @transform_4, window_bounds = array<i64: 64, 1024>}, {transform_indices = @transform_5, window_bounds = array<i64: 64, 1024>}, {transform_indices = @transform_6, window_bounds = array<i64: 128, 1024>}, {transform_indices = @transform_7, window_bounds = array<i64: 256, 1024>}, {transform_indices = @transform_8, window_bounds = array<i64: 1, 1024>}, {transform_indices = @transform_9, window_bounds = array<i64: 1, 1, 1024>}]} {
    %c0_i32 = arith.constant 0 : i32
    %0 = arith.cmpi eq, %arg2, %c0_i32 : i32
    %1 = arith.extui %0 : i1 to i32
    %c0_i32_0 = arith.constant 0 : i32
    %2 = arith.cmpi ne, %1, %c0_i32_0 : i32
    scf.if %2 {
      %cst_32 = arith.constant 0xFF800000 : f32
      %37 = vector.broadcast %cst_32 : f32 to vector<1x1024xf32>
      %c0_33 = arith.constant 0 : index
      %c0_34 = arith.constant 0 : index
      %c0_35 = arith.constant 0 : index
      %38 = vector.load %arg12[%c0_33, %c0_34, %c0_35] : memref<1x1x1024xf32, #tpu.memory_space<vmem>>, vector<1x1x1024xf32>
      %39 = vector.shape_cast %38 : vector<1x1x1024xf32> to vector<1x1024xf32>
      %40 = vector.shape_cast %37 : vector<1x1024xf32> to vector<1x1x1024xf32>
      tpu.vector_store %arg12[%c0_33, %c0_34, %c0_35], %40 {strides = array<i32>} : memref<1x1x1024xf32, #tpu.memory_space<vmem>>, vector<1x1x1024xf32>,
    } else {
    }
    %c0 = arith.constant 0 : index
    %c0_1 = arith.constant 0 : index
    %c0_2 = arith.constant 0 : index
    %3 = vector.load %arg3[%c0, %c0_1, %c0_2] : memref<1x16x64xf32, #tpu.memory_space<vmem>>, vector<1x16x64xf32>
    %4 = vector.shape_cast %3 : vector<1x16x64xf32> to vector<16x64xf32>
    %5 = arith.truncf %4 : vector<16x64xf32> to vector<16x64xbf16>
    %c0_3 = arith.constant 0 : index
    %c0_4 = arith.constant 0 : index
    %6 = vector.load %arg7[%c0_3, %c0_4] : memref<64x1024xbf16, #tpu.memory_space<vmem>>, vector<64x1024xbf16>
    %cst = arith.constant dense<0.000000e+00> : vector<16x1024xf32>
    %7 = tpu.matmul %5, %6, %cst {dimension_numbers = #tpu.dot_dimension_numbers<[1], [0], [0], [1], [0, 0, 1, 1], [], []>} : vector<16x64xbf16>, vector<64x1024xbf16>, vector<16x1024xf32> -> vector<16x1024xf32>
    %c0_5 = arith.constant 0 : index
    %c0_6 = arith.constant 0 : index
    %c0_7 = arith.constant 0 : index
    %8 = vector.load %arg4[%c0_5, %c0_6, %c0_7] : memref<1x16x64xf32, #tpu.memory_space<vmem>>, vector<1x16x64xf32>
    %9 = vector.shape_cast %8 : vector<1x16x64xf32> to vector<16x64xf32>
    %10 = arith.truncf %9 : vector<16x64xf32> to vector<16x64xbf16>
    %c0_8 = arith.constant 0 : index
    %c0_9 = arith.constant 0 : index
    %11 = vector.load %arg8[%c0_8, %c0_9] : memref<64x1024xbf16, #tpu.memory_space<vmem>>, vector<64x1024xbf16>
    %cst_10 = arith.constant dense<0.000000e+00> : vector<16x1024xf32>
    %12 = tpu.matmul %10, %11, %cst_10 {dimension_numbers = #tpu.dot_dimension_numbers<[1], [0], [0], [1], [0, 0, 1, 1], [], []>} : vector<16x64xbf16>, vector<64x1024xbf16>, vector<16x1024xf32> -> vector<16x1024xf32>
    %13 = arith.addf %7, %12 : vector<16x1024xf32>
    %c0_11 = arith.constant 0 : index
    %c0_12 = arith.constant 0 : index
    %c0_13 = arith.constant 0 : index
    %14 = vector.load %arg5[%c0_11, %c0_12, %c0_13] : memref<1x16x128xf32, #tpu.memory_space<vmem>>, vector<1x16x128xf32>
    %15 = vector.shape_cast %14 : vector<1x16x128xf32> to vector<16x128xf32>
    %16 = arith.truncf %15 : vector<16x128xf32> to vector<16x128xbf16>
    %c0_14 = arith.constant 0 : index
    %c0_15 = arith.constant 0 : index
    %17 = vector.load %arg9[%c0_14, %c0_15] : memref<128x1024xbf16, #tpu.memory_space<vmem>>, vector<128x1024xbf16>
    %cst_16 = arith.constant dense<0.000000e+00> : vector<16x1024xf32>
    %18 = tpu.matmul %16, %17, %cst_16 {dimension_numbers = #tpu.dot_dimension_numbers<[1], [0], [0], [1], [0, 0, 1, 1], [], []>} : vector<16x128xbf16>, vector<128x1024xbf16>, vector<16x1024xf32> -> vector<16x1024xf32>
    %19 = arith.addf %13, %18 : vector<16x1024xf32>
    %c0_17 = arith.constant 0 : index
    %c0_18 = arith.constant 0 : index
    %c0_19 = arith.constant 0 : index
    %20 = vector.load %arg6[%c0_17, %c0_18, %c0_19] : memref<1x16x256xf32, #tpu.memory_space<vmem>>, vector<1x16x256xf32>
    %21 = vector.shape_cast %20 : vector<1x16x256xf32> to vector<16x256xf32>
    %22 = arith.truncf %21 : vector<16x256xf32> to vector<16x256xbf16>
    %c0_20 = arith.constant 0 : index
    %c0_21 = arith.constant 0 : index
    %23 = vector.load %arg10[%c0_20, %c0_21] : memref<256x1024xbf16, #tpu.memory_space<vmem>>, vector<256x1024xbf16>
    %cst_22 = arith.constant dense<0.000000e+00> : vector<16x1024xf32>
    %24 = tpu.matmul %22, %23, %cst_22 {dimension_numbers = #tpu.dot_dimension_numbers<[1], [0], [0], [1], [0, 0, 1, 1], [], []>} : vector<16x256xbf16>, vector<256x1024xbf16>, vector<16x1024xf32> -> vector<16x1024xf32>
    %25 = arith.addf %19, %24 : vector<16x1024xf32>
    %c0_23 = arith.constant 0 : index
    %c0_24 = arith.constant 0 : index
    %c0_25 = arith.constant 0 : index
    %26 = vector.load %arg12[%c0_23, %c0_24, %c0_25] : memref<1x1x1024xf32, #tpu.memory_space<vmem>>, vector<1x1x1024xf32>
    %27 = vector.shape_cast %26 : vector<1x1x1024xf32> to vector<1x1024xf32>
    %cst_26 = arith.constant dense<0xFF800000> : vector<1024xf32>
    %28 = vector.multi_reduction <maximumf>, %25, %cst_26 [0] : vector<16x1024xf32> to vector<1024xf32>
    %29 = vector.shape_cast %28 : vector<1024xf32> to vector<1x1024xf32>
    %30 = arith.maximumf %27, %29 : vector<1x1024xf32>
    %c0_27 = arith.constant 0 : index
    %c0_28 = arith.constant 0 : index
    %c0_29 = arith.constant 0 : index
    %31 = vector.load %arg12[%c0_27, %c0_28, %c0_29] : memref<1x1x1024xf32, #tpu.memory_space<vmem>>, vector<1x1x1024xf32>
    %32 = vector.shape_cast %31 : vector<1x1x1024xf32> to vector<1x1024xf32>
    %33 = vector.shape_cast %30 : vector<1x1024xf32> to vector<1x1x1024xf32>
    tpu.vector_store %arg12[%c0_27, %c0_28, %c0_29], %33 {strides = array<i32>} : memref<1x1x1024xf32, #tpu.memory_space<vmem>>, vector<1x1x1024xf32>,
    %c0_i32_30 = arith.constant 0 : i32
    %34 = arith.cmpi eq, %arg2, %c0_i32_30 : i32
    %35 = arith.extui %34 : i1 to i32
    %c0_i32_31 = arith.constant 0 : i32
    %36 = arith.cmpi ne, %35, %c0_i32_31 : i32
    scf.if %36 {
      %c0_32 = arith.constant 0 : index
      %c0_33 = arith.constant 0 : index
      %c0_34 = arith.constant 0 : index
      %37 = vector.load %arg12[%c0_32, %c0_33, %c0_34] : memref<1x1x1024xf32, #tpu.memory_space<vmem>>, vector<1x1x1024xf32>
      %38 = vector.shape_cast %37 : vector<1x1x1024xf32> to vector<1x1024xf32>
      %c0_35 = arith.constant 0 : index
      %c0_36 = arith.constant 0 : index
      %39 = vector.load %arg11[%c0_35, %c0_36] : memref<1x1024xf32, #tpu.memory_space<vmem>>, vector<1x1024xf32>
      %40 = arith.addf %38, %39 : vector<1x1024xf32>
      %cst_37 = arith.constant 0.000000e+00 : f32
      %41 = vector.broadcast %cst_37 : f32 to vector<1x1024xf32>
      %42 = arith.cmpf ogt, %40, %41 : vector<1x1024xf32>
      %cst_38 = arith.constant 2.000000e-01 : f32
      %43 = vector.broadcast %cst_38 : f32 to vector<1x1024xf32>
      %44 = arith.mulf %43, %40 : vector<1x1024xf32>
      %45 = arith.select %42, %40, %44 : vector<1x1024xi1>, vector<1x1024xf32>
      %c0_39 = arith.constant 0 : index
      %c0_40 = arith.constant 0 : index
      %c0_41 = arith.constant 0 : index
      %46 = vector.load %arg12[%c0_39, %c0_40, %c0_41] : memref<1x1x1024xf32, #tpu.memory_space<vmem>>, vector<1x1x1024xf32>
      %47 = vector.shape_cast %46 : vector<1x1x1024xf32> to vector<1x1024xf32>
      %48 = vector.shape_cast %45 : vector<1x1024xf32> to vector<1x1x1024xf32>
      tpu.vector_store %arg12[%c0_39, %c0_40, %c0_41], %48 {strides = array<i32>} : memref<1x1x1024xf32, #tpu.memory_space<vmem>>, vector<1x1x1024xf32>,
    } else {
    }
    return
  }
  func.func @transform_0(%arg0: i32, %arg1: i32, %arg2: i32) -> (i32, i32, i32) {
    %c0_i32 = arith.constant 0 : i32
    %c0_i32_0 = arith.constant 0 : i32
    return %arg1, %arg2, %c0_i32 : i32, i32, i32
  }
  func.func @transform_1(%arg0: i32, %arg1: i32, %arg2: i32) -> (i32, i32, i32) {
    %c0_i32 = arith.constant 0 : i32
    %c0_i32_0 = arith.constant 0 : i32
    return %arg1, %arg2, %c0_i32 : i32, i32, i32
  }
  func.func @transform_2(%arg0: i32, %arg1: i32, %arg2: i32) -> (i32, i32, i32) {
    %c0_i32 = arith.constant 0 : i32
    %c0_i32_0 = arith.constant 0 : i32
    return %arg1, %arg2, %c0_i32 : i32, i32, i32
  }
  func.func @transform_3(%arg0: i32, %arg1: i32, %arg2: i32) -> (i32, i32, i32) {
    %c0_i32 = arith.constant 0 : i32
    %c0_i32_0 = arith.constant 0 : i32
    return %arg1, %arg2, %c0_i32 : i32, i32, i32
  }
  func.func @transform_4(%arg0: i32, %arg1: i32, %arg2: i32) -> (i32, i32) {
    %c0_i32 = arith.constant 0 : i32
    %c0_i32_0 = arith.constant 0 : i32
    return %c0_i32, %arg0 : i32, i32
  }
  func.func @transform_5(%arg0: i32, %arg1: i32, %arg2: i32) -> (i32, i32) {
    %c0_i32 = arith.constant 0 : i32
    %c0_i32_0 = arith.constant 0 : i32
    return %c0_i32, %arg0 : i32, i32
  }
  func.func @transform_6(%arg0: i32, %arg1: i32, %arg2: i32) -> (i32, i32) {
    %c0_i32 = arith.constant 0 : i32
    %c0_i32_0 = arith.constant 0 : i32
    return %c0_i32, %arg0 : i32, i32
  }
  func.func @transform_7(%arg0: i32, %arg1: i32, %arg2: i32) -> (i32, i32) {
    %c0_i32 = arith.constant 0 : i32
    %c0_i32_0 = arith.constant 0 : i32
    return %c0_i32, %arg0 : i32, i32
  }
  func.func @transform_8(%arg0: i32, %arg1: i32, %arg2: i32) -> (i32, i32) {
    %c0_i32 = arith.constant 0 : i32
    %c0_i32_0 = arith.constant 0 : i32
    return %c0_i32, %arg0 : i32, i32
  }
  func.func @transform_9(%arg0: i32, %arg1: i32, %arg2: i32) -> (i32, i32, i32) {
    %c0_i32 = arith.constant 0 : i32
    %c0_i32_0 = arith.constant 0 : i32
    return %arg1, %c0_i32, %arg0 : i32, i32, i32
  }
}

module attributes {stable_mosaic.version = 11 : i64} {
  func.func @_classifier_kernel(%arg0: i32, %arg1: memref<2x1024xbf16, #tpu.memory_space<vmem>>, %arg2: memref<1024x512xbf16, #tpu.memory_space<vmem>>, %arg3: memref<1x512xf32, #tpu.memory_space<vmem>>, %arg4: memref<512x256xbf16, #tpu.memory_space<vmem>>, %arg5: memref<1x256xf32, #tpu.memory_space<vmem>>, %arg6: memref<256x10xbf16, #tpu.memory_space<vmem>>, %arg7: memref<1x10xf32, #tpu.memory_space<vmem>>, %arg8: memref<2x10xf32, #tpu.memory_space<vmem>>) attributes {dimension_semantics = [#tpu.dimension_semantics<arbitrary>], iteration_bounds = array<i64: 1>, scalar_prefetch = 0 : i64, scratch_operands = 0 : i64, tpu.core_type = #tpu.core_type<tc>, window_params = [{pipeline_mode = #tpu.pipeline_mode<synchronous>, transform_indices = @transform_0, window_bounds = array<i64: 2, 1024>}, {pipeline_mode = #tpu.pipeline_mode<synchronous>, transform_indices = @transform_1, window_bounds = array<i64: 1024, 512>}, {pipeline_mode = #tpu.pipeline_mode<synchronous>, transform_indices = @transform_2, window_bounds = array<i64: 1, 512>}, {pipeline_mode = #tpu.pipeline_mode<synchronous>, transform_indices = @transform_3, window_bounds = array<i64: 512, 256>}, {pipeline_mode = #tpu.pipeline_mode<synchronous>, transform_indices = @transform_4, window_bounds = array<i64: 1, 256>}, {pipeline_mode = #tpu.pipeline_mode<synchronous>, transform_indices = @transform_5, window_bounds = array<i64: 256, 10>}, {pipeline_mode = #tpu.pipeline_mode<synchronous>, transform_indices = @transform_6, window_bounds = array<i64: 1, 10>}, {pipeline_mode = #tpu.pipeline_mode<synchronous>, transform_indices = @transform_7, window_bounds = array<i64: 2, 10>}]} {
    %c0 = arith.constant 0 : index
    %c0_0 = arith.constant 0 : index
    %0 = vector.load %arg1[%c0, %c0_0] : memref<2x1024xbf16, #tpu.memory_space<vmem>>, vector<2x1024xbf16>
    %c0_1 = arith.constant 0 : index
    %c0_2 = arith.constant 0 : index
    %1 = vector.load %arg2[%c0_1, %c0_2] : memref<1024x512xbf16, #tpu.memory_space<vmem>>, vector<1024x512xbf16>
    %cst = arith.constant dense<0.000000e+00> : vector<2x512xf32>
    %2 = tpu.matmul %0, %1, %cst {dimension_numbers = #tpu.dot_dimension_numbers<[1], [0], [0], [1], [0, 0, 1, 1], [], []>} : vector<2x1024xbf16>, vector<1024x512xbf16>, vector<2x512xf32> -> vector<2x512xf32>
    %c0_3 = arith.constant 0 : index
    %c0_4 = arith.constant 0 : index
    %3 = vector.load %arg3[%c0_3, %c0_4] : memref<1x512xf32, #tpu.memory_space<vmem>>, vector<1x512xf32>
    %4 = vector.broadcast %3 : vector<1x512xf32> to vector<2x512xf32>
    %5 = arith.addf %2, %4 : vector<2x512xf32>
    %cst_5 = arith.constant 0.000000e+00 : f32
    %6 = vector.broadcast %cst_5 : f32 to vector<2x512xf32>
    %7 = arith.cmpf ogt, %5, %6 : vector<2x512xf32>
    %cst_6 = arith.constant 2.000000e-01 : f32
    %8 = vector.broadcast %cst_6 : f32 to vector<2x512xf32>
    %9 = arith.mulf %8, %5 : vector<2x512xf32>
    %10 = arith.select %7, %5, %9 : vector<2x512xi1>, vector<2x512xf32>
    %11 = arith.truncf %10 : vector<2x512xf32> to vector<2x512xbf16>
    %c0_7 = arith.constant 0 : index
    %c0_8 = arith.constant 0 : index
    %12 = vector.load %arg4[%c0_7, %c0_8] : memref<512x256xbf16, #tpu.memory_space<vmem>>, vector<512x256xbf16>
    %cst_9 = arith.constant dense<0.000000e+00> : vector<2x256xf32>
    %13 = tpu.matmul %11, %12, %cst_9 {dimension_numbers = #tpu.dot_dimension_numbers<[1], [0], [0], [1], [0, 0, 1, 1], [], []>} : vector<2x512xbf16>, vector<512x256xbf16>, vector<2x256xf32> -> vector<2x256xf32>
    %c0_10 = arith.constant 0 : index
    %c0_11 = arith.constant 0 : index
    %14 = vector.load %arg5[%c0_10, %c0_11] : memref<1x256xf32, #tpu.memory_space<vmem>>, vector<1x256xf32>
    %15 = vector.broadcast %14 : vector<1x256xf32> to vector<2x256xf32>
    %16 = arith.addf %13, %15 : vector<2x256xf32>
    %cst_12 = arith.constant 0.000000e+00 : f32
    %17 = vector.broadcast %cst_12 : f32 to vector<2x256xf32>
    %18 = arith.cmpf ogt, %16, %17 : vector<2x256xf32>
    %cst_13 = arith.constant 2.000000e-01 : f32
    %19 = vector.broadcast %cst_13 : f32 to vector<2x256xf32>
    %20 = arith.mulf %19, %16 : vector<2x256xf32>
    %21 = arith.select %18, %16, %20 : vector<2x256xi1>, vector<2x256xf32>
    %22 = arith.truncf %21 : vector<2x256xf32> to vector<2x256xbf16>
    %c0_14 = arith.constant 0 : index
    %c0_15 = arith.constant 0 : index
    %23 = vector.load %arg6[%c0_14, %c0_15] : memref<256x10xbf16, #tpu.memory_space<vmem>>, vector<256x10xbf16>
    %cst_16 = arith.constant dense<0.000000e+00> : vector<2x10xf32>
    %24 = tpu.matmul %22, %23, %cst_16 {dimension_numbers = #tpu.dot_dimension_numbers<[1], [0], [0], [1], [0, 0, 1, 1], [], []>} : vector<2x256xbf16>, vector<256x10xbf16>, vector<2x10xf32> -> vector<2x10xf32>
    %c0_17 = arith.constant 0 : index
    %c0_18 = arith.constant 0 : index
    %25 = vector.load %arg7[%c0_17, %c0_18] : memref<1x10xf32, #tpu.memory_space<vmem>>, vector<1x10xf32>
    %26 = vector.broadcast %25 : vector<1x10xf32> to vector<2x10xf32>
    %27 = arith.addf %24, %26 : vector<2x10xf32>
    %c0_19 = arith.constant 0 : index
    %c0_20 = arith.constant 0 : index
    %28 = vector.load %arg8[%c0_19, %c0_20] : memref<2x10xf32, #tpu.memory_space<vmem>>, vector<2x10xf32>
    tpu.vector_store %arg8[%c0_19, %c0_20], %27 {strides = array<i32>} : memref<2x10xf32, #tpu.memory_space<vmem>>, vector<2x10xf32>,
    return
  }
  func.func @transform_0(%arg0: i32) -> (i32, i32) {
    %c0_i32 = arith.constant 0 : i32
    %c0_i32_0 = arith.constant 0 : i32
    %c0_i32_1 = arith.constant 0 : i32
    return %c0_i32, %c0_i32_0 : i32, i32
  }
  func.func @transform_1(%arg0: i32) -> (i32, i32) {
    %c0_i32 = arith.constant 0 : i32
    %c0_i32_0 = arith.constant 0 : i32
    %c0_i32_1 = arith.constant 0 : i32
    return %c0_i32, %c0_i32_0 : i32, i32
  }
  func.func @transform_2(%arg0: i32) -> (i32, i32) {
    %c0_i32 = arith.constant 0 : i32
    %c0_i32_0 = arith.constant 0 : i32
    %c0_i32_1 = arith.constant 0 : i32
    return %c0_i32, %c0_i32_0 : i32, i32
  }
  func.func @transform_3(%arg0: i32) -> (i32, i32) {
    %c0_i32 = arith.constant 0 : i32
    %c0_i32_0 = arith.constant 0 : i32
    %c0_i32_1 = arith.constant 0 : i32
    return %c0_i32, %c0_i32_0 : i32, i32
  }
  func.func @transform_4(%arg0: i32) -> (i32, i32) {
    %c0_i32 = arith.constant 0 : i32
    %c0_i32_0 = arith.constant 0 : i32
    %c0_i32_1 = arith.constant 0 : i32
    return %c0_i32, %c0_i32_0 : i32, i32
  }
  func.func @transform_5(%arg0: i32) -> (i32, i32) {
    %c0_i32 = arith.constant 0 : i32
    %c0_i32_0 = arith.constant 0 : i32
    %c0_i32_1 = arith.constant 0 : i32
    return %c0_i32, %c0_i32_0 : i32, i32
  }
  func.func @transform_6(%arg0: i32) -> (i32, i32) {
    %c0_i32 = arith.constant 0 : i32
    %c0_i32_0 = arith.constant 0 : i32
    %c0_i32_1 = arith.constant 0 : i32
    return %c0_i32, %c0_i32_0 : i32, i32
  }
  func.func @transform_7(%arg0: i32) -> (i32, i32) {
    %c0_i32 = arith.constant 0 : i32
    %c0_i32_0 = arith.constant 0 : i32
    %c0_i32_1 = arith.constant 0 : i32
    return %c0_i32, %c0_i32_0 : i32, i32
  }
}

</mosaic_0001>

<bundles_post_ra>
// kernel: dgcnn_forward.10
= control target key start
LH: loop header
LB: loop body
LE: loop exit
PB: predicated region body
PF: predicated region fallthrough
CT: control target
= control target key end

     0   :  { %s600_s15 = smov 0   ;;  %s602_s16 = smov 0   ;;  %s654_s0 = inlined_call_operand.vmem [shape: f32[2,16,8], index: 0, kind: input, shape index: {}, may-alias: {0,1}]   ;;  %s655_s1 = inlined_call_operand.vmem [shape: f32[2,16,8], index: 1, kind: input, shape index: {}, may-alias: {0,1}]   ;;  %s656_s2 = inlined_call_operand.vmem [shape: f32[2,16,1], index: 2, kind: input, shape index: {}]   ;;  %s657_s3 = inlined_call_operand.vmem [shape: f32[2,1,16], index: 3, kind: input, shape index: {}]   ;;  %s658_s4 = inlined_call_operand.vmem [shape: f32[2,16,16], index: 4, kind: output, shape index: {}]  }
   0x1   :  { %s604_s17 = smov 0  }
   0x2 LB: > { %s26_s18 = sadd.s32 1, %s568_s16  ;;  %p502_p0 = scmp.ge.s32.totalorder %s572_s17, 1  ;;  %s572_s17 = sphi %s604_s17, %s14_s17   ;;  %s568_s16 = sphi %s602_s16, %s660_s16   ;;  %s564_s15 = sphi %s600_s15, %s659_s15  }
   0x3   : > { %p28_p1 = scmp.ge.s32.totalorder %s26_s18, 2  ;;  %p218_p2 = scmp.lt.s32.totalorder %s572_s17, 3 }
   0x5   : > { %s662_s18 = smov (%p28_p1, %s26_s18), 0  ;;  %p219_p3 = pnand %p502_p0, %p218_p2 }
   0x6   : > { %p270_p4 = scmp.lt.s32.totalorder (!%p219_p3), %s564_s15, 1 }
   0x7   : > { %222 = sbr.rel (%p219_p3) target bundleno = 157 (0x9d), region = 36 }
   0xc   : > { %v574_v0 = vmov 0   ;;  %s664_s15 = smov (!%p270_p4, %s564_s15), 1  ;;  %vm311_vm0 = vcmask 64512   ;;  %vm369_vm1 = vcmask 130048  }
   0xd   : > { %548 = vset.pattern.permute.xlu0 %v574_v0  ;;  %s618_s19 = sshll.u32 %s664_s15, 4  ;;  %s296_s22 = scalar_lea.vmem %s657_s3, %s664_s15 }
   0xe   : > { %s283_s25 = scalar_lea.vmem %s655_s1, %s618_s19  ;;  %s292_s28 = scalar_lea.vmem %s656_s2, %s618_s19  ;;  %v549_v11 = vld [vmem:[%s296_s22] ss:$0 sm:$0xff] }
   0xf   : > { %v310_v1 = vld [vmem:[%s283_s25 + $0x8] sm:$0xff]  ;;  %v349_v2 = vld [vmem:[%s292_s28] sm:$0xff]  ;;  %s277_s5 = scalar_lea.vmem %s654_s0, %s618_s19  ;;  %s305_s8 = scalar_lea.vmem %s658_s4, %s618_s19 }
  0x10   : > { %511 = vmatpush.xpose.msk.msra.mxu0 %vm311_vm0, %v310_v1  ;;  %521 = vmatpush.xpose.msk.msra.mxu1 %vm311_vm0, %v310_v1  ;;  %v309_v3 = vld [vmem:[%s283_s25] sm:$0xff]  ;;  %v308_v5 = vld [vmem:[%s277_s5 + $0x8] sm:$0xff] }
  0x11   : > { %353 = vperm.xlu0 %548, %v349_v2   ;;  %v307_v4 = vld [vmem:[%s277_s5] sm:$0xff]  ;;  %v350_v6 = vld [vmem:[%s292_s28 + $0x8] sm:$0xff] }
  0x14   : > { %512 = vmatpush.xpose.msk.msra.mxu0 %vm311_vm0, %v309_v3  ;;  %522 = vmatpush.xpose.msk.msra.mxu1 %vm311_vm0, %v309_v3 }
  0x17   : > { %513 = vmatmul.msk.f32.vlgmr.msra.gmra.mxu0 %vm311_vm0, %v307_v4  ;;  %514 = vmatmul.msk.f32.vlgmr.msra.gmra.mxu1 %vm311_vm0, %v308_v5 }
  0x19   : > { %358 = vperm.xlu0 %548, %v350_v6  }
  0x83   : > { %v354_v7 = vpop.permute.xlu0 %353 }
  0x8b   : > { %v359_v13 = vpop.permute.xlu0 %358 }
  0x94   : > { %v341_v8 = vpop.f32.mrf.mxu0  ;;  %v344_v9 = vpop.f32.mrf.mxu1 }
  0x95   : > { %v347_v10 = vmul.f32 2.0, %v341_v8  ;;  %v348_v12 = vmul.f32 2.0, %v344_v9 }
  0x97   : > { %v361_v14 = vsub.f32 %v347_v10, %v354_v7  ;;  %v362_v15 = vsub.f32 %v348_v12, %v359_v13 }
  0x99   : > { %v367_v16 = vsub.f32 %v361_v14, %v549_v11  ;;  %v368_v17 = vsub.f32 %v362_v15, %v549_v11 }
  0x9b   : > { %370 = vst.msk [vmem:[%s305_s8] sm:$0xff] %vm369_vm1, %v367_v16 }
  0x9c   : > { %371 = vst.msk [vmem:[%s305_s8 + $0x8] sm:$0xff] %vm369_vm1, %v368_v17 }
  0x9d PF: > { %s14_s17 = sadd.s32 1, %s572_s17   ;;  %s659_s15 = smov %s568_s16 }
  0x9e   : > { %p11_p5 = scmp.ge.s32.totalorder %s14_s17, 4   ;;  %s660_s16 = smov %s662_s18 }
  0xa0   :  { %13 = sbr.rel (!%p11_p5) target bundleno = 2 (0x2), region = 75 }

// kernel: dgcnn_forward.11
= control target key start
LH: loop header
LB: loop body
LE: loop exit
PB: predicated region body
PF: predicated region fallthrough
CT: control target
= control target key end

     0   :  { %vm56_vm0 = vcmask 1043456   ;;  %vm49_vm1 = vcmask 64512   ;;  %vm25_vm2 = vcmask 523264   ;;  %v377_v8 = vmov -inf   ;;  %s529_s2 = inlined_call_operand.vmem [shape: bf16[8,64], index: 2, kind: input, shape index: {}]   ;;  %s530_s0 = inlined_call_operand.vmem [shape: bf16[4,32,8], index: 0, kind: input, shape index: {}]   ;;  %s531_s3 = inlined_call_operand.vmem [shape: bf16[8,64], index: 3, kind: input, shape index: {}]   ;;  %s532_s5 = inlined_call_operand.vmem [shape: f32[32,64], index: 5, kind: output, shape index: {}]   ;;  %s533_s1 = inlined_call_operand.vmem [shape: bf16[32,8], index: 1, kind: input, shape index: {}]   ;;  %s534_s4 = inlined_call_operand.vmem [shape: f32[1,64], index: 4, kind: input, shape index: {}]  }
   0x1   :  { %v38_v0 = vld [vmem:[%s529_s2] sm:$0xf]  ;;  %v365_v2 = vld [vmem:[%s530_s0 + $0x8] sm:$0xff]  ;;  %v370_v7 = vld [vmem:[%s530_s0 + $0x30] sm:$0xff]  ;;  %28 = vst.msk [vmem:[%s532_s5 + $0x10] sm:$0xff] %vm25_vm2, %v377_v8 }
   0x2   :  { %v58_v1 = vsel %vm56_vm0, %v38_v0, 0  ;;  %v368_v3 = vld [vmem:[%s530_s0 + $0x20] sm:$0xff]  ;;  %26 = vst.msk [vmem:[%s532_s5] sm:$0xff] %vm25_vm2, %v377_v8  ;;  %v366_v9 = vld [vmem:[%s530_s0 + $0x10] sm:$0xff]  ;;  %v369_v10 = vld [vmem:[%s530_s0 + $0x28] sm:$0xff] }
   0x3   :  { %v227_v4 = vld [vmem:[%s531_s3] sm:$0xf]  ;;  %374 = vmatpush.bf16.msra.mxu1 %v58_v1  ;;  %155 = vmatpush.bf16.msra.mxu2 %v58_v1  ;;  %27 = vst.msk [vmem:[%s532_s5 + $0x8] sm:$0xff] %vm25_vm2, %v377_v8  ;;  %v371_v12 = vld [vmem:[%s530_s0 + $0x38] sm:$0xff]  ;;  %v373_v14 = vld [vmem:[%s533_s1 + $0x8] sm:$0xff] }
   0x4   :  { %v364_v5 = vld [vmem:[%s530_s0] sm:$0xff]  ;;  %v245_v6 = vsel %vm56_vm0, %v227_v4, 0  ;;  %67 = vmatpush.bf16.msra.mxu0 %v58_v1  ;;  %199 = vmatpush.bf16.msra.mxu3 %v58_v1  ;;  %29 = vst.msk [vmem:[%s532_s5 + $0x18] sm:$0xff] %vm25_vm2, %v377_v8  ;;  %v367_v13 = vld [vmem:[%s530_s0 + $0x18] sm:$0xff] }
   0x5   :  { %v372_v11 = vld [vmem:[%s533_s1] sm:$0xff] }
   0x6   :  { %311 = vmatmul.msk.bf16.vlgmr.msra.gmra.mxu1 %vm49_vm1, %v365_v2  ;;  %338 = vmatmul.msk.bf16.vlgmr.msra.gmra.mxu2 %vm49_vm1, %v368_v3  ;;  %v376_v36 = vld [vmem:[%s534_s4] ss:$0 sm:$0xff] }
   0x7   :  { %111 = vmatpush.bf16.msrb.mxu1 %v58_v1  ;;  %310 = vmatmul.msk.bf16.vlgmr.msra.gmra.mxu0 %vm49_vm1, %v364_v5 }
   0x8   :  { %254 = vmatpush.bf16.msrb.mxu0 %v245_v6  ;;  %352 = vmatmul.msk.bf16.vlgmr.msra.gmra.mxu3 %vm49_vm1, %v370_v7  ;;  %v32_v35 = vld [vmem:[%s532_s5 + $0x10] sm:$0xff] }
   0x9   :  { %v30_v18 = vld [vmem:[%s532_s5] sm:$0xff] }
   0xa   :  { %v31_v26 = vld [vmem:[%s532_s5 + $0x8] sm:$0xff] }
   0xb   :  { %v33_v49 = vld [vmem:[%s532_s5 + $0x18] sm:$0xff] }
  0x16   :  { %324 = vmatmul.msk.bf16.vlgmr.msrb.gmra.mxu1 %vm49_vm1, %v366_v9  ;;  %339 = vmatmul.msk.bf16.gmra.mxu2 %vm49_vm1, %v369_v10 }
  0x17   :  { %362 = vmatmul.msk.bf16.vlgmr.msrb.gmra.mxu0 %vm49_vm1, %v372_v11 }
  0x18   :  { %353 = vmatmul.msk.bf16.gmra.mxu3 %vm49_vm1, %v371_v12 }
  0x26   :  { %325 = vmatmul.msk.bf16.gmra.mxu1 %vm49_vm1, %v367_v13 }
  0x27   :  { %363 = vmatmul.msk.bf16.gmra.mxu0 %vm49_vm1, %v373_v14 }
  0x83   :  { %v74_v15 = vpop.f32.mrf.mxu1 }
  0x84   :  { %v69_v16 = vpop.f32.mrf.mxu0  ;;  %v81_v39 = vmax.f32 %v32_v35, %v74_v15 }
  0x85   :  { %v79_v20 = vmax.f32 %v30_v18, %v69_v16 }
  0x89   :  { %v157_v19 = vpop.f32.mrf.mxu2 }
  0x8b   :  { %v76_v17 = vpop.f32.mrf.mxu1  ;;  %v201_v21 = vpop.f32.mrf.mxu3 }
  0x8c   :  { %v71_v22 = vpop.f32.mrf.mxu0  ;;  %v82_v53 = vmax.f32 %v33_v49, %v76_v17 }
  0x8d   :  { %v80_v29 = vmax.f32 %v31_v26, %v71_v22 }
  0x91   :  { %v159_v28 = vpop.f32.mrf.mxu2 }
  0x93   :  { %v113_v23 = vpop.f32.mrf.mxu1  ;;  %v203_v30 = vpop.f32.mrf.mxu3 }
  0x94   :  { %v123_v24 = vmax.f32 %v79_v20, %v113_v23  ;;  %v256_v31 = vpop.f32.mrf.mxu0 }
  0x96   :  { %v167_v25 = vmax.f32 %v123_v24, %v157_v19 }
  0x98   :  { %v211_v27 = vmax.f32 %v167_v25, %v201_v21 }
  0x99   :  { %v162_v41 = vpop.f32.mrf.mxu2 }
  0x9a   :  { %216 = vst.msk [vmem:[%s532_s5] sm:$0xff] %vm25_vm2, %v211_v27 }
  0x9b   :  { %v115_v32 = vpop.f32.mrf.mxu1  ;;  %v206_v45 = vpop.f32.mrf.mxu3 }
  0x9c   :  { %v124_v33 = vmax.f32 %v80_v29, %v115_v32  ;;  %v258_v46 = vpop.f32.mrf.mxu0 }
  0x9e   :  { %v168_v34 = vmax.f32 %v124_v33, %v159_v28 }
  0xa0   :  { %v212_v37 = vmax.f32 %v168_v34, %v203_v30 }
  0xa1   :  { %v266_v38 = vld [vmem:[%s532_s5] sm:$0xff]  ;;  %v164_v58 = vpop.f32.mrf.mxu2 }
  0xa2   :  { %v270_v40 = vadd.f32 %v266_v38, %v256_v31  ;;  %217 = vst.msk [vmem:[%s532_s5 + $0x8] sm:$0xff] %vm25_vm2, %v212_v37 }
  0xa3   :  { %v118_v42 = vpop.f32.mrf.mxu1  ;;  %v208_v61 = vpop.f32.mrf.mxu3 }
  0xa4   :  { %v278_v43 = vadd.f32 %v376_v36, %v270_v40  ;;  %v125_v44 = vmax.f32 %v81_v39, %v118_v42  ;;  %v261_v62 = vpop.f32.mrf.mxu0 }
  0xa6   :  { %vm282_vm3 = vcmp.gt.f32.partialorder %v278_v43, 0.0  ;;  %v286_v47 = vmul.f32 0.2, %v278_v43  ;;  %v169_v48 = vmax.f32 %v125_v44, %v162_v41 }
  0xa8   :  { %v290_v50 = vsel %vm282_vm3, %v278_v43, %v286_v47  ;;  %v213_v51 = vmax.f32 %v169_v48, %v206_v45 }
  0xa9   :  { %294 = vst.msk [vmem:[%s532_s5] sm:$0xff] %vm25_vm2, %v290_v50  ;;  %v267_v52 = vld [vmem:[%s532_s5 + $0x8] sm:$0xff] }
  0xaa   :  { %v271_v54 = vadd.f32 %v267_v52, %v258_v46  ;;  %218 = vst.msk [vmem:[%s532_s5 + $0x10] sm:$0xff] %vm25_vm2, %v213_v51 }
  0xab   :  { %v120_v55 = vpop.f32.mrf.mxu1 }
  0xac   :  { %v279_v56 = vadd.f32 %v376_v36, %v271_v54  ;;  %v126_v57 = vmax.f32 %v82_v53, %v120_v55  ;;  %v263_v6 = vpop.f32.mrf.mxu0 }
  0xae   :  { %vm283_vm4 = vcmp.gt.f32.partialorder %v279_v56, 0.0  ;;  %v287_v59 = vmul.f32 0.2, %v279_v56  ;;  %v170_v60 = vmax.f32 %v126_v57, %v164_v58 }
  0xb0   :  { %v291_v63 = vsel %vm283_vm4, %v279_v56, %v287_v59  ;;  %v214_v0 = vmax.f32 %v170_v60, %v208_v61 }
  0xb1   :  { %295 = vst.msk [vmem:[%s532_s5 + $0x8] sm:$0xff] %vm25_vm2, %v291_v63  ;;  %v268_v1 = vld [vmem:[%s532_s5 + $0x10] sm:$0xff] }
  0xb2   :  { %v272_v2 = vadd.f32 %v268_v1, %v261_v62  ;;  %219 = vst.msk [vmem:[%s532_s5 + $0x18] sm:$0xff] %vm25_vm2, %v214_v0 }
  0xb4   :  { %v280_v3 = vadd.f32 %v376_v36, %v272_v2 }
  0xb6   :  { %vm284_vm5 = vcmp.gt.f32.partialorder %v280_v3, 0.0  ;;  %v288_v4 = vmul.f32 0.2, %v280_v3 }
  0xb8   :  { %v292_v5 = vsel %vm284_vm5, %v280_v3, %v288_v4 }
  0xb9   :  { %296 = vst.msk [vmem:[%s532_s5 + $0x10] sm:$0xff] %vm25_vm2, %v292_v5  ;;  %v269_v7 = vld [vmem:[%s532_s5 + $0x18] sm:$0xff] }
  0xba   :  { %v273_v8 = vadd.f32 %v269_v7, %v263_v6 }
  0xbc   :  { %v281_v9 = vadd.f32 %v376_v36, %v273_v8 }
  0xbe   :  { %vm285_vm6 = vcmp.gt.f32.partialorder %v281_v9, 0.0  ;;  %v289_v10 = vmul.f32 0.2, %v281_v9 }
  0xc0   :  { %v293_v11 = vsel %vm285_vm6, %v281_v9, %v289_v10 }
  0xc1   :  { %297 = vst.msk [vmem:[%s532_s5 + $0x18] sm:$0xff] %vm25_vm2, %v293_v11 }

// kernel: dgcnn_forward.12
= control target key start
LH: loop header
LB: loop body
LE: loop exit
PB: predicated region body
PF: predicated region fallthrough
CT: control target
= control target key end

     0   :  { %s600_s15 = smov 0   ;;  %s602_s16 = smov 0   ;;  %s654_s0 = inlined_call_operand.vmem [shape: f32[2,16,64], index: 0, kind: input, shape index: {}, may-alias: {0,1}]   ;;  %s655_s1 = inlined_call_operand.vmem [shape: f32[2,16,64], index: 1, kind: input, shape index: {}, may-alias: {0,1}]   ;;  %s656_s2 = inlined_call_operand.vmem [shape: f32[2,16,1], index: 2, kind: input, shape index: {}]   ;;  %s657_s3 = inlined_call_operand.vmem [shape: f32[2,1,16], index: 3, kind: input, shape index: {}]   ;;  %s658_s4 = inlined_call_operand.vmem [shape: f32[2,16,16], index: 4, kind: output, shape index: {}]  }
   0x1   :  { %s604_s17 = smov 0  }
   0x2 LB: > { %s26_s18 = sadd.s32 1, %s568_s16  ;;  %p502_p0 = scmp.ge.s32.totalorder %s572_s17, 1  ;;  %s572_s17 = sphi %s604_s17, %s14_s17   ;;  %s568_s16 = sphi %s602_s16, %s660_s16   ;;  %s564_s15 = sphi %s600_s15, %s659_s15  }
   0x3   : > { %p28_p1 = scmp.ge.s32.totalorder %s26_s18, 2  ;;  %p218_p2 = scmp.lt.s32.totalorder %s572_s17, 3 }
   0x5   : > { %s662_s18 = smov (%p28_p1, %s26_s18), 0  ;;  %p219_p3 = pnand %p502_p0, %p218_p2 }
   0x6   : > { %p270_p4 = scmp.lt.s32.totalorder (!%p219_p3), %s564_s15, 1 }
   0x7   : > { %222 = sbr.rel (%p219_p3) target bundleno = 157 (0x9d), region = 36 }
   0xc   : > { %v574_v0 = vmov 0   ;;  %s664_s15 = smov (!%p270_p4, %s564_s15), 1  ;;  %vm311_vm0 = vcmask 523264   ;;  %vm369_vm1 = vcmask 130048  }
   0xd   : > { %548 = vset.pattern.permute.xlu0 %v574_v0  ;;  %s618_s19 = sshll.u32 %s664_s15, 4  ;;  %s296_s22 = scalar_lea.vmem %s657_s3, %s664_s15 }
   0xe   : > { %s283_s25 = scalar_lea.vmem %s655_s1, %s618_s19  ;;  %s292_s28 = scalar_lea.vmem %s656_s2, %s618_s19  ;;  %v549_v11 = vld [vmem:[%s296_s22] ss:$0 sm:$0xff] }
   0xf   : > { %v310_v1 = vld [vmem:[%s283_s25 + $0x8] sm:$0xff]  ;;  %v349_v2 = vld [vmem:[%s292_s28] sm:$0xff]  ;;  %s277_s5 = scalar_lea.vmem %s654_s0, %s618_s19  ;;  %s305_s8 = scalar_lea.vmem %s658_s4, %s618_s19 }
  0x10   : > { %511 = vmatpush.xpose.msk.msra.mxu0 %vm311_vm0, %v310_v1  ;;  %521 = vmatpush.xpose.msk.msra.mxu1 %vm311_vm0, %v310_v1  ;;  %v309_v3 = vld [vmem:[%s283_s25] sm:$0xff]  ;;  %v308_v5 = vld [vmem:[%s277_s5 + $0x8] sm:$0xff] }
  0x11   : > { %353 = vperm.xlu0 %548, %v349_v2   ;;  %v307_v4 = vld [vmem:[%s277_s5] sm:$0xff]  ;;  %v350_v6 = vld [vmem:[%s292_s28 + $0x8] sm:$0xff] }
  0x14   : > { %512 = vmatpush.xpose.msk.msra.mxu0 %vm311_vm0, %v309_v3  ;;  %522 = vmatpush.xpose.msk.msra.mxu1 %vm311_vm0, %v309_v3 }
  0x17   : > { %513 = vmatmul.msk.f32.vlgmr.msra.gmra.mxu0 %vm311_vm0, %v307_v4  ;;  %514 = vmatmul.msk.f32.vlgmr.msra.gmra.mxu1 %vm311_vm0, %v308_v5 }
  0x19   : > { %358 = vperm.xlu0 %548, %v350_v6  }
  0x83   : > { %v354_v7 = vpop.permute.xlu0 %353 }
  0x8b   : > { %v359_v13 = vpop.permute.xlu0 %358 }
  0x94   : > { %v341_v8 = vpop.f32.mrf.mxu0  ;;  %v344_v9 = vpop.f32.mrf.mxu1 }
  0x95   : > { %v347_v10 = vmul.f32 2.0, %v341_v8  ;;  %v348_v12 = vmul.f32 2.0, %v344_v9 }
  0x97   : > { %v361_v14 = vsub.f32 %v347_v10, %v354_v7  ;;  %v362_v15 = vsub.f32 %v348_v12, %v359_v13 }
  0x99   : > { %v367_v16 = vsub.f32 %v361_v14, %v549_v11  ;;  %v368_v17 = vsub.f32 %v362_v15, %v549_v11 }
  0x9b   : > { %370 = vst.msk [vmem:[%s305_s8] sm:$0xff] %vm369_vm1, %v367_v16 }
  0x9c   : > { %371 = vst.msk [vmem:[%s305_s8 + $0x8] sm:$0xff] %vm369_vm1, %v368_v17 }
  0x9d PF: > { %s14_s17 = sadd.s32 1, %s572_s17   ;;  %s659_s15 = smov %s568_s16 }
  0x9e   : > { %p11_p5 = scmp.ge.s32.totalorder %s14_s17, 4   ;;  %s660_s16 = smov %s662_s18 }
  0xa0   :  { %13 = sbr.rel (!%p11_p5) target bundleno = 2 (0x2), region = 75 }

// kernel: dgcnn_forward.13
= control target key start
LH: loop header
LB: loop body
LE: loop exit
PB: predicated region body
PF: predicated region fallthrough
CT: control target
= control target key end

     0   :  { %vm25_vm0 = vcmask 523264   ;;  %v474_v10 = vmov -inf   ;;  %s644_s2 = inlined_call_operand.vmem [shape: bf16[64,64], index: 2, kind: input, shape index: {}]   ;;  %s645_s3 = inlined_call_operand.vmem [shape: bf16[64,64], index: 3, kind: input, shape index: {}]   ;;  %s646_s0 = inlined_call_operand.vmem [shape: bf16[4,32,64], index: 0, kind: input, shape index: {}]   ;;  %s647_s5 = inlined_call_operand.vmem [shape: f32[32,64], index: 5, kind: output, shape index: {}]   ;;  %s648_s1 = inlined_call_operand.vmem [shape: bf16[32,64], index: 1, kind: input, shape index: {}]   ;;  %s649_s4 = inlined_call_operand.vmem [shape: f32[1,64], index: 4, kind: input, shape index: {}]  }
   0x1   :  { %v455_v0 = vld [vmem:[%s644_s2 + $0x18] sm:$0xff]  ;;  %v454_v1 = vld [vmem:[%s644_s2 + $0x10] sm:$0xff]  ;;  %v453_v2 = vld [vmem:[%s644_s2 + $0x8] sm:$0xff]  ;;  %28 = vst.msk [vmem:[%s647_s5 + $0x10] sm:$0xff] %vm25_vm0, %v474_v10 }
   0x2   :  { %468 = vmatpush.bf16.msra.mxu1 %v455_v0  ;;  %179 = vmatpush.bf16.msra.mxu2 %v455_v0  ;;  %v452_v3 = vld [vmem:[%s644_s2] sm:$0xff]  ;;  %v467_v4 = vld [vmem:[%s645_s3 + $0x18] sm:$0xff]  ;;  %v451_v5 = vld [vmem:[%s646_s0 + $0x8] sm:$0xff]  ;;  %26 = vst.msk [vmem:[%s647_s5] sm:$0xff] %vm25_vm0, %v474_v10 }
   0x3   :  { %91 = vmatpush.bf16.msra.mxu0 %v455_v0  ;;  %223 = vmatpush.bf16.msra.mxu3 %v455_v0  ;;  %v458_v6 = vld [vmem:[%s646_s0 + $0x20] sm:$0xff]  ;;  %v460_v8 = vld [vmem:[%s646_s0 + $0x30] sm:$0xff]  ;;  %v465_v11 = vld [vmem:[%s645_s3 + $0x8] sm:$0xff]  ;;  %27 = vst.msk [vmem:[%s647_s5 + $0x8] sm:$0xff] %vm25_vm0, %v474_v10 }
   0x4   :  { %v450_v7 = vld [vmem:[%s646_s0] sm:$0xff]  ;;  %v466_v9 = vld [vmem:[%s645_s3 + $0x10] sm:$0xff]  ;;  %29 = vst.msk [vmem:[%s647_s5 + $0x18] sm:$0xff] %vm25_vm0, %v474_v10  ;;  %v459_v14 = vld [vmem:[%s646_s0 + $0x28] sm:$0xff] }
   0x5   :  { %v464_v12 = vld [vmem:[%s645_s3] sm:$0xff]  ;;  %v456_v13 = vld [vmem:[%s646_s0 + $0x10] sm:$0xff]  ;;  %v461_v16 = vld [vmem:[%s646_s0 + $0x38] sm:$0xff] }
   0x6   :  { %469 = vmatpush.bf16.msra.mxu1 %v454_v1  ;;  %180 = vmatpush.bf16.msra.mxu2 %v454_v1  ;;  %v462_v15 = vld [vmem:[%s648_s1] sm:$0xff]  ;;  %v457_v17 = vld [vmem:[%s646_s0 + $0x18] sm:$0xff]  ;;  %v463_v18 = vld [vmem:[%s648_s1 + $0x8] sm:$0xff] }
   0x7   :  { %92 = vmatpush.bf16.msra.mxu0 %v454_v1  ;;  %224 = vmatpush.bf16.msra.mxu3 %v454_v1  ;;  %v473_v40 = vld [vmem:[%s649_s4] ss:$0 sm:$0xff] }
   0x8   :  { %v32_v39 = vld [vmem:[%s647_s5 + $0x10] sm:$0xff] }
   0x9   :  { %v30_v22 = vld [vmem:[%s647_s5] sm:$0xff] }
   0xa   :  { %470 = vmatpush.bf16.msra.mxu1 %v453_v2  ;;  %181 = vmatpush.bf16.msra.mxu2 %v453_v2  ;;  %v31_v30 = vld [vmem:[%s647_s5 + $0x8] sm:$0xff] }
   0xb   :  { %93 = vmatpush.bf16.msra.mxu0 %v453_v2  ;;  %225 = vmatpush.bf16.msra.mxu3 %v453_v2  ;;  %v33_v53 = vld [vmem:[%s647_s5 + $0x18] sm:$0xff] }
   0xe   :  { %471 = vmatpush.bf16.msra.mxu1 %v452_v3  ;;  %182 = vmatpush.bf16.msra.mxu2 %v452_v3 }
   0xf   :  { %94 = vmatpush.bf16.msra.mxu0 %v452_v3  ;;  %226 = vmatpush.bf16.msra.mxu3 %v452_v3 }
  0x11   :  { %381 = vmatmul.msk.bf16.vlgmr.msra.gmra.mxu1 %vm25_vm0, %v451_v5  ;;  %408 = vmatmul.msk.bf16.vlgmr.msra.gmra.mxu2 %vm25_vm0, %v458_v6 }
  0x12   :  { %135 = vmatpush.bf16.msrb.mxu1 %v455_v0  ;;  %380 = vmatmul.msk.bf16.vlgmr.msra.gmra.mxu0 %vm25_vm0, %v450_v7 }
  0x13   :  { %305 = vmatpush.bf16.msrb.mxu0 %v467_v4  ;;  %422 = vmatmul.msk.bf16.vlgmr.msra.gmra.mxu3 %vm25_vm0, %v460_v8 }
  0x16   :  { %136 = vmatpush.bf16.msrb.mxu1 %v454_v1 }
  0x17   :  { %306 = vmatpush.bf16.msrb.mxu0 %v466_v9 }
  0x1a   :  { %137 = vmatpush.bf16.msrb.mxu1 %v453_v2 }
  0x1b   :  { %307 = vmatpush.bf16.msrb.mxu0 %v465_v11 }
  0x1e   :  { %138 = vmatpush.bf16.msrb.mxu1 %v452_v3 }
  0x1f   :  { %308 = vmatpush.bf16.msrb.mxu0 %v464_v12 }
  0x21   :  { %394 = vmatmul.msk.bf16.vlgmr.msrb.gmra.mxu1 %vm25_vm0, %v456_v13  ;;  %409 = vmatmul.msk.bf16.gmra.mxu2 %vm25_vm0, %v459_v14 }
  0x22   :  { %448 = vmatmul.msk.bf16.vlgmr.msrb.gmra.mxu0 %vm25_vm0, %v462_v15 }
  0x23   :  { %423 = vmatmul.msk.bf16.gmra.mxu3 %vm25_vm0, %v461_v16 }
  0x31   :  { %395 = vmatmul.msk.bf16.gmra.mxu1 %vm25_vm0, %v457_v17 }
  0x32   :  { %449 = vmatmul.msk.bf16.gmra.mxu0 %vm25_vm0, %v463_v18 }
  0x8e   :  { %v101_v19 = vpop.f32.mrf.mxu1 }
  0x8f   :  { %v96_v20 = vpop.f32.mrf.mxu0  ;;  %v108_v43 = vmax.f32 %v32_v39, %v101_v19 }
  0x90   :  { %v106_v24 = vmax.f32 %v30_v22, %v96_v20 }
  0x94   :  { %v184_v23 = vpop.f32.mrf.mxu2 }
  0x96   :  { %v103_v21 = vpop.f32.mrf.mxu1  ;;  %v228_v25 = vpop.f32.mrf.mxu3 }
  0x97   :  { %v98_v26 = vpop.f32.mrf.mxu0  ;;  %v109_v57 = vmax.f32 %v33_v53, %v103_v21 }
  0x98   :  { %v107_v33 = vmax.f32 %v31_v30, %v98_v26 }
  0x9c   :  { %v186_v32 = vpop.f32.mrf.mxu2 }
  0x9e   :  { %v140_v27 = vpop.f32.mrf.mxu1  ;;  %v230_v34 = vpop.f32.mrf.mxu3 }
  0x9f   :  { %v150_v28 = vmax.f32 %v106_v24, %v140_v27  ;;  %v310_v35 = vpop.f32.mrf.mxu0 }
  0xa1   :  { %v194_v29 = vmax.f32 %v150_v28, %v184_v23 }
  0xa3   :  { %v238_v31 = vmax.f32 %v194_v29, %v228_v25 }
  0xa4   :  { %v189_v45 = vpop.f32.mrf.mxu2 }
  0xa5   :  { %242 = vst.msk [vmem:[%s647_s5] sm:$0xff] %vm25_vm0, %v238_v31 }
  0xa6   :  { %v142_v36 = vpop.f32.mrf.mxu1  ;;  %v233_v49 = vpop.f32.mrf.mxu3 }
  0xa7   :  { %v151_v37 = vmax.f32 %v107_v33, %v142_v36  ;;  %v312_v50 = vpop.f32.mrf.mxu0 }
  0xa9   :  { %v195_v38 = vmax.f32 %v151_v37, %v186_v32 }
  0xab   :  { %v239_v41 = vmax.f32 %v195_v38, %v230_v34 }
  0xac   :  { %v320_v42 = vld [vmem:[%s647_s5] sm:$0xff]  ;;  %v191_v62 = vpop.f32.mrf.mxu2 }
  0xad   :  { %v324_v44 = vadd.f32 %v320_v42, %v310_v35  ;;  %243 = vst.msk [vmem:[%s647_s5 + $0x8] sm:$0xff] %vm25_vm0, %v239_v41 }
  0xae   :  { %v145_v46 = vpop.f32.mrf.mxu1  ;;  %v235_v1 = vpop.f32.mrf.mxu3 }
  0xaf   :  { %v332_v47 = vadd.f32 %v473_v40, %v324_v44  ;;  %v152_v48 = vmax.f32 %v108_v43, %v145_v46  ;;  %v315_v2 = vpop.f32.mrf.mxu0 }
  0xb1   :  { %vm336_vm1 = vcmp.gt.f32.partialorder %v332_v47, 0.0  ;;  %v340_v51 = vmul.f32 0.2, %v332_v47  ;;  %v196_v52 = vmax.f32 %v152_v48, %v189_v45 }
  0xb3   :  { %v344_v54 = vsel %vm336_vm1, %v332_v47, %v340_v51  ;;  %v240_v55 = vmax.f32 %v196_v52, %v233_v49 }
  0xb4   :  { %348 = vst.msk [vmem:[%s647_s5] sm:$0xff] %vm25_vm0, %v344_v54  ;;  %v321_v56 = vld [vmem:[%s647_s5 + $0x8] sm:$0xff] }
  0xb5   :  { %v325_v58 = vadd.f32 %v321_v56, %v312_v50  ;;  %244 = vst.msk [vmem:[%s647_s5 + $0x10] sm:$0xff] %vm25_vm0, %v240_v55 }
  0xb6   :  { %v147_v59 = vpop.f32.mrf.mxu1 }
  0xb7   :  { %v333_v60 = vadd.f32 %v473_v40, %v325_v58  ;;  %v153_v61 = vmax.f32 %v109_v57, %v147_v59  ;;  %v317_v10 = vpop.f32.mrf.mxu0 }
  0xb9   :  { %vm337_vm2 = vcmp.gt.f32.partialorder %v333_v60, 0.0  ;;  %v341_v63 = vmul.f32 0.2, %v333_v60  ;;  %v197_v0 = vmax.f32 %v153_v61, %v191_v62 }
  0xbb   :  { %v345_v3 = vsel %vm337_vm2, %v333_v60, %v341_v63  ;;  %v241_v4 = vmax.f32 %v197_v0, %v235_v1 }
  0xbc   :  { %349 = vst.msk [vmem:[%s647_s5 + $0x8] sm:$0xff] %vm25_vm0, %v345_v3  ;;  %v322_v5 = vld [vmem:[%s647_s5 + $0x10] sm:$0xff] }
  0xbd   :  { %v326_v6 = vadd.f32 %v322_v5, %v315_v2  ;;  %245 = vst.msk [vmem:[%s647_s5 + $0x18] sm:$0xff] %vm25_vm0, %v241_v4 }
  0xbf   :  { %v334_v7 = vadd.f32 %v473_v40, %v326_v6 }
  0xc1   :  { %vm338_vm3 = vcmp.gt.f32.partialorder %v334_v7, 0.0  ;;  %v342_v8 = vmul.f32 0.2, %v334_v7 }
  0xc3   :  { %v346_v9 = vsel %vm338_vm3, %v334_v7, %v342_v8 }
  0xc4   :  { %350 = vst.msk [vmem:[%s647_s5 + $0x10] sm:$0xff] %vm25_vm0, %v346_v9  ;;  %v323_v11 = vld [vmem:[%s647_s5 + $0x18] sm:$0xff] }
  0xc5   :  { %v327_v12 = vadd.f32 %v323_v11, %v317_v10 }
  0xc7   :  { %v335_v13 = vadd.f32 %v473_v40, %v327_v12 }
  0xc9   :  { %vm339_vm4 = vcmp.gt.f32.partialorder %v335_v13, 0.0  ;;  %v343_v14 = vmul.f32 0.2, %v335_v13 }
  0xcb   :  { %v347_v15 = vsel %vm339_vm4, %v335_v13, %v343_v14 }
  0xcc   :  { %351 = vst.msk [vmem:[%s647_s5 + $0x18] sm:$0xff] %vm25_vm0, %v347_v15 }

// kernel: dgcnn_forward.16
= control target key start
LH: loop header
LB: loop body
LE: loop exit
PB: predicated region body
PF: predicated region fallthrough
CT: control target
= control target key end

     0   :  { %s583_s15 = smov 0   ;;  %s585_s16 = smov 0   ;;  %s625_s0 = inlined_call_operand.vmem [shape: f32[2,16,128], index: 0, kind: input, shape index: {}, may-alias: {0,1}]   ;;  %s626_s1 = inlined_call_operand.vmem [shape: f32[2,16,128], index: 1, kind: input, shape index: {}, may-alias: {0,1}]   ;;  %s627_s2 = inlined_call_operand.vmem [shape: f32[2,16,1], index: 2, kind: input, shape index: {}]   ;;  %s628_s3 = inlined_call_operand.vmem [shape: f32[2,1,16], index: 3, kind: input, shape index: {}]   ;;  %s629_s4 = inlined_call_operand.vmem [shape: f32[2,16,16], index: 4, kind: output, shape index: {}]  }
   0x1   :  { %s587_s17 = smov 0  }
   0x2 LB: > { %s26_s18 = sadd.s32 1, %s551_s16  ;;  %p489_p0 = scmp.ge.s32.totalorder %s555_s17, 1  ;;  %s555_s17 = sphi %s587_s17, %s14_s17   ;;  %s551_s16 = sphi %s585_s16, %s631_s16   ;;  %s547_s15 = sphi %s583_s15, %s630_s15  }
   0x3   : > { %p28_p1 = scmp.ge.s32.totalorder %s26_s18, 2  ;;  %p218_p2 = scmp.lt.s32.totalorder %s555_s17, 3 }
   0x5   : > { %s633_s18 = smov (%p28_p1, %s26_s18), 0  ;;  %p219_p3 = pnand %p489_p0, %p218_p2 }
   0x6   : > { %p270_p4 = scmp.lt.s32.totalorder (!%p219_p3), %s547_s15, 1 }
   0x7   : > { %222 = sbr.rel (%p219_p3) target bundleno = 157 (0x9d), region = 36 }
   0xc   : > { %v557_v0 = vmov 0   ;;  %s635_s15 = smov (!%p270_p4, %s547_s15), 1  ;;  %vm356_vm0 = vcmask 130048  }
   0xd   : > { %531 = vset.pattern.permute.xlu0 %v557_v0  ;;  %s500_s19 = sshll.u32 %s635_s15, 4  ;;  %s296_s22 = scalar_lea.vmem %s628_s3, %s635_s15 }
   0xe   : > { %s283_s25 = scalar_lea.vmem %s626_s1, %s500_s19  ;;  %s292_s28 = scalar_lea.vmem %s627_s2, %s500_s19  ;;  %v532_v11 = vld [vmem:[%s296_s22] ss:$0 sm:$0xff] }
   0xf   : > { %v310_v1 = vld [vmem:[%s283_s25 + $0x8] sm:$0xff]  ;;  %v336_v2 = vld [vmem:[%s292_s28] sm:$0xff]  ;;  %s277_s5 = scalar_lea.vmem %s625_s0, %s500_s19  ;;  %s305_s8 = scalar_lea.vmem %s629_s4, %s500_s19 }
  0x10   : > { %325 = vmatpush.xpose.msra.mxu0 %v310_v1  ;;  %504 = vmatpush.xpose.msra.mxu1 %v310_v1  ;;  %v309_v3 = vld [vmem:[%s283_s25] sm:$0xff]  ;;  %v308_v5 = vld [vmem:[%s277_s5 + $0x8] sm:$0xff] }
  0x11   : > { %340 = vperm.xlu0 %531, %v336_v2   ;;  %v307_v4 = vld [vmem:[%s277_s5] sm:$0xff]  ;;  %v337_v6 = vld [vmem:[%s292_s28 + $0x8] sm:$0xff] }
  0x14   : > { %326 = vmatpush.xpose.msra.mxu0 %v309_v3  ;;  %505 = vmatpush.xpose.msra.mxu1 %v309_v3 }
  0x17   : > { %327 = vmatmul.f32.vlgmr.msra.gmra.mxu0 %v307_v4  ;;  %330 = vmatmul.f32.vlgmr.msra.gmra.mxu1 %v308_v5 }
  0x19   : > { %345 = vperm.xlu0 %531, %v337_v6  }
  0x83   : > { %v341_v7 = vpop.permute.xlu0 %340 }
  0x8b   : > { %v346_v13 = vpop.permute.xlu0 %345 }
  0x94   : > { %v328_v8 = vpop.f32.mrf.mxu0  ;;  %v331_v9 = vpop.f32.mrf.mxu1 }
  0x95   : > { %v334_v10 = vmul.f32 2.0, %v328_v8  ;;  %v335_v12 = vmul.f32 2.0, %v331_v9 }
  0x97   : > { %v348_v14 = vsub.f32 %v334_v10, %v341_v7  ;;  %v349_v15 = vsub.f32 %v335_v12, %v346_v13 }
  0x99   : > { %v354_v16 = vsub.f32 %v348_v14, %v532_v11  ;;  %v355_v17 = vsub.f32 %v349_v15, %v532_v11 }
  0x9b   : > { %357 = vst.msk [vmem:[%s305_s8] sm:$0xff] %vm356_vm0, %v354_v16 }
  0x9c   : > { %358 = vst.msk [vmem:[%s305_s8 + $0x8] sm:$0xff] %vm356_vm0, %v355_v17 }
  0x9d PF: > { %s14_s17 = sadd.s32 1, %s555_s17   ;;  %s630_s15 = smov %s551_s16 }
  0x9e   : > { %p11_p5 = scmp.ge.s32.totalorder %s14_s17, 4   ;;  %s631_s16 = smov %s633_s18 }
  0xa0   :  { %13 = sbr.rel (!%p11_p5) target bundleno = 2 (0x2), region = 75 }

// kernel: dgcnn_forward.15
= control target key start
LH: loop header
LB: loop body
LE: loop exit
PB: predicated region body
PF: predicated region fallthrough
CT: control target
= control target key end

     0   :  { %10 = vsyncpa [#allocation3], 0  ;;  %s519_s21 = smov [#allocation2]   ;;  %s520_s23 = smov 64   ;;  %s622_s0 = inlined_call_operand.vmem [shape: bf16[4,32,64], index: 0, kind: input, shape index: {}]   ;;  %s623_s1 = inlined_call_operand.vmem [shape: bf16[32,64], index: 1, kind: input, shape index: {}]   ;;  %s624_s2 = inlined_call_operand.vmem [shape: bf16[64,128], index: 2, kind: input, shape index: {}]   ;;  %s625_s3 = inlined_call_operand.hbm [shape: bf16[64,128], index: 3, kind: input, shape index: {}]   ;;  %s626_s4 = inlined_call_operand.vmem [shape: f32[1,128], index: 4, kind: input, shape index: {}]   ;;  %s627_s5 = inlined_call_operand.vmem [shape: f32[32,128], index: 5, kind: output, shape index: {}]  }
   0x1   :  { %s21_s20 = sshll.u32 %s625_s3, 4  ;;  %s23_s22 = sshll.u32 %s519_s21, 4  ;;  %s22_s20 = int_to_ptr.hbm [resolvable:$true] %s21_s20  ;;  %s24_s22 = int_to_ptr.vmem [resolvable:$true] %s23_s22 }
   0x2   :  { %s521_s24 = smov 4  }
   0x3   :  { %29 = dma.hbm_to_vmem [thread:$0]  %s22_s20, 512, %s24_s22, [#allocation3], %s520_s23, %s520_s23, %s521_s24  }
   0x4   :  { %517 = dma.done.wait [#allocation3], 512  }
   0x5   :  { %518 = vsyncadd [#allocation3], 4294966784  ;;  %v471_v0 = vld [vmem:[%s624_s2 + $0x18] sm:$0xff]  ;;  %v470_v1 = vld [vmem:[%s624_s2 + $0x10] sm:$0xff]  ;;  %vm95_vm0 = vcmask 523264  }
   0x6   :  { %484 = vmatpush.bf16.msra.mxu1 %v471_v0  ;;  %194 = vmatpush.bf16.msra.mxu2 %v471_v0  ;;  %v469_v2 = vld [vmem:[%s624_s2 + $0x8] sm:$0xff]  ;;  %v468_v3 = vld [vmem:[%s624_s2] sm:$0xff]  ;;  %v483_v4 = vld [vmem:[#allocation2 + $0x18] sm:$0xff] }
   0x7   :  { %106 = vmatpush.bf16.msra.mxu0 %v471_v0  ;;  %238 = vmatpush.bf16.msra.mxu3 %v471_v0  ;;  %v467_v5 = vld [vmem:[%s622_s0 + $0x8] sm:$0xff]  ;;  %v474_v6 = vld [vmem:[%s622_s0 + $0x20] sm:$0xff]  ;;  %v476_v8 = vld [vmem:[%s622_s0 + $0x30] sm:$0xff] }
   0x8   :  { %v466_v7 = vld [vmem:[%s622_s0] sm:$0xff]  ;;  %v482_v9 = vld [vmem:[#allocation2 + $0x10] sm:$0xff]  ;;  %v481_v10 = vld [vmem:[#allocation2 + $0x8] sm:$0xff] }
   0x9   :  { %v480_v11 = vld [vmem:[#allocation2] sm:$0xff]  ;;  %v472_v12 = vld [vmem:[%s622_s0 + $0x10] sm:$0xff]  ;;  %v475_v13 = vld [vmem:[%s622_s0 + $0x28] sm:$0xff] }
   0xa   :  { %485 = vmatpush.bf16.msra.mxu1 %v470_v1  ;;  %195 = vmatpush.bf16.msra.mxu2 %v470_v1  ;;  %v478_v14 = vld [vmem:[%s623_s1] sm:$0xff]  ;;  %v477_v15 = vld [vmem:[%s622_s0 + $0x38] sm:$0xff]  ;;  %v479_v17 = vld [vmem:[%s623_s1 + $0x8] sm:$0xff] }
   0xb   :  { %107 = vmatpush.bf16.msra.mxu0 %v470_v1  ;;  %239 = vmatpush.bf16.msra.mxu3 %v470_v1  ;;  %v473_v16 = vld [vmem:[%s622_s0 + $0x18] sm:$0xff]  ;;  %v492_v29 = vld [vmem:[%s626_s4] ss:$0 sm:$0xff] }
   0xe   :  { %486 = vmatpush.bf16.msra.mxu1 %v469_v2  ;;  %196 = vmatpush.bf16.msra.mxu2 %v469_v2 }
   0xf   :  { %108 = vmatpush.bf16.msra.mxu0 %v469_v2  ;;  %240 = vmatpush.bf16.msra.mxu3 %v469_v2 }
  0x12   :  { %487 = vmatpush.bf16.msra.mxu1 %v468_v3  ;;  %197 = vmatpush.bf16.msra.mxu2 %v468_v3 }
  0x13   :  { %109 = vmatpush.bf16.msra.mxu0 %v468_v3  ;;  %241 = vmatpush.bf16.msra.mxu3 %v468_v3 }
  0x15   :  { %397 = vmatmul.msk.bf16.vlgmr.msra.gmra.mxu1 %vm95_vm0, %v467_v5  ;;  %424 = vmatmul.msk.bf16.vlgmr.msra.gmra.mxu2 %vm95_vm0, %v474_v6 }
  0x16   :  { %150 = vmatpush.bf16.msrb.mxu1 %v471_v0  ;;  %396 = vmatmul.msk.bf16.vlgmr.msra.gmra.mxu0 %vm95_vm0, %v466_v7 }
  0x17   :  { %320 = vmatpush.bf16.msrb.mxu0 %v483_v4  ;;  %438 = vmatmul.msk.bf16.vlgmr.msra.gmra.mxu3 %vm95_vm0, %v476_v8 }
  0x1a   :  { %151 = vmatpush.bf16.msrb.mxu1 %v470_v1 }
  0x1b   :  { %321 = vmatpush.bf16.msrb.mxu0 %v482_v9 }
  0x1e   :  { %152 = vmatpush.bf16.msrb.mxu1 %v469_v2 }
  0x1f   :  { %322 = vmatpush.bf16.msrb.mxu0 %v481_v10 }
  0x22   :  { %153 = vmatpush.bf16.msrb.mxu1 %v468_v3 }
  0x23   :  { %323 = vmatpush.bf16.msrb.mxu0 %v480_v11 }
  0x25   :  { %410 = vmatmul.msk.bf16.vlgmr.msrb.gmra.mxu1 %vm95_vm0, %v472_v12  ;;  %425 = vmatmul.msk.bf16.gmra.mxu2 %vm95_vm0, %v475_v13 }
  0x26   :  { %464 = vmatmul.msk.bf16.vlgmr.msrb.gmra.mxu0 %vm95_vm0, %v478_v14 }
  0x27   :  { %439 = vmatmul.msk.bf16.gmra.mxu3 %vm95_vm0, %v477_v15 }
  0x35   :  { %411 = vmatmul.msk.bf16.gmra.mxu1 %vm95_vm0, %v473_v16 }
  0x36   :  { %465 = vmatmul.msk.bf16.gmra.mxu0 %vm95_vm0, %v479_v17 }
  0x92   :  { %v116_v18 = vpop.f32.mrf.mxu1 }
  0x93   :  { %v111_v19 = vpop.f32.mrf.mxu0 }
  0x98   :  { %v199_v22 = vpop.f32.mrf.mxu2 }
  0x9a   :  { %v118_v20 = vpop.f32.mrf.mxu1  ;;  %v243_v23 = vpop.f32.mrf.mxu3 }
  0x9b   :  { %v113_v21 = vpop.f32.mrf.mxu0 }
  0xa0   :  { %v201_v30 = vpop.f32.mrf.mxu2 }
  0xa2   :  { %v155_v24 = vpop.f32.mrf.mxu1  ;;  %v245_v32 = vpop.f32.mrf.mxu3 }
  0xa3   :  { %v165_v25 = vmax.f32 %v111_v19, %v155_v24  ;;  %v325_v26 = vpop.f32.mrf.mxu0 }
  0xa5   :  { %v209_v27 = vmax.f32 %v165_v25, %v199_v22 }
  0xa7   :  { %v253_v28 = vmax.f32 %v209_v27, %v243_v23 }
  0xa8   :  { %v204_v42 = vpop.f32.mrf.mxu2 }
  0xa9   :  { %v339_v31 = vadd.f32 %v325_v26, %v253_v28 }
  0xaa   :  { %v157_v33 = vpop.f32.mrf.mxu1  ;;  %v248_v46 = vpop.f32.mrf.mxu3 }
  0xab   :  { %v347_v34 = vadd.f32 %v492_v29, %v339_v31  ;;  %v166_v35 = vmax.f32 %v113_v21, %v157_v33  ;;  %v327_v36 = vpop.f32.mrf.mxu0 }
  0xad   :  { %vm351_vm1 = vcmp.gt.f32.partialorder %v347_v34, 0.0  ;;  %v355_v37 = vmul.f32 0.2, %v347_v34  ;;  %v210_v38 = vmax.f32 %v166_v35, %v201_v30 }
  0xaf   :  { %v359_v39 = vsel %vm351_vm1, %v347_v34, %v355_v37  ;;  %v254_v40 = vmax.f32 %v210_v38, %v245_v32 }
  0xb0   :  { %363 = vst [vmem:[%s627_s5] sm:$0xff] %v359_v39  ;;  %v206_v56 = vpop.f32.mrf.mxu2 }
  0xb1   :  { %v340_v41 = vadd.f32 %v327_v36, %v254_v40 }
  0xb2   :  { %v160_v43 = vpop.f32.mrf.mxu1  ;;  %v250_v59 = vpop.f32.mrf.mxu3 }
  0xb3   :  { %v348_v44 = vadd.f32 %v492_v29, %v340_v41  ;;  %v167_v45 = vmax.f32 %v116_v18, %v160_v43  ;;  %v330_v49 = vpop.f32.mrf.mxu0 }
  0xb5   :  { %vm352_vm2 = vcmp.gt.f32.partialorder %v348_v44, 0.0  ;;  %v356_v47 = vmul.f32 0.2, %v348_v44  ;;  %v211_v48 = vmax.f32 %v167_v45, %v204_v42 }
  0xb7   :  { %v360_v50 = vsel %vm352_vm2, %v348_v44, %v356_v47  ;;  %v255_v51 = vmax.f32 %v211_v48, %v248_v46 }
  0xb8   :  { %364 = vst [vmem:[%s627_s5 + $0x8] sm:$0xff] %v360_v50 }
  0xb9   :  { %v341_v52 = vadd.f32 %v330_v49, %v255_v51 }
  0xba   :  { %v162_v53 = vpop.f32.mrf.mxu1 }
  0xbb   :  { %v349_v54 = vadd.f32 %v492_v29, %v341_v52  ;;  %v168_v55 = vmax.f32 %v118_v20, %v162_v53  ;;  %v332_v62 = vpop.f32.mrf.mxu0 }
  0xbd   :  { %vm353_vm3 = vcmp.gt.f32.partialorder %v349_v54, 0.0  ;;  %v357_v57 = vmul.f32 0.2, %v349_v54  ;;  %v212_v58 = vmax.f32 %v168_v55, %v206_v56 }
  0xbf   :  { %v361_v60 = vsel %vm353_vm3, %v349_v54, %v357_v57  ;;  %v256_v61 = vmax.f32 %v212_v58, %v250_v59 }
  0xc0   :  { %365 = vst [vmem:[%s627_s5 + $0x10] sm:$0xff] %v361_v60 }
  0xc1   :  { %v342_v63 = vadd.f32 %v332_v62, %v256_v61 }
  0xc3   :  { %v350_v0 = vadd.f32 %v492_v29, %v342_v63 }
  0xc5   :  { %vm354_vm4 = vcmp.gt.f32.partialorder %v350_v0, 0.0  ;;  %v358_v1 = vmul.f32 0.2, %v350_v0 }
  0xc7   :  { %v362_v2 = vsel %vm354_vm4, %v350_v0, %v358_v1 }
  0xc8   :  { %366 = vst [vmem:[%s627_s5 + $0x18] sm:$0xff] %v362_v2 }
  0xc9   :  { %371 = vsyncpa [#allocation3], 1 }

// kernel: dgcnn_forward.17
= control target key start
LH: loop header
LB: loop body
LE: loop exit
PB: predicated region body
PF: predicated region fallthrough
CT: control target
= control target key end

     0   :  { %10 = vsyncpa [#allocation3], 0  ;;  %s1160_s0 = inlined_call_operand.vmem [shape: bf16[4,32,128], index: 0, kind: input, shape index: {}]   ;;  %s1161_s1 = inlined_call_operand.vmem [shape: bf16[32,128], index: 1, kind: input, shape index: {}]   ;;  %s1162_s2 = inlined_call_operand.hbm [shape: bf16[128,256], index: 2, kind: input, shape index: {}]   ;;  %s1163_s3 = inlined_call_operand.hbm [shape: bf16[128,256], index: 3, kind: input, shape index: {}]   ;;  %s1164_s4 = inlined_call_operand.vmem [shape: f32[1,256], index: 4, kind: input, shape index: {}]   ;;  %s1165_s5 = inlined_call_operand.vmem [shape: f32[32,256], index: 5, kind: output, shape index: {}]  }
   0x1   :  { %s20_s20 = sshll.u32 %s1162_s2, 4  ;;  %s21_s20 = int_to_ptr.hbm [resolvable:$true] %s20_s20 }
   0x2   :  { %11 = vsyncpa [#allocation5], 0  ;;  %s943_s21 = smov [#allocation2]   ;;  %s33_s25 = sshll.u32 %s1163_s3, 4  ;;  %s34_s25 = int_to_ptr.hbm [resolvable:$true] %s33_s25 }
   0x3   :  { %s22_s22 = sshll.u32 %s943_s21, 4  ;;  %s944_s26 = smov 128   ;;  %s23_s22 = int_to_ptr.vmem [resolvable:$true] %s22_s22 }
   0x4   :  { %s945_s27 = smov 8   ;;  %s946_s28 = smov [#allocation4]  }
   0x5   :  { %28 = dma.hbm_to_vmem [thread:$0]  %s21_s20, 2048, %s23_s22, [#allocation3], %s944_s26, %s944_s26, %s945_s27  }
   0x6   :  { %s35_s29 = sshll.u32 %s946_s28, 4  ;;  %s36_s29 = int_to_ptr.vmem [resolvable:$true] %s35_s29 }
   0x7   :  { %41 = dma.hbm_to_vmem [thread:$0]  %s34_s25, 2048, %s36_s29, [#allocation5], %s944_s26, %s944_s26, %s945_s27  }
   0x8   :  { %939 = dma.done.wait [#allocation3], 2048  }
   0x9   :  { %940 = vsyncadd [#allocation3], 4294965248 }
   0xa   :  { %941 = dma.done.wait [#allocation5], 2048  }
   0xb   :  { %942 = vsyncadd [#allocation5], 4294965248  ;;  %v714_v0 = vld [vmem:[#allocation2 + $0x70] sm:$0xf]  ;;  %v845_v1 = vld [vmem:[#allocation2 + $0x74] sm:$0xf0] }
   0xc   :  { %v844_v2 = vld [vmem:[#allocation2 + $0x74] sm:$0xf]  ;;  %v983_v3 = vor.u32 %v845_v1, %v714_v0  ;;  %v716_v4 = vld [vmem:[#allocation2 + $0x78] sm:$0xf0]  ;;  %v706_v5 = vld [vmem:[#allocation2 + $0x60] sm:$0xf] }
   0xd   :  { %v843_v6 = vld [vmem:[#allocation2 + $0x64] sm:$0xf0]  ;;  %v985_v7 = vor.u32 %v844_v2, %v716_v4  ;;  %v842_v8 = vld [vmem:[#allocation2 + $0x64] sm:$0xf]  ;;  %v708_v9 = vld [vmem:[#allocation2 + $0x68] sm:$0xf0] }
   0xe   :  { %184 = vmatpush.bf16.msra.mxu0 %v983_v3  ;;  %247 = vmatpush.bf16.msra.mxu2 %v983_v3  ;;  %v989_v10 = vor.u32 %v843_v6, %v706_v5  ;;  %v993_v11 = vor.u32 %v842_v8, %v708_v9  ;;  %v698_v12 = vld [vmem:[#allocation2 + $0x50] sm:$0xf]  ;;  %v841_v13 = vld [vmem:[#allocation2 + $0x54] sm:$0xf0]  ;;  %v840_v14 = vld [vmem:[#allocation2 + $0x54] sm:$0xf] }
   0xf   :  { %203 = vmatpush.bf16.msra.mxu1 %v985_v7  ;;  %266 = vmatpush.bf16.msra.mxu3 %v985_v7  ;;  %v700_v15 = vld [vmem:[#allocation2 + $0x58] sm:$0xf0]  ;;  %v997_v16 = vor.u32 %v841_v13, %v698_v12  ;;  %v690_v18 = vld [vmem:[#allocation2 + $0x40] sm:$0xf]  ;;  %v839_v19 = vld [vmem:[#allocation2 + $0x44] sm:$0xf0] }
  0x10   :  { %v1001_v17 = vor.u32 %v840_v14, %v700_v15  ;;  %v838_v20 = vld [vmem:[#allocation2 + $0x44] sm:$0xf]  ;;  %v692_v21 = vld [vmem:[#allocation2 + $0x48] sm:$0xf0]  ;;  %v1005_v22 = vor.u32 %v839_v19, %v690_v18  ;;  %v682_v24 = vld [vmem:[#allocation2 + $0x30] sm:$0xf] }
  0x11   :  { %v1009_v23 = vor.u32 %v838_v20, %v692_v21  ;;  %v837_v25 = vld [vmem:[#allocation2 + $0x34] sm:$0xf0]  ;;  %v836_v26 = vld [vmem:[#allocation2 + $0x34] sm:$0xf]  ;;  %v684_v27 = vld [vmem:[#allocation2 + $0x38] sm:$0xf0] }
  0x12   :  { %185 = vmatpush.bf16.msra.mxu0 %v989_v10  ;;  %248 = vmatpush.bf16.msra.mxu2 %v989_v10  ;;  %v1013_v28 = vor.u32 %v837_v25, %v682_v24  ;;  %v1017_v29 = vor.u32 %v836_v26, %v684_v27  ;;  %v674_v30 = vld [vmem:[#allocation2 + $0x20] sm:$0xf]  ;;  %v835_v31 = vld [vmem:[#allocation2 + $0x24] sm:$0xf0]  ;;  %v834_v32 = vld [vmem:[#allocation2 + $0x24] sm:$0xf] }
  0x13   :  { %204 = vmatpush.bf16.msra.mxu1 %v993_v11  ;;  %267 = vmatpush.bf16.msra.mxu3 %v993_v11  ;;  %v676_v33 = vld [vmem:[#allocation2 + $0x28] sm:$0xf0]  ;;  %v1021_v34 = vor.u32 %v835_v31, %v674_v30  ;;  %v666_v36 = vld [vmem:[#allocation2 + $0x10] sm:$0xf]  ;;  %v833_v37 = vld [vmem:[#allocation2 + $0x14] sm:$0xf0] }
  0x14   :  { %v1025_v35 = vor.u32 %v834_v32, %v676_v33  ;;  %v832_v38 = vld [vmem:[#allocation2 + $0x14] sm:$0xf]  ;;  %v668_v39 = vld [vmem:[#allocation2 + $0x18] sm:$0xf0]  ;;  %v1029_v40 = vor.u32 %v833_v37, %v666_v36  ;;  %v658_v42 = vld [vmem:[#allocation2] sm:$0xf] }
  0x15   :  { %v671_v41 = vor.u32 %v832_v38, %v668_v39  ;;  %v831_v43 = vld [vmem:[#allocation2 + $0x4] sm:$0xf0]  ;;  %v830_v44 = vld [vmem:[#allocation2 + $0x4] sm:$0xf]  ;;  %v660_v45 = vld [vmem:[#allocation2 + $0x8] sm:$0xf0] }
  0x16   :  { %186 = vmatpush.bf16.msra.mxu0 %v997_v16  ;;  %249 = vmatpush.bf16.msra.mxu2 %v997_v16  ;;  %v1035_v46 = vor.u32 %v831_v43, %v658_v42  ;;  %v1037_v47 = vor.u32 %v830_v44, %v660_v45  ;;  %v828_v48 = vld [vmem:[%s1160_s0] sm:$0xff]  ;;  %v846_v49 = vld [vmem:[%s1160_s0 + $0x10] sm:$0xff]  ;;  %v829_v50 = vld [vmem:[%s1160_s0 + $0x8] sm:$0xff] }
  0x17   :  { %205 = vmatpush.bf16.msra.mxu1 %v1001_v17  ;;  %268 = vmatpush.bf16.msra.mxu3 %v1001_v17  ;;  %v847_v51 = vld [vmem:[%s1160_s0 + $0x18] sm:$0xff]  ;;  %v822_v52 = vld [vmem:[#allocation4 + $0x70] sm:$0xf]  ;;  %v868_v54 = vld [vmem:[#allocation4 + $0x74] sm:$0xf] }
  0x18   :  { %v869_v53 = vld [vmem:[#allocation4 + $0x74] sm:$0xf0]  ;;  %v824_v55 = vld [vmem:[#allocation4 + $0x78] sm:$0xf0]  ;;  %v866_v58 = vld [vmem:[#allocation4 + $0x64] sm:$0xf] }
  0x19   :  { %v823_v56 = vor.u32 %v869_v53, %v822_v52  ;;  %v827_v57 = vor.u32 %v868_v54, %v824_v55  ;;  %v816_v59 = vld [vmem:[#allocation4 + $0x68] sm:$0xf0]  ;;  %v814_v60 = vld [vmem:[#allocation4 + $0x60] sm:$0xf]  ;;  %v867_v61 = vld [vmem:[#allocation4 + $0x64] sm:$0xf0] }
  0x1a   :  { %187 = vmatpush.bf16.msra.mxu0 %v1005_v22  ;;  %250 = vmatpush.bf16.msra.mxu2 %v1005_v22  ;;  %v850_v62 = vld [vmem:[%s1160_s0 + $0x30] sm:$0xff]  ;;  %v819_v63 = vor.u32 %v866_v58, %v816_v59  ;;  %v848_v0 = vld [vmem:[%s1160_s0 + $0x20] sm:$0xff]  ;;  %v808_v2 = vld [vmem:[#allocation4 + $0x58] sm:$0xf0] }
  0x1b   :  { %206 = vmatpush.bf16.msra.mxu1 %v1009_v23  ;;  %269 = vmatpush.bf16.msra.mxu3 %v1009_v23  ;;  %v864_v1 = vld [vmem:[#allocation4 + $0x54] sm:$0xf]  ;;  %v806_v4 = vld [vmem:[#allocation4 + $0x50] sm:$0xf]  ;;  %v865_v5 = vld [vmem:[#allocation4 + $0x54] sm:$0xf0] }
  0x1c   :  { %v811_v6 = vor.u32 %v864_v1, %v808_v2  ;;  %v800_v8 = vld [vmem:[#allocation4 + $0x48] sm:$0xf0]  ;;  %v807_v9 = vor.u32 %v865_v5, %v806_v4  ;;  %v860_v13 = vld [vmem:[#allocation4 + $0x34] sm:$0xf]  ;;  %v792_v14 = vld [vmem:[#allocation4 + $0x38] sm:$0xf0] }
  0x1d   :  { %v795_v18 = vor.u32 %v860_v13, %v792_v14  ;;  %v858_v19 = vld [vmem:[#allocation4 + $0x24] sm:$0xf]  ;;  %v784_v20 = vld [vmem:[#allocation4 + $0x28] sm:$0xf0]  ;;  %v851_v24 = vld [vmem:[%s1160_s0 + $0x38] sm:$0xff] }
  0x1e   :  { %188 = vmatpush.bf16.msra.mxu0 %v1013_v28  ;;  %251 = vmatpush.bf16.msra.mxu2 %v1013_v28  ;;  %v787_v25 = vor.u32 %v858_v19, %v784_v20  ;;  %v849_v26 = vld [vmem:[%s1160_s0 + $0x28] sm:$0xff]  ;;  %v856_v27 = vld [vmem:[#allocation4 + $0x14] sm:$0xf]  ;;  %v774_v30 = vld [vmem:[#allocation4 + $0x10] sm:$0xf] }
  0x1f   :  { %207 = vmatpush.bf16.msra.mxu1 %v1017_v29  ;;  %270 = vmatpush.bf16.msra.mxu3 %v1017_v29  ;;  %v857_v31 = vld [vmem:[#allocation4 + $0x14] sm:$0xf0]  ;;  %v854_v33 = vld [vmem:[#allocation4 + $0x4] sm:$0xf]  ;;  %v766_v36 = vld [vmem:[#allocation4] sm:$0xf] }
  0x20   :  { %v855_v37 = vld [vmem:[#allocation4 + $0x4] sm:$0xf0] }
  0x21   :  { %v767_v39 = vor.u32 %v855_v37, %v766_v36 }
  0x22   :  { %189 = vmatpush.bf16.msra.mxu0 %v1021_v34  ;;  %252 = vmatpush.bf16.msra.mxu2 %v1021_v34 }
  0x23   :  { %208 = vmatpush.bf16.msra.mxu1 %v1025_v35  ;;  %271 = vmatpush.bf16.msra.mxu3 %v1025_v35 }
  0x26   :  { %190 = vmatpush.bf16.msra.mxu0 %v1029_v40  ;;  %253 = vmatpush.bf16.msra.mxu2 %v1029_v40 }
  0x27   :  { %209 = vmatpush.bf16.msra.mxu1 %v671_v41  ;;  %272 = vmatpush.bf16.msra.mxu3 %v671_v41 }
  0x2a   :  { %191 = vmatpush.bf16.msra.mxu0 %v1035_v46  ;;  %254 = vmatpush.bf16.msra.mxu2 %v1035_v46 }
  0x2b   :  { %210 = vmatpush.bf16.msra.mxu1 %v1037_v47  ;;  %273 = vmatpush.bf16.msra.mxu3 %v1037_v47 }
  0x2d   :  { %192 = vmatmul.bf16.vlgmr.msra.gmra.mxu0 %v828_v48  ;;  %255 = vmatmul.bf16.vlgmr.msra.gmra.mxu2 %v846_v49 }
  0x2e   :  { %373 = vmatpush.bf16.msrb.mxu2 %v983_v3  ;;  %211 = vmatmul.bf16.vlgmr.msra.gmra.mxu1 %v828_v48 }
  0x2f   :  { %392 = vmatpush.bf16.msrb.mxu3 %v985_v7  ;;  %310 = vmatpush.bf16.msrb.mxu0 %v983_v3  ;;  %v815_v3 = vor.u32 %v867_v61, %v814_v60 }
  0x30   :  { %274 = vmatmul.bf16.vlgmr.msra.gmra.mxu3 %v846_v49  ;;  %329 = vmatpush.bf16.msrb.mxu1 %v985_v7  ;;  %v862_v7 = vld [vmem:[#allocation4 + $0x44] sm:$0xf] }
  0x31   :  { %v803_v12 = vor.u32 %v862_v7, %v800_v8 }
  0x32   :  { %374 = vmatpush.bf16.msrb.mxu2 %v989_v10 }
  0x33   :  { %393 = vmatpush.bf16.msrb.mxu3 %v993_v11  ;;  %311 = vmatpush.bf16.msrb.mxu0 %v989_v10  ;;  %v798_v10 = vld [vmem:[#allocation4 + $0x40] sm:$0xf] }
  0x34   :  { %330 = vmatpush.bf16.msrb.mxu1 %v993_v11  ;;  %v863_v11 = vld [vmem:[#allocation4 + $0x44] sm:$0xf0] }
  0x35   :  { %v799_v15 = vor.u32 %v863_v11, %v798_v10  ;;  %v596_v10 = vld [vmem:[%s1164_s4] sm:$0x3] }
  0x36   :  { %375 = vmatpush.bf16.msrb.mxu2 %v997_v16 }
  0x37   :  { %394 = vmatpush.bf16.msrb.mxu3 %v1001_v17  ;;  %312 = vmatpush.bf16.msrb.mxu0 %v997_v16  ;;  %v790_v16 = vld [vmem:[#allocation4 + $0x30] sm:$0xf] }
  0x38   :  { %331 = vmatpush.bf16.msrb.mxu1 %v1001_v17  ;;  %v861_v17 = vld [vmem:[#allocation4 + $0x34] sm:$0xf0] }
  0x39   :  { %v791_v21 = vor.u32 %v861_v17, %v790_v16  ;;  %v1118_v17 = vperm.slane %v596_v10, 0 }
  0x3a   :  { %376 = vmatpush.bf16.msrb.mxu2 %v1005_v22 }
  0x3b   :  { %395 = vmatpush.bf16.msrb.mxu3 %v1009_v23  ;;  %313 = vmatpush.bf16.msrb.mxu0 %v1005_v22  ;;  %v782_v22 = vld [vmem:[#allocation4 + $0x20] sm:$0xf] }
  0x3c   :  { %332 = vmatpush.bf16.msrb.mxu1 %v1009_v23  ;;  %v859_v23 = vld [vmem:[#allocation4 + $0x24] sm:$0xf0] }
  0x3d   :  { %197 = vmatmul.bf16.gmra.mxu0 %v829_v50  ;;  %260 = vmatmul.bf16.gmra.mxu2 %v847_v51 }
  0x3e   :  { %377 = vmatpush.bf16.msrb.mxu2 %v1013_v28  ;;  %216 = vmatmul.bf16.gmra.mxu1 %v829_v50 }
  0x3f   :  { %396 = vmatpush.bf16.msrb.mxu3 %v1017_v29  ;;  %314 = vmatpush.bf16.msrb.mxu0 %v1013_v28  ;;  %v776_v28 = vld [vmem:[#allocation4 + $0x18] sm:$0xf0] }
  0x40   :  { %279 = vmatmul.bf16.gmra.mxu3 %v847_v51  ;;  %333 = vmatpush.bf16.msrb.mxu1 %v1017_v29  ;;  %v783_v29 = vor.u32 %v859_v23, %v782_v22  ;;  %v779_v32 = vor.u32 %v856_v27, %v776_v28 }
  0x42   :  { %378 = vmatpush.bf16.msrb.mxu2 %v1021_v34 }
  0x43   :  { %397 = vmatpush.bf16.msrb.mxu3 %v1025_v35  ;;  %315 = vmatpush.bf16.msrb.mxu0 %v1021_v34  ;;  %v768_v34 = vld [vmem:[#allocation4 + $0x8] sm:$0xf0] }
  0x44   :  { %334 = vmatpush.bf16.msrb.mxu1 %v1025_v35  ;;  %v775_v35 = vor.u32 %v857_v31, %v774_v30  ;;  %v771_v38 = vor.u32 %v854_v33, %v768_v34 }
  0x46   :  { %379 = vmatpush.bf16.msrb.mxu2 %v1029_v40 }
  0x47   :  { %398 = vmatpush.bf16.msrb.mxu3 %v671_v41  ;;  %316 = vmatpush.bf16.msrb.mxu0 %v1029_v40  ;;  %v853_v40 = vld [vmem:[%s1161_s1 + $0x8] sm:$0xff] }
  0x48   :  { %335 = vmatpush.bf16.msrb.mxu1 %v671_v41  ;;  %v852_v41 = vld [vmem:[%s1161_s1] sm:$0xff] }
  0x4a   :  { %380 = vmatpush.bf16.msrb.mxu2 %v1035_v46 }
  0x4b   :  { %399 = vmatpush.bf16.msrb.mxu3 %v1037_v47  ;;  %317 = vmatpush.bf16.msrb.mxu0 %v1035_v46 }
  0x4c   :  { %336 = vmatpush.bf16.msrb.mxu1 %v1037_v47 }
  0x4d   :  { %381 = vmatmul.bf16.vlgmr.msrb.gmra.mxu2 %v850_v62 }
  0x4e   :  { %870 = vmatpush.bf16.msra.mxu2 %v823_v56  ;;  %318 = vmatmul.bf16.vlgmr.msrb.gmra.mxu0 %v848_v0 }
  0x4f   :  { %878 = vmatpush.bf16.msra.mxu3 %v827_v57  ;;  %542 = vmatpush.bf16.msra.mxu0 %v823_v56 }
  0x50   :  { %561 = vmatpush.bf16.msra.mxu1 %v827_v57  ;;  %400 = vmatmul.bf16.vlgmr.msrb.gmra.mxu3 %v850_v62 }
  0x51   :  { %337 = vmatmul.bf16.vlgmr.msrb.gmra.mxu1 %v848_v0 }
  0x52   :  { %871 = vmatpush.bf16.msra.mxu2 %v815_v3 }
  0x53   :  { %879 = vmatpush.bf16.msra.mxu3 %v819_v63  ;;  %543 = vmatpush.bf16.msra.mxu0 %v815_v3 }
  0x54   :  { %562 = vmatpush.bf16.msra.mxu1 %v819_v63 }
  0x56   :  { %872 = vmatpush.bf16.msra.mxu2 %v807_v9 }
  0x57   :  { %880 = vmatpush.bf16.msra.mxu3 %v811_v6  ;;  %544 = vmatpush.bf16.msra.mxu0 %v807_v9 }
  0x58   :  { %563 = vmatpush.bf16.msra.mxu1 %v811_v6 }
  0x5a   :  { %873 = vmatpush.bf16.msra.mxu2 %v799_v15 }
  0x5b   :  { %881 = vmatpush.bf16.msra.mxu3 %v803_v12  ;;  %545 = vmatpush.bf16.msra.mxu0 %v799_v15 }
  0x5c   :  { %564 = vmatpush.bf16.msra.mxu1 %v803_v12 }
  0x5d   :  { %386 = vmatmul.bf16.gmra.mxu2 %v851_v24 }
  0x5e   :  { %874 = vmatpush.bf16.msra.mxu2 %v791_v21  ;;  %323 = vmatmul.bf16.gmra.mxu0 %v849_v26 }
  0x5f   :  { %882 = vmatpush.bf16.msra.mxu3 %v795_v18  ;;  %546 = vmatpush.bf16.msra.mxu0 %v791_v21 }
  0x60   :  { %565 = vmatpush.bf16.msra.mxu1 %v795_v18  ;;  %405 = vmatmul.bf16.gmra.mxu3 %v851_v24  ;;  %v1120_v18 = vperm.slane %v596_v10, 1 }
  0x61   :  { %342 = vmatmul.bf16.gmra.mxu1 %v849_v26 }
  0x62   :  { %875 = vmatpush.bf16.msra.mxu2 %v783_v29 }
  0x63   :  { %883 = vmatpush.bf16.msra.mxu3 %v787_v25  ;;  %547 = vmatpush.bf16.msra.mxu0 %v783_v29 }
  0x64   :  { %566 = vmatpush.bf16.msra.mxu1 %v787_v25 }
  0x66   :  { %876 = vmatpush.bf16.msra.mxu2 %v775_v35 }
  0x67   :  { %884 = vmatpush.bf16.msra.mxu3 %v779_v32  ;;  %548 = vmatpush.bf16.msra.mxu0 %v775_v35 }
  0x68   :  { %567 = vmatpush.bf16.msra.mxu1 %v779_v32 }
  0x6a   :  { %877 = vmatpush.bf16.msra.mxu2 %v767_v39 }
  0x6b   :  { %885 = vmatpush.bf16.msra.mxu3 %v771_v38  ;;  %549 = vmatpush.bf16.msra.mxu0 %v767_v39 }
  0x6c   :  { %568 = vmatpush.bf16.msra.mxu1 %v771_v38 }
  0x6d   :  { %555 = vmatmul.bf16.vlgmr.msra.gmra.mxu2 %v853_v40 }
  0x6e   :  { %550 = vmatmul.bf16.vlgmr.msra.gmra.mxu0 %v852_v41 }
  0x70   :  { %574 = vmatmul.bf16.vlgmr.msra.gmra.mxu3 %v853_v40 }
  0x71   :  { %569 = vmatmul.bf16.vlgmr.msra.gmra.mxu1 %v852_v41 }
  0xaa   :  { %v193_v42 = vpop.f32.mrf.mxu0 }
  0xab   :  { %v212_v43 = vpop.f32.mrf.mxu1 }
  0xb0   :  { %v256_v44 = vpop.f32.mrf.mxu2 }
  0xb1   :  { %v285_v8 = vmax.f32 %v193_v42, %v256_v44 }
  0xb2   :  { %v195_v46 = vpop.f32.mrf.mxu0 }
  0xb3   :  { %v275_v45 = vpop.f32.mrf.mxu3  ;;  %v214_v47 = vpop.f32.mrf.mxu1 }
  0xb4   :  { %v286_v9 = vmax.f32 %v212_v43, %v275_v45 }
  0xb8   :  { %v258_v48 = vpop.f32.mrf.mxu2 }
  0xb9   :  { %v287_v24 = vmax.f32 %v195_v46, %v258_v48 }
  0xba   :  { %v198_v50 = vpop.f32.mrf.mxu0 }
  0xbb   :  { %v277_v49 = vpop.f32.mrf.mxu3  ;;  %v217_v51 = vpop.f32.mrf.mxu1 }
  0xbc   :  { %v288_v25 = vmax.f32 %v214_v47, %v277_v49 }
  0xc0   :  { %v261_v52 = vpop.f32.mrf.mxu2 }
  0xc1   :  { %v289_v19 = vmax.f32 %v198_v50, %v261_v52 }
  0xc2   :  { %v1103_v54 = vpop.f32.mrf.mxu0 }
  0xc3   :  { %v280_v53 = vpop.f32.mrf.mxu3  ;;  %v1105_v55 = vpop.f32.mrf.mxu1 }
  0xc4   :  { %v290_v26 = vmax.f32 %v217_v51, %v280_v53 }
  0xc8   :  { %v1107_v56 = vpop.f32.mrf.mxu2 }
  0xc9   :  { %v291_v44 = vmax.f32 %v1103_v54, %v1107_v56 }
  0xcb   :  { %v1109_v57 = vpop.f32.mrf.mxu3  ;;  %v319_v58 = vpop.f32.mrf.mxu0 }
  0xcc   :  { %v348_v11 = vmax.f32 %v285_v8, %v319_v58  ;;  %v292_v49 = vmax.f32 %v1105_v55, %v1109_v57 }
  0xce   :  { %v338_v59 = vpop.f32.mrf.mxu1 }
  0xcf   :  { %v349_v12 = vmax.f32 %v286_v9, %v338_v59 }
  0xd0   :  { %v382_v60 = vpop.f32.mrf.mxu2 }
  0xd1   :  { %v411_v14 = vmax.f32 %v348_v11, %v382_v60 }
  0xd3   :  { %v401_v61 = vpop.f32.mrf.mxu3  ;;  %v321_v62 = vpop.f32.mrf.mxu0 }
  0xd4   :  { %v412_v15 = vmax.f32 %v349_v12, %v401_v61  ;;  %v350_v30 = vmax.f32 %v287_v24, %v321_v62 }
  0xd6   :  { %v340_v63 = vpop.f32.mrf.mxu1 }
  0xd7   :  { %v351_v31 = vmax.f32 %v288_v25, %v340_v63 }
  0xd8   :  { %v384_v0 = vpop.f32.mrf.mxu2 }
  0xd9   :  { %v413_v39 = vmax.f32 %v350_v30, %v384_v0 }
  0xdb   :  { %v403_v1 = vpop.f32.mrf.mxu3  ;;  %v324_v2 = vpop.f32.mrf.mxu0 }
  0xdc   :  { %v352_v27 = vmax.f32 %v289_v19, %v324_v2  ;;  %v414_v40 = vmax.f32 %v351_v31, %v403_v1 }
  0xde   :  { %v343_v3 = vpop.f32.mrf.mxu1 }
  0xdf   :  { %v353_v32 = vmax.f32 %v290_v26, %v343_v3 }
  0xe0   :  { %v387_v4 = vpop.f32.mrf.mxu2 }
  0xe1   :  { %v415_v33 = vmax.f32 %v352_v27, %v387_v4 }
  0xe3   :  { %v406_v5 = vpop.f32.mrf.mxu3  ;;  %v326_v6 = vpop.f32.mrf.mxu0 }
  0xe4   :  { %v416_v37 = vmax.f32 %v353_v32, %v406_v5  ;;  %v354_v52 = vmax.f32 %v291_v44, %v326_v6 }
  0xe6   :  { %v345_v7 = vpop.f32.mrf.mxu1 }
  0xe7   :  { %v355_v56 = vmax.f32 %v292_v49, %v345_v7 }
  0xe8   :  { %v1114_v13 = vpop.f32.mrf.mxu2 }
  0xe9   :  { %v417_v60 = vmax.f32 %v354_v52, %v1114_v13 }
  0xeb   :  { %v1116_v16 = vpop.f32.mrf.mxu3  ;;  %v551_v20 = vpop.f32.mrf.mxu0 }
  0xec   :  { %v588_v22 = vadd.f32 %v551_v20, %v411_v14  ;;  %v418_v63 = vmax.f32 %v355_v56, %v1116_v16 }
  0xee   :  { %v570_v21 = vpop.f32.mrf.mxu1  ;;  %v602_v28 = vadd.f32 %v1118_v17, %v588_v22 }
  0xef   :  { %v589_v23 = vadd.f32 %v570_v21, %v412_v15 }
  0xf0   :  { %vm610_vm0 = vcmp.gt.f32.partialorder %v602_v28, 0.0  ;;  %v618_v34 = vmul.f32 0.2, %v602_v28  ;;  %v556_v36 = vpop.f32.mrf.mxu2 }
  0xf1   :  { %v603_v29 = vadd.f32 %v1120_v18, %v589_v23  ;;  %v592_v38 = vadd.f32 %v556_v36, %v415_v33 }
  0xf2   :  { %v626_v41 = vsel %vm610_vm0, %v602_v28, %v618_v34 }
  0xf3   :  { %vm611_vm1 = vcmp.gt.f32.partialorder %v603_v29, 0.0  ;;  %v619_v35 = vmul.f32 0.2, %v603_v29  ;;  %v575_v43 = vpop.f32.mrf.mxu3  ;;  %634 = vst [vmem:[%s1165_s5] sm:$0xff] %v626_v41  ;;  %v606_v45 = vadd.f32 %v1118_v17, %v592_v38  ;;  %v553_v47 = vpop.f32.mrf.mxu0 }
  0xf4   :  { %v593_v46 = vadd.f32 %v575_v43, %v416_v37  ;;  %v590_v50 = vadd.f32 %v553_v47, %v413_v39 }
  0xf5   :  { %v627_v42 = vsel %vm611_vm1, %v603_v29, %v619_v35  ;;  %vm614_vm2 = vcmp.gt.f32.partialorder %v606_v45, 0.0  ;;  %v622_v53 = vmul.f32 0.2, %v606_v45 }
  0xf6   :  { %v572_v48 = vpop.f32.mrf.mxu1  ;;  %635 = vst [vmem:[%s1165_s5 + $0x8] sm:$0xff] %v627_v42  ;;  %v607_v54 = vadd.f32 %v1120_v18, %v593_v46  ;;  %v604_v58 = vadd.f32 %v1118_v17, %v590_v50 }
  0xf7   :  { %v591_v51 = vadd.f32 %v572_v48, %v414_v40  ;;  %v630_v61 = vsel %vm614_vm2, %v606_v45, %v622_v53 }
  0xf8   :  { %vm615_vm3 = vcmp.gt.f32.partialorder %v607_v54, 0.0  ;;  %v623_v55 = vmul.f32 0.2, %v607_v54  ;;  %638 = vst [vmem:[%s1165_s5 + $0x20] sm:$0xff] %v630_v61  ;;  %vm612_vm4 = vcmp.gt.f32.partialorder %v604_v58, 0.0  ;;  %v558_v62 = vpop.f32.mrf.mxu2 }
  0xf9   :  { %v605_v59 = vadd.f32 %v1120_v18, %v591_v51  ;;  %v620_v57 = vmul.f32 0.2, %v604_v58  ;;  %v594_v2 = vadd.f32 %v558_v62, %v417_v60 }
  0xfa   :  { %v631_v0 = vsel %vm615_vm3, %v607_v54, %v623_v55 }
  0xfb   :  { %vm613_vm5 = vcmp.gt.f32.partialorder %v605_v59, 0.0  ;;  %v621_v1 = vmul.f32 0.2, %v605_v59  ;;  %639 = vst [vmem:[%s1165_s5 + $0x28] sm:$0xff] %v631_v0  ;;  %v628_v3 = vsel %vm612_vm4, %v604_v58, %v620_v57  ;;  %v577_v4 = vpop.f32.mrf.mxu3  ;;  %v608_v6 = vadd.f32 %v1118_v17, %v594_v2 }
  0xfc   :  { %636 = vst [vmem:[%s1165_s5 + $0x10] sm:$0xff] %v628_v3  ;;  %v595_v7 = vadd.f32 %v577_v4, %v418_v63 }
  0xfd   :  { %v629_v5 = vsel %vm613_vm5, %v605_v59, %v621_v1  ;;  %vm616_vm6 = vcmp.gt.f32.partialorder %v608_v6, 0.0  ;;  %v624_v8 = vmul.f32 0.2, %v608_v6 }
  0xfe   :  { %637 = vst [vmem:[%s1165_s5 + $0x18] sm:$0xff] %v629_v5  ;;  %v609_v9 = vadd.f32 %v1120_v18, %v595_v7 }
  0xff   :  { %v632_v10 = vsel %vm616_vm6, %v608_v6, %v624_v8 }
 0x100   :  { %vm617_vm7 = vcmp.gt.f32.partialorder %v609_v9, 0.0  ;;  %v625_v11 = vmul.f32 0.2, %v609_v9  ;;  %640 = vst [vmem:[%s1165_s5 + $0x30] sm:$0xff] %v632_v10 }
 0x102   :  { %v633_v12 = vsel %vm617_vm7, %v609_v9, %v625_v11 }
 0x103   :  { %641 = vst [vmem:[%s1165_s5 + $0x38] sm:$0xff] %v633_v12 }
 0x104   :  { %646 = vsyncpa [#allocation3], 1 }
 0x105   :  { %647 = vsyncpa [#allocation5], 1 }

// kernel: dgcnn_forward.18
= control target key start
LH: loop header
LB: loop body
LE: loop exit
PB: predicated region body
PF: predicated region fallthrough
CT: control target
= control target key end

     0   :  { %14 = vsyncpa [#allocation3], 0  ;;  %s4537_s30 = smov 0   ;;  %s4539_s10 = smov 0   ;;  %s6153_s0 = inlined_call_operand.vmem [shape: f32[2,16,64], index: 0, kind: input, shape index: {}]   ;;  %s6154_s1 = inlined_call_operand.vmem [shape: f32[2,16,64], index: 1, kind: input, shape index: {}]   ;;  %s6155_s2 = inlined_call_operand.vmem [shape: f32[2,16,128], index: 2, kind: input, shape index: {}]   ;;  %s6156_s3 = inlined_call_operand.vmem [shape: f32[2,16,256], index: 3, kind: input, shape index: {}]   ;;  %s6157_s4 = inlined_call_operand.vmem [shape: bf16[64,1024], index: 4, kind: input, shape index: {}]   ;;  %s6158_s5 = inlined_call_operand.hbm [shape: bf16[64,1024], index: 5, kind: input, shape index: {}]   ;;  %s6159_s6 = inlined_call_operand.vmem [shape: bf16[128,1024], index: 6, kind: input, shape index: {}]   ;;  %s6160_s7 = inlined_call_operand.vmem [shape: bf16[256,1024], index: 7, kind: input, shape index: {}]   ;;  %s6161_s8 = inlined_call_operand.vmem [shape: f32[1,1024], index: 8, kind: input, shape index: {}]   ;;  %s6162_s9 = inlined_call_operand.vmem [shape: f32[2,1,1024], index: 9, kind: output, shape index: {}]  }
   0x1   :  { %s4541_s11 = smov 0  }
   0x2 LB: > { %s3066_s12 = sadd.s32 4294967295, %s4482_s11   ;;  %s35_s13 = sadd.s32 1, %s4478_s10  ;;  %s4482_s11 = sphi %s4541_s11, %s20_s11   ;;  %s4478_s10 = sphi %s4539_s10, %s6164_s10   ;;  %s4474_s30 = sphi %s4537_s30, %s6163_s30  }
   0x3   : > { %p37_p0 = scmp.ge.s32.totalorder %s35_s13, 2  ;;  %p3068_p1 = scmp.ge.s32.totalorder %s4482_s11, 1 }
   0x4   : > { %p314_p2 = scmp.lt.s32.totalorder %s4482_s11, 3  ;;  %p4396_p4 = scmp.eq.s32.totalorder %s3066_s12, 0 }
   0x5   : > { %s6166_s13 = smov (%p37_p0, %s35_s13), 0  ;;  %s337_s16 = sshll.u32 %s6158_s5, 4  ;;  %s338_s16 = int_to_ptr.hbm [resolvable:$true] %s337_s16 }
   0x6   : > { %p315_p3 = pnand %p3068_p1, %p314_p2  ;;  %s4484_s17 = smov [#allocation2]  }
   0x7   : > { %s339_s18 = sshll.u32 %s4484_s17, 4  ;;  %s4485_s19 = smov 512   ;;  %s340_s18 = int_to_ptr.vmem [resolvable:$true] %s339_s18 }
   0x8   : > { %p4392_p5 = pneg %p315_p3  ;;  %s4486_s20 = smov 32  }
   0x9   : > { %434 = sbr.rel (%p315_p3) target bundleno = 446 (0x1be), region = 56 }
   0xa   : > { %p4393_p6 = pnand %p4396_p4, %p4392_p5 }
   0xc   : > { %4395 = dma.hbm_to_vmem [thread:$0]  (!%p4393_p6), %s338_s16, 4096, %s340_s18, [#allocation3], %s4485_s19, %s4485_s19, %s4486_s20  }
   0xe   : > { %4469 = dma.done.wait (%p4396_p4), [#allocation3], 4096  }
   0xf   : > { %4471 = vsyncadd (%p4396_p4), [#allocation3], 4294963200  ;;  %p526_p7 = scmp.lt.s32.totalorder %s4474_s30, 1  ;;  %v3184_v0 = vld [vmem:[#allocation2 + $0xc0] sm:$0xf]  ;;  %vm835_vm0 = vcmask 523264  }
  0x10   : > { %v4192_v1 = vld [vmem:[#allocation2 + $0xdc] sm:$0xf0]  ;;  %v4188_v2 = vld [vmem:[#allocation2 + $0xc4] sm:$0xf]  ;;  %v3192_v5 = vld [vmem:[#allocation2 + $0xc8] sm:$0xf] }
  0x11   : > { %s6168_s30 = smov (!%p526_p7, %s4474_s30), 1  ;;  %v3185_v3 = vor.u32 %v4192_v1, %v3184_v0  ;;  %v3186_v4 = vld [vmem:[#allocation2 + $0xe0] sm:$0xf0]  ;;  %v4193_v6 = vld [vmem:[#allocation2 + $0xe4] sm:$0xf0]  ;;  %vm2827_vm1 = vcmask 1040384  }
  0x12   : > { %s4562_s21 = sshll.u32 %s6168_s30, 4  ;;  %v3189_v7 = vor.u32 %v4188_v2, %v3186_v4  ;;  %v3193_v8 = vor.u32 %v4193_v6, %v3192_v5  ;;  %v4189_v9 = vld [vmem:[#allocation2 + $0xcc] sm:$0xf]  ;;  %v3152_v11 = vld [vmem:[#allocation2 + $0x80] sm:$0xf]  ;;  %s4131_s17 = sshll.u32 %s6168_s30, 5 }
  0x13   : > { %v3194_v10 = vld [vmem:[#allocation2 + $0xe8] sm:$0xf0]  ;;  %843 = vmatpush.bf16.msra.mxu0 %v3185_v3  ;;  %v4184_v13 = vld [vmem:[#allocation2 + $0x9c] sm:$0xf0]  ;;  %v4180_v14 = vld [vmem:[#allocation2 + $0x84] sm:$0xf]  ;;  %s543_s24 = scalar_lea.vmem %s6154_s1, %s4562_s21  ;;  %s533_s23 = scalar_lea.vmem %s6153_s0, %s4562_s21 }
  0x14   : > { %v3197_v12 = vor.u32 %v4189_v9, %v3194_v10  ;;  %v3154_v15 = vld [vmem:[#allocation2 + $0xa0] sm:$0xf0]  ;;  %857 = vmatpush.bf16.msra.mxu1 %v3189_v7  ;;  %871 = vmatpush.bf16.msra.mxu2 %v3193_v8  ;;  %v3153_v16 = vor.u32 %v4184_v13, %v3152_v11  ;;  %v3160_v18 = vld [vmem:[#allocation2 + $0x88] sm:$0xf]  ;;  %v4181_v20 = vld [vmem:[#allocation2 + $0x8c] sm:$0xf]  ;;  %s553_s15 = scalar_lea.vmem %s6155_s2, %s4562_s21  ;;  %s564_s22 = scalar_lea.vmem %s6156_s3, %s4131_s17 }
  0x15   : > { %v3157_v17 = vor.u32 %v4180_v14, %v3154_v15  ;;  %v4185_v19 = vld [vmem:[#allocation2 + $0xa4] sm:$0xf0]  ;;  %v3162_v22 = vld [vmem:[#allocation2 + $0xa8] sm:$0xf0]  ;;  %v3120_v23 = vld [vmem:[#allocation2 + $0x40] sm:$0xf] }
  0x16   : > { %885 = vmatpush.bf16.msra.mxu3 %v3197_v12  ;;  %v3161_v21 = vor.u32 %v4185_v19, %v3160_v18  ;;  %v4176_v24 = vld [vmem:[#allocation2 + $0x5c] sm:$0xf0]  ;;  %v3165_v25 = vor.u32 %v4181_v20, %v3162_v22  ;;  %v4172_v26 = vld [vmem:[#allocation2 + $0x44] sm:$0xf]  ;;  %v3128_v28 = vld [vmem:[#allocation2 + $0x48] sm:$0xf] }
  0x17   : > { %v3122_v27 = vld [vmem:[#allocation2 + $0x60] sm:$0xf0]  ;;  %844 = vmatpush.bf16.msra.mxu0 %v3153_v16  ;;  %v3121_v29 = vor.u32 %v4176_v24, %v3120_v23  ;;  %v4177_v30 = vld [vmem:[#allocation2 + $0x64] sm:$0xf0]  ;;  %v4173_v31 = vld [vmem:[#allocation2 + $0x4c] sm:$0xf] }
  0x18   : > { %v3130_v32 = vld [vmem:[#allocation2 + $0x68] sm:$0xf0]  ;;  %858 = vmatpush.bf16.msra.mxu1 %v3157_v17  ;;  %872 = vmatpush.bf16.msra.mxu2 %v3161_v21  ;;  %v3125_v33 = vor.u32 %v4172_v26, %v3122_v27  ;;  %v3129_v34 = vor.u32 %v4177_v30, %v3128_v28  ;;  %v3088_v35 = vld [vmem:[#allocation2] sm:$0xf]  ;;  %v4164_v37 = vld [vmem:[#allocation2 + $0x4] sm:$0xf] }
  0x19   : > { %v4168_v36 = vld [vmem:[#allocation2 + $0x1c] sm:$0xf0]  ;;  %v3133_v38 = vor.u32 %v4173_v31, %v3130_v32  ;;  %v3090_v39 = vld [vmem:[#allocation2 + $0x20] sm:$0xf0]  ;;  %v3096_v40 = vld [vmem:[#allocation2 + $0x8] sm:$0xf] }
  0x1a   : > { %886 = vmatpush.bf16.msra.mxu3 %v3165_v25  ;;  %v4169_v41 = vld [vmem:[#allocation2 + $0x24] sm:$0xf0]  ;;  %v4165_v42 = vld [vmem:[#allocation2 + $0xc] sm:$0xf]  ;;  %v3200_v44 = vld [vmem:[#allocation2 + $0xd0] sm:$0xf]  ;;  %v3089_v45 = vor.u32 %v4168_v36, %v3088_v35  ;;  %v3093_v49 = vor.u32 %v4164_v37, %v3090_v39 }
  0x1b   : > { %v3098_v43 = vld [vmem:[#allocation2 + $0x28] sm:$0xf0]  ;;  %845 = vmatpush.bf16.msra.mxu0 %v3121_v29  ;;  %v4194_v46 = vld [vmem:[#allocation2 + $0xec] sm:$0xf0]  ;;  %v4190_v47 = vld [vmem:[#allocation2 + $0xd4] sm:$0xf]  ;;  %v3097_v50 = vor.u32 %v4169_v41, %v3096_v40 }
  0x1c   : > { %v3202_v48 = vld [vmem:[#allocation2 + $0xf0] sm:$0xf0]  ;;  %859 = vmatpush.bf16.msra.mxu1 %v3125_v33  ;;  %873 = vmatpush.bf16.msra.mxu2 %v3129_v34  ;;  %v3208_v51 = vld [vmem:[#allocation2 + $0xd8] sm:$0xf]  ;;  %v4191_v53 = vld [vmem:[#allocation2 + $0xdc] sm:$0xf]  ;;  %v3101_v54 = vor.u32 %v4165_v42, %v3098_v43  ;;  %v3201_v55 = vor.u32 %v4194_v46, %v3200_v44 }
  0x1d   : > { %v4195_v52 = vld [vmem:[#allocation2 + $0xf4] sm:$0xf0]  ;;  %v3210_v56 = vld [vmem:[#allocation2 + $0xf8] sm:$0xf0]  ;;  %v640_v57 = vld [vmem:[%s543_s24] sm:$0xff]  ;;  %v3205_v59 = vor.u32 %v4190_v47, %v3202_v48  ;;  %vm2829_vm2 = vcmask 1042434  }
  0x1e   : > { %887 = vmatpush.bf16.msra.mxu3 %v3133_v38  ;;  %v641_v58 = vld [vmem:[%s543_s24 + $0x8] sm:$0xff]  ;;  %v3209_v60 = vor.u32 %v4195_v52, %v3208_v51  ;;  %v3168_v61 = vld [vmem:[#allocation2 + $0x90] sm:$0xf]  ;;  %v4182_v63 = vld [vmem:[#allocation2 + $0x94] sm:$0xf]  ;;  %v3213_v0 = vor.u32 %v4191_v53, %v3210_v56  ;;  %vm2831_vm3 = vcmask 1041408  }
  0x1f   : > { %v4186_v62 = vld [vmem:[#allocation2 + $0xac] sm:$0xf0]  ;;  %846 = vmatpush.bf16.msra.mxu0 %v3089_v45  ;;  %v4568_v1 = vpack.c.bf16 %v641_v58, %v640_v57  ;;  %v3170_v2 = vld [vmem:[#allocation2 + $0xb0] sm:$0xf0]  ;;  %v3176_v3 = vld [vmem:[#allocation2 + $0x98] sm:$0xf] }
  0x20   : > { %v4187_v4 = vld [vmem:[#allocation2 + $0xb4] sm:$0xf0]  ;;  %860 = vmatpush.bf16.msra.mxu1 %v3093_v49  ;;  %874 = vmatpush.bf16.msra.mxu2 %v3097_v50  ;;  %v4183_v5 = vld [vmem:[#allocation2 + $0x9c] sm:$0xf]  ;;  %v3169_v7 = vor.u32 %v4186_v62, %v3168_v61  ;;  %v3173_v8 = vor.u32 %v4182_v63, %v3170_v2  ;;  %v3136_v10 = vld [vmem:[#allocation2 + $0x50] sm:$0xf] }
  0x21   : > { %v3178_v6 = vld [vmem:[#allocation2 + $0xb8] sm:$0xf0]  ;;  %v3177_v9 = vor.u32 %v4187_v4, %v3176_v3  ;;  %v4178_v11 = vld [vmem:[#allocation2 + $0x6c] sm:$0xf0]  ;;  %v4174_v12 = vld [vmem:[#allocation2 + $0x54] sm:$0xf] }
  0x22   : > { %888 = vmatpush.bf16.msra.mxu3 %v3101_v54  ;;  %3214 = vmatmul.msk.bf16.vlgmr.msra.gmra.mxu0 %vm835_vm0, %v4568_v1  ;;  %v3181_v13 = vor.u32 %v4183_v5, %v3178_v6  ;;  %v3138_v14 = vld [vmem:[#allocation2 + $0x70] sm:$0xf0]  ;;  %v3144_v15 = vld [vmem:[#allocation2 + $0x58] sm:$0xf]  ;;  %v4175_v17 = vld [vmem:[#allocation2 + $0x5c] sm:$0xf]  ;;  %v3137_v19 = vor.u32 %v4178_v11, %v3136_v10 }
  0x23   : > { %899 = vmatpush.bf16.msrb.mxu0 %v3201_v55  ;;  %v4179_v16 = vld [vmem:[#allocation2 + $0x74] sm:$0xf0]  ;;  %3215 = vmatmul.msk.bf16.vlgmr.msra.gmra.mxu1 %vm835_vm0, %v4568_v1  ;;  %v3146_v18 = vld [vmem:[#allocation2 + $0x78] sm:$0xf0]  ;;  %v3104_v20 = vld [vmem:[#allocation2 + $0x10] sm:$0xf]  ;;  %v3141_v22 = vor.u32 %v4174_v12, %v3138_v14 }
  0x24   : > { %913 = vmatpush.bf16.msrb.mxu1 %v3205_v59  ;;  %927 = vmatpush.bf16.msrb.mxu2 %v3209_v60  ;;  %v4170_v21 = vld [vmem:[#allocation2 + $0x2c] sm:$0xf0]  ;;  %v3145_v23 = vor.u32 %v4179_v16, %v3144_v15  ;;  %v4166_v24 = vld [vmem:[#allocation2 + $0x14] sm:$0xf]  ;;  %v3112_v26 = vld [vmem:[#allocation2 + $0x18] sm:$0xf]  ;;  %v3149_v27 = vor.u32 %v4175_v17, %v3146_v18 }
  0x25   : > { %3216 = vmatmul.msk.bf16.vlgmr.msra.gmra.mxu2 %vm835_vm0, %v4568_v1  ;;  %3217 = vmatmul.msk.bf16.vlgmr.msra.gmra.mxu3 %vm835_vm0, %v4568_v1  ;;  %v3106_v25 = vld [vmem:[#allocation2 + $0x30] sm:$0xf0]  ;;  %v4171_v28 = vld [vmem:[#allocation2 + $0x34] sm:$0xf0]  ;;  %v4167_v29 = vld [vmem:[#allocation2 + $0x1c] sm:$0xf]  ;;  %v3105_v34 = vor.u32 %v4170_v21, %v3104_v20 }
  0x26   : > { %941 = vmatpush.bf16.msrb.mxu3 %v3213_v0  ;;  %v3114_v30 = vld [vmem:[#allocation2 + $0x38] sm:$0xf0]  ;;  %v3320_v31 = vld [vmem:[%s6157_s4 + $0xc0] sm:$0xf]  ;;  %v4156_v33 = vld [vmem:[%s6157_s4 + $0xc4] sm:$0xf]  ;;  %v3109_v38 = vor.u32 %v4166_v24, %v3106_v25  ;;  %v3113_v39 = vor.u32 %v4171_v28, %v3112_v26 }
  0x27   : > { %900 = vmatpush.bf16.msrb.mxu0 %v3169_v7  ;;  %v4160_v32 = vld [vmem:[%s6157_s4 + $0xdc] sm:$0xf0]  ;;  %v3322_v35 = vld [vmem:[%s6157_s4 + $0xe0] sm:$0xf0]  ;;  %v3328_v36 = vld [vmem:[%s6157_s4 + $0xc8] sm:$0xf]  ;;  %v3117_v42 = vor.u32 %v4167_v29, %v3114_v30 }
  0x28   : > { %914 = vmatpush.bf16.msrb.mxu1 %v3173_v8  ;;  %928 = vmatpush.bf16.msrb.mxu2 %v3177_v9  ;;  %v4161_v37 = vld [vmem:[%s6157_s4 + $0xe4] sm:$0xf0]  ;;  %v4157_v40 = vld [vmem:[%s6157_s4 + $0xcc] sm:$0xf]  ;;  %v3321_v43 = vor.u32 %v4160_v32, %v3320_v31  ;;  %v3325_v44 = vor.u32 %v4156_v33, %v3322_v35  ;;  %v3288_v46 = vld [vmem:[%s6157_s4 + $0x80] sm:$0xf] }
  0x29   : > { %v3330_v41 = vld [vmem:[%s6157_s4 + $0xe8] sm:$0xf0]  ;;  %v3329_v45 = vor.u32 %v4161_v37, %v3328_v36  ;;  %v4152_v47 = vld [vmem:[%s6157_s4 + $0x9c] sm:$0xf0]  ;;  %v4148_v48 = vld [vmem:[%s6157_s4 + $0x84] sm:$0xf] }
  0x2a   : > { %942 = vmatpush.bf16.msrb.mxu3 %v3181_v13  ;;  %v3333_v49 = vor.u32 %v4157_v40, %v3330_v41  ;;  %v3290_v50 = vld [vmem:[%s6157_s4 + $0xa0] sm:$0xf0]  ;;  %v3296_v51 = vld [vmem:[%s6157_s4 + $0x88] sm:$0xf]  ;;  %v4149_v53 = vld [vmem:[%s6157_s4 + $0x8c] sm:$0xf]  ;;  %v3289_v55 = vor.u32 %v4152_v47, %v3288_v46 }
  0x2b   : > { %901 = vmatpush.bf16.msrb.mxu0 %v3137_v19  ;;  %v4153_v52 = vld [vmem:[%s6157_s4 + $0xa4] sm:$0xf0]  ;;  %v3298_v54 = vld [vmem:[%s6157_s4 + $0xa8] sm:$0xf0]  ;;  %v3293_v56 = vor.u32 %v4148_v48, %v3290_v50  ;;  %v3256_v58 = vld [vmem:[%s6157_s4 + $0x40] sm:$0xf] }
  0x2c   : > { %915 = vmatpush.bf16.msrb.mxu1 %v3141_v22  ;;  %929 = vmatpush.bf16.msrb.mxu2 %v3145_v23  ;;  %v3297_v57 = vor.u32 %v4153_v52, %v3296_v51  ;;  %v4144_v59 = vld [vmem:[%s6157_s4 + $0x5c] sm:$0xf0]  ;;  %v4140_v60 = vld [vmem:[%s6157_s4 + $0x44] sm:$0xf]  ;;  %v3301_v61 = vor.u32 %v4149_v53, %v3298_v54  ;;  %v3264_v63 = vld [vmem:[%s6157_s4 + $0x48] sm:$0xf] }
  0x2d   : > { %v3258_v62 = vld [vmem:[%s6157_s4 + $0x60] sm:$0xf0]  ;;  %v4145_v0 = vld [vmem:[%s6157_s4 + $0x64] sm:$0xf0]  ;;  %v4141_v2 = vld [vmem:[%s6157_s4 + $0x4c] sm:$0xf]  ;;  %v3257_v4 = vor.u32 %v4144_v59, %v3256_v58 }
  0x2e   : > { %943 = vmatpush.bf16.msrb.mxu3 %v3149_v27  ;;  %v3266_v3 = vld [vmem:[%s6157_s4 + $0x68] sm:$0xf0]  ;;  %v3224_v5 = vld [vmem:[%s6157_s4] sm:$0xf]  ;;  %v3261_v7 = vor.u32 %v4140_v60, %v3258_v62  ;;  %v3265_v8 = vor.u32 %v4145_v0, %v3264_v63  ;;  %v4132_v9 = vld [vmem:[%s6157_s4 + $0x4] sm:$0xf] }
  0x2f   : > { %902 = vmatpush.bf16.msrb.mxu0 %v3105_v34  ;;  %v4136_v6 = vld [vmem:[%s6157_s4 + $0x1c] sm:$0xf0]  ;;  %v3226_v10 = vld [vmem:[%s6157_s4 + $0x20] sm:$0xf0]  ;;  %v3232_v11 = vld [vmem:[%s6157_s4 + $0x8] sm:$0xf]  ;;  %v3269_v12 = vor.u32 %v4141_v2, %v3266_v3 }
  0x30   : > { %916 = vmatpush.bf16.msrb.mxu1 %v3109_v38  ;;  %930 = vmatpush.bf16.msrb.mxu2 %v3113_v39  ;;  %v4137_v13 = vld [vmem:[%s6157_s4 + $0x24] sm:$0xf0]  ;;  %v4133_v14 = vld [vmem:[%s6157_s4 + $0xc] sm:$0xf]  ;;  %v3336_v16 = vld [vmem:[%s6157_s4 + $0xd0] sm:$0xf]  ;;  %v3225_v19 = vor.u32 %v4136_v6, %v3224_v5  ;;  %v3229_v23 = vor.u32 %v4132_v9, %v3226_v10 }
  0x31   : > { %v3234_v15 = vld [vmem:[%s6157_s4 + $0x28] sm:$0xf0]  ;;  %v4162_v17 = vld [vmem:[%s6157_s4 + $0xec] sm:$0xf0]  ;;  %v4158_v18 = vld [vmem:[%s6157_s4 + $0xd4] sm:$0xf]  ;;  %v3233_v24 = vor.u32 %v4137_v13, %v3232_v11 }
  0x32   : > { %944 = vmatpush.bf16.msrb.mxu3 %v3117_v42  ;;  %3218 = vmatmul.msk.bf16.vlgmr.msrb.gmra.mxu0 %vm835_vm0, %v4568_v1  ;;  %v3338_v20 = vld [vmem:[%s6157_s4 + $0xf0] sm:$0xf0]  ;;  %v3344_v21 = vld [vmem:[%s6157_s4 + $0xd8] sm:$0xf]  ;;  %v3346_v25 = vld [vmem:[%s6157_s4 + $0xf8] sm:$0xf0]  ;;  %v3237_v26 = vor.u32 %v4133_v14, %v3234_v15  ;;  %v3337_v27 = vor.u32 %v4162_v17, %v3336_v16 }
  0x33   : > { %1118 = vmatpush.bf16.msra.mxu0 %v3321_v43  ;;  %3219 = vmatmul.msk.bf16.vlgmr.msrb.gmra.mxu1 %vm835_vm0, %v4568_v1  ;;  %v4163_v22 = vld [vmem:[%s6157_s4 + $0xf4] sm:$0xf0]  ;;  %v3341_v28 = vor.u32 %v4158_v18, %v3338_v20  ;;  %v3304_v30 = vld [vmem:[%s6157_s4 + $0x90] sm:$0xf]  ;;  %v4150_v32 = vld [vmem:[%s6157_s4 + $0x94] sm:$0xf] }
  0x34   : > { %1132 = vmatpush.bf16.msra.mxu1 %v3325_v44  ;;  %1146 = vmatpush.bf16.msra.mxu2 %v3329_v45  ;;  %v3345_v29 = vor.u32 %v4163_v22, %v3344_v21  ;;  %v4154_v31 = vld [vmem:[%s6157_s4 + $0xac] sm:$0xf0]  ;;  %v3306_v34 = vld [vmem:[%s6157_s4 + $0xb0] sm:$0xf0]  ;;  %v3312_v35 = vld [vmem:[%s6157_s4 + $0x98] sm:$0xf] }
  0x35   : > { %3220 = vmatmul.msk.bf16.vlgmr.msrb.gmra.mxu2 %vm835_vm0, %v4568_v1  ;;  %3221 = vmatmul.msk.bf16.vlgmr.msrb.gmra.mxu3 %vm835_vm0, %v4568_v1  ;;  %v4159_v1 = vld [vmem:[%s6157_s4 + $0xdc] sm:$0xf]  ;;  %v4155_v36 = vld [vmem:[%s6157_s4 + $0xb4] sm:$0xf0]  ;;  %v3305_v39 = vor.u32 %v4154_v31, %v3304_v30  ;;  %v3309_v40 = vor.u32 %v4150_v32, %v3306_v34  ;;  %v605_v42 = vld [vmem:[%s533_s23] sm:$0xff]  ;;  %vm2833_vm4 = vcmask 1044484  }
  0x36   : > { %1160 = vmatpush.bf16.msra.mxu3 %v3333_v49  ;;  %v3349_v33 = vor.u32 %v4159_v1, %v3346_v25  ;;  %v4151_v37 = vld [vmem:[%s6157_s4 + $0x9c] sm:$0xf]  ;;  %v3313_v41 = vor.u32 %v4155_v36, %v3312_v35  ;;  %v606_v43 = vld [vmem:[%s533_s23 + $0x8] sm:$0xff]  ;;  %v3272_v45 = vld [vmem:[%s6157_s4 + $0x50] sm:$0xf]  ;;  %vm2835_vm5 = vcmask 1046534  }
  0x37   : > { %1119 = vmatpush.bf16.msra.mxu0 %v3289_v55  ;;  %v3314_v38 = vld [vmem:[%s6157_s4 + $0xb8] sm:$0xf0]  ;;  %v4146_v46 = vld [vmem:[%s6157_s4 + $0x6c] sm:$0xf0]  ;;  %v4142_v47 = vld [vmem:[%s6157_s4 + $0x54] sm:$0xf]  ;;  %v4743_v48 = vpack.c.bf16 %v606_v43, %v605_v42 }
  0x38   : > { %1133 = vmatpush.bf16.msra.mxu1 %v3293_v56  ;;  %1147 = vmatpush.bf16.msra.mxu2 %v3297_v57  ;;  %v3317_v44 = vor.u32 %v4151_v37, %v3314_v38  ;;  %v3274_v49 = vld [vmem:[%s6157_s4 + $0x70] sm:$0xf0]  ;;  %v3280_v50 = vld [vmem:[%s6157_s4 + $0x58] sm:$0xf]  ;;  %v4143_v52 = vld [vmem:[%s6157_s4 + $0x5c] sm:$0xf]  ;;  %v3273_v54 = vor.u32 %v4146_v46, %v3272_v45 }
  0x39   : > { %v4147_v51 = vld [vmem:[%s6157_s4 + $0x74] sm:$0xf0]  ;;  %v3282_v53 = vld [vmem:[%s6157_s4 + $0x78] sm:$0xf0]  ;;  %v3240_v55 = vld [vmem:[%s6157_s4 + $0x10] sm:$0xf]  ;;  %v3277_v57 = vor.u32 %v4142_v47, %v3274_v49 }
  0x3a   : > { %1161 = vmatpush.bf16.msra.mxu3 %v3301_v61  ;;  %v4138_v56 = vld [vmem:[%s6157_s4 + $0x2c] sm:$0xf0]  ;;  %v3281_v58 = vor.u32 %v4147_v51, %v3280_v50  ;;  %v4134_v59 = vld [vmem:[%s6157_s4 + $0x14] sm:$0xf]  ;;  %v3248_v61 = vld [vmem:[%s6157_s4 + $0x18] sm:$0xf]  ;;  %v3285_v62 = vor.u32 %v4143_v52, %v3282_v53 }
  0x3b   : > { %1120 = vmatpush.bf16.msra.mxu0 %v3257_v4  ;;  %v3242_v60 = vld [vmem:[%s6157_s4 + $0x30] sm:$0xf0]  ;;  %v4139_v63 = vld [vmem:[%s6157_s4 + $0x34] sm:$0xf0]  ;;  %v4135_v0 = vld [vmem:[%s6157_s4 + $0x1c] sm:$0xf]  ;;  %v3241_v6 = vor.u32 %v4138_v56, %v3240_v55 }
  0x3c   : > { %1134 = vmatpush.bf16.msra.mxu1 %v3261_v7  ;;  %1148 = vmatpush.bf16.msra.mxu2 %v3265_v8  ;;  %v3250_v2 = vld [vmem:[%s6157_s4 + $0x38] sm:$0xf0]  ;;  %v3584_v3 = vld [vmem:[%s6159_s6 + $0x1c0] sm:$0xf]  ;;  %v4252_v5 = vld [vmem:[%s6159_s6 + $0x1c4] sm:$0xf]  ;;  %v3245_v10 = vor.u32 %v4134_v59, %v3242_v60  ;;  %v3249_v11 = vor.u32 %v4139_v63, %v3248_v61 }
  0x3d   : > { %v4256_v4 = vld [vmem:[%s6159_s6 + $0x1dc] sm:$0xf0]  ;;  %v3586_v7 = vld [vmem:[%s6159_s6 + $0x1e0] sm:$0xf0]  ;;  %v3592_v8 = vld [vmem:[%s6159_s6 + $0x1c8] sm:$0xf]  ;;  %v3253_v14 = vor.u32 %v4135_v0, %v3250_v2 }
  0x3e   : > { %1162 = vmatpush.bf16.msra.mxu3 %v3269_v12  ;;  %v4257_v9 = vld [vmem:[%s6159_s6 + $0x1e4] sm:$0xf0]  ;;  %v4253_v12 = vld [vmem:[%s6159_s6 + $0x1cc] sm:$0xf]  ;;  %v3585_v15 = vor.u32 %v4256_v4, %v3584_v3  ;;  %v3589_v16 = vor.u32 %v4252_v5, %v3586_v7  ;;  %v3552_v18 = vld [vmem:[%s6159_s6 + $0x180] sm:$0xf] }
  0x3f   : > { %1121 = vmatpush.bf16.msra.mxu0 %v3225_v19  ;;  %v3594_v13 = vld [vmem:[%s6159_s6 + $0x1e8] sm:$0xf0]  ;;  %v3593_v17 = vor.u32 %v4257_v9, %v3592_v8  ;;  %v4248_v19 = vld [vmem:[%s6159_s6 + $0x19c] sm:$0xf0]  ;;  %v4244_v20 = vld [vmem:[%s6159_s6 + $0x184] sm:$0xf] }
  0x40   : > { %1135 = vmatpush.bf16.msra.mxu1 %v3229_v23  ;;  %1149 = vmatpush.bf16.msra.mxu2 %v3233_v24  ;;  %v3597_v21 = vor.u32 %v4253_v12, %v3594_v13  ;;  %v3554_v22 = vld [vmem:[%s6159_s6 + $0x1a0] sm:$0xf0]  ;;  %v3560_v23 = vld [vmem:[%s6159_s6 + $0x188] sm:$0xf]  ;;  %v4245_v1 = vld [vmem:[%s6159_s6 + $0x18c] sm:$0xf] }
  0x41   : > { %v4249_v24 = vld [vmem:[%s6159_s6 + $0x1a4] sm:$0xf0]  ;;  %v3562_v25 = vld [vmem:[%s6159_s6 + $0x1a8] sm:$0xf0]  ;;  %v4240_v30 = vld [vmem:[%s6159_s6 + $0x15c] sm:$0xf0] }
  0x42   : > { %1163 = vmatpush.bf16.msra.mxu3 %v3237_v26  ;;  %3350 = vmatmul.msk.bf16.vlgmr.msra.gmra.mxu0 %vm835_vm0, %v4743_v48  ;;  %v3553_v26 = vor.u32 %v4248_v19, %v3552_v18  ;;  %v4236_v31 = vld [vmem:[%s6159_s6 + $0x144] sm:$0xf]  ;;  %v3565_v32 = vor.u32 %v4245_v1, %v3562_v25  ;;  %v3528_v34 = vld [vmem:[%s6159_s6 + $0x148] sm:$0xf]  ;;  %v4237_v36 = vld [vmem:[%s6159_s6 + $0x14c] sm:$0xf] }
  0x43   : > { %1174 = vmatpush.bf16.msrb.mxu0 %v3337_v27  ;;  %3351 = vmatmul.msk.bf16.vlgmr.msra.gmra.mxu1 %vm835_vm0, %v4743_v48  ;;  %v3557_v27 = vor.u32 %v4244_v20, %v3554_v22  ;;  %v4241_v35 = vld [vmem:[%s6159_s6 + $0x164] sm:$0xf0]  ;;  %v3530_v37 = vld [vmem:[%s6159_s6 + $0x168] sm:$0xf0]  ;;  %v4232_v42 = vld [vmem:[%s6159_s6 + $0x11c] sm:$0xf0] }
  0x44   : > { %1188 = vmatpush.bf16.msrb.mxu1 %v3341_v28  ;;  %1202 = vmatpush.bf16.msrb.mxu2 %v3345_v29  ;;  %v3561_v28 = vor.u32 %v4249_v24, %v3560_v23  ;;  %v3520_v29 = vld [vmem:[%s6159_s6 + $0x140] sm:$0xf]  ;;  %v4228_v43 = vld [vmem:[%s6159_s6 + $0x104] sm:$0xf]  ;;  %v3496_v46 = vld [vmem:[%s6159_s6 + $0x108] sm:$0xf] }
  0x45   : > { %3352 = vmatmul.msk.bf16.vlgmr.msra.gmra.mxu2 %vm835_vm0, %v4743_v48  ;;  %3353 = vmatmul.msk.bf16.vlgmr.msra.gmra.mxu3 %vm835_vm0, %v4743_v48  ;;  %v3521_v38 = vor.u32 %v4240_v30, %v3520_v29  ;;  %v3490_v45 = vld [vmem:[%s6159_s6 + $0x120] sm:$0xf0]  ;;  %v4233_v47 = vld [vmem:[%s6159_s6 + $0x124] sm:$0xf0]  ;;  %v4229_v49 = vld [vmem:[%s6159_s6 + $0x10c] sm:$0xf] }
  0x46   : > { %1216 = vmatpush.bf16.msrb.mxu3 %v3349_v33  ;;  %v3522_v33 = vld [vmem:[%s6159_s6 + $0x160] sm:$0xf0]  ;;  %v3498_v50 = vld [vmem:[%s6159_s6 + $0x128] sm:$0xf0]  ;;  %v3493_v52 = vor.u32 %v4228_v43, %v3490_v45  ;;  %v3497_v53 = vor.u32 %v4233_v47, %v3496_v46  ;;  %v4224_v55 = vld [vmem:[%s6159_s6 + $0xdc] sm:$0xf0] }
  0x47   : > { %1175 = vmatpush.bf16.msrb.mxu0 %v3305_v39  ;;  %v3525_v39 = vor.u32 %v4236_v31, %v3522_v33  ;;  %v4220_v56 = vld [vmem:[%s6159_s6 + $0xc4] sm:$0xf]  ;;  %v3464_v59 = vld [vmem:[%s6159_s6 + $0xc8] sm:$0xf]  ;;  %v4221_v61 = vld [vmem:[%s6159_s6 + $0xcc] sm:$0xf] }
  0x48   : > { %1189 = vmatpush.bf16.msrb.mxu1 %v3309_v40  ;;  %1203 = vmatpush.bf16.msrb.mxu2 %v3313_v41  ;;  %v3529_v40 = vor.u32 %v4241_v35, %v3528_v34  ;;  %v3488_v41 = vld [vmem:[%s6159_s6 + $0x100] sm:$0xf]  ;;  %v4225_v60 = vld [vmem:[%s6159_s6 + $0xe4] sm:$0xf0]  ;;  %v4212_v5 = vld [vmem:[%s6159_s6 + $0x84] sm:$0xf] }
  0x49   : > { %v3489_v51 = vor.u32 %v4232_v42, %v3488_v41  ;;  %v3465_v2 = vor.u32 %v4225_v60, %v3464_v59  ;;  %v3424_v3 = vld [vmem:[%s6159_s6 + $0x80] sm:$0xf]  ;;  %v3432_v7 = vld [vmem:[%s6159_s6 + $0x88] sm:$0xf]  ;;  %v4213_v9 = vld [vmem:[%s6159_s6 + $0x8c] sm:$0xf] }
  0x4a   : > { %1217 = vmatpush.bf16.msrb.mxu3 %v3317_v44  ;;  %v3533_v44 = vor.u32 %v4237_v36, %v3530_v37  ;;  %v4216_v4 = vld [vmem:[%s6159_s6 + $0x9c] sm:$0xf0]  ;;  %v4217_v8 = vld [vmem:[%s6159_s6 + $0xa4] sm:$0xf0]  ;;  %v3394_v18 = vld [vmem:[%s6159_s6 + $0x60] sm:$0xf0] }
  0x4b   : > { %1176 = vmatpush.bf16.msrb.mxu0 %v3273_v54  ;;  %v3456_v54 = vld [vmem:[%s6159_s6 + $0xc0] sm:$0xf]  ;;  %v3433_v13 = vor.u32 %v4217_v8, %v3432_v7  ;;  %v3400_v19 = vld [vmem:[%s6159_s6 + $0x48] sm:$0xf]  ;;  %v3402_v22 = vld [vmem:[%s6159_s6 + $0x68] sm:$0xf0] }
  0x4c   : > { %1190 = vmatpush.bf16.msrb.mxu1 %v3277_v57  ;;  %1204 = vmatpush.bf16.msrb.mxu2 %v3281_v58  ;;  %v3501_v57 = vor.u32 %v4229_v49, %v3498_v50  ;;  %v3458_v58 = vld [vmem:[%s6159_s6 + $0xe0] sm:$0xf0]  ;;  %v3457_v63 = vor.u32 %v4224_v55, %v3456_v54  ;;  %v4209_v20 = vld [vmem:[%s6159_s6 + $0x64] sm:$0xf0]  ;;  %v3360_v24 = vld [vmem:[%s6159_s6] sm:$0xf] }
  0x4d   : > { %v3461_v0 = vor.u32 %v4220_v56, %v3458_v58  ;;  %v4200_v1 = vld [vmem:[%s6159_s6 + $0x1c] sm:$0xf0]  ;;  %v4196_v25 = vld [vmem:[%s6159_s6 + $0x4] sm:$0xf]  ;;  %v3368_v29 = vld [vmem:[%s6159_s6 + $0x8] sm:$0xf] }
  0x4e   : > { %1218 = vmatpush.bf16.msrb.mxu3 %v3285_v62  ;;  %v3466_v62 = vld [vmem:[%s6159_s6 + $0xe8] sm:$0xf0]  ;;  %v4201_v30 = vld [vmem:[%s6159_s6 + $0x24] sm:$0xf0]  ;;  %v3600_v34 = vld [vmem:[%s6159_s6 + $0x1d0] sm:$0xf] }
  0x4f   : > { %1177 = vmatpush.bf16.msrb.mxu0 %v3241_v6  ;;  %v3426_v6 = vld [vmem:[%s6159_s6 + $0xa0] sm:$0xf0]  ;;  %v3370_v33 = vld [vmem:[%s6159_s6 + $0x28] sm:$0xf0]  ;;  %v4258_v35 = vld [vmem:[%s6159_s6 + $0x1ec] sm:$0xf0]  ;;  %v3369_v43 = vor.u32 %v4201_v30, %v3368_v29 }
  0x50   : > { %1191 = vmatpush.bf16.msrb.mxu1 %v3245_v10  ;;  %1205 = vmatpush.bf16.msrb.mxu2 %v3249_v11  ;;  %v3434_v10 = vld [vmem:[%s6159_s6 + $0xa8] sm:$0xf0]  ;;  %v3425_v11 = vor.u32 %v4216_v4, %v3424_v3  ;;  %v3429_v12 = vor.u32 %v4212_v5, %v3426_v6  ;;  %v4254_v36 = vld [vmem:[%s6159_s6 + $0x1d4] sm:$0xf]  ;;  %v4255_v41 = vld [vmem:[%s6159_s6 + $0x1dc] sm:$0xf]  ;;  %v3601_v49 = vor.u32 %v4258_v35, %v3600_v34 }
  0x51   : > { %v3602_v37 = vld [vmem:[%s6159_s6 + $0x1f0] sm:$0xf0]  ;;  %v1226_v45 = vld [vmem:[%s553_s15] sm:$0xff]  ;;  %v1227_v46 = vld [vmem:[%s553_s15 + $0x8] sm:$0xff]  ;;  %vm2837_vm6 = vcmask 1045508   ;;  %vm2839_vm7 = vcmask 1043456  }
  0x52   : > { %1219 = vmatpush.bf16.msrb.mxu3 %v3253_v14  ;;  %3354 = vmatmul.msk.bf16.vlgmr.msrb.gmra.mxu0 %vm835_vm0, %v4743_v48  ;;  %v3392_v14 = vld [vmem:[%s6159_s6 + $0x40] sm:$0xf]  ;;  %v3605_v50 = vor.u32 %v4254_v36, %v3602_v37  ;;  %v4246_v54 = vld [vmem:[%s6159_s6 + $0x194] sm:$0xf]  ;;  %v5029_v56 = vpack.c.bf16 %v1227_v46, %v1226_v45  ;;  %v3576_v58 = vld [vmem:[%s6159_s6 + $0x198] sm:$0xf] }
  0x53   : > { %1613 = vmatpush.bf16.msra.mxu0 %v3585_v15  ;;  %3355 = vmatmul.msk.bf16.vlgmr.msrb.gmra.mxu1 %vm835_vm0, %v4743_v48  ;;  %v4208_v15 = vld [vmem:[%s6159_s6 + $0x5c] sm:$0xf0]  ;;  %v4251_v59 = vld [vmem:[%s6159_s6 + $0x1b4] sm:$0xf0]  ;;  %v4247_v60 = vld [vmem:[%s6159_s6 + $0x19c] sm:$0xf] }
  0x54   : > { %1627 = vmatpush.bf16.msra.mxu1 %v3589_v16  ;;  %1641 = vmatpush.bf16.msra.mxu2 %v3593_v17  ;;  %v4204_v16 = vld [vmem:[%s6159_s6 + $0x44] sm:$0xf]  ;;  %v3437_v17 = vor.u32 %v4213_v9, %v3434_v10  ;;  %v3393_v23 = vor.u32 %v4208_v15, %v3392_v14  ;;  %v4242_v3 = vld [vmem:[%s6159_s6 + $0x16c] sm:$0xf0]  ;;  %v4238_v4 = vld [vmem:[%s6159_s6 + $0x154] sm:$0xf] }
  0x55   : > { %3356 = vmatmul.msk.bf16.vlgmr.msrb.gmra.mxu2 %vm835_vm0, %v4743_v48  ;;  %3357 = vmatmul.msk.bf16.vlgmr.msrb.gmra.mxu3 %vm835_vm0, %v4743_v48  ;;  %v3469_v48 = vor.u32 %v4221_v61, %v3466_v62  ;;  %v3578_v61 = vld [vmem:[%s6159_s6 + $0x1b8] sm:$0xf0]  ;;  %v3544_v6 = vld [vmem:[%s6159_s6 + $0x158] sm:$0xf]  ;;  %v4234_v14 = vld [vmem:[%s6159_s6 + $0x12c] sm:$0xf0] }
  0x56   : > { %1655 = vmatpush.bf16.msra.mxu3 %v3597_v21  ;;  %v4205_v21 = vld [vmem:[%s6159_s6 + $0x4c] sm:$0xf]  ;;  %v3581_v5 = vor.u32 %v4247_v60, %v3578_v61  ;;  %v4243_v7 = vld [vmem:[%s6159_s6 + $0x174] sm:$0xf0]  ;;  %v4239_v8 = vld [vmem:[%s6159_s6 + $0x15c] sm:$0xf] }
  0x57   : > { %1614 = vmatpush.bf16.msra.mxu0 %v3553_v26  ;;  %v3397_v26 = vor.u32 %v4204_v16, %v3394_v18  ;;  %v3405_v31 = vor.u32 %v4205_v21, %v3402_v22  ;;  %v3546_v9 = vld [vmem:[%s6159_s6 + $0x178] sm:$0xf0]  ;;  %v4230_v15 = vld [vmem:[%s6159_s6 + $0x114] sm:$0xf]  ;;  %v3512_v18 = vld [vmem:[%s6159_s6 + $0x118] sm:$0xf] }
  0x58   : > { %1628 = vmatpush.bf16.msra.mxu1 %v3557_v27  ;;  %1642 = vmatpush.bf16.msra.mxu2 %v3561_v28  ;;  %v3401_v27 = vor.u32 %v4209_v20, %v3400_v19  ;;  %v3362_v28 = vld [vmem:[%s6159_s6 + $0x20] sm:$0xf0]  ;;  %v3549_v16 = vor.u32 %v4239_v8, %v3546_v9  ;;  %v4235_v19 = vld [vmem:[%s6159_s6 + $0x134] sm:$0xf0]  ;;  %v4231_v20 = vld [vmem:[%s6159_s6 + $0x11c] sm:$0xf] }
  0x59   : > { %v3365_v42 = vor.u32 %v4196_v25, %v3362_v28  ;;  %v3514_v21 = vld [vmem:[%s6159_s6 + $0x138] sm:$0xf0]  ;;  %v4226_v25 = vld [vmem:[%s6159_s6 + $0xec] sm:$0xf0]  ;;  %v3474_v28 = vld [vmem:[%s6159_s6 + $0xf0] sm:$0xf0] }
  0x5a   : > { %1656 = vmatpush.bf16.msra.mxu3 %v3565_v32  ;;  %v4197_v32 = vld [vmem:[%s6159_s6 + $0xc] sm:$0xf]  ;;  %v3480_v29 = vld [vmem:[%s6159_s6 + $0xd8] sm:$0xf]  ;;  %v3440_v36 = vld [vmem:[%s6159_s6 + $0x90] sm:$0xf] }
  0x5b   : > { %1615 = vmatpush.bf16.msra.mxu0 %v3521_v38  ;;  %v3361_v38 = vor.u32 %v4200_v1, %v3360_v24  ;;  %v3373_v47 = vor.u32 %v4197_v32, %v3370_v33  ;;  %v3513_v24 = vor.u32 %v4235_v19, %v3512_v18  ;;  %v3472_v1 = vld [vmem:[%s6159_s6 + $0xd0] sm:$0xf]  ;;  %v4227_v30 = vld [vmem:[%s6159_s6 + $0xf4] sm:$0xf0]  ;;  %v3482_v32 = vld [vmem:[%s6159_s6 + $0xf8] sm:$0xf0] }
  0x5c   : > { %1629 = vmatpush.bf16.msra.mxu1 %v3525_v39  ;;  %1643 = vmatpush.bf16.msra.mxu2 %v3529_v40  ;;  %v3608_v39 = vld [vmem:[%s6159_s6 + $0x1d8] sm:$0xf]  ;;  %v3473_v33 = vor.u32 %v4226_v25, %v3472_v1  ;;  %v3481_v35 = vor.u32 %v4227_v30, %v3480_v29  ;;  %v4218_v37 = vld [vmem:[%s6159_s6 + $0xac] sm:$0xf0]  ;;  %v4320_v8 = vld [vmem:[%s6160_s7 + $0x1dc] sm:$0xf0] }
  0x5d   : > { %v4259_v40 = vld [vmem:[%s6159_s6 + $0x1f4] sm:$0xf0]  ;;  %v3441_v45 = vor.u32 %v4218_v37, %v3440_v36  ;;  %v3376_v60 = vld [vmem:[%s6159_s6 + $0x10] sm:$0xf]  ;;  %v4096_v9 = vld [vmem:[%s6160_s7 + $0x3c0] sm:$0xf] }
  0x5e   : > { %1657 = vmatpush.bf16.msra.mxu3 %v3533_v44  ;;  %v3610_v44 = vld [vmem:[%s6159_s6 + $0x1f8] sm:$0xf0]  ;;  %v4202_v61 = vld [vmem:[%s6159_s6 + $0x2c] sm:$0xf0]  ;;  %v4376_v25 = vld [vmem:[%s6160_s7 + $0x39c] sm:$0xf0] }
  0x5f   : > { %1616 = vmatpush.bf16.msra.mxu0 %v3489_v51  ;;  %v3609_v51 = vor.u32 %v4259_v40, %v3608_v39  ;;  %v3613_v55 = vor.u32 %v4255_v41, %v3610_v44  ;;  %v3442_v40 = vld [vmem:[%s6159_s6 + $0xb0] sm:$0xf0]  ;;  %v3448_v41 = vld [vmem:[%s6159_s6 + $0x98] sm:$0xf]  ;;  %v3450_v44 = vld [vmem:[%s6159_s6 + $0xb8] sm:$0xf0] }
  0x60   : > { %1630 = vmatpush.bf16.msra.mxu1 %v3493_v52  ;;  %1644 = vmatpush.bf16.msra.mxu2 %v3497_v53  ;;  %v3568_v52 = vld [vmem:[%s6159_s6 + $0x190] sm:$0xf]  ;;  %v4066_v29 = vld [vmem:[%s6160_s7 + $0x3a0] sm:$0xf0]  ;;  %v4368_v37 = vld [vmem:[%s6160_s7 + $0x35c] sm:$0xf0] }
  0x61   : > { %v4250_v53 = vld [vmem:[%s6159_s6 + $0x1ac] sm:$0xf0]  ;;  %s3085_s14 = sshll.u32 %s6168_s30, 3 }
  0x62   : > { %1658 = vmatpush.bf16.msra.mxu3 %v3501_v57  ;;  %v3570_v57 = vld [vmem:[%s6159_s6 + $0x1b0] sm:$0xf0]  ;;  %v3569_v62 = vor.u32 %v4250_v53, %v3568_v52  ;;  %s597_s19 = scalar_lea.vmem %s6162_s9, %s3085_s14 }
  0x63   : > { %1617 = vmatpush.bf16.msra.mxu0 %v3457_v63  ;;  %v3573_v63 = vor.u32 %v4246_v54, %v3570_v57  ;;  %v3410_v53 = vld [vmem:[%s6159_s6 + $0x70] sm:$0xf0]  ;;  %v3416_v54 = vld [vmem:[%s6159_s6 + $0x58] sm:$0xf]  ;;  %v4207_v57 = vld [vmem:[%s6159_s6 + $0x5c] sm:$0xf] }
  0x64   : > { %1631 = vmatpush.bf16.msra.mxu1 %v3461_v0  ;;  %1645 = vmatpush.bf16.msra.mxu2 %v3465_v2  ;;  %v3577_v0 = vor.u32 %v4251_v59, %v3576_v58  ;;  %v3536_v2 = vld [vmem:[%s6159_s6 + $0x150] sm:$0xf]  ;;  %v3418_v58 = vld [vmem:[%s6159_s6 + $0x78] sm:$0xf0] }
  0x65   : > { %v3537_v10 = vor.u32 %v4242_v3, %v3536_v2  ;;  %v3378_v2 = vld [vmem:[%s6159_s6 + $0x30] sm:$0xf0]  ;;  %v3384_v3 = vld [vmem:[%s6159_s6 + $0x18] sm:$0xf] }
  0x66   : > { %1659 = vmatpush.bf16.msra.mxu3 %v3469_v48  ;;  %v3538_v48 = vld [vmem:[%s6159_s6 + $0x170] sm:$0xf0] }
  0x67   : > { %1618 = vmatpush.bf16.msra.mxu0 %v3425_v11  ;;  %v3541_v11 = vor.u32 %v4238_v4, %v3538_v48  ;;  %v3421_v4 = vor.u32 %v4207_v57, %v3418_v58  ;;  %v4199_v48 = vld [vmem:[%s6159_s6 + $0x1c] sm:$0xf]  ;;  %v3712_v58 = vld [vmem:[%s6160_s7 + $0xc0] sm:$0xf] }
  0x68   : > { %1632 = vmatpush.bf16.msra.mxu1 %v3429_v12  ;;  %1646 = vmatpush.bf16.msra.mxu2 %v3433_v13  ;;  %v3545_v12 = vor.u32 %v4243_v7, %v3544_v6  ;;  %v3504_v13 = vld [vmem:[%s6159_s6 + $0x110] sm:$0xf]  ;;  %v3386_v6 = vld [vmem:[%s6159_s6 + $0x38] sm:$0xf0]  ;;  %v3840_v7 = vld [vmem:[%s6160_s7 + $0x1c0] sm:$0xf] }
  0x69   : > { %v3505_v22 = vor.u32 %v4234_v14, %v3504_v13  ;;  %v3842_v13 = vld [vmem:[%s6160_s7 + $0x1e0] sm:$0xf0]  ;;  %v3389_v18 = vor.u32 %v4199_v48, %v3386_v6  ;;  %v3841_v19 = vor.u32 %v4320_v8, %v3840_v7  ;;  %v3680_v6 = vld [vmem:[%s6160_s7 + $0x80] sm:$0xf] }
  0x6a   : > { %1660 = vmatpush.bf16.msra.mxu3 %v3437_v17  ;;  %v3506_v17 = vld [vmem:[%s6159_s6 + $0x130] sm:$0xf0]  ;;  %v4280_v7 = vld [vmem:[%s6160_s7 + $0x9c] sm:$0xf0] }
  0x6b   : > { %1619 = vmatpush.bf16.msra.mxu0 %v3393_v23  ;;  %v3509_v23 = vor.u32 %v4230_v15, %v3506_v17  ;;  %v4098_v17 = vld [vmem:[%s6160_s7 + $0x3e0] sm:$0xf0]  ;;  %v3936_v8 = vld [vmem:[%s6160_s7 + $0x280] sm:$0xf] }
  0x6c   : > { %1633 = vmatpush.bf16.msra.mxu1 %v3397_v26  ;;  %1647 = vmatpush.bf16.msra.mxu2 %v3401_v27  ;;  %v4222_v26 = vld [vmem:[%s6159_s6 + $0xd4] sm:$0xf]  ;;  %v3517_v27 = vor.u32 %v4231_v20, %v3514_v21 }
  0x6d   : > { %v3477_v34 = vor.u32 %v4222_v26, %v3474_v28  ;;  %v4308_v26 = vld [vmem:[%s6160_s7 + $0x184] sm:$0xf] }
  0x6e   : > { %1661 = vmatpush.bf16.msra.mxu3 %v3405_v31  ;;  %v4223_v31 = vld [vmem:[%s6159_s6 + $0xdc] sm:$0xf]  ;;  %v4372_v28 = vld [vmem:[%s6160_s7 + $0x384] sm:$0xf] }
  0x6f   : > { %1620 = vmatpush.bf16.msra.mxu0 %v3361_v38  ;;  %v4214_v38 = vld [vmem:[%s6159_s6 + $0x94] sm:$0xf]  ;;  %v3485_v39 = vor.u32 %v4223_v31, %v3482_v32  ;;  %v4069_v36 = vor.u32 %v4372_v28, %v4066_v29  ;;  %v4264_v28 = vld [vmem:[%s6160_s7 + $0x1c] sm:$0xf0] }
  0x70   : > { %1634 = vmatpush.bf16.msra.mxu1 %v3365_v42  ;;  %1648 = vmatpush.bf16.msra.mxu2 %v3369_v43  ;;  %v4219_v42 = vld [vmem:[%s6159_s6 + $0xb4] sm:$0xf0]  ;;  %v4215_v43 = vld [vmem:[%s6159_s6 + $0x9c] sm:$0xf]  ;;  %v3445_v46 = vor.u32 %v4214_v38, %v3442_v40  ;;  %v4300_v38 = vld [vmem:[%s6160_s7 + $0x144] sm:$0xf] }
  0x71   : > { %v3453_v52 = vor.u32 %v4215_v43, %v3450_v44  ;;  %v4364_v40 = vld [vmem:[%s6160_s7 + $0x344] sm:$0xf]  ;;  %v3872_v29 = vld [vmem:[%s6160_s7 + $0x200] sm:$0xf] }
  0x72   : > { %1662 = vmatpush.bf16.msra.mxu3 %v3373_v47  ;;  %1621 = vmatmul.bf16.vlgmr.msra.gmra.mxu0 %v5029_v56  ;;  %v3449_v47 = vor.u32 %v4219_v42, %v3448_v41  ;;  %v4034_v41 = vld [vmem:[%s6160_s7 + $0x360] sm:$0xf0] }
  0x73   : > { %1669 = vmatpush.bf16.msrb.mxu0 %v3601_v49  ;;  %1635 = vmatmul.bf16.vlgmr.msra.gmra.mxu1 %v5029_v56  ;;  %v3408_v49 = vld [vmem:[%s6159_s6 + $0x50] sm:$0xf] }
  0x74   : > { %1683 = vmatpush.bf16.msrb.mxu1 %v3605_v50  ;;  %1697 = vmatpush.bf16.msrb.mxu2 %v3609_v51  ;;  %v4210_v50 = vld [vmem:[%s6159_s6 + $0x6c] sm:$0xf0]  ;;  %v4206_v51 = vld [vmem:[%s6159_s6 + $0x54] sm:$0xf] }
  0x75   : > { %1649 = vmatmul.bf16.vlgmr.msra.gmra.mxu2 %v5029_v56  ;;  %1663 = vmatmul.bf16.vlgmr.msra.gmra.mxu3 %v5029_v56  ;;  %v3409_v59 = vor.u32 %v4210_v50, %v3408_v49  ;;  %v4360_v49 = vld [vmem:[%s6160_s7 + $0x31c] sm:$0xf0]  ;;  %v4292_v50 = vld [vmem:[%s6160_s7 + $0x104] sm:$0xf] }
  0x76   : > { %1711 = vmatpush.bf16.msrb.mxu3 %v3613_v55  ;;  %v4211_v55 = vld [vmem:[%s6159_s6 + $0x74] sm:$0xf0] }
  0x77   : > { %1670 = vmatpush.bf16.msrb.mxu0 %v3569_v62  ;;  %v3413_v62 = vor.u32 %v4206_v51, %v3410_v53  ;;  %v3746_v51 = vld [vmem:[%s6160_s7 + $0x120] sm:$0xf0] }
  0x78   : > { %1684 = vmatpush.bf16.msrb.mxu1 %v3573_v63  ;;  %1698 = vmatpush.bf16.msrb.mxu2 %v3577_v0  ;;  %v3417_v63 = vor.u32 %v4211_v55, %v3416_v54  ;;  %v4198_v0 = vld [vmem:[%s6159_s6 + $0x14] sm:$0xf]  ;;  %v4002_v53 = vld [vmem:[%s6160_s7 + $0x320] sm:$0xf0]  ;;  %v3749_v57 = vor.u32 %v4292_v50, %v3746_v51  ;;  %v4106_v50 = vld [vmem:[%s6160_s7 + $0x3e8] sm:$0xf0] }
  0x79   : > { %v3381_v14 = vor.u32 %v4198_v0, %v3378_v2  ;;  %v3714_v0 = vld [vmem:[%s6160_s7 + $0xe0] sm:$0xf0] }
  0x7a   : > { %1712 = vmatpush.bf16.msrb.mxu3 %v3581_v5  ;;  %v4203_v5 = vld [vmem:[%s6159_s6 + $0x34] sm:$0xf0]  ;;  %v4348_v2 = vld [vmem:[%s6160_s7 + $0x2c4] sm:$0xf] }
  0x7b   : > { %1671 = vmatpush.bf16.msrb.mxu0 %v3537_v10  ;;  %v3377_v10 = vor.u32 %v4202_v61, %v3376_v60  ;;  %v3385_v15 = vor.u32 %v4203_v5, %v3384_v3  ;;  %v3968_v60 = vld [vmem:[%s6160_s7 + $0x2c0] sm:$0xf]  ;;  %v3970_v3 = vld [vmem:[%s6160_s7 + $0x2e0] sm:$0xf0] }
  0x7c   : > { %1685 = vmatpush.bf16.msrb.mxu1 %v3541_v11  ;;  %1699 = vmatpush.bf16.msrb.mxu2 %v3545_v12  ;;  %v4384_v11 = vld [vmem:[%s6160_s7 + $0x3dc] sm:$0xf0]  ;;  %v4316_v12 = vld [vmem:[%s6160_s7 + $0x1c4] sm:$0xf] }
  0x7d   : > { %v4097_v20 = vor.u32 %v4384_v11, %v4096_v9  ;;  %v3845_v21 = vor.u32 %v4316_v12, %v3842_v13  ;;  %v3973_v9 = vor.u32 %v4348_v2, %v3970_v3  ;;  %v4276_v11 = vld [vmem:[%s6160_s7 + $0x84] sm:$0xf]  ;;  %v4377_v2 = vld [vmem:[%s6160_s7 + $0x3a4] sm:$0xf0]  ;;  %v4309_v3 = vld [vmem:[%s6160_s7 + $0x18c] sm:$0xf] }
  0x7e   : > { %1713 = vmatpush.bf16.msrb.mxu3 %v3549_v16  ;;  %v4380_v16 = vld [vmem:[%s6160_s7 + $0x3c4] sm:$0xf] }
  0x7f   : > { %1672 = vmatpush.bf16.msrb.mxu0 %v3505_v22  ;;  %v3808_v22 = vld [vmem:[%s6160_s7 + $0x180] sm:$0xf]  ;;  %v4101_v1 = vor.u32 %v4380_v16, %v4098_v17  ;;  %v3682_v12 = vld [vmem:[%s6160_s7 + $0xa0] sm:$0xf0] }
  0x80   : > { %1686 = vmatpush.bf16.msrb.mxu1 %v3509_v23  ;;  %1700 = vmatpush.bf16.msrb.mxu2 %v3513_v24  ;;  %v4312_v23 = vld [vmem:[%s6160_s7 + $0x19c] sm:$0xf0]  ;;  %v4340_v13 = vld [vmem:[%s6160_s7 + $0x284] sm:$0xf]  ;;  %v3685_v17 = vor.u32 %v4276_v11, %v3682_v12  ;;  %v3784_v12 = vld [vmem:[%s6160_s7 + $0x148] sm:$0xf] }
  0x81   : > { %v4064_v24 = vld [vmem:[%s6160_s7 + $0x380] sm:$0xf]  ;;  %v3809_v30 = vor.u32 %v4312_v23, %v3808_v22  ;;  %v4268_v23 = vld [vmem:[%s6160_s7 + $0x44] sm:$0xf] }
  0x82   : > { %1714 = vmatpush.bf16.msrb.mxu3 %v3517_v27  ;;  %v3810_v27 = vld [vmem:[%s6160_s7 + $0x1a0] sm:$0xf0]  ;;  %v4065_v31 = vor.u32 %v4376_v25, %v4064_v24  ;;  %v4336_v22 = vld [vmem:[%s6160_s7 + $0x25c] sm:$0xf0] }
  0x83   : > { %1673 = vmatpush.bf16.msrb.mxu0 %v3473_v33  ;;  %v3813_v32 = vor.u32 %v4308_v26, %v3810_v27  ;;  %v3776_v33 = vld [vmem:[%s6160_s7 + $0x140] sm:$0xf]  ;;  %v3650_v24 = vld [vmem:[%s6160_s7 + $0x60] sm:$0xf0] }
  0x84   : > { %1687 = vmatpush.bf16.msrb.mxu1 %v3477_v34  ;;  %1701 = vmatpush.bf16.msrb.mxu2 %v3481_v35  ;;  %v4304_v34 = vld [vmem:[%s6160_s7 + $0x15c] sm:$0xf0]  ;;  %v3906_v25 = vld [vmem:[%s6160_s7 + $0x260] sm:$0xf0] }
  0x85   : > { %v4032_v35 = vld [vmem:[%s6160_s7 + $0x340] sm:$0xf]  ;;  %v3777_v42 = vor.u32 %v4304_v34, %v3776_v33  ;;  %v4260_v33 = vld [vmem:[%s6160_s7 + $0x4] sm:$0xf] }
  0x86   : > { %1715 = vmatpush.bf16.msrb.mxu3 %v3485_v39  ;;  %v3778_v39 = vld [vmem:[%s6160_s7 + $0x160] sm:$0xf0]  ;;  %v4033_v43 = vor.u32 %v4368_v37, %v4032_v35  ;;  %v3616_v27 = vld [vmem:[%s6160_s7] sm:$0xf] }
  0x87   : > { %1674 = vmatpush.bf16.msrb.mxu0 %v3441_v45  ;;  %v3781_v44 = vor.u32 %v4300_v38, %v3778_v39  ;;  %v3744_v45 = vld [vmem:[%s6160_s7 + $0x100] sm:$0xf]  ;;  %v3618_v34 = vld [vmem:[%s6160_s7 + $0x20] sm:$0xf0]  ;;  %v3848_v38 = vld [vmem:[%s6160_s7 + $0x1c8] sm:$0xf] }
  0x88   : > { %1688 = vmatpush.bf16.msrb.mxu1 %v3445_v46  ;;  %1702 = vmatpush.bf16.msrb.mxu2 %v3449_v47  ;;  %v4296_v46 = vld [vmem:[%s6160_s7 + $0x11c] sm:$0xf0]  ;;  %v3874_v37 = vld [vmem:[%s6160_s7 + $0x220] sm:$0xf0]  ;;  %v4321_v39 = vld [vmem:[%s6160_s7 + $0x1e4] sm:$0xf0] }
  0x89   : > { %v4000_v47 = vld [vmem:[%s6160_s7 + $0x300] sm:$0xf]  ;;  %v3745_v54 = vor.u32 %v4296_v46, %v3744_v45  ;;  %v3850_v45 = vld [vmem:[%s6160_s7 + $0x1e8] sm:$0xf0] }
  0x8a   : > { %1716 = vmatpush.bf16.msrb.mxu3 %v3453_v52  ;;  %v4356_v52 = vld [vmem:[%s6160_s7 + $0x304] sm:$0xf]  ;;  %v4001_v55 = vor.u32 %v4360_v49, %v4000_v47  ;;  %v4381_v46 = vld [vmem:[%s6160_s7 + $0x3cc] sm:$0xf]  ;;  %v3621_v49 = vor.u32 %v4260_v33, %v3618_v34 }
  0x8b   : > { %1675 = vmatpush.bf16.msrb.mxu0 %v3409_v59  ;;  %v4288_v59 = vld [vmem:[%s6160_s7 + $0xdc] sm:$0xf0]  ;;  %v4005_v61 = vor.u32 %v4356_v52, %v4002_v53  ;;  %v1743_v52 = vld [vmem:[%s564_s22 + $0x10] sm:$0xff]  ;;  %v4010_v33 = vld [vmem:[%s6160_s7 + $0x328] sm:$0xf0] }
  0x8c   : > { %1689 = vmatpush.bf16.msrb.mxu1 %v3413_v62  ;;  %1703 = vmatpush.bf16.msrb.mxu2 %v3417_v63  ;;  %v4352_v62 = vld [vmem:[%s6160_s7 + $0x2dc] sm:$0xf0]  ;;  %v4284_v63 = vld [vmem:[%s6160_s7 + $0xc4] sm:$0xf] }
  0x8d   : > { %v3969_v5 = vor.u32 %v4352_v62, %v3968_v60  ;;  %v3717_v48 = vor.u32 %v4284_v63, %v3714_v0  ;;  %v1741_v51 = vld [vmem:[%s564_s22] sm:$0xff]  ;;  %v3816_v60 = vld [vmem:[%s6160_s7 + $0x188] sm:$0xf]  ;;  %v4109_v63 = vor.u32 %v4381_v46, %v4106_v50  ;;  %v3722_v46 = vld [vmem:[%s6160_s7 + $0xe8] sm:$0xf0] }
  0x8e   : > { %1717 = vmatpush.bf16.msrb.mxu3 %v3421_v4  ;;  %v3713_v4 = vor.u32 %v4288_v59, %v3712_v58  ;;  %v4072_v62 = vld [vmem:[%s6160_s7 + $0x388] sm:$0xf]  ;;  %v5431_v0 = vpack.c.bf16 %v1743_v52, %v1741_v51 }
  0x8f   : > { %1676 = vmatpush.bf16.msrb.mxu0 %v3377_v10  ;;  %v4344_v10 = vld [vmem:[%s6160_s7 + $0x29c] sm:$0xf0] }
  0x90   : > { %1690 = vmatpush.bf16.msrb.mxu1 %v3381_v14  ;;  %1704 = vmatpush.bf16.msrb.mxu2 %v3385_v15  ;;  %v3938_v14 = vld [vmem:[%s6160_s7 + $0x2a0] sm:$0xf0]  ;;  %v3681_v15 = vor.u32 %v4280_v7, %v3680_v6  ;;  %v3937_v16 = vor.u32 %v4344_v10, %v3936_v8  ;;  %v4074_v6 = vld [vmem:[%s6160_s7 + $0x3a8] sm:$0xf0] }
  0x92   : > { %1718 = vmatpush.bf16.msrb.mxu3 %v3389_v18  ;;  %1677 = vmatmul.bf16.vlgmr.msrb.gmra.mxu0 %v5029_v56  ;;  %v3648_v18 = vld [vmem:[%s6160_s7 + $0x40] sm:$0xf] }
  0x93   : > { %2515 = vmatpush.bf16.msra.mxu0 %v3841_v19  ;;  %1691 = vmatmul.bf16.vlgmr.msrb.gmra.mxu1 %v5029_v56  ;;  %v4272_v19 = vld [vmem:[%s6160_s7 + $0x5c] sm:$0xf0] }
  0x94   : > { %2529 = vmatpush.bf16.msra.mxu1 %v4097_v20  ;;  %2543 = vmatpush.bf16.msra.mxu2 %v3845_v21  ;;  %v3904_v20 = vld [vmem:[%s6160_s7 + $0x240] sm:$0xf]  ;;  %v3941_v21 = vor.u32 %v4340_v13, %v3938_v14  ;;  %v3649_v26 = vor.u32 %v4272_v19, %v3648_v18  ;;  %v4305_v13 = vld [vmem:[%s6160_s7 + $0x164] sm:$0xf0]  ;;  %v4301_v18 = vld [vmem:[%s6160_s7 + $0x14c] sm:$0xf] }
  0x95   : > { %1705 = vmatmul.bf16.vlgmr.msrb.gmra.mxu2 %v5029_v56  ;;  %1719 = vmatmul.bf16.vlgmr.msrb.gmra.mxu3 %v5029_v56  ;;  %v4037_v56 = vor.u32 %v4364_v40, %v4034_v41  ;;  %v4104_v40 = vld [vmem:[%s6160_s7 + $0x3c8] sm:$0xf]  ;;  %v3786_v19 = vld [vmem:[%s6160_s7 + $0x168] sm:$0xf0] }
  0x96   : > { %2557 = vmatpush.bf16.msra.mxu3 %v4101_v1  ;;  %v4332_v1 = vld [vmem:[%s6160_s7 + $0x244] sm:$0xf]  ;;  %v4385_v41 = vld [vmem:[%s6160_s7 + $0x3e4] sm:$0xf0] }
  0x97   : > { %2516 = vmatpush.bf16.msra.mxu0 %v3809_v30  ;;  %v3905_v30 = vor.u32 %v4336_v22, %v3904_v20  ;;  %v3909_v35 = vor.u32 %v4332_v1, %v3906_v25  ;;  %v4105_v58 = vor.u32 %v4385_v41, %v4104_v40  ;;  %v4040_v14 = vld [vmem:[%s6160_s7 + $0x348] sm:$0xf]  ;;  %v4042_v22 = vld [vmem:[%s6160_s7 + $0x368] sm:$0xf0]  ;;  %v3789_v1 = vor.u32 %v4301_v18, %v3786_v19 }
  0x98   : > { %2530 = vmatpush.bf16.msra.mxu1 %v4065_v31  ;;  %2544 = vmatpush.bf16.msra.mxu2 %v3813_v32  ;;  %v3653_v31 = vor.u32 %v4268_v23, %v3650_v24  ;;  %v4328_v32 = vld [vmem:[%s6160_s7 + $0x21c] sm:$0xf0]  ;;  %v3785_v23 = vor.u32 %v4305_v13, %v3784_v12  ;;  %v3752_v25 = vld [vmem:[%s6160_s7 + $0x108] sm:$0xf]  ;;  %v4333_v18 = vld [vmem:[%s6160_s7 + $0x24c] sm:$0xf] }
  0x99   : > { %v4289_v40 = vld [vmem:[%s6160_s7 + $0xe4] sm:$0xf0]  ;;  %v3914_v19 = vld [vmem:[%s6160_s7 + $0x268] sm:$0xf0] }
  0x9a   : > { %2558 = vmatpush.bf16.msra.mxu3 %v4069_v36  ;;  %v4324_v36 = vld [vmem:[%s6160_s7 + $0x204] sm:$0xf]  ;;  %v3976_v41 = vld [vmem:[%s6160_s7 + $0x2c8] sm:$0xf] }
  0x9b   : > { %2517 = vmatpush.bf16.msra.mxu0 %v3777_v42  ;;  %v3877_v53 = vor.u32 %v4324_v36, %v3874_v37  ;;  %v4337_v13 = vld [vmem:[%s6160_s7 + $0x264] sm:$0xf0] }
  0x9c   : > { %2531 = vmatpush.bf16.msra.mxu1 %v4033_v43  ;;  %2545 = vmatpush.bf16.msra.mxu2 %v3781_v44  ;;  %v3617_v43 = vor.u32 %v4264_v28, %v3616_v27  ;;  %v4317_v44 = vld [vmem:[%s6160_s7 + $0x1cc] sm:$0xf]  ;;  %v4008_v27 = vld [vmem:[%s6160_s7 + $0x308] sm:$0xf] }
  0x9d   : > { %v3853_v59 = vor.u32 %v4317_v44, %v3850_v45  ;;  %v4353_v44 = vld [vmem:[%s6160_s7 + $0x2e4] sm:$0xf0]  ;;  %v4285_v45 = vld [vmem:[%s6160_s7 + $0xcc] sm:$0xf] }
  0x9e   : > { %2559 = vmatpush.bf16.msra.mxu3 %v4037_v56  ;;  %v3873_v56 = vor.u32 %v4328_v32, %v3872_v29  ;;  %v4361_v29 = vld [vmem:[%s6160_s7 + $0x324] sm:$0xf0]  ;;  %v4357_v32 = vld [vmem:[%s6160_s7 + $0x30c] sm:$0xf] }
  0x9f   : > { %2518 = vmatpush.bf16.msra.mxu0 %v3745_v54  ;;  %v5406_v42 = vpop.f32.mrf.mxu0  ;;  %v3849_v54 = vor.u32 %v4321_v39, %v3848_v38  ;;  %v4009_v36 = vor.u32 %v4361_v29, %v4008_v27  ;;  %v3720_v39 = vld [vmem:[%s6160_s7 + $0xc8] sm:$0xf]  ;;  %v4261_v29 = vld [vmem:[%s6160_s7 + $0xc] sm:$0xf] }
  0xa0   : > { %2532 = vmatpush.bf16.msra.mxu1 %v4001_v55  ;;  %2546 = vmatpush.bf16.msra.mxu2 %v3749_v57  ;;  %v5417_v47 = vpop.f32.mrf.mxu1  ;;  %v1742_v55 = vld [vmem:[%s564_s22 + $0x8] sm:$0xff]  ;;  %v1744_v57 = vld [vmem:[%s564_s22 + $0x18] sm:$0xff]  ;;  %v3721_v51 = vor.u32 %v4289_v40, %v3720_v39  ;;  %v4386_v40 = vld [vmem:[%s6160_s7 + $0x3ec] sm:$0xf0] }
  0xa1   : > { %v3880_v27 = vld [vmem:[%s6160_s7 + $0x208] sm:$0xf] }
  0xa2   : > { %2560 = vmatpush.bf16.msra.mxu3 %v4005_v61  ;;  %v4313_v61 = vld [vmem:[%s6160_s7 + $0x1a4] sm:$0xf0] }
  0xa3   : > { %2519 = vmatpush.bf16.msra.mxu0 %v3713_v4  ;;  %v3818_v4 = vld [vmem:[%s6160_s7 + $0x1a8] sm:$0xf0]  ;;  %v3817_v7 = vor.u32 %v4313_v61, %v3816_v60  ;;  %v4345_v60 = vld [vmem:[%s6160_s7 + $0x2a4] sm:$0xf0] }
  0xa4   : > { %2533 = vmatpush.bf16.msra.mxu1 %v3969_v5  ;;  %2547 = vmatpush.bf16.msra.mxu2 %v3717_v48  ;;  %v5442_v5 = vpack.c.bf16 %v1744_v57, %v1742_v55  ;;  %v4373_v48 = vld [vmem:[%s6160_s7 + $0x38c] sm:$0xf]  ;;  %v3821_v10 = vor.u32 %v4309_v3, %v3818_v4  ;;  %v3688_v55 = vld [vmem:[%s6160_s7 + $0x88] sm:$0xf] }
  0xa5   : > { %v4281_v57 = vld [vmem:[%s6160_s7 + $0xa4] sm:$0xf0]  ;;  %v4277_v61 = vld [vmem:[%s6160_s7 + $0x8c] sm:$0xf] }
  0xa6   : > { %2561 = vmatpush.bf16.msra.mxu3 %v3973_v9  ;;  %v4073_v9 = vor.u32 %v4377_v2, %v4072_v62  ;;  %v3690_v62 = vld [vmem:[%s6160_s7 + $0xa8] sm:$0xf0]  ;;  %v3689_v3 = vor.u32 %v4281_v57, %v3688_v55 }
  0xa7   : > { %2520 = vmatpush.bf16.msra.mxu0 %v3681_v15  ;;  %v5463_v15 = vpop.f32.mrf.mxu0  ;;  %v3946_v2 = vld [vmem:[%s6160_s7 + $0x2a8] sm:$0xf0] }
  0xa8   : > { %2534 = vmatpush.bf16.msra.mxu1 %v3937_v16  ;;  %2548 = vmatpush.bf16.msra.mxu2 %v3685_v17  ;;  %v5450_v8 = vpop.f32.mrf.mxu2  ;;  %v5452_v11 = vpop.f32.mrf.mxu3  ;;  %v4077_v16 = vor.u32 %v4373_v48, %v4074_v6  ;;  %v4369_v17 = vld [vmem:[%s6160_s7 + $0x364] sm:$0xf0]  ;;  %v3693_v48 = vor.u32 %v4277_v61, %v3690_v62  ;;  %v4080_v61 = vld [vmem:[%s6160_s7 + $0x390] sm:$0xf] }
  0xa9   : > { %v5475_v20 = vpop.f32.mrf.mxu1  ;;  %v4041_v24 = vor.u32 %v4369_v17, %v4040_v14  ;;  %v3656_v6 = vld [vmem:[%s6160_s7 + $0x48] sm:$0xf]  ;;  %v4269_v14 = vld [vmem:[%s6160_s7 + $0x4c] sm:$0xf] }
  0xaa   : > { %2562 = vmatpush.bf16.msra.mxu3 %v3941_v21  ;;  %v4365_v21 = vld [vmem:[%s6160_s7 + $0x34c] sm:$0xf] }
  0xab   : > { %2521 = vmatpush.bf16.msra.mxu0 %v3649_v26  ;;  %v4297_v26 = vld [vmem:[%s6160_s7 + $0x124] sm:$0xf0]  ;;  %v4045_v28 = vor.u32 %v4365_v21, %v4042_v22 }
  0xac   : > { %2535 = vmatpush.bf16.msra.mxu1 %v3905_v30  ;;  %2549 = vmatpush.bf16.msra.mxu2 %v3653_v31  ;;  %v4293_v30 = vld [vmem:[%s6160_s7 + $0x10c] sm:$0xf]  ;;  %v3753_v34 = vor.u32 %v4297_v26, %v3752_v25 }
  0xad   : > { %v3754_v31 = vld [vmem:[%s6160_s7 + $0x128] sm:$0xf0] }
  0xae   : > { %2563 = vmatpush.bf16.msra.mxu3 %v3909_v35  ;;  %v3757_v37 = vor.u32 %v4293_v30, %v3754_v31  ;;  %v3917_v30 = vor.u32 %v4333_v18, %v3914_v19  ;;  %v3626_v31 = vld [vmem:[%s6160_s7 + $0x28] sm:$0xf0]  ;;  %v4370_v19 = vld [vmem:[%s6160_s7 + $0x36c] sm:$0xf0] }
  0xaf   : > { %2522 = vmatpush.bf16.msra.mxu0 %v3617_v43  ;;  %v4013_v43 = vor.u32 %v4357_v32, %v4010_v33  ;;  %v5538_v50 = vpop.f32.mrf.mxu0  ;;  %v4325_v32 = vld [vmem:[%s6160_s7 + $0x20c] sm:$0xf] }
  0xb0   : > { %2536 = vmatpush.bf16.msra.mxu1 %v3873_v56  ;;  %2550 = vmatpush.bf16.msra.mxu2 %v3621_v49  ;;  %v5510_v35 = vpop.f32.mrf.mxu2  ;;  %v5512_v38 = vpop.f32.mrf.mxu3  ;;  %v4349_v56 = vld [vmem:[%s6160_s7 + $0x2cc] sm:$0xf] }
  0xb1   : > { %v3978_v49 = vld [vmem:[%s6160_s7 + $0x2e8] sm:$0xf0]  ;;  %v5540_v52 = vpop.f32.mrf.mxu1 }
  0xb2   : > { %2564 = vmatpush.bf16.msra.mxu3 %v3877_v53  ;;  %2523 = vmatmul.bf16.vlgmr.msra.gmra.mxu0 %v5431_v0  ;;  %v3977_v53 = vor.u32 %v4353_v44, %v3976_v41  ;;  %v3882_v33 = vld [vmem:[%s6160_s7 + $0x228] sm:$0xf0]  ;;  %v4318_v41 = vld [vmem:[%s6160_s7 + $0x1d4] sm:$0xf] }
  0xb3   : > { %2571 = vmatpush.bf16.msrb.mxu0 %v3849_v54  ;;  %2537 = vmatmul.bf16.vlgmr.msra.gmra.mxu1 %v5442_v5  ;;  %v3725_v54 = vor.u32 %v4285_v45, %v3722_v46  ;;  %v3629_v45 = vor.u32 %v4261_v29, %v3626_v31  ;;  %v4382_v46 = vld [vmem:[%s6160_s7 + $0x3d4] sm:$0xf] }
  0xb4   : > { %2585 = vmatpush.bf16.msrb.mxu1 %v4105_v58  ;;  %2599 = vmatpush.bf16.msrb.mxu2 %v3853_v59  ;;  %v3944_v58 = vld [vmem:[%s6160_s7 + $0x288] sm:$0xf]  ;;  %v3981_v59 = vor.u32 %v4349_v56, %v3978_v49  ;;  %v4114_v56 = vld [vmem:[%s6160_s7 + $0x3f0] sm:$0xf0]  ;;  %v3885_v49 = vor.u32 %v4325_v32, %v3882_v33  ;;  %v3760_v33 = vld [vmem:[%s6160_s7 + $0x110] sm:$0xf] }
  0xb5   : > { %2551 = vmatmul.bf16.vlgmr.msra.gmra.mxu2 %v5431_v0  ;;  %2565 = vmatmul.bf16.vlgmr.msra.gmra.mxu3 %v5442_v5  ;;  %v3945_v4 = vor.u32 %v4345_v60, %v3944_v58  ;;  %v4314_v60 = vld [vmem:[%s6160_s7 + $0x1ac] sm:$0xf0]  ;;  %v4117_v62 = vor.u32 %v4382_v46, %v4114_v56 }
  0xb6   : > { %2613 = vmatpush.bf16.msrb.mxu3 %v4109_v63  ;;  %v4341_v63 = vld [vmem:[%s6160_s7 + $0x28c] sm:$0xf] }
  0xb7   : > { %2572 = vmatpush.bf16.msrb.mxu0 %v3817_v7  ;;  %v4273_v7 = vld [vmem:[%s6160_s7 + $0x64] sm:$0xf0]  ;;  %v5594_v21 = vpop.f32.mrf.mxu0 }
  0xb8   : > { %2586 = vmatpush.bf16.msrb.mxu1 %v4073_v9  ;;  %2600 = vmatpush.bf16.msrb.mxu2 %v3821_v10  ;;  %v3912_v9 = vld [vmem:[%s6160_s7 + $0x248] sm:$0xf]  ;;  %v3949_v10 = vor.u32 %v4341_v63, %v3946_v2  ;;  %v5575_v12 = vpop.f32.mrf.mxu2  ;;  %v5586_v17 = vpop.f32.mrf.mxu3  ;;  %v3657_v22 = vor.u32 %v4273_v7, %v3656_v6  ;;  %v4082_v7 = vld [vmem:[%s6160_s7 + $0x3b0] sm:$0xf0] }
  0xb9   : > { %v3913_v25 = vor.u32 %v4337_v13, %v3912_v9 }
  0xba   : > { %2614 = vmatpush.bf16.msrb.mxu3 %v4077_v16  ;;  %v3658_v16 = vld [vmem:[%s6160_s7 + $0x68] sm:$0xf0] }
  0xbb   : > { %2573 = vmatpush.bf16.msrb.mxu0 %v3785_v23  ;;  %v5596_v23 = vpop.f32.mrf.mxu1  ;;  %v3661_v26 = vor.u32 %v4269_v14, %v3658_v16  ;;  %v4306_v14 = vld [vmem:[%s6160_s7 + $0x16c] sm:$0xf0] }
  0xbc   : > { %2587 = vmatpush.bf16.msrb.mxu1 %v4041_v24  ;;  %2601 = vmatpush.bf16.msrb.mxu2 %v3789_v1  ;;  %v3624_v24 = vld [vmem:[%s6160_s7 + $0x8] sm:$0xf]  ;;  %v4048_v16 = vld [vmem:[%s6160_s7 + $0x350] sm:$0xf] }
  0xbd   : > { %v4265_v1 = vld [vmem:[%s6160_s7 + $0x24] sm:$0xf0] }
  0xbe   : > { %2615 = vmatpush.bf16.msrb.mxu3 %v4045_v28  ;;  %v4329_v28 = vld [vmem:[%s6160_s7 + $0x224] sm:$0xf0]  ;;  %v3625_v39 = vor.u32 %v4265_v1, %v3624_v24  ;;  %v3794_v24 = vld [vmem:[%s6160_s7 + $0x170] sm:$0xf0] }
  0xbf   : > { %2574 = vmatpush.bf16.msrb.mxu0 %v3753_v34  ;;  %v3856_v34 = vld [vmem:[%s6160_s7 + $0x1d0] sm:$0xf]  ;;  %v3881_v44 = vor.u32 %v4329_v28, %v3880_v27  ;;  %v1123_v58 = vpop.f32.mrf.mxu0  ;;  %v4366_v1 = vld [vmem:[%s6160_s7 + $0x354] sm:$0xf]  ;;  %v4049_v28 = vor.u32 %v4370_v19, %v4048_v16 }
  0xc0   : > { %2588 = vmatpush.bf16.msrb.mxu1 %v4009_v36  ;;  %2602 = vmatpush.bf16.msrb.mxu2 %v3757_v37  ;;  %v4322_v36 = vld [vmem:[%s6160_s7 + $0x1ec] sm:$0xf0]  ;;  %v5648_v57 = vpop.f32.mrf.mxu3  ;;  %v5660_v63 = vadd.f32 %v1123_v58, %v5406_v42  ;;  %v4374_v42 = vld [vmem:[%s6160_s7 + $0x394] sm:$0xf] }
  0xc1   : > { %v4112_v37 = vld [vmem:[%s6160_s7 + $0x3d0] sm:$0xf]  ;;  %v4085_v18 = vor.u32 %v4374_v42, %v4082_v7  ;;  %v4278_v16 = vld [vmem:[%s6160_s7 + $0x94] sm:$0xf] }
  0xc2   : > { %2616 = vmatpush.bf16.msrb.mxu3 %v4013_v43  ;;  %v3858_v43 = vld [vmem:[%s6160_s7 + $0x1f0] sm:$0xf0]  ;;  %v4354_v58 = vld [vmem:[%s6160_s7 + $0x2ec] sm:$0xf0] }
  0xc3   : > { %2575 = vmatpush.bf16.msrb.mxu0 %v3721_v51  ;;  %v3857_v51 = vor.u32 %v4322_v36, %v3856_v34  ;;  %v3861_v55 = vor.u32 %v4318_v41, %v3858_v43  ;;  %v1137_v2 = vpop.f32.mrf.mxu1  ;;  %v4298_v34 = vld [vmem:[%s6160_s7 + $0x12c] sm:$0xf0]  ;;  %v4294_v43 = vld [vmem:[%s6160_s7 + $0x114] sm:$0xf] }
  0xc4   : > { %2589 = vmatpush.bf16.msrb.mxu1 %v3977_v53  ;;  %2603 = vmatpush.bf16.msrb.mxu2 %v3725_v54  ;;  %v5646_v53 = vpop.f32.mrf.mxu2  ;;  %v4113_v54 = vor.u32 %v4386_v40, %v4112_v37  ;;  %v5672_v6 = vadd.f32 %v1137_v2, %v5417_v47  ;;  %v3792_v47 = vld [vmem:[%s6160_s7 + $0x150] sm:$0xf]  ;;  %v3761_v46 = vor.u32 %v4298_v34, %v3760_v33  ;;  %v4270_v33 = vld [vmem:[%s6160_s7 + $0x54] sm:$0xf] }
  0xc5   : > { %v4016_v36 = vld [vmem:[%s6160_s7 + $0x310] sm:$0xf]  ;;  %v3666_v34 = vld [vmem:[%s6160_s7 + $0x70] sm:$0xf0] }
  0xc6   : > { %2617 = vmatpush.bf16.msrb.mxu3 %v3981_v59  ;;  %v3824_v59 = vld [vmem:[%s6160_s7 + $0x190] sm:$0xf] }
  0xc7   : > { %2576 = vmatpush.bf16.msrb.mxu0 %v3689_v3  ;;  %v4378_v3 = vld [vmem:[%s6160_s7 + $0x3ac] sm:$0xf0]  ;;  %v3825_v9 = vor.u32 %v4314_v60, %v3824_v59  ;;  %v1125_v32 = vpop.f32.mrf.mxu0  ;;  %v4286_v59 = vld [vmem:[%s6160_s7 + $0xd4] sm:$0xf] }
  0xc8   : > { %2590 = vmatpush.bf16.msrb.mxu1 %v3945_v4  ;;  %2604 = vmatpush.bf16.msrb.mxu2 %v3693_v48  ;;  %v4310_v4 = vld [vmem:[%s6160_s7 + $0x194] sm:$0xf]  ;;  %v1165_v31 = vpop.f32.mrf.mxu3  ;;  %v4362_v41 = vld [vmem:[%s6160_s7 + $0x32c] sm:$0xf0] }
  0xc9   : > { %v3826_v48 = vld [vmem:[%s6160_s7 + $0x1b0] sm:$0xf0]  ;;  %v4017_v56 = vor.u32 %v4362_v41, %v4016_v36  ;;  %v3632_v41 = vld [vmem:[%s6160_s7 + $0x10] sm:$0xf] }
  0xca   : > { %2618 = vmatpush.bf16.msrb.mxu3 %v3949_v10  ;;  %v4081_v10 = vor.u32 %v4378_v3, %v4080_v61  ;;  %v3829_v13 = vor.u32 %v4310_v4, %v3826_v48  ;;  %v3730_v60 = vld [vmem:[%s6160_s7 + $0xf0] sm:$0xf0] }
  0xcb   : > { %2577 = vmatpush.bf16.msrb.mxu0 %v3657_v22  ;;  %v4302_v22 = vld [vmem:[%s6160_s7 + $0x154] sm:$0xf]  ;;  %v1139_v40 = vpop.f32.mrf.mxu1  ;;  %v3733_v48 = vor.u32 %v4286_v59, %v3730_v60 }
  0xcc   : > { %2591 = vmatpush.bf16.msrb.mxu1 %v3913_v25  ;;  %2605 = vmatpush.bf16.msrb.mxu2 %v3661_v26  ;;  %v4050_v25 = vld [vmem:[%s6160_s7 + $0x370] sm:$0xf0]  ;;  %v3793_v26 = vor.u32 %v4306_v14, %v3792_v47  ;;  %v1151_v27 = vpop.f32.mrf.mxu2  ;;  %v3797_v29 = vor.u32 %v4302_v22, %v3794_v24 }
  0xcd   : > { %v4053_v37 = vor.u32 %v4366_v1, %v4050_v25  ;;  %v4350_v61 = vld [vmem:[%s6160_s7 + $0x2d4] sm:$0xf] }
  0xce   : > { %2619 = vmatpush.bf16.msrb.mxu3 %v3917_v30  ;;  %v5709_v30 = vadd.f32 %v1151_v27, %v5450_v8  ;;  %v5724_v8 = vadd.f32 %v1125_v32, %v5463_v15  ;;  %v4018_v15 = vld [vmem:[%s6160_s7 + $0x330] sm:$0xf0] }
  0xcf   : > { %2578 = vmatpush.bf16.msrb.mxu0 %v3625_v39  ;;  %v5721_v39 = vadd.f32 %v1165_v31, %v5452_v11  ;;  %v4358_v11 = vld [vmem:[%s6160_s7 + $0x314] sm:$0xf]  ;;  %v1179_v19 = vpop.f32.mrf.mxu0  ;;  %v4274_v31 = vld [vmem:[%s6160_s7 + $0x6c] sm:$0xf0] }
  0xd0   : > { %2592 = vmatpush.bf16.msrb.mxu1 %v3881_v44  ;;  %2606 = vmatpush.bf16.msrb.mxu2 %v3629_v45  ;;  %v3762_v44 = vld [vmem:[%s6160_s7 + $0x130] sm:$0xf0]  ;;  %v5736_v45 = vadd.f32 %v1139_v40, %v5475_v20  ;;  %v4290_v20 = vld [vmem:[%s6160_s7 + $0xec] sm:$0xf0]  ;;  %v1167_v7 = vpop.f32.mrf.mxu3  ;;  %v5799_v24 = vadd.f32 %v1179_v19, %v5538_v50 }
  0xd1   : > { %v5781_v14 = vadd.f32 %v1167_v7, %v5512_v38  ;;  %v4342_v22 = vld [vmem:[%s6160_s7 + $0x294] sm:$0xf]  ;;  %v3920_v50 = vld [vmem:[%s6160_s7 + $0x250] sm:$0xf]  ;;  %v4387_v7 = vld [vmem:[%s6160_s7 + $0x3f4] sm:$0xf0] }
  0xd2   : > { %2620 = vmatpush.bf16.msrb.mxu3 %v3885_v49  ;;  %2579 = vmatmul.bf16.vlgmr.msrb.gmra.mxu0 %v5431_v0  ;;  %v3765_v49 = vor.u32 %v4294_v43, %v3762_v44  ;;  %v3954_v38 = vld [vmem:[%s6160_s7 + $0x2b0] sm:$0xf0]  ;;  %v4266_v43 = vld [vmem:[%s6160_s7 + $0x2c] sm:$0xf0] }
  0xd3   : > { %2627 = vmatpush.bf16.msra.mxu0 %v3857_v51  ;;  %2593 = vmatmul.bf16.vlgmr.msrb.gmra.mxu1 %v5442_v5  ;;  %v3728_v51 = vld [vmem:[%s6160_s7 + $0xd0] sm:$0xf]  ;;  %v1193_v1 = vpop.f32.mrf.mxu1  ;;  %v3957_v32 = vor.u32 %v4342_v22, %v3954_v38  ;;  %v4334_v36 = vld [vmem:[%s6160_s7 + $0x254] sm:$0xf]  ;;  %v4315_v38 = vld [vmem:[%s6160_s7 + $0x1b4] sm:$0xf0] }
  0xd4   : > { %2641 = vmatpush.bf16.msra.mxu1 %v4113_v54  ;;  %2655 = vmatpush.bf16.msra.mxu2 %v3861_v55  ;;  %v3984_v54 = vld [vmem:[%s6160_s7 + $0x2d0] sm:$0xf]  ;;  %v4021_v55 = vor.u32 %v4358_v11, %v4018_v15  ;;  %v3729_v2 = vor.u32 %v4290_v20, %v3728_v51  ;;  %v1153_v3 = vpop.f32.mrf.mxu2  ;;  %v3669_v11 = vor.u32 %v4270_v33, %v3666_v34  ;;  %v3634_v20 = vld [vmem:[%s6160_s7 + $0x30] sm:$0xf0] }
  0xd5   : > { %2607 = vmatmul.bf16.vlgmr.msrb.gmra.mxu2 %v5431_v0  ;;  %2621 = vmatmul.bf16.vlgmr.msrb.gmra.mxu3 %v5442_v5  ;;  %v3985_v4 = vor.u32 %v4354_v58, %v3984_v54  ;;  %v5769_v42 = vadd.f32 %v1153_v3, %v5510_v35  ;;  %v4346_v35 = vld [vmem:[%s6160_s7 + $0x2ac] sm:$0xf0]  ;;  %v4326_v54 = vld [vmem:[%s6160_s7 + $0x214] sm:$0xf] }
  0xd6   : > { %2669 = vmatpush.bf16.msra.mxu3 %v4117_v62  ;;  %v3986_v62 = vld [vmem:[%s6160_s7 + $0x2f0] sm:$0xf0]  ;;  %v3888_v15 = vld [vmem:[%s6160_s7 + $0x210] sm:$0xf] }
  0xd7   : > { %2628 = vmatpush.bf16.msra.mxu0 %v3825_v9  ;;  %v3696_v9 = vld [vmem:[%s6160_s7 + $0x90] sm:$0xf]  ;;  %v3989_v47 = vor.u32 %v4350_v61, %v3986_v62  ;;  %v1181_v60 = vpop.f32.mrf.mxu0  ;;  %v3864_v61 = vld [vmem:[%s6160_s7 + $0x1d8] sm:$0xf] }
  0xd8   : > { %2642 = vmatpush.bf16.msra.mxu1 %v4081_v10  ;;  %2656 = vmatpush.bf16.msra.mxu2 %v3829_v13  ;;  %v4282_v10 = vld [vmem:[%s6160_s7 + $0xac] sm:$0xf0]  ;;  %v1221_v59 = vpop.f32.mrf.mxu3  ;;  %v4323_v62 = vld [vmem:[%s6160_s7 + $0x1f4] sm:$0xf0] }
  0xd9   : > { %v3952_v13 = vld [vmem:[%s6160_s7 + $0x290] sm:$0xf]  ;;  %v3697_v25 = vor.u32 %v4282_v10, %v3696_v9  ;;  %v5865_v3 = vadd.f32 %v1221_v59, %v5586_v17  ;;  %v4319_v9 = vld [vmem:[%s6160_s7 + $0x1dc] sm:$0xf]  ;;  %v4024_v59 = vld [vmem:[%s6160_s7 + $0x318] sm:$0xf] }
  0xda   : > { %2670 = vmatpush.bf16.msra.mxu3 %v4085_v18  ;;  %v3698_v18 = vld [vmem:[%s6160_s7 + $0xb0] sm:$0xf0]  ;;  %v3953_v27 = vor.u32 %v4346_v35, %v3952_v13  ;;  %v3866_v10 = vld [vmem:[%s6160_s7 + $0x1f8] sm:$0xf0] }
  0xdb   : > { %2629 = vmatpush.bf16.msra.mxu0 %v3793_v26  ;;  %v5802_v26 = vadd.f32 %v1193_v1, %v5540_v52  ;;  %v4338_v52 = vld [vmem:[%s6160_s7 + $0x26c] sm:$0xf0]  ;;  %v4122_v35 = vld [vmem:[%s6160_s7 + $0x3f8] sm:$0xf0]  ;;  %v3869_v22 = vor.u32 %v4319_v9, %v3866_v10  ;;  %v4088_v1 = vld [vmem:[%s6160_s7 + $0x398] sm:$0xf] }
  0xdc   : > { %2643 = vmatpush.bf16.msra.mxu1 %v4049_v28  ;;  %2657 = vmatpush.bf16.msra.mxu2 %v3797_v29  ;;  %v3701_v28 = vor.u32 %v4278_v16, %v3698_v18  ;;  %v3664_v29 = vld [vmem:[%s6160_s7 + $0x50] sm:$0xf]  ;;  %v3921_v44 = vor.u32 %v4338_v52, %v3920_v50  ;;  %v1207_v51 = vpop.f32.mrf.mxu2  ;;  %v3865_v18 = vor.u32 %v4323_v62, %v3864_v61  ;;  %v4090_v50 = vld [vmem:[%s6160_s7 + $0x3b8] sm:$0xf0]  ;;  %v4363_v61 = vld [vmem:[%s6160_s7 + $0x334] sm:$0xf0] }
  0xdd   : > { %v3665_v40 = vor.u32 %v4274_v31, %v3664_v29  ;;  %v5853_v58 = vadd.f32 %v1207_v51, %v5575_v12  ;;  %v5868_v12 = vadd.f32 %v1181_v60, %v5594_v21  ;;  %v3834_v29 = vld [vmem:[%s6160_s7 + $0x1b8] sm:$0xf0] }
  0xde   : > { %2671 = vmatpush.bf16.msra.mxu3 %v4053_v37  ;;  %v3922_v37 = vld [vmem:[%s6160_s7 + $0x270] sm:$0xf0]  ;;  %v4375_v31 = vld [vmem:[%s6160_s7 + $0x39c] sm:$0xf] }
  0xdf   : > { %2630 = vmatpush.bf16.msra.mxu0 %v3761_v46  ;;  %v4330_v46 = vld [vmem:[%s6160_s7 + $0x22c] sm:$0xf0]  ;;  %v4295_v62 = vld [vmem:[%s6160_s7 + $0x11c] sm:$0xf] }
  0xe0   : > { %2644 = vmatpush.bf16.msra.mxu1 %v4017_v56  ;;  %2658 = vmatpush.bf16.msra.mxu2 %v3765_v49  ;;  %v4262_v56 = vld [vmem:[%s6160_s7 + $0x14] sm:$0xf]  ;;  %v3925_v49 = vor.u32 %v4334_v36, %v3922_v37  ;;  %v3889_v21 = vor.u32 %v4330_v46, %v3888_v15  ;;  %v1223_v37 = vpop.f32.mrf.mxu3  ;;  %v4303_v15 = vld [vmem:[%s6160_s7 + $0x15c] sm:$0xf] }
  0xe1   : > { %v3637_v13 = vor.u32 %v4262_v56, %v3634_v20  ;;  %v3802_v46 = vld [vmem:[%s6160_s7 + $0x178] sm:$0xf0] }
  0xe2   : > { %2672 = vmatpush.bf16.msra.mxu3 %v4021_v55  ;;  %v3890_v55 = vld [vmem:[%s6160_s7 + $0x230] sm:$0xf0]  ;;  %v4058_v56 = vld [vmem:[%s6160_s7 + $0x378] sm:$0xf0]  ;;  %v3805_v20 = vor.u32 %v4303_v15, %v3802_v46 }
  0xe3   : > { %2631 = vmatpush.bf16.msra.mxu0 %v3729_v2  ;;  %v4120_v2 = vld [vmem:[%s6160_s7 + $0x3d8] sm:$0xf]  ;;  %v3893_v16 = vor.u32 %v4326_v54, %v3890_v55 }
  0xe4   : > { %2645 = vmatpush.bf16.msra.mxu1 %v3985_v4  ;;  %2659 = vmatpush.bf16.msra.mxu2 %v3733_v48  ;;  %v1195_v4 = vpop.f32.mrf.mxu1  ;;  %v3633_v48 = vor.u32 %v4266_v43, %v3632_v41  ;;  %v4121_v19 = vor.u32 %v4387_v7, %v4120_v2  ;;  %v1209_v52 = vpop.f32.mrf.mxu2  ;;  %v4307_v41 = vld [vmem:[%s6160_s7 + $0x174] sm:$0xf0]  ;;  %v3770_v2 = vld [vmem:[%s6160_s7 + $0x138] sm:$0xf0] }
  0xe5   : > { %v5880_v17 = vadd.f32 %v1195_v4, %v5596_v23  ;;  %v3832_v23 = vld [vmem:[%s6160_s7 + $0x198] sm:$0xf]  ;;  %v5913_v36 = vadd.f32 %v1209_v52, %v5646_v53  ;;  %v5926_v53 = vadd.f32 %v1223_v37, %v5648_v57  ;;  %v4367_v57 = vld [vmem:[%s6160_s7 + $0x35c] sm:$0xf] }
  0xe6   : > { %2673 = vmatpush.bf16.msra.mxu3 %v3989_v47  ;;  %v4383_v47 = vld [vmem:[%s6160_s7 + $0x3dc] sm:$0xf]  ;;  %v4056_v43 = vld [vmem:[%s6160_s7 + $0x358] sm:$0xf]  ;;  %v4061_v60 = vor.u32 %v4367_v57, %v4058_v56 }
  0xe7   : > { %2632 = vmatpush.bf16.msra.mxu0 %v3697_v25  ;;  %v4125_v25 = vor.u32 %v4383_v47, %v4122_v35  ;;  %v3768_v54 = vld [vmem:[%s6160_s7 + $0x118] sm:$0xf]  ;;  %v4026_v7 = vld [vmem:[%s6160_s7 + $0x338] sm:$0xf0]  ;;  %v4025_v47 = vor.u32 %v4363_v61, %v4024_v59  ;;  %v3773_v35 = vor.u32 %v4295_v62, %v3770_v2 }
  0xe8   : > { %2646 = vmatpush.bf16.msra.mxu1 %v3953_v27  ;;  %2660 = vmatpush.bf16.msra.mxu2 %v3701_v28  ;;  %v4379_v27 = vld [vmem:[%s6160_s7 + $0x3b4] sm:$0xf0]  ;;  %v4311_v28 = vld [vmem:[%s6160_s7 + $0x19c] sm:$0xf] }
  0xe9   : > { %v4089_v33 = vor.u32 %v4379_v27, %v4088_v1  ;;  %v3837_v34 = vor.u32 %v4311_v28, %v3834_v29  ;;  %v4299_v55 = vld [vmem:[%s6160_s7 + $0x134] sm:$0xf0]  ;;  %v3994_v1 = vld [vmem:[%s6160_s7 + $0x2f8] sm:$0xf0] }
  0xea   : > { %2674 = vmatpush.bf16.msra.mxu3 %v3957_v32  ;;  %v3833_v32 = vor.u32 %v4315_v38, %v3832_v23  ;;  %v3738_v23 = vld [vmem:[%s6160_s7 + $0xf8] sm:$0xf0]  ;;  %v3704_v29 = vld [vmem:[%s6160_s7 + $0x98] sm:$0xf] }
  0xeb   : > { %2633 = vmatpush.bf16.msra.mxu0 %v3665_v40  ;;  %v3800_v40 = vld [vmem:[%s6160_s7 + $0x158] sm:$0xf]  ;;  %v4351_v38 = vld [vmem:[%s6160_s7 + $0x2dc] sm:$0xf] }
  0xec   : > { %2647 = vmatpush.bf16.msra.mxu1 %v3921_v44  ;;  %2661 = vmatpush.bf16.msra.mxu2 %v3669_v11  ;;  %v4093_v44 = vor.u32 %v4375_v31, %v4090_v50  ;;  %v4371_v11 = vld [vmem:[%s6160_s7 + $0x374] sm:$0xf0]  ;;  %v3706_v37 = vld [vmem:[%s6160_s7 + $0xb8] sm:$0xf0] }
  0xed   : > { %v4057_v51 = vor.u32 %v4371_v11, %v4056_v43  ;;  %v4283_v31 = vld [vmem:[%s6160_s7 + $0xb4] sm:$0xf0]  ;;  %v3962_v11 = vld [vmem:[%s6160_s7 + $0x2b8] sm:$0xf0] }
  0xee   : > { %2675 = vmatpush.bf16.msra.mxu3 %v3925_v49  ;;  %v3801_v49 = vor.u32 %v4307_v41, %v3800_v40  ;;  %v3960_v50 = vld [vmem:[%s6160_s7 + $0x298] sm:$0xf]  ;;  %v3674_v59 = vld [vmem:[%s6160_s7 + $0x78] sm:$0xf0] }
  0xef   : > { %2634 = vmatpush.bf16.msra.mxu0 %v3633_v48  ;;  %v1622_v4 = vpop.f32.mrf.mxu0  ;;  %v4359_v48 = vld [vmem:[%s6160_s7 + $0x31c] sm:$0xf] }
  0xf0   : > { %2648 = vmatpush.bf16.msra.mxu1 %v3889_v21  ;;  %2662 = vmatpush.bf16.msra.mxu2 %v3637_v13  ;;  %v5971_v9 = vadd.f32 %v1622_v4, %v5660_v63  ;;  %v1636_v10 = vpop.f32.mrf.mxu1  ;;  %v3769_v21 = vor.u32 %v4299_v55, %v3768_v54  ;;  %v3992_v63 = vld [vmem:[%s6160_s7 + $0x2d8] sm:$0xf]  ;;  %v4271_v55 = vld [vmem:[%s6160_s7 + $0x5c] sm:$0xf] }
  0xf1   : > { %v5974_v13 = vadd.f32 %v1636_v10, %v5672_v6  ;;  %v4355_v6 = vld [vmem:[%s6160_s7 + $0x2f4] sm:$0xf0]  ;;  %v3930_v61 = vld [vmem:[%s6160_s7 + $0x278] sm:$0xf0]  ;;  %v3677_v4 = vor.u32 %v4271_v55, %v3674_v59 }
  0xf2   : > { %2676 = vmatpush.bf16.msra.mxu3 %v3893_v16  ;;  %2635 = vmatmul.bf16.vlgmr.msra.gmra.mxu0 %v5431_v0  ;;  %v3736_v16 = vld [vmem:[%s6160_s7 + $0xd8] sm:$0xf]  ;;  %v3993_v27 = vor.u32 %v4355_v6, %v3992_v63  ;;  %v4327_v6 = vld [vmem:[%s6160_s7 + $0x21c] sm:$0xf] }
  0xf3   : > { %2683 = vmatpush.bf16.msrb.mxu0 %v3865_v18  ;;  %2649 = vmatmul.bf16.vlgmr.msra.gmra.mxu1 %v5442_v5  ;;  %v4291_v18 = vld [vmem:[%s6160_s7 + $0xf4] sm:$0xf0] }
  0xf4   : > { %2697 = vmatpush.bf16.msrb.mxu1 %v4121_v19  ;;  %2711 = vmatpush.bf16.msrb.mxu2 %v3869_v22  ;;  %v4029_v19 = vor.u32 %v4359_v48, %v4026_v7  ;;  %v4287_v22 = vld [vmem:[%s6160_s7 + $0xdc] sm:$0xf]  ;;  %v3640_v48 = vld [vmem:[%s6160_s7 + $0x18] sm:$0xf] }
  0xf5   : > { %2663 = vmatmul.bf16.vlgmr.msra.gmra.mxu2 %v5431_v0  ;;  %2677 = vmatmul.bf16.vlgmr.msra.gmra.mxu3 %v5442_v5  ;;  %v3741_v28 = vor.u32 %v4287_v22, %v3738_v23  ;;  %v4267_v7 = vld [vmem:[%s6160_s7 + $0x34] sm:$0xf0]  ;;  %v3898_v22 = vld [vmem:[%s6160_s7 + $0x238] sm:$0xf0] }
  0xf6   : > { %2725 = vmatpush.bf16.msrb.mxu3 %v4125_v25  ;;  %v3737_v25 = vor.u32 %v4291_v18, %v3736_v16  ;;  %v3896_v10 = vld [vmem:[%s6160_s7 + $0x218] sm:$0xf]  ;;  %v4263_v16 = vld [vmem:[%s6160_s7 + $0x1c] sm:$0xf] }
  0xf7   : > { %2684 = vmatpush.bf16.msrb.mxu0 %v3833_v32  ;;  %v3997_v32 = vor.u32 %v4351_v38, %v3994_v1  ;;  %v1624_v43 = vpop.f32.mrf.mxu0  ;;  %v3642_v18 = vld [vmem:[%s6160_s7 + $0x38] sm:$0xf0]  ;;  %v3641_v38 = vor.u32 %v4267_v7, %v3640_v48 }
  0xf8   : > { %2698 = vmatpush.bf16.msrb.mxu1 %v4089_v33  ;;  %2712 = vmatpush.bf16.msrb.mxu2 %v3837_v34  ;;  %v1650_v52 = vpop.f32.mrf.mxu2  ;;  %v4347_v33 = vld [vmem:[%s6160_s7 + $0x2b4] sm:$0xf0]  ;;  %v4279_v34 = vld [vmem:[%s6160_s7 + $0x9c] sm:$0xf]  ;;  %v1664_v41 = vpop.f32.mrf.mxu3  ;;  %v6031_v46 = vadd.f32 %v1624_v43, %v5724_v8 }
  0xf9   : > { %v6019_v40 = vadd.f32 %v1650_v52, %v5709_v30  ;;  %v6028_v15 = vadd.f32 %v1664_v41, %v5721_v39  ;;  %v1638_v57 = vpop.f32.mrf.mxu1  ;;  %v3705_v30 = vor.u32 %v4283_v31, %v3704_v29  ;;  %v4275_v39 = vld [vmem:[%s6160_s7 + $0x74] sm:$0xf0] }
  0xfa   : > { %2726 = vmatpush.bf16.msrb.mxu3 %v4093_v44  ;;  %v4343_v44 = vld [vmem:[%s6160_s7 + $0x29c] sm:$0xf]  ;;  %v6034_v56 = vadd.f32 %v1638_v57, %v5736_v45  ;;  %v3928_v8 = vld [vmem:[%s6160_s7 + $0x258] sm:$0xf] }
  0xfb   : > { %2685 = vmatpush.bf16.msrb.mxu0 %v3801_v49  ;;  %v3961_v49 = vor.u32 %v4347_v33, %v3960_v50  ;;  %v3965_v54 = vor.u32 %v4343_v44, %v3962_v11  ;;  %v4339_v45 = vld [vmem:[%s6160_s7 + $0x274] sm:$0xf0] }
  0xfc   : > { %2699 = vmatpush.bf16.msrb.mxu1 %v4057_v51  ;;  %2713 = vmatpush.bf16.msrb.mxu2 %v3805_v20  ;;  %v3709_v51 = vor.u32 %v4279_v34, %v3706_v37  ;;  %v3672_v20 = vld [vmem:[%s6160_s7 + $0x58] sm:$0xf]  ;;  %v3929_v2 = vor.u32 %v4339_v45, %v3928_v8 }
  0xfd   : > { %v3673_v62 = vor.u32 %v4275_v39, %v3672_v20 }
  0xfe   : > { %2727 = vmatpush.bf16.msrb.mxu3 %v4061_v60  ;;  %v4335_v60 = vld [vmem:[%s6160_s7 + $0x25c] sm:$0xf] }
  0xff   : > { %2686 = vmatpush.bf16.msrb.mxu0 %v3769_v21  ;;  %v3933_v21 = vor.u32 %v4335_v60, %v3930_v61 }
 0x100   : > { %2700 = vmatpush.bf16.msrb.mxu1 %v4025_v47  ;;  %2714 = vmatpush.bf16.msrb.mxu2 %v3773_v35  ;;  %v1652_v47 = vpop.f32.mrf.mxu2  ;;  %v4331_v35 = vld [vmem:[%s6160_s7 + $0x234] sm:$0xf0] }
 0x101   : > { %v6079_v63 = vadd.f32 %v1652_v47, %v5769_v42  ;;  %v3897_v1 = vor.u32 %v4331_v35, %v3896_v10  ;;  %v3901_v42 = vor.u32 %v4327_v6, %v3898_v22 }
 0x102   : > { %2728 = vmatpush.bf16.msrb.mxu3 %v4029_v19  ;;  %v1666_v19 = vpop.f32.mrf.mxu3 }
 0x103   : > { %2687 = vmatpush.bf16.msrb.mxu0 %v3737_v25  ;;  %v6088_v23 = vadd.f32 %v1666_v19, %v5781_v14  ;;  %v3645_v25 = vor.u32 %v4263_v16, %v3642_v18 }
 0x104   : > { %2701 = vmatpush.bf16.msrb.mxu1 %v3993_v27  ;;  %2715 = vmatpush.bf16.msrb.mxu2 %v3741_v28 }
 0x106   : > { %2729 = vmatpush.bf16.msrb.mxu3 %v3997_v32 }
 0x107   : > { %2688 = vmatpush.bf16.msrb.mxu0 %v3705_v30 }
 0x108   : > { %2702 = vmatpush.bf16.msrb.mxu1 %v3961_v49  ;;  %2716 = vmatpush.bf16.msrb.mxu2 %v3709_v51 }
 0x10a   : > { %2730 = vmatpush.bf16.msrb.mxu3 %v3965_v54 }
 0x10b   : > { %2689 = vmatpush.bf16.msrb.mxu0 %v3673_v62 }
 0x10c   : > { %2703 = vmatpush.bf16.msrb.mxu1 %v3929_v2  ;;  %2717 = vmatpush.bf16.msrb.mxu2 %v3677_v4 }
 0x10e   : > { %2731 = vmatpush.bf16.msrb.mxu3 %v3933_v21 }
 0x10f   : > { %2690 = vmatpush.bf16.msrb.mxu0 %v3641_v38  ;;  %v1678_v14 = vpop.f32.mrf.mxu0 }
 0x110   : > { %2704 = vmatpush.bf16.msrb.mxu1 %v3897_v1  ;;  %2718 = vmatpush.bf16.msrb.mxu2 %v3645_v25  ;;  %v6095_v27 = vadd.f32 %v1678_v14, %v5799_v24  ;;  %v1692_v28 = vpop.f32.mrf.mxu1 }
 0x111   : > { %v6098_v29 = vadd.f32 %v1692_v28, %v5802_v26 }
 0x112   : > { %2732 = vmatpush.bf16.msrb.mxu3 %v3901_v42  ;;  %2691 = vmatmul.bf16.vlgmr.msrb.gmra.mxu0 %v5431_v0 }
 0x113   : > { %2705 = vmatmul.bf16.vlgmr.msrb.gmra.mxu1 %v5442_v5  ;;  %2719 = vmatmul.bf16.vlgmr.msrb.gmra.mxu2 %v5431_v0 }
 0x115   : > { %2733 = vmatmul.bf16.vlgmr.msrb.gmra.mxu3 %v5442_v5 }
 0x117   : > { %v1680_v52 = vpop.f32.mrf.mxu0 }
 0x118   : > { %v1706_v31 = vpop.f32.mrf.mxu2  ;;  %v1720_v32 = vpop.f32.mrf.mxu3  ;;  %v6107_v0 = vadd.f32 %v1680_v52, %v5868_v12 }
 0x119   : > { %v6101_v50 = vadd.f32 %v1706_v31, %v5853_v58  ;;  %v6104_v33 = vadd.f32 %v1720_v32, %v5865_v3  ;;  %v1694_v5 = vpop.f32.mrf.mxu1 }
 0x11a   : > { %v6110_v24 = vadd.f32 %v1694_v5, %v5880_v17 }
 0x120   : > { %v1708_v34 = vpop.f32.mrf.mxu2  ;;  %v1722_v37 = vpop.f32.mrf.mxu3 }
 0x121   : > { %v6113_v26 = vadd.f32 %v1708_v34, %v5913_v36  ;;  %v6116_v58 = vadd.f32 %v1722_v37, %v5926_v53 }
 0x12f   : > { %v2524_v41 = vpop.f32.mrf.mxu0 }
 0x130   : > { %v2538_v43 = vpop.f32.mrf.mxu1 }
 0x131   : > { %v2539_v3 = vadd.f32 %v2538_v43, %v2524_v41 }
 0x133   : > { %v2739_v49 = vadd.f32 %v2539_v3, %v5971_v9 }
 0x137   : > { %v2526_v57 = vpop.f32.mrf.mxu0 }
 0x138   : > { %v2552_v44 = vpop.f32.mrf.mxu2  ;;  %v2566_v11 = vpop.f32.mrf.mxu3 }
 0x139   : > { %v2540_v12 = vpop.f32.mrf.mxu1  ;;  %v2567_v20 = vadd.f32 %v2566_v11, %v2552_v44 }
 0x13a   : > { %v2541_v30 = vadd.f32 %v2540_v12, %v2526_v57 }
 0x13b   : > { %v2740_v53 = vadd.f32 %v2567_v20, %v5974_v13 }
 0x13c   : > { %v2747_v17 = vadd.f32 %v2541_v30, %v6031_v46 }
 0x13e   : > { %v2756_v51 = vmax.f32 %v2739_v49, %v2747_v17 }
 0x140   : > { %v2554_v36 = vpop.f32.mrf.mxu2  ;;  %v2757_v39 = vrot.slane %v2756_v51, 4  ;;  %v2568_v8 = vpop.f32.mrf.mxu3 }
 0x141   : > { %v2569_v54 = vadd.f32 %v2568_v8, %v2554_v36 }
 0x142   : > { %v2758_v45 = vmax.f32 %v2756_v51, %v2757_v39 }
 0x143   : > { %v2748_v55 = vadd.f32 %v2569_v54, %v6034_v56 }
 0x144   : > { %v2759_v60 = vrot.slane %v2758_v45, 2 }
 0x145   : > { %v2763_v59 = vmax.f32 %v2740_v53, %v2748_v55 }
 0x146   : > { %v2760_v2 = vmax.f32 %v2758_v45, %v2759_v60 }
 0x147   : > { %v2764_v61 = vrot.slane %v2763_v59, 4 }
 0x148   : > { %v2761_v46 = vrot.slane %v2760_v2, 1 }
 0x149   : > { %v2765_v62 = vmax.f32 %v2763_v59, %v2764_v61 }
 0x14a   : > { %v2762_v47 = vmax.f32 %v2760_v2, %v2761_v46 }
 0x14b   : > { %v2766_v4 = vrot.slane %v2765_v62, 2 }
 0x14d   : > { %v2767_v9 = vmax.f32 %v2765_v62, %v2766_v4 }
 0x14f   : > { %v2580_v48 = vpop.f32.mrf.mxu0  ;;  %v2768_v7 = vrot.slane %v2767_v9, 1 }
 0x150   : > { %v2594_v10 = vpop.f32.mrf.mxu1 }
 0x151   : > { %v2769_v21 = vmax.f32 %v2767_v9, %v2768_v7  ;;  %v2595_v18 = vadd.f32 %v2594_v10, %v2580_v48 }
 0x153   : > { %v2820_v35 = vrot.slane %v2769_v21, 7  ;;  %v2741_v38 = vadd.f32 %v2595_v18, %v6019_v40 }
 0x155   : > { %v2828_v16 = vsel %vm2827_vm1, %v2762_v47, %v2820_v35 }
 0x157   : > { %v2582_v56 = vpop.f32.mrf.mxu0 }
 0x158   : > { %v2608_v13 = vpop.f32.mrf.mxu2  ;;  %v2622_v19 = vpop.f32.mrf.mxu3 }
 0x159   : > { %v2596_v6 = vpop.f32.mrf.mxu1  ;;  %v2623_v42 = vadd.f32 %v2622_v19, %v2608_v13 }
 0x15a   : > { %v2597_v22 = vadd.f32 %v2596_v6, %v2582_v56 }
 0x15b   : > { %v2742_v5 = vadd.f32 %v2623_v42, %v6028_v15 }
 0x15c   : > { %v2749_v1 = vadd.f32 %v2597_v22, %v6079_v63 }
 0x15e   : > { %v2770_v25 = vmax.f32 %v2741_v38, %v2749_v1 }
 0x160   : > { %v2610_v14 = vpop.f32.mrf.mxu2  ;;  %v2771_v28 = vrot.slane %v2770_v25, 4  ;;  %v2624_v31 = vpop.f32.mrf.mxu3 }
 0x161   : > { %v2625_v32 = vadd.f32 %v2624_v31, %v2610_v14 }
 0x162   : > { %v2772_v52 = vmax.f32 %v2770_v25, %v2771_v28 }
 0x163   : > { %v2750_v34 = vadd.f32 %v2625_v32, %v6088_v23 }
 0x164   : > { %v2773_v37 = vrot.slane %v2772_v52, 2 }
 0x165   : > { %v2777_v41 = vmax.f32 %v2742_v5, %v2750_v34 }
 0x166   : > { %v2774_v43 = vmax.f32 %v2772_v52, %v2773_v37 }
 0x167   : > { %v2778_v44 = vrot.slane %v2777_v41, 4 }
 0x168   : > { %v2775_v11 = vrot.slane %v2774_v43, 1 }
 0x169   : > { %v2779_v3 = vmax.f32 %v2777_v41, %v2778_v44 }
 0x16a   : > { %v2776_v12 = vmax.f32 %v2774_v43, %v2775_v11 }
 0x16b   : > { %v2780_v40 = vrot.slane %v2779_v3, 2 }
 0x16c   : > { %v2821_v51 = vrot.slane %v2776_v12, 6 }
 0x16d   : > { %v2781_v57 = vmax.f32 %v2779_v3, %v2780_v40 }
 0x16f   : > { %v2636_v63 = vpop.f32.mrf.mxu0  ;;  %v2782_v30 = vrot.slane %v2781_v57, 1 }
 0x170   : > { %v2650_v49 = vpop.f32.mrf.mxu1 }
 0x171   : > { %v2783_v17 = vmax.f32 %v2781_v57, %v2782_v30  ;;  %v2651_v39 = vadd.f32 %v2650_v49, %v2636_v63 }
 0x173   : > { %v2822_v20 = vrot.slane %v2783_v17, 5  ;;  %v2743_v55 = vadd.f32 %v2651_v39, %v6095_v27 }
 0x175   : > { %v2830_v15 = vsel %vm2829_vm2, %v2821_v51, %v2822_v20 }
 0x176   : > { %v6126_v23 = vsel %vm2831_vm3, %v2828_v16, %v2830_v15 }
 0x177   : > { %v2638_v54 = vpop.f32.mrf.mxu0 }
 0x178   : > { %v2664_v36 = vpop.f32.mrf.mxu2  ;;  %v2678_v8 = vpop.f32.mrf.mxu3 }
 0x179   : > { %v2652_v53 = vpop.f32.mrf.mxu1  ;;  %v2679_v61 = vadd.f32 %v2678_v8, %v2664_v36 }
 0x17a   : > { %v2653_v45 = vadd.f32 %v2652_v53, %v2638_v54  ;;  %v2848_v54 = vld [vmem:[%s6161_s8] sm:$0xff] }
 0x17b   : > { %v2744_v46 = vadd.f32 %v2679_v61, %v6098_v29 }
 0x17c   : > { %v2751_v59 = vadd.f32 %v2653_v45, %v6107_v0 }
 0x17e   : > { %v2784_v60 = vmax.f32 %v2743_v55, %v2751_v59 }
 0x180   : > { %v2666_v62 = vpop.f32.mrf.mxu2  ;;  %v2785_v2 = vrot.slane %v2784_v60, 4  ;;  %v2680_v4 = vpop.f32.mrf.mxu3 }
 0x181   : > { %v2681_v9 = vadd.f32 %v2680_v4, %v2666_v62 }
 0x182   : > { %v2786_v48 = vmax.f32 %v2784_v60, %v2785_v2 }
 0x183   : > { %v2752_v7 = vadd.f32 %v2681_v9, %v6110_v24 }
 0x184   : > { %v2787_v10 = vrot.slane %v2786_v48, 2 }
 0x185   : > { %v2791_v21 = vmax.f32 %v2744_v46, %v2752_v7 }
 0x186   : > { %v2788_v47 = vmax.f32 %v2786_v48, %v2787_v10 }
 0x187   : > { %v2792_v35 = vrot.slane %v2791_v21, 4 }
 0x188   : > { %v2789_v13 = vrot.slane %v2788_v47, 1 }
 0x189   : > { %v2793_v16 = vmax.f32 %v2791_v21, %v2792_v35 }
 0x18a   : > { %v2790_v56 = vmax.f32 %v2788_v47, %v2789_v13 }
 0x18b   : > { %v2794_v27 = vrot.slane %v2793_v16, 2 }
 0x18c   : > { %v2823_v38 = vrot.slane %v2790_v56, 4 }
 0x18d   : > { %v2795_v18 = vmax.f32 %v2793_v16, %v2794_v27 }
 0x18f   : > { %v2692_v0 = vpop.f32.mrf.mxu0  ;;  %v2796_v6 = vrot.slane %v2795_v18, 1 }
 0x190   : > { %v2706_v19 = vpop.f32.mrf.mxu1 }
 0x191   : > { %v2797_v22 = vmax.f32 %v2795_v18, %v2796_v6  ;;  %v2707_v42 = vadd.f32 %v2706_v19, %v2692_v0 }
 0x193   : > { %v2824_v1 = vrot.slane %v2797_v22, 3  ;;  %v2745_v32 = vadd.f32 %v2707_v42, %v6101_v50 }
 0x195   : > { %v2834_v29 = vsel %vm2833_vm4, %v2823_v38, %v2824_v1 }
 0x196   : > { %v2720_v25 = vpop.f32.mrf.mxu2 }
 0x197   : > { %v2694_v14 = vpop.f32.mrf.mxu0 }
 0x198   : > { %v2734_v24 = vpop.f32.mrf.mxu3  ;;  %v2708_v28 = vpop.f32.mrf.mxu1 }
 0x199   : > { %v2709_v31 = vadd.f32 %v2708_v28, %v2694_v14  ;;  %v2735_v34 = vadd.f32 %v2734_v24, %v2720_v25 }
 0x19b   : > { %v2753_v52 = vadd.f32 %v2709_v31, %v6113_v26  ;;  %v2746_v11 = vadd.f32 %v2735_v34, %v6104_v33 }
 0x19d   : > { %v2798_v5 = vmax.f32 %v2745_v32, %v2753_v52 }
 0x19e   : > { %v2722_v37 = vpop.f32.mrf.mxu2 }
 0x19f   : > { %v2799_v41 = vrot.slane %v2798_v5, 4 }
 0x1a0   : > { %v2736_v43 = vpop.f32.mrf.mxu3 }
 0x1a1   : > { %v2737_v44 = vadd.f32 %v2736_v43, %v2722_v37  ;;  %v2800_v3 = vmax.f32 %v2798_v5, %v2799_v41 }
 0x1a3   : > { %v2754_v40 = vadd.f32 %v2737_v44, %v6116_v58  ;;  %v2801_v57 = vrot.slane %v2800_v3, 2 }
 0x1a5   : > { %v2805_v63 = vmax.f32 %v2746_v11, %v2754_v40  ;;  %v2802_v12 = vmax.f32 %v2800_v3, %v2801_v57 }
 0x1a7   : > { %v2806_v30 = vrot.slane %v2805_v63, 4  ;;  %v2803_v50 = vrot.slane %v2802_v12, 1 }
 0x1a9   : > { %v2807_v49 = vmax.f32 %v2805_v63, %v2806_v30  ;;  %v2804_v51 = vmax.f32 %v2802_v12, %v2803_v50 }
 0x1ab   : > { %v2808_v17 = vrot.slane %v2807_v49, 2  ;;  %v2825_v36 = vrot.slane %v2804_v51, 2 }
 0x1ad   : > { %v2809_v26 = vmax.f32 %v2807_v49, %v2808_v17 }
 0x1af   : > { %v2810_v20 = vrot.slane %v2809_v26, 1 }
 0x1b1   : > { %v2811_v15 = vmax.f32 %v2809_v26, %v2810_v20 }
 0x1b3   : > { %v2826_v39 = vrot.slane %v2811_v15, 1 }
 0x1b5   : > { %v2836_v33 = vsel %vm2835_vm5, %v2825_v36, %v2826_v39 }
 0x1b6   : > { %v2838_v8 = vsel %vm2837_vm6, %v2834_v29, %v2836_v33 }
 0x1b7   : > { %v2840_v58 = vsel %vm2839_vm7, %v6126_v23, %v2838_v8 }
 0x1b8   : > { %v2849_v53 = vadd.f32 %v2848_v54, %v2840_v58 }
 0x1ba   : > { %vm2850_vm8 = vcmp.gt.f32.partialorder %v2849_v53, 0.0  ;;  %v2851_v45 = vmul.f32 0.2, %v2849_v53 }
 0x1bc   : > { %v2852_v55 = vsel %vm2850_vm8, %v2849_v53, %v2851_v45 }
 0x1bd   : > { %2853 = vst [vmem:[%s597_s19] sm:$0xff] %v2852_v55 }
 0x1be PF: > { %s20_s11 = sadd.s32 1, %s4482_s11   ;;  %s6163_s30 = smov %s4478_s10 }
 0x1bf   : > { %p17_p8 = scmp.ge.s32.totalorder %s20_s11, 4   ;;  %s6164_s10 = smov %s6166_s13 }
 0x1c1   :  { %19 = sbr.rel (!%p17_p8) target bundleno = 2 (0x2), region = 121 }
 0x1c6   :  { %2882 = vsyncpa [#allocation3], 1 }
 0x1c7   :  { %2884 = vsyncpa [#allocation3 + $0x1], 1 }

// kernel: dgcnn_forward.19
= control target key start
LH: loop header
LB: loop body
LE: loop exit
PB: predicated region body
PF: predicated region fallthrough
CT: control target
= control target key end

     0   :  { %12 = vsyncpa [#allocation3], 0  ;;  %s6205_s0 = inlined_call_operand.vmem [shape: bf16[2,1024], index: 0, kind: input, shape index: {}]   ;;  %s6206_s1 = inlined_call_operand.vmem [shape: bf16[1024,512], index: 1, kind: input, shape index: {}]   ;;  %s6207_s2 = inlined_call_operand.vmem [shape: f32[1,512], index: 2, kind: input, shape index: {}]   ;;  %s6208_s3 = inlined_call_operand.hbm [shape: bf16[512,256], index: 3, kind: input, shape index: {}]   ;;  %s6209_s4 = inlined_call_operand.vmem [shape: f32[1,256], index: 4, kind: input, shape index: {}]   ;;  %s6210_s5 = inlined_call_operand.vmem [shape: bf16[256,10], index: 5, kind: input, shape index: {}]   ;;  %s6211_s6 = inlined_call_operand.vmem [shape: f32[1,10], index: 6, kind: input, shape index: {}]   ;;  %s6212_s7 = inlined_call_operand.hbm [shape: f32[2,10], index: 7, kind: output, shape index: {}]  }
   0x1   :  { %13 = vsyncpa [#allocation4], 0  ;;  %s24_s26 = sshll.u32 %s6208_s3, 4  ;;  %s4465_s27 = smov [#allocation2]   ;;  %s25_s26 = int_to_ptr.hbm [resolvable:$true] %s24_s26 }
   0x2   :  { %s26_s28 = sshll.u32 %s4465_s27, 4  ;;  %s4466_s29 = smov 128   ;;  %s27_s28 = int_to_ptr.vmem [resolvable:$true] %s26_s28 }
   0x3   :  { %s4467_s30 = smov 8  }
   0x4   :  { %32 = dma.hbm_to_vmem [thread:$0]  %s25_s26, 8192, %s27_s28, [#allocation3], %s4466_s29, %s4466_s29, %s4467_s30  }
   0x5   :  { %4461 = dma.done.wait [#allocation3], 8192  }
   0x6   :  { %4462 = vsyncadd [#allocation3], 4294959104  ;;  %v2833_v0 = vld [vmem:[%s6206_s1 + $0xe0] sm:$0xf]  ;;  %v4093_v1 = vld [vmem:[%s6206_s1 + $0xec] sm:$0xf0] }
   0x7   :  { %v2961_v2 = vld [vmem:[%s6206_s1 + $0x1e0] sm:$0xf]  ;;  %v2834_v3 = vor.u32 %v4093_v1, %v2833_v0  ;;  %v4125_v4 = vld [vmem:[%s6206_s1 + $0x1ec] sm:$0xf0]  ;;  %s4468_s22 = smov [#allocation5]   ;;  %s2709_s26 = sshll.u32 %s6212_s7, 4  ;;  %s2710_s26 = int_to_ptr.hbm [resolvable:$true] %s2709_s26 }
   0x8   :  { %v3089_v5 = vld [vmem:[%s6206_s1 + $0x2e0] sm:$0xf]  ;;  %v4157_v6 = vld [vmem:[%s6206_s1 + $0x2ec] sm:$0xf0]  ;;  %v2962_v7 = vor.u32 %v4125_v4, %v2961_v2  ;;  %s2707_s23 = sshll.u32 %s4468_s22, 4  ;;  %vm2700_vm6 = vcmask 74752   ;;  %s2708_s23 = int_to_ptr.vmem [resolvable:$true] %s2707_s23 }
   0x9   :  { %v3090_v8 = vor.u32 %v4157_v6, %v3089_v5  ;;  %v3217_v9 = vld [vmem:[%s6206_s1 + $0x3e0] sm:$0xf]  ;;  %v4189_v10 = vld [vmem:[%s6206_s1 + $0x3ec] sm:$0xf0]  ;;  %1608 = vmatpush.bf16.msra.mxu0 %v2834_v3 }
   0xa   :  { %v2817_v11 = vld [vmem:[%s6206_s1 + $0xc0] sm:$0xf]  ;;  %v3218_v12 = vor.u32 %v4189_v10, %v3217_v9  ;;  %v4089_v13 = vld [vmem:[%s6206_s1 + $0xcc] sm:$0xf0]  ;;  %1621 = vmatpush.bf16.msra.mxu1 %v2962_v7 }
   0xb   :  { %v2945_v14 = vld [vmem:[%s6206_s1 + $0x1c0] sm:$0xf]  ;;  %v4121_v15 = vld [vmem:[%s6206_s1 + $0x1cc] sm:$0xf0]  ;;  %1634 = vmatpush.bf16.msra.mxu2 %v3090_v8  ;;  %v2818_v16 = vor.u32 %v4089_v13, %v2817_v11 }
   0xc   :  { %v2946_v17 = vor.u32 %v4121_v15, %v2945_v14  ;;  %v3073_v18 = vld [vmem:[%s6206_s1 + $0x2c0] sm:$0xf]  ;;  %v4153_v19 = vld [vmem:[%s6206_s1 + $0x2cc] sm:$0xf0]  ;;  %1647 = vmatpush.bf16.msra.mxu3 %v3218_v12 }
   0xd   :  { %v3201_v20 = vld [vmem:[%s6206_s1 + $0x3c0] sm:$0xf]  ;;  %v3074_v21 = vor.u32 %v4153_v19, %v3073_v18  ;;  %v4185_v22 = vld [vmem:[%s6206_s1 + $0x3cc] sm:$0xf0]  ;;  %1609 = vmatpush.bf16.msra.mxu0 %v2818_v16 }
   0xe   :  { %v2801_v23 = vld [vmem:[%s6206_s1 + $0xa0] sm:$0xf]  ;;  %v4085_v24 = vld [vmem:[%s6206_s1 + $0xac] sm:$0xf0]  ;;  %v3202_v25 = vor.u32 %v4185_v22, %v3201_v20  ;;  %1622 = vmatpush.bf16.msra.mxu1 %v2946_v17 }
   0xf   :  { %v2929_v26 = vld [vmem:[%s6206_s1 + $0x1a0] sm:$0xf]  ;;  %v4117_v27 = vld [vmem:[%s6206_s1 + $0x1ac] sm:$0xf0]  ;;  %v2802_v29 = vor.u32 %v4085_v24, %v2801_v23  ;;  %1635 = vmatpush.bf16.msra.mxu2 %v3074_v21 }
  0x10   :  { %v3057_v28 = vld [vmem:[%s6206_s1 + $0x2a0] sm:$0xf]  ;;  %v4149_v30 = vld [vmem:[%s6206_s1 + $0x2ac] sm:$0xf0]  ;;  %v2930_v33 = vor.u32 %v4117_v27, %v2929_v26  ;;  %1648 = vmatpush.bf16.msra.mxu3 %v3202_v25 }
  0x11   :  { %v3185_v31 = vld [vmem:[%s6206_s1 + $0x3a0] sm:$0xf]  ;;  %v4181_v32 = vld [vmem:[%s6206_s1 + $0x3ac] sm:$0xf0]  ;;  %v3058_v34 = vor.u32 %v4149_v30, %v3057_v28  ;;  %1610 = vmatpush.bf16.msra.mxu0 %v2802_v29 }
  0x12   :  { %v2785_v35 = vld [vmem:[%s6206_s1 + $0x80] sm:$0xf]  ;;  %v4081_v36 = vld [vmem:[%s6206_s1 + $0x8c] sm:$0xf0]  ;;  %v3186_v38 = vor.u32 %v4181_v32, %v3185_v31  ;;  %1623 = vmatpush.bf16.msra.mxu1 %v2930_v33 }
  0x13   :  { %v2913_v37 = vld [vmem:[%s6206_s1 + $0x180] sm:$0xf]  ;;  %v4113_v39 = vld [vmem:[%s6206_s1 + $0x18c] sm:$0xf0]  ;;  %v2786_v44 = vor.u32 %v4081_v36, %v2785_v35  ;;  %1636 = vmatpush.bf16.msra.mxu2 %v3058_v34 }
  0x14   :  { %v3041_v40 = vld [vmem:[%s6206_s1 + $0x280] sm:$0xf]  ;;  %v4145_v41 = vld [vmem:[%s6206_s1 + $0x28c] sm:$0xf0]  ;;  %v2914_v45 = vor.u32 %v4113_v39, %v2913_v37  ;;  %1649 = vmatpush.bf16.msra.mxu3 %v3186_v38 }
  0x15   :  { %v3169_v42 = vld [vmem:[%s6206_s1 + $0x380] sm:$0xf]  ;;  %v4177_v43 = vld [vmem:[%s6206_s1 + $0x38c] sm:$0xf0]  ;;  %v3042_v46 = vor.u32 %v4145_v41, %v3041_v40  ;;  %1611 = vmatpush.bf16.msra.mxu0 %v2786_v44 }
  0x16   :  { %v2769_v47 = vld [vmem:[%s6206_s1 + $0x60] sm:$0xf]  ;;  %v4077_v48 = vld [vmem:[%s6206_s1 + $0x6c] sm:$0xf0]  ;;  %v3170_v50 = vor.u32 %v4177_v43, %v3169_v42  ;;  %1624 = vmatpush.bf16.msra.mxu1 %v2914_v45 }
  0x17   :  { %v2897_v49 = vld [vmem:[%s6206_s1 + $0x160] sm:$0xf]  ;;  %v4109_v51 = vld [vmem:[%s6206_s1 + $0x16c] sm:$0xf0]  ;;  %v2770_v56 = vor.u32 %v4077_v48, %v2769_v47  ;;  %1637 = vmatpush.bf16.msra.mxu2 %v3042_v46 }
  0x18   :  { %v3025_v52 = vld [vmem:[%s6206_s1 + $0x260] sm:$0xf]  ;;  %v4141_v53 = vld [vmem:[%s6206_s1 + $0x26c] sm:$0xf0]  ;;  %v2898_v57 = vor.u32 %v4109_v51, %v2897_v49  ;;  %1650 = vmatpush.bf16.msra.mxu3 %v3170_v50 }
  0x19   :  { %v3153_v54 = vld [vmem:[%s6206_s1 + $0x360] sm:$0xf]  ;;  %v4173_v55 = vld [vmem:[%s6206_s1 + $0x36c] sm:$0xf0]  ;;  %v3026_v58 = vor.u32 %v4141_v53, %v3025_v52  ;;  %1612 = vmatpush.bf16.msra.mxu0 %v2770_v56 }
  0x1a   :  { %v2753_v59 = vld [vmem:[%s6206_s1 + $0x40] sm:$0xf]  ;;  %v4073_v60 = vld [vmem:[%s6206_s1 + $0x4c] sm:$0xf0]  ;;  %v3154_v62 = vor.u32 %v4173_v55, %v3153_v54  ;;  %1625 = vmatpush.bf16.msra.mxu1 %v2898_v57 }
  0x1b   :  { %v2881_v61 = vld [vmem:[%s6206_s1 + $0x140] sm:$0xf]  ;;  %v4105_v63 = vld [vmem:[%s6206_s1 + $0x14c] sm:$0xf0]  ;;  %v2754_v4 = vor.u32 %v4073_v60, %v2753_v59  ;;  %1638 = vmatpush.bf16.msra.mxu2 %v3026_v58 }
  0x1c   :  { %v3009_v0 = vld [vmem:[%s6206_s1 + $0x240] sm:$0xf]  ;;  %v4137_v1 = vld [vmem:[%s6206_s1 + $0x24c] sm:$0xf0]  ;;  %v2882_v5 = vor.u32 %v4105_v63, %v2881_v61  ;;  %1651 = vmatpush.bf16.msra.mxu3 %v3154_v62 }
  0x1d   :  { %v3137_v2 = vld [vmem:[%s6206_s1 + $0x340] sm:$0xf]  ;;  %v4169_v3 = vld [vmem:[%s6206_s1 + $0x34c] sm:$0xf0]  ;;  %v3010_v6 = vor.u32 %v4137_v1, %v3009_v0  ;;  %1613 = vmatpush.bf16.msra.mxu0 %v2754_v4 }
  0x1e   :  { %v2737_v7 = vld [vmem:[%s6206_s1 + $0x20] sm:$0xf]  ;;  %v4069_v8 = vld [vmem:[%s6206_s1 + $0x2c] sm:$0xf0]  ;;  %v3138_v10 = vor.u32 %v4169_v3, %v3137_v2  ;;  %1626 = vmatpush.bf16.msra.mxu1 %v2882_v5 }
  0x1f   :  { %v2865_v9 = vld [vmem:[%s6206_s1 + $0x120] sm:$0xf]  ;;  %v4101_v11 = vld [vmem:[%s6206_s1 + $0x12c] sm:$0xf0]  ;;  %v2738_v16 = vor.u32 %v4069_v8, %v2737_v7  ;;  %1639 = vmatpush.bf16.msra.mxu2 %v3010_v6 }
  0x20   :  { %v2993_v12 = vld [vmem:[%s6206_s1 + $0x220] sm:$0xf]  ;;  %v4133_v13 = vld [vmem:[%s6206_s1 + $0x22c] sm:$0xf0]  ;;  %v2866_v19 = vor.u32 %v4101_v11, %v2865_v9  ;;  %1652 = vmatpush.bf16.msra.mxu3 %v3138_v10 }
  0x21   :  { %v3121_v14 = vld [vmem:[%s6206_s1 + $0x320] sm:$0xf]  ;;  %v4165_v15 = vld [vmem:[%s6206_s1 + $0x32c] sm:$0xf0]  ;;  %v2994_v20 = vor.u32 %v4133_v13, %v2993_v12  ;;  %1614 = vmatpush.bf16.msra.mxu0 %v2738_v16 }
  0x22   :  { %v2721_v17 = vld [vmem:[%s6206_s1] sm:$0xf]  ;;  %v4065_v18 = vld [vmem:[%s6206_s1 + $0xc] sm:$0xf0]  ;;  %v3122_v24 = vor.u32 %v4165_v15, %v3121_v14  ;;  %1627 = vmatpush.bf16.msra.mxu1 %v2866_v19 }
  0x23   :  { %v2849_v21 = vld [vmem:[%s6206_s1 + $0x100] sm:$0xf]  ;;  %v4097_v22 = vld [vmem:[%s6206_s1 + $0x10c] sm:$0xf0]  ;;  %v2722_v31 = vor.u32 %v4065_v18, %v2721_v17  ;;  %1640 = vmatpush.bf16.msra.mxu2 %v2994_v20 }
  0x24   :  { %v2977_v23 = vld [vmem:[%s6206_s1 + $0x200] sm:$0xf]  ;;  %v4129_v25 = vld [vmem:[%s6206_s1 + $0x20c] sm:$0xf0]  ;;  %v2850_v35 = vor.u32 %v4097_v22, %v2849_v21  ;;  %1653 = vmatpush.bf16.msra.mxu3 %v3122_v24 }
  0x25   :  { %v3105_v26 = vld [vmem:[%s6206_s1 + $0x300] sm:$0xf]  ;;  %v4161_v27 = vld [vmem:[%s6206_s1 + $0x30c] sm:$0xf0]  ;;  %v2978_v36 = vor.u32 %v4129_v25, %v2977_v23  ;;  %1615 = vmatpush.bf16.msra.mxu0 %v2722_v31 }
  0x26   :  { %v3345_v28 = vld [vmem:[%s6206_s1 + $0x4e0] sm:$0xf]  ;;  %v4221_v29 = vld [vmem:[%s6206_s1 + $0x4ec] sm:$0xf0]  ;;  %v3106_v39 = vor.u32 %v4161_v27, %v3105_v26  ;;  %1628 = vmatpush.bf16.msra.mxu1 %v2850_v35 }
  0x27   :  { %v3473_v30 = vld [vmem:[%s6206_s1 + $0x5e0] sm:$0xf]  ;;  %v4253_v32 = vld [vmem:[%s6206_s1 + $0x5ec] sm:$0xf0]  ;;  %v3346_v40 = vor.u32 %v4221_v29, %v3345_v28  ;;  %1641 = vmatpush.bf16.msra.mxu2 %v2978_v36 }
  0x28   :  { %v3601_v33 = vld [vmem:[%s6206_s1 + $0x6e0] sm:$0xf]  ;;  %v4285_v34 = vld [vmem:[%s6206_s1 + $0x6ec] sm:$0xf0]  ;;  %v3474_v41 = vor.u32 %v4253_v32, %v3473_v30  ;;  %1654 = vmatpush.bf16.msra.mxu3 %v3106_v39 }
  0x29   :  { %v3729_v37 = vld [vmem:[%s6206_s1 + $0x7e0] sm:$0xf]  ;;  %v4317_v38 = vld [vmem:[%s6206_s1 + $0x7ec] sm:$0xf0]  ;;  %v3602_v42 = vor.u32 %v4285_v34, %v3601_v33  ;;  %1660 = vmatpush.bf16.msrb.mxu0 %v3346_v40 }
  0x2a   :  { %v3329_v43 = vld [vmem:[%s6206_s1 + $0x4c0] sm:$0xf]  ;;  %v4217_v44 = vld [vmem:[%s6206_s1 + $0x4cc] sm:$0xf0]  ;;  %v3730_v46 = vor.u32 %v4317_v38, %v3729_v37  ;;  %1673 = vmatpush.bf16.msrb.mxu1 %v3474_v41 }
  0x2b   :  { %v3457_v45 = vld [vmem:[%s6206_s1 + $0x5c0] sm:$0xf]  ;;  %v4249_v47 = vld [vmem:[%s6206_s1 + $0x5cc] sm:$0xf0]  ;;  %v3330_v52 = vor.u32 %v4217_v44, %v3329_v43  ;;  %1686 = vmatpush.bf16.msrb.mxu2 %v3602_v42 }
  0x2c   :  { %v3585_v48 = vld [vmem:[%s6206_s1 + $0x6c0] sm:$0xf]  ;;  %v4281_v49 = vld [vmem:[%s6206_s1 + $0x6cc] sm:$0xf0]  ;;  %v3458_v55 = vor.u32 %v4249_v47, %v3457_v45  ;;  %1699 = vmatpush.bf16.msrb.mxu3 %v3730_v46 }
  0x2d   :  { %v3713_v50 = vld [vmem:[%s6206_s1 + $0x7c0] sm:$0xf]  ;;  %v4313_v51 = vld [vmem:[%s6206_s1 + $0x7cc] sm:$0xf0]  ;;  %v3586_v56 = vor.u32 %v4281_v49, %v3585_v48  ;;  %1661 = vmatpush.bf16.msrb.mxu0 %v3330_v52 }
  0x2e   :  { %v3313_v53 = vld [vmem:[%s6206_s1 + $0x4a0] sm:$0xf]  ;;  %v4213_v54 = vld [vmem:[%s6206_s1 + $0x4ac] sm:$0xf0]  ;;  %v3714_v60 = vor.u32 %v4313_v51, %v3713_v50  ;;  %1674 = vmatpush.bf16.msrb.mxu1 %v3458_v55 }
  0x2f   :  { %v3441_v57 = vld [vmem:[%s6206_s1 + $0x5a0] sm:$0xf]  ;;  %v4245_v58 = vld [vmem:[%s6206_s1 + $0x5ac] sm:$0xf0]  ;;  %v3314_v1 = vor.u32 %v4213_v54, %v3313_v53  ;;  %1687 = vmatpush.bf16.msrb.mxu2 %v3586_v56 }
  0x30   :  { %v43_v59 = vld [vmem:[%s6205_s0] sm:$0xff]  ;;  %v4277_v62 = vld [vmem:[%s6206_s1 + $0x6ac] sm:$0xf0]  ;;  %v3442_v2 = vor.u32 %v4245_v58, %v3441_v57  ;;  %1700 = vmatpush.bf16.msrb.mxu3 %v3714_v60 }
  0x31   :  { %v3569_v61 = vld [vmem:[%s6206_s1 + $0x6a0] sm:$0xf]  ;;  %311 = vst [vmem:[#allocation1] ss:$9 sm:$0xff] %v43_v59  ;;  %v4309_v0 = vld [vmem:[%s6206_s1 + $0x7ac] sm:$0xf0]  ;;  %1662 = vmatpush.bf16.msrb.mxu0 %v3314_v1 }
  0x32   :  { %v3697_v63 = vld [vmem:[%s6206_s1 + $0x7a0] sm:$0xf]  ;;  %v3570_v3 = vor.u32 %v4277_v62, %v3569_v61  ;;  %v4209_v5 = vld [vmem:[%s6206_s1 + $0x48c] sm:$0xf0]  ;;  %1675 = vmatpush.bf16.msrb.mxu1 %v3442_v2  ;;  %v4091_v1 = vld [vmem:[%s6206_s1 + $0xe4] sm:$0xf] }
  0x33   :  { %v3297_v4 = vld [vmem:[%s6206_s1 + $0x480] sm:$0xf]  ;;  %v3698_v7 = vor.u32 %v4309_v0, %v3697_v63  ;;  %v4241_v8 = vld [vmem:[%s6206_s1 + $0x58c] sm:$0xf0]  ;;  %v2835_v2 = vld [vmem:[%s6206_s1 + $0xf0] sm:$0xf0] }
  0x34   :  { %v3425_v6 = vld [vmem:[%s6206_s1 + $0x580] sm:$0xf]  ;;  %v4273_v10 = vld [vmem:[%s6206_s1 + $0x68c] sm:$0xf0]  ;;  %v3298_v14 = vor.u32 %v4209_v5, %v3297_v4  ;;  %1688 = vmatpush.bf16.msrb.mxu2 %v3570_v3  ;;  %v4123_v3 = vld [vmem:[%s6206_s1 + $0x1e4] sm:$0xf] }
  0x35   :  { %v3553_v9 = vld [vmem:[%s6206_s1 + $0x680] sm:$0xf]  ;;  %v4305_v12 = vld [vmem:[%s6206_s1 + $0x78c] sm:$0xf0]  ;;  %v3426_v18 = vor.u32 %v4241_v8, %v3425_v6  ;;  %1701 = vmatpush.bf16.msrb.mxu3 %v3698_v7  ;;  %v2963_v5 = vld [vmem:[%s6206_s1 + $0x1f0] sm:$0xf0] }
  0x36   :  { %v3681_v11 = vld [vmem:[%s6206_s1 + $0x780] sm:$0xf]  ;;  %v4205_v15 = vld [vmem:[%s6206_s1 + $0x46c] sm:$0xf0]  ;;  %v3554_v19 = vor.u32 %v4273_v10, %v3553_v9  ;;  %1663 = vmatpush.bf16.msrb.mxu0 %v3298_v14  ;;  %v4155_v6 = vld [vmem:[%s6206_s1 + $0x2e4] sm:$0xf]  ;;  %v2966_v14 = vor.u32 %v4123_v3, %v2963_v5 }
  0x37   :  { %v3281_v13 = vld [vmem:[%s6206_s1 + $0x460] sm:$0xf]  ;;  %v4237_v17 = vld [vmem:[%s6206_s1 + $0x56c] sm:$0xf0]  ;;  %v3682_v23 = vor.u32 %v4305_v12, %v3681_v11  ;;  %1676 = vmatpush.bf16.msrb.mxu1 %v3426_v18  ;;  %v3091_v7 = vld [vmem:[%s6206_s1 + $0x2f0] sm:$0xf0] }
  0x38   :  { %v3409_v16 = vld [vmem:[%s6206_s1 + $0x560] sm:$0xf]  ;;  %v4815_v20 = vld [vmem:[#allocation1 + $0x12] sm:$0xff]  ;;  %v4828_v26 = vld [vmem:[#allocation1 + $0x9] sm:$0xff]  ;;  %v3282_v29 = vor.u32 %v4205_v15, %v3281_v13  ;;  %1689 = vmatpush.bf16.msrb.mxu2 %v3554_v19  ;;  %v2838_v13 = vor.u32 %v4091_v1, %v2835_v2  ;;  %v3094_v15 = vor.u32 %v4155_v6, %v3091_v7 }
  0x39   :  { %v4817_v21 = vld [vmem:[#allocation1] sm:$0xff]  ;;  %v4269_v25 = vld [vmem:[%s6206_s1 + $0x66c] sm:$0xf0]  ;;  %1642 = vmatmul.bf16.vlgmr.msra.gmra.mxu2 %v4815_v20  ;;  %1629 = vmatmul.bf16.vlgmr.msra.gmra.mxu1 %v4828_v26  ;;  %v3410_v30 = vor.u32 %v4237_v17, %v3409_v16  ;;  %v3219_v11 = vld [vmem:[%s6206_s1 + $0x3f0] sm:$0xf0] }
  0x3a   :  { %v4819_v22 = vld [vmem:[#allocation1 + $0x1b] sm:$0xff]  ;;  %v4301_v28 = vld [vmem:[%s6206_s1 + $0x76c] sm:$0xf0]  ;;  %1616 = vmatmul.bf16.vlgmr.msra.gmra.mxu0 %v4817_v21  ;;  %1702 = vmatpush.bf16.msrb.mxu3 %v3682_v23  ;;  %v4187_v10 = vld [vmem:[%s6206_s1 + $0x3e4] sm:$0xf] }
  0x3b   :  { %v3537_v24 = vld [vmem:[%s6206_s1 + $0x660] sm:$0xf]  ;;  %1655 = vmatmul.bf16.vlgmr.msra.gmra.mxu3 %v4819_v22  ;;  %v4201_v33 = vld [vmem:[%s6206_s1 + $0x44c] sm:$0xf0]  ;;  %1664 = vmatpush.bf16.msrb.mxu0 %v3282_v29  ;;  %v4087_v16 = vld [vmem:[%s6206_s1 + $0xc4] sm:$0xf]  ;;  %v3222_v19 = vor.u32 %v4187_v10, %v3219_v11 }
  0x3c   :  { %v3665_v27 = vld [vmem:[%s6206_s1 + $0x760] sm:$0xf]  ;;  %v3538_v31 = vor.u32 %v4269_v25, %v3537_v24  ;;  %v4233_v36 = vld [vmem:[%s6206_s1 + $0x54c] sm:$0xf0]  ;;  %1677 = vmatpush.bf16.msrb.mxu1 %v3410_v30  ;;  %v2819_v17 = vld [vmem:[%s6206_s1 + $0xd0] sm:$0xf0] }
  0x3d   :  { %v3265_v32 = vld [vmem:[%s6206_s1 + $0x440] sm:$0xf]  ;;  %v3666_v35 = vor.u32 %v4301_v28, %v3665_v27  ;;  %v4265_v38 = vld [vmem:[%s6206_s1 + $0x64c] sm:$0xf0]  ;;  %v4119_v18 = vld [vmem:[%s6206_s1 + $0x1c4] sm:$0xf]  ;;  %v2822_v30 = vor.u32 %v4087_v16, %v2819_v17 }
  0x3e   :  { %v3393_v34 = vld [vmem:[%s6206_s1 + $0x540] sm:$0xf]  ;;  %v4297_v40 = vld [vmem:[%s6206_s1 + $0x74c] sm:$0xf0]  ;;  %v3266_v41 = vor.u32 %v4201_v33, %v3265_v32  ;;  %1690 = vmatpush.bf16.msrb.mxu2 %v3538_v31  ;;  %v2947_v23 = vld [vmem:[%s6206_s1 + $0x1d0] sm:$0xf0] }
  0x3f   :  { %v3521_v37 = vld [vmem:[%s6206_s1 + $0x640] sm:$0xf]  ;;  %v3394_v42 = vor.u32 %v4233_v36, %v3393_v34  ;;  %v4197_v45 = vld [vmem:[%s6206_s1 + $0x42c] sm:$0xf0]  ;;  %1703 = vmatpush.bf16.msrb.mxu3 %v3666_v35  ;;  %v4151_v24 = vld [vmem:[%s6206_s1 + $0x2c4] sm:$0xf]  ;;  %v2950_v34 = vor.u32 %v4119_v18, %v2947_v23 }
  0x40   :  { %v3649_v39 = vld [vmem:[%s6206_s1 + $0x740] sm:$0xf]  ;;  %v3522_v43 = vor.u32 %v4265_v38, %v3521_v37  ;;  %v4229_v48 = vld [vmem:[%s6206_s1 + $0x52c] sm:$0xf0]  ;;  %1665 = vmatpush.bf16.msrb.mxu0 %v3266_v41  ;;  %v3075_v25 = vld [vmem:[%s6206_s1 + $0x2d0] sm:$0xf0] }
  0x41   :  { %v3249_v44 = vld [vmem:[%s6206_s1 + $0x420] sm:$0xf]  ;;  %v3650_v47 = vor.u32 %v4297_v40, %v3649_v39  ;;  %v4261_v50 = vld [vmem:[%s6206_s1 + $0x62c] sm:$0xf0]  ;;  %1678 = vmatpush.bf16.msrb.mxu1 %v3394_v42  ;;  %v4183_v27 = vld [vmem:[%s6206_s1 + $0x3c4] sm:$0xf]  ;;  %v3078_v35 = vor.u32 %v4151_v24, %v3075_v25 }
  0x42   :  { %v3377_v46 = vld [vmem:[%s6206_s1 + $0x520] sm:$0xf]  ;;  %v4293_v52 = vld [vmem:[%s6206_s1 + $0x72c] sm:$0xf0]  ;;  %v3250_v53 = vor.u32 %v4197_v45, %v3249_v44  ;;  %1691 = vmatpush.bf16.msrb.mxu2 %v3522_v43  ;;  %v3203_v28 = vld [vmem:[%s6206_s1 + $0x3d0] sm:$0xf0] }
  0x43   :  { %v3505_v49 = vld [vmem:[%s6206_s1 + $0x620] sm:$0xf]  ;;  %v4193_v55 = vld [vmem:[%s6206_s1 + $0x40c] sm:$0xf0]  ;;  %v3378_v56 = vor.u32 %v4229_v48, %v3377_v46  ;;  %1704 = vmatpush.bf16.msrb.mxu3 %v3650_v47  ;;  %v4959_v29 = vld [vmem:[#allocation1 + $0x36] sm:$0xff]  ;;  %v3206_v39 = vor.u32 %v4183_v27, %v3203_v28 }
  0x44   :  { %v3633_v51 = vld [vmem:[%s6206_s1 + $0x720] sm:$0xf]  ;;  %v3506_v57 = vor.u32 %v4261_v50, %v3505_v49  ;;  %v4225_v59 = vld [vmem:[%s6206_s1 + $0x50c] sm:$0xf0]  ;;  %1666 = vmatpush.bf16.msrb.mxu0 %v3250_v53  ;;  %v4961_v31 = vld [vmem:[#allocation1 + $0x24] sm:$0xff] }
  0x45   :  { %v3233_v54 = vld [vmem:[%s6206_s1 + $0x400] sm:$0xf]  ;;  %v3634_v61 = vor.u32 %v4293_v52, %v3633_v51  ;;  %v4257_v62 = vld [vmem:[%s6206_s1 + $0x60c] sm:$0xf0]  ;;  %1679 = vmatpush.bf16.msrb.mxu1 %v3378_v56  ;;  %v4083_v33 = vld [vmem:[%s6206_s1 + $0xa4] sm:$0xf] }
  0x46   :  { %v3361_v58 = vld [vmem:[%s6206_s1 + $0x500] sm:$0xf]  ;;  %v4289_v0 = vld [vmem:[%s6206_s1 + $0x70c] sm:$0xf0]  ;;  %v3234_v4 = vor.u32 %v4193_v55, %v3233_v54  ;;  %1692 = vmatpush.bf16.msrb.mxu2 %v3506_v57  ;;  %v2803_v36 = vld [vmem:[%s6206_s1 + $0xb0] sm:$0xf0] }
  0x47   :  { %v3489_v60 = vld [vmem:[%s6206_s1 + $0x600] sm:$0xf]  ;;  %v3362_v8 = vor.u32 %v4225_v59, %v3361_v58  ;;  %1705 = vmatpush.bf16.msrb.mxu3 %v3634_v61  ;;  %v4115_v37 = vld [vmem:[%s6206_s1 + $0x1a4] sm:$0xf]  ;;  %v4974_v38 = vld [vmem:[#allocation1 + $0x2d] sm:$0xff]  ;;  %v2806_v45 = vor.u32 %v4083_v33, %v2803_v36 }
  0x48   :  { %v3617_v63 = vld [vmem:[%s6206_s1 + $0x700] sm:$0xf]  ;;  %v3490_v9 = vor.u32 %v4257_v62, %v3489_v60  ;;  %1667 = vmatpush.bf16.msrb.mxu0 %v3234_v4  ;;  %v2931_v40 = vld [vmem:[%s6206_s1 + $0x1b0] sm:$0xf0]  ;;  %v4147_v41 = vld [vmem:[%s6206_s1 + $0x2a4] sm:$0xf] }
  0x49   :  { %v3618_v12 = vor.u32 %v4289_v0, %v3617_v63  ;;  %1680 = vmatpush.bf16.msrb.mxu1 %v3362_v8  ;;  %v4963_v32 = vld [vmem:[#allocation1 + $0x3f] sm:$0xff]  ;;  %v3059_v42 = vld [vmem:[%s6206_s1 + $0x2b0] sm:$0xf0]  ;;  %v2934_v46 = vor.u32 %v4115_v37, %v2931_v40 }
  0x4a   :  { %1693 = vmatpush.bf16.msrb.mxu2 %v3490_v9  ;;  %v4179_v43 = vld [vmem:[%s6206_s1 + $0x3a4] sm:$0xf]  ;;  %v3187_v44 = vld [vmem:[%s6206_s1 + $0x3b0] sm:$0xf0]  ;;  %v3062_v47 = vor.u32 %v4147_v41, %v3059_v42 }
  0x4b   :  { %1706 = vmatpush.bf16.msrb.mxu3 %v3618_v12  ;;  %1668 = vmatmul.bf16.vlgmr.msrb.gmra.mxu0 %v4961_v31  ;;  %v4079_v48 = vld [vmem:[%s6206_s1 + $0x84] sm:$0xf]  ;;  %v2787_v49 = vld [vmem:[%s6206_s1 + $0x90] sm:$0xf0]  ;;  %v3190_v51 = vor.u32 %v4179_v43, %v3187_v44 }
  0x4c   :  { %1712 = vmatpush.bf16.msra.mxu0 %v2838_v13  ;;  %1681 = vmatmul.bf16.vlgmr.msrb.gmra.mxu1 %v4974_v38  ;;  %v4111_v50 = vld [vmem:[%s6206_s1 + $0x184] sm:$0xf]  ;;  %v2915_v52 = vld [vmem:[%s6206_s1 + $0x190] sm:$0xf0]  ;;  %v2790_v57 = vor.u32 %v4079_v48, %v2787_v49 }
  0x4d   :  { %1725 = vmatpush.bf16.msra.mxu1 %v2966_v14  ;;  %1694 = vmatmul.bf16.vlgmr.msrb.gmra.mxu2 %v4959_v29  ;;  %v4143_v53 = vld [vmem:[%s6206_s1 + $0x284] sm:$0xf]  ;;  %v3043_v54 = vld [vmem:[%s6206_s1 + $0x290] sm:$0xf0]  ;;  %v2918_v58 = vor.u32 %v4111_v50, %v2915_v52 }
  0x4e   :  { %1738 = vmatpush.bf16.msra.mxu2 %v3094_v15  ;;  %1707 = vmatmul.bf16.vlgmr.msrb.gmra.mxu3 %v4963_v32  ;;  %v4175_v55 = vld [vmem:[%s6206_s1 + $0x384] sm:$0xf]  ;;  %v3171_v56 = vld [vmem:[%s6206_s1 + $0x390] sm:$0xf0]  ;;  %v3046_v59 = vor.u32 %v4143_v53, %v3043_v54 }
  0x4f   :  { %1751 = vmatpush.bf16.msra.mxu3 %v3222_v19  ;;  %v4075_v60 = vld [vmem:[%s6206_s1 + $0x64] sm:$0xf]  ;;  %v2771_v61 = vld [vmem:[%s6206_s1 + $0x70] sm:$0xf0]  ;;  %v3174_v63 = vor.u32 %v4175_v55, %v3171_v56 }
  0x50   :  { %1713 = vmatpush.bf16.msra.mxu0 %v2822_v30  ;;  %v4107_v62 = vld [vmem:[%s6206_s1 + $0x164] sm:$0xf]  ;;  %v2899_v0 = vld [vmem:[%s6206_s1 + $0x170] sm:$0xf0]  ;;  %v2774_v5 = vor.u32 %v4075_v60, %v2771_v61 }
  0x51   :  { %1726 = vmatpush.bf16.msra.mxu1 %v2950_v34  ;;  %v4139_v1 = vld [vmem:[%s6206_s1 + $0x264] sm:$0xf]  ;;  %v3027_v2 = vld [vmem:[%s6206_s1 + $0x270] sm:$0xf0]  ;;  %v2902_v6 = vor.u32 %v4107_v62, %v2899_v0 }
  0x52   :  { %1739 = vmatpush.bf16.msra.mxu2 %v3078_v35  ;;  %v4171_v3 = vld [vmem:[%s6206_s1 + $0x364] sm:$0xf]  ;;  %v3155_v4 = vld [vmem:[%s6206_s1 + $0x370] sm:$0xf0]  ;;  %v3030_v7 = vor.u32 %v4139_v1, %v3027_v2 }
  0x53   :  { %1752 = vmatpush.bf16.msra.mxu3 %v3206_v39  ;;  %v4071_v8 = vld [vmem:[%s6206_s1 + $0x44] sm:$0xf]  ;;  %v2755_v9 = vld [vmem:[%s6206_s1 + $0x50] sm:$0xf0]  ;;  %v3158_v11 = vor.u32 %v4171_v3, %v3155_v4 }
  0x54   :  { %1714 = vmatpush.bf16.msra.mxu0 %v2806_v45  ;;  %v4103_v10 = vld [vmem:[%s6206_s1 + $0x144] sm:$0xf]  ;;  %v2883_v12 = vld [vmem:[%s6206_s1 + $0x150] sm:$0xf0]  ;;  %v2758_v17 = vor.u32 %v4071_v8, %v2755_v9 }
  0x55   :  { %1727 = vmatpush.bf16.msra.mxu1 %v2934_v46  ;;  %v4135_v13 = vld [vmem:[%s6206_s1 + $0x244] sm:$0xf]  ;;  %v3011_v14 = vld [vmem:[%s6206_s1 + $0x250] sm:$0xf0]  ;;  %v2886_v18 = vor.u32 %v4103_v10, %v2883_v12 }
  0x56   :  { %1740 = vmatpush.bf16.msra.mxu2 %v3062_v47  ;;  %v4167_v15 = vld [vmem:[%s6206_s1 + $0x344] sm:$0xf]  ;;  %v3139_v16 = vld [vmem:[%s6206_s1 + $0x350] sm:$0xf0]  ;;  %v3014_v19 = vor.u32 %v4135_v13, %v3011_v14 }
  0x57   :  { %1753 = vmatpush.bf16.msra.mxu3 %v3190_v51  ;;  %v4067_v23 = vld [vmem:[%s6206_s1 + $0x24] sm:$0xf]  ;;  %v2739_v24 = vld [vmem:[%s6206_s1 + $0x30] sm:$0xf0]  ;;  %v3142_v27 = vor.u32 %v4167_v15, %v3139_v16 }
  0x58   :  { %1715 = vmatpush.bf16.msra.mxu0 %v2790_v57  ;;  %v4099_v25 = vld [vmem:[%s6206_s1 + $0x124] sm:$0xf]  ;;  %v2867_v28 = vld [vmem:[%s6206_s1 + $0x130] sm:$0xf0]  ;;  %v2742_v36 = vor.u32 %v4067_v23, %v2739_v24 }
  0x59   :  { %1728 = vmatpush.bf16.msra.mxu1 %v2918_v58  ;;  %v4131_v30 = vld [vmem:[%s6206_s1 + $0x224] sm:$0xf]  ;;  %v2995_v33 = vld [vmem:[%s6206_s1 + $0x230] sm:$0xf0]  ;;  %v2870_v41 = vor.u32 %v4099_v25, %v2867_v28 }
  0x5a   :  { %1741 = vmatpush.bf16.msra.mxu2 %v3046_v59  ;;  %v4163_v34 = vld [vmem:[%s6206_s1 + $0x324] sm:$0xf]  ;;  %v3123_v35 = vld [vmem:[%s6206_s1 + $0x330] sm:$0xf0]  ;;  %v2998_v42 = vor.u32 %v4131_v30, %v2995_v33 }
  0x5b   :  { %1754 = vmatpush.bf16.msra.mxu3 %v3174_v63  ;;  %v4063_v37 = vld [vmem:[%s6206_s1 + $0x4] sm:$0xf]  ;;  %v2723_v39 = vld [vmem:[%s6206_s1 + $0x10] sm:$0xf0]  ;;  %v3126_v46 = vor.u32 %v4163_v34, %v3123_v35 }
  0x5c   :  { %1716 = vmatpush.bf16.msra.mxu0 %v2774_v5  ;;  %v4095_v40 = vld [vmem:[%s6206_s1 + $0x104] sm:$0xf]  ;;  %v2851_v43 = vld [vmem:[%s6206_s1 + $0x110] sm:$0xf0]  ;;  %v2726_v52 = vor.u32 %v4063_v37, %v2723_v39 }
  0x5d   :  { %1729 = vmatpush.bf16.msra.mxu1 %v2902_v6  ;;  %v4127_v44 = vld [vmem:[%s6206_s1 + $0x204] sm:$0xf]  ;;  %v2979_v45 = vld [vmem:[%s6206_s1 + $0x210] sm:$0xf0]  ;;  %v2854_v56 = vor.u32 %v4095_v40, %v2851_v43 }
  0x5e   :  { %1742 = vmatpush.bf16.msra.mxu2 %v3030_v7  ;;  %v4159_v47 = vld [vmem:[%s6206_s1 + $0x304] sm:$0xf]  ;;  %v3107_v48 = vld [vmem:[%s6206_s1 + $0x310] sm:$0xf0]  ;;  %v2982_v57 = vor.u32 %v4127_v44, %v2979_v45 }
  0x5f   :  { %1755 = vmatpush.bf16.msra.mxu3 %v3158_v11  ;;  %v4219_v49 = vld [vmem:[%s6206_s1 + $0x4e4] sm:$0xf]  ;;  %v3347_v50 = vld [vmem:[%s6206_s1 + $0x4f0] sm:$0xf0]  ;;  %v3110_v60 = vor.u32 %v4159_v47, %v3107_v48 }
  0x60   :  { %1717 = vmatpush.bf16.msra.mxu0 %v2758_v17  ;;  %v4251_v51 = vld [vmem:[%s6206_s1 + $0x5e4] sm:$0xf]  ;;  %v3475_v53 = vld [vmem:[%s6206_s1 + $0x5f0] sm:$0xf0]  ;;  %v3350_v61 = vor.u32 %v4219_v49, %v3347_v50 }
  0x61   :  { %1730 = vmatpush.bf16.msra.mxu1 %v2886_v18  ;;  %v4283_v54 = vld [vmem:[%s6206_s1 + $0x6e4] sm:$0xf]  ;;  %v3603_v55 = vld [vmem:[%s6206_s1 + $0x6f0] sm:$0xf0]  ;;  %v3478_v62 = vor.u32 %v4251_v51, %v3475_v53 }
  0x62   :  { %1743 = vmatpush.bf16.msra.mxu2 %v3014_v19  ;;  %v4315_v58 = vld [vmem:[%s6206_s1 + $0x7e4] sm:$0xf]  ;;  %v3731_v59 = vld [vmem:[%s6206_s1 + $0x7f0] sm:$0xf0]  ;;  %v3606_v63 = vor.u32 %v4283_v54, %v3603_v55 }
  0x63   :  { %1756 = vmatpush.bf16.msra.mxu3 %v3142_v27  ;;  %v4215_v0 = vld [vmem:[%s6206_s1 + $0x4c4] sm:$0xf]  ;;  %v3331_v1 = vld [vmem:[%s6206_s1 + $0x4d0] sm:$0xf0]  ;;  %v3734_v3 = vor.u32 %v4315_v58, %v3731_v59 }
  0x64   :  { %1718 = vmatpush.bf16.msra.mxu0 %v2742_v36  ;;  %v4247_v2 = vld [vmem:[%s6206_s1 + $0x5c4] sm:$0xf]  ;;  %v3459_v4 = vld [vmem:[%s6206_s1 + $0x5d0] sm:$0xf0]  ;;  %v3334_v9 = vor.u32 %v4215_v0, %v3331_v1 }
  0x65   :  { %1731 = vmatpush.bf16.msra.mxu1 %v2870_v41  ;;  %v4279_v5 = vld [vmem:[%s6206_s1 + $0x6c4] sm:$0xf]  ;;  %v3587_v6 = vld [vmem:[%s6206_s1 + $0x6d0] sm:$0xf0]  ;;  %v3462_v10 = vor.u32 %v4247_v2, %v3459_v4 }
  0x66   :  { %1744 = vmatpush.bf16.msra.mxu2 %v2998_v42  ;;  %v4311_v7 = vld [vmem:[%s6206_s1 + $0x7c4] sm:$0xf]  ;;  %v3715_v8 = vld [vmem:[%s6206_s1 + $0x7d0] sm:$0xf0]  ;;  %v3590_v11 = vor.u32 %v4279_v5, %v3587_v6 }
  0x67   :  { %1757 = vmatpush.bf16.msra.mxu3 %v3126_v46  ;;  %v4211_v12 = vld [vmem:[%s6206_s1 + $0x4a4] sm:$0xf]  ;;  %v3315_v13 = vld [vmem:[%s6206_s1 + $0x4b0] sm:$0xf0]  ;;  %v3718_v15 = vor.u32 %v4311_v7, %v3715_v8 }
  0x68   :  { %1719 = vmatpush.bf16.msra.mxu0 %v2726_v52  ;;  %v4243_v14 = vld [vmem:[%s6206_s1 + $0x5a4] sm:$0xf]  ;;  %v3443_v16 = vld [vmem:[%s6206_s1 + $0x5b0] sm:$0xf0]  ;;  %v3318_v24 = vor.u32 %v4211_v12, %v3315_v13 }
  0x69   :  { %1732 = vmatpush.bf16.msra.mxu1 %v2854_v56  ;;  %v4275_v17 = vld [vmem:[%s6206_s1 + $0x6a4] sm:$0xf]  ;;  %v3571_v18 = vld [vmem:[%s6206_s1 + $0x6b0] sm:$0xf0]  ;;  %v3446_v25 = vor.u32 %v4243_v14, %v3443_v16 }
  0x6a   :  { %1745 = vmatpush.bf16.msra.mxu2 %v2982_v57  ;;  %v4307_v19 = vld [vmem:[%s6206_s1 + $0x7a4] sm:$0xf]  ;;  %v3699_v23 = vld [vmem:[%s6206_s1 + $0x7b0] sm:$0xf0]  ;;  %v3574_v27 = vor.u32 %v4275_v17, %v3571_v18 }
  0x6b   :  { %1758 = vmatpush.bf16.msra.mxu3 %v3110_v60  ;;  %1720 = vmatmul.bf16.vlgmr.msra.gmra.mxu0 %v4817_v21  ;;  %v4207_v28 = vld [vmem:[%s6206_s1 + $0x484] sm:$0xf]  ;;  %v3299_v30 = vld [vmem:[%s6206_s1 + $0x490] sm:$0xf0]  ;;  %v3702_v34 = vor.u32 %v4307_v19, %v3699_v23 }
  0x6c   :  { %1764 = vmatpush.bf16.msrb.mxu0 %v3350_v61  ;;  %1733 = vmatmul.bf16.vlgmr.msra.gmra.mxu1 %v4828_v26  ;;  %v4239_v33 = vld [vmem:[%s6206_s1 + $0x584] sm:$0xf]  ;;  %v3427_v35 = vld [vmem:[%s6206_s1 + $0x590] sm:$0xf0]  ;;  %v3302_v41 = vor.u32 %v4207_v28, %v3299_v30  ;;  %v2841_v30 = vld [vmem:[%s6206_s1 + $0xe8] sm:$0xf] }
  0x6d   :  { %1777 = vmatpush.bf16.msrb.mxu1 %v3478_v62  ;;  %1746 = vmatmul.bf16.vlgmr.msra.gmra.mxu2 %v4815_v20  ;;  %v4271_v36 = vld [vmem:[%s6206_s1 + $0x684] sm:$0xf]  ;;  %v3555_v37 = vld [vmem:[%s6206_s1 + $0x690] sm:$0xf0]  ;;  %v3430_v42 = vor.u32 %v4239_v33, %v3427_v35  ;;  %v4094_v33 = vld [vmem:[%s6206_s1 + $0xf4] sm:$0xf0] }
  0x6e   :  { %1790 = vmatpush.bf16.msrb.mxu2 %v3606_v63  ;;  %1759 = vmatmul.bf16.vlgmr.msra.gmra.mxu3 %v4819_v22  ;;  %v4303_v39 = vld [vmem:[%s6206_s1 + $0x784] sm:$0xf]  ;;  %v3683_v40 = vld [vmem:[%s6206_s1 + $0x790] sm:$0xf0]  ;;  %v3558_v43 = vor.u32 %v4271_v36, %v3555_v37  ;;  %v4126_v36 = vld [vmem:[%s6206_s1 + $0x1f4] sm:$0xf0] }
  0x6f   :  { %1803 = vmatpush.bf16.msrb.mxu3 %v3734_v3  ;;  %v4203_v44 = vld [vmem:[%s6206_s1 + $0x464] sm:$0xf]  ;;  %v3283_v45 = vld [vmem:[%s6206_s1 + $0x470] sm:$0xf0]  ;;  %v3686_v47 = vor.u32 %v4303_v39, %v3683_v40  ;;  %v3097_v37 = vld [vmem:[%s6206_s1 + $0x2e8] sm:$0xf] }
  0x70   :  { %1765 = vmatpush.bf16.msrb.mxu0 %v3334_v9  ;;  %v4235_v46 = vld [vmem:[%s6206_s1 + $0x564] sm:$0xf]  ;;  %v3411_v48 = vld [vmem:[%s6206_s1 + $0x570] sm:$0xf0]  ;;  %v3286_v53 = vor.u32 %v4203_v44, %v3283_v45  ;;  %v4158_v39 = vld [vmem:[%s6206_s1 + $0x2f4] sm:$0xf0]  ;;  %v2842_v45 = vor.u32 %v4094_v33, %v2841_v30 }
  0x71   :  { %1778 = vmatpush.bf16.msrb.mxu1 %v3462_v10  ;;  %v4267_v49 = vld [vmem:[%s6206_s1 + $0x664] sm:$0xf]  ;;  %v3539_v50 = vld [vmem:[%s6206_s1 + $0x670] sm:$0xf0]  ;;  %v3414_v54 = vor.u32 %v4235_v46, %v3411_v48  ;;  %v2825_v48 = vld [vmem:[%s6206_s1 + $0xc8] sm:$0xf] }
  0x72   :  { %1791 = vmatpush.bf16.msrb.mxu2 %v3590_v11  ;;  %v4299_v51 = vld [vmem:[%s6206_s1 + $0x764] sm:$0xf]  ;;  %v3667_v52 = vld [vmem:[%s6206_s1 + $0x770] sm:$0xf0]  ;;  %v3542_v55 = vor.u32 %v4267_v49, %v3539_v50  ;;  %v4090_v49 = vld [vmem:[%s6206_s1 + $0xd4] sm:$0xf0] }
  0x73   :  { %1804 = vmatpush.bf16.msrb.mxu3 %v3718_v15  ;;  %v4199_v56 = vld [vmem:[%s6206_s1 + $0x444] sm:$0xf]  ;;  %v3267_v57 = vld [vmem:[%s6206_s1 + $0x450] sm:$0xf0]  ;;  %v3670_v59 = vor.u32 %v4299_v51, %v3667_v52  ;;  %v2953_v50 = vld [vmem:[%s6206_s1 + $0x1c8] sm:$0xf] }
  0x74   :  { %1766 = vmatpush.bf16.msrb.mxu0 %v3318_v24  ;;  %v4231_v58 = vld [vmem:[%s6206_s1 + $0x544] sm:$0xf]  ;;  %v3395_v60 = vld [vmem:[%s6206_s1 + $0x550] sm:$0xf0]  ;;  %v3270_v1 = vor.u32 %v4199_v56, %v3267_v57  ;;  %v4122_v52 = vld [vmem:[%s6206_s1 + $0x1d4] sm:$0xf0]  ;;  %v2826_v57 = vor.u32 %v4090_v49, %v2825_v48 }
  0x75   :  { %1779 = vmatpush.bf16.msrb.mxu1 %v3446_v25  ;;  %v4263_v61 = vld [vmem:[%s6206_s1 + $0x644] sm:$0xf]  ;;  %v3523_v62 = vld [vmem:[%s6206_s1 + $0x650] sm:$0xf0]  ;;  %v3398_v2 = vor.u32 %v4231_v58, %v3395_v60  ;;  %v4186_v56 = vld [vmem:[%s6206_s1 + $0x3d4] sm:$0xf0]  ;;  %v2954_v58 = vor.u32 %v4122_v52, %v2953_v50 }
  0x76   :  { %1792 = vmatpush.bf16.msrb.mxu2 %v3574_v27  ;;  %v4295_v63 = vld [vmem:[%s6206_s1 + $0x744] sm:$0xf]  ;;  %v3651_v0 = vld [vmem:[%s6206_s1 + $0x750] sm:$0xf0]  ;;  %v3526_v3 = vor.u32 %v4263_v61, %v3523_v62  ;;  %v2809_v60 = vld [vmem:[%s6206_s1 + $0xa8] sm:$0xf] }
  0x77   :  { %1805 = vmatpush.bf16.msrb.mxu3 %v3702_v34  ;;  %v4195_v4 = vld [vmem:[%s6206_s1 + $0x424] sm:$0xf]  ;;  %v3251_v5 = vld [vmem:[%s6206_s1 + $0x430] sm:$0xf0]  ;;  %v3654_v7 = vor.u32 %v4295_v63, %v3651_v0  ;;  %v2969_v34 = vld [vmem:[%s6206_s1 + $0x1e8] sm:$0xf] }
  0x78   :  { %1767 = vmatpush.bf16.msrb.mxu0 %v3302_v41  ;;  %v4227_v6 = vld [vmem:[%s6206_s1 + $0x524] sm:$0xf]  ;;  %v3379_v8 = vld [vmem:[%s6206_s1 + $0x530] sm:$0xf0]  ;;  %v3254_v13 = vor.u32 %v4195_v4, %v3251_v5  ;;  %v2970_v46 = vor.u32 %v4126_v36, %v2969_v34  ;;  %v4086_v61 = vld [vmem:[%s6206_s1 + $0xb4] sm:$0xf0] }
  0x79   :  { %1780 = vmatpush.bf16.msrb.mxu1 %v3430_v42  ;;  %v4259_v9 = vld [vmem:[%s6206_s1 + $0x624] sm:$0xf]  ;;  %v3507_v10 = vld [vmem:[%s6206_s1 + $0x630] sm:$0xf0]  ;;  %v3382_v16 = vor.u32 %v4227_v6, %v3379_v8  ;;  %v3225_v42 = vld [vmem:[%s6206_s1 + $0x3e8] sm:$0xf]  ;;  %v2810_v4 = vor.u32 %v4086_v61, %v2809_v60 }
  0x7a   :  { %1793 = vmatpush.bf16.msrb.mxu2 %v3558_v43  ;;  %v4291_v11 = vld [vmem:[%s6206_s1 + $0x724] sm:$0xf]  ;;  %v3635_v12 = vld [vmem:[%s6206_s1 + $0x730] sm:$0xf0]  ;;  %v3510_v17 = vor.u32 %v4259_v9, %v3507_v10  ;;  %v4190_v43 = vld [vmem:[%s6206_s1 + $0x3f4] sm:$0xf0] }
  0x7b   :  { %1806 = vmatpush.bf16.msrb.mxu3 %v3686_v47  ;;  %v4191_v14 = vld [vmem:[%s6206_s1 + $0x404] sm:$0xf]  ;;  %v3235_v15 = vld [vmem:[%s6206_s1 + $0x410] sm:$0xf0]  ;;  %v3638_v24 = vor.u32 %v4291_v11, %v3635_v12  ;;  %v3098_v47 = vor.u32 %v4158_v39, %v3097_v37  ;;  %v3226_v51 = vor.u32 %v4190_v43, %v3225_v42  ;;  %v2937_v62 = vld [vmem:[%s6206_s1 + $0x1a8] sm:$0xf] }
  0x7c   :  { %1768 = vmatpush.bf16.msrb.mxu0 %v3286_v53  ;;  %v4223_v18 = vld [vmem:[%s6206_s1 + $0x504] sm:$0xf]  ;;  %v3363_v19 = vld [vmem:[%s6206_s1 + $0x510] sm:$0xf0]  ;;  %v3238_v35 = vor.u32 %v4191_v14, %v3235_v15  ;;  %v3081_v53 = vld [vmem:[%s6206_s1 + $0x2c8] sm:$0xf] }
  0x7d   :  { %1781 = vmatpush.bf16.msrb.mxu1 %v3414_v54  ;;  %v4255_v23 = vld [vmem:[%s6206_s1 + $0x604] sm:$0xf]  ;;  %v3491_v25 = vld [vmem:[%s6206_s1 + $0x610] sm:$0xf0]  ;;  %v3366_v40 = vor.u32 %v4223_v18, %v3363_v19  ;;  %v4154_v54 = vld [vmem:[%s6206_s1 + $0x2d4] sm:$0xf0] }
  0x7e   :  { %1794 = vmatpush.bf16.msrb.mxu2 %v3542_v55  ;;  %v4287_v27 = vld [vmem:[%s6206_s1 + $0x704] sm:$0xf]  ;;  %v3619_v28 = vld [vmem:[%s6206_s1 + $0x710] sm:$0xf0]  ;;  %v3494_v41 = vor.u32 %v4255_v23, %v3491_v25  ;;  %v3209_v55 = vld [vmem:[%s6206_s1 + $0x3c8] sm:$0xf] }
  0x7f   :  { %1807 = vmatpush.bf16.msrb.mxu3 %v3670_v59  ;;  %v3622_v44 = vor.u32 %v4287_v27, %v3619_v28  ;;  %v3082_v59 = vor.u32 %v4154_v54, %v3081_v53  ;;  %v3210_v63 = vor.u32 %v4186_v56, %v3209_v55  ;;  %v4118_v0 = vld [vmem:[%s6206_s1 + $0x1b4] sm:$0xf0]  ;;  %v3049_v9 = vld [vmem:[%s6206_s1 + $0x288] sm:$0xf] }
  0x80   :  { %1769 = vmatpush.bf16.msrb.mxu0 %v3270_v1  ;;  %v3065_v1 = vld [vmem:[%s6206_s1 + $0x2a8] sm:$0xf]  ;;  %v2938_v5 = vor.u32 %v4118_v0, %v2937_v62  ;;  %v4146_v10 = vld [vmem:[%s6206_s1 + $0x294] sm:$0xf0] }
  0x81   :  { %1782 = vmatpush.bf16.msrb.mxu1 %v3398_v2  ;;  %v4150_v2 = vld [vmem:[%s6206_s1 + $0x2b4] sm:$0xf0]  ;;  %v3177_v11 = vld [vmem:[%s6206_s1 + $0x388] sm:$0xf]  ;;  %v3050_v15 = vor.u32 %v4146_v10, %v3049_v9 }
  0x82   :  { %1795 = vmatpush.bf16.msrb.mxu2 %v3526_v3  ;;  %v4182_v3 = vld [vmem:[%s6206_s1 + $0x3b4] sm:$0xf0]  ;;  %v3066_v6 = vor.u32 %v4150_v2, %v3065_v1  ;;  %v2905_v18 = vld [vmem:[%s6206_s1 + $0x168] sm:$0xf] }
  0x83   :  { %1808 = vmatpush.bf16.msrb.mxu3 %v3654_v7  ;;  %v2921_v7 = vld [vmem:[%s6206_s1 + $0x188] sm:$0xf]  ;;  %v4178_v12 = vld [vmem:[%s6206_s1 + $0x394] sm:$0xf0] }
  0x84   :  { %1770 = vmatpush.bf16.msrb.mxu0 %v3254_v13  ;;  %v3178_v19 = vor.u32 %v4178_v12, %v3177_v11  ;;  %v4110_v23 = vld [vmem:[%s6206_s1 + $0x174] sm:$0xf0]  ;;  %v3161_v27 = vld [vmem:[%s6206_s1 + $0x368] sm:$0xf] }
  0x85   :  { %1783 = vmatpush.bf16.msrb.mxu1 %v3382_v16  ;;  %v2777_v16 = vld [vmem:[%s6206_s1 + $0x68] sm:$0xf]  ;;  %v4142_v25 = vld [vmem:[%s6206_s1 + $0x274] sm:$0xf0]  ;;  %v2906_v33 = vor.u32 %v4110_v23, %v2905_v18 }
  0x86   :  { %1796 = vmatpush.bf16.msrb.mxu2 %v3510_v17  ;;  %v4078_v17 = vld [vmem:[%s6206_s1 + $0x74] sm:$0xf0]  ;;  %v2889_v37 = vld [vmem:[%s6206_s1 + $0x148] sm:$0xf] }
  0x87   :  { %1809 = vmatpush.bf16.msrb.mxu3 %v3638_v24  ;;  %v3033_v24 = vld [vmem:[%s6206_s1 + $0x268] sm:$0xf]  ;;  %v4174_v28 = vld [vmem:[%s6206_s1 + $0x374] sm:$0xf0]  ;;  %v2778_v30 = vor.u32 %v4078_v17, %v2777_v16 }
  0x88   :  { %1771 = vmatpush.bf16.msrb.mxu0 %v3238_v35  ;;  %v3034_v34 = vor.u32 %v4142_v25, %v3033_v24  ;;  %v2761_v35 = vld [vmem:[%s6206_s1 + $0x48] sm:$0xf]  ;;  %v4074_v36 = vld [vmem:[%s6206_s1 + $0x54] sm:$0xf0]  ;;  %v3162_v39 = vor.u32 %v4174_v28, %v3161_v27 }
  0x89   :  { %1784 = vmatpush.bf16.msrb.mxu1 %v3366_v40  ;;  %v4106_v40 = vld [vmem:[%s6206_s1 + $0x154] sm:$0xf0]  ;;  %v3145_v43 = vld [vmem:[%s6206_s1 + $0x348] sm:$0xf] }
  0x8a   :  { %1797 = vmatpush.bf16.msrb.mxu2 %v3494_v41  ;;  %v3017_v41 = vld [vmem:[%s6206_s1 + $0x248] sm:$0xf]  ;;  %v4138_v42 = vld [vmem:[%s6206_s1 + $0x254] sm:$0xf0] }
  0x8b   :  { %1810 = vmatpush.bf16.msrb.mxu3 %v3622_v44  ;;  %1772 = vmatmul.bf16.vlgmr.msrb.gmra.mxu0 %v4961_v31  ;;  %v2793_v31 = vld [vmem:[%s6206_s1 + $0x88] sm:$0xf]  ;;  %v4170_v44 = vld [vmem:[%s6206_s1 + $0x354] sm:$0xf0] }
  0x8c   :  { %1816 = vmatpush.bf16.msra.mxu0 %v2842_v45  ;;  %1785 = vmatmul.bf16.vlgmr.msrb.gmra.mxu1 %v4974_v38  ;;  %v4114_v38 = vld [vmem:[%s6206_s1 + $0x194] sm:$0xf0]  ;;  %v2762_v45 = vor.u32 %v4074_v36, %v2761_v35  ;;  %v2745_v48 = vld [vmem:[%s6206_s1 + $0x28] sm:$0xf] }
  0x8d   :  { %1829 = vmatpush.bf16.msra.mxu1 %v2970_v46  ;;  %1798 = vmatmul.bf16.vlgmr.msrb.gmra.mxu2 %v4959_v29  ;;  %v3193_v29 = vld [vmem:[%s6206_s1 + $0x3a8] sm:$0xf]  ;;  %v2922_v14 = vor.u32 %v4114_v38, %v2921_v7  ;;  %v2890_v46 = vor.u32 %v4106_v40, %v2889_v37  ;;  %v4070_v49 = vld [vmem:[%s6206_s1 + $0x34] sm:$0xf0] }
  0x8e   :  { %1842 = vmatpush.bf16.msra.mxu2 %v3098_v47  ;;  %1811 = vmatmul.bf16.vlgmr.msrb.gmra.mxu3 %v4963_v32  ;;  %v4082_v32 = vld [vmem:[%s6206_s1 + $0x94] sm:$0xf0]  ;;  %v3194_v8 = vor.u32 %v4182_v3, %v3193_v29  ;;  %v3018_v47 = vor.u32 %v4138_v42, %v3017_v41  ;;  %v2873_v50 = vld [vmem:[%s6206_s1 + $0x128] sm:$0xf] }
  0x8f   :  { %1855 = vmatpush.bf16.msra.mxu3 %v3226_v51  ;;  %v2794_v13 = vor.u32 %v4082_v32, %v2793_v31  ;;  %v3146_v51 = vor.u32 %v4170_v44, %v3145_v43  ;;  %v4102_v52 = vld [vmem:[%s6206_s1 + $0x134] sm:$0xf0]  ;;  %v3001_v53 = vld [vmem:[%s6206_s1 + $0x228] sm:$0xf] }
  0x90   :  { %1817 = vmatpush.bf16.msra.mxu0 %v2826_v57  ;;  %v4134_v54 = vld [vmem:[%s6206_s1 + $0x234] sm:$0xf0]  ;;  %v3129_v55 = vld [vmem:[%s6206_s1 + $0x328] sm:$0xf]  ;;  %v2746_v57 = vor.u32 %v4070_v49, %v2745_v48  ;;  %v2874_v60 = vor.u32 %v4102_v52, %v2873_v50 }
  0x91   :  { %1830 = vmatpush.bf16.msra.mxu1 %v2954_v58  ;;  %v4166_v56 = vld [vmem:[%s6206_s1 + $0x334] sm:$0xf0]  ;;  %v2729_v58 = vld [vmem:[%s6206_s1 + $0x8] sm:$0xf]  ;;  %v3002_v61 = vor.u32 %v4134_v54, %v3001_v53 }
  0x92   :  { %1843 = vmatpush.bf16.msra.mxu2 %v3082_v59  ;;  %v4066_v59 = vld [vmem:[%s6206_s1 + $0x14] sm:$0xf0]  ;;  %v2857_v62 = vld [vmem:[%s6206_s1 + $0x108] sm:$0xf]  ;;  %v3130_v1 = vor.u32 %v4166_v56, %v3129_v55 }
  0x93   :  { %1856 = vmatpush.bf16.msra.mxu3 %v3210_v63  ;;  %v4098_v63 = vld [vmem:[%s6206_s1 + $0x114] sm:$0xf0]  ;;  %v2985_v0 = vld [vmem:[%s6206_s1 + $0x208] sm:$0xf]  ;;  %v2730_v31 = vor.u32 %v4066_v59, %v2729_v58 }
  0x94   :  { %1818 = vmatpush.bf16.msra.mxu0 %v2810_v4  ;;  %v4130_v2 = vld [vmem:[%s6206_s1 + $0x214] sm:$0xf0]  ;;  %v3113_v29 = vld [vmem:[%s6206_s1 + $0x308] sm:$0xf]  ;;  %v2858_v38 = vor.u32 %v4098_v63, %v2857_v62  ;;  %v5628_v63 = vld [vmem:[%s6207_s2] sm:$0xf] }
  0x95   :  { %1831 = vmatpush.bf16.msra.mxu1 %v2938_v5  ;;  %v4162_v3 = vld [vmem:[%s6206_s1 + $0x314] sm:$0xf0]  ;;  %v3353_v4 = vld [vmem:[%s6206_s1 + $0x4e8] sm:$0xf]  ;;  %v2986_v9 = vor.u32 %v4130_v2, %v2985_v0 }
  0x96   :  { %1844 = vmatpush.bf16.msra.mxu2 %v3066_v6  ;;  %v4222_v5 = vld [vmem:[%s6206_s1 + $0x4f4] sm:$0xf0]  ;;  %v3481_v6 = vld [vmem:[%s6206_s1 + $0x5e8] sm:$0xf]  ;;  %v3114_v12 = vor.u32 %v4162_v3, %v3113_v29 }
  0x97   :  { %1857 = vmatpush.bf16.msra.mxu3 %v3194_v8  ;;  %v4254_v32 = vld [vmem:[%s6206_s1 + $0x5f4] sm:$0xf0]  ;;  %v3609_v7 = vld [vmem:[%s6206_s1 + $0x6e8] sm:$0xf] }
  0x98   :  { %1819 = vmatpush.bf16.msra.mxu0 %v2794_v13  ;;  %v4286_v8 = vld [vmem:[%s6206_s1 + $0x6f4] sm:$0xf0]  ;;  %v3737_v10 = vld [vmem:[%s6206_s1 + $0x7e8] sm:$0xf]  ;;  %v3354_v13 = vor.u32 %v4222_v5, %v3353_v4 }
  0x99   :  { %1832 = vmatpush.bf16.msra.mxu1 %v2922_v14  ;;  %v4318_v11 = vld [vmem:[%s6206_s1 + $0x7f4] sm:$0xf0]  ;;  %v3482_v14 = vor.u32 %v4254_v32, %v3481_v6  ;;  %v3337_v16 = vld [vmem:[%s6206_s1 + $0x4c8] sm:$0xf] }
  0x9a   :  { %1845 = vmatpush.bf16.msra.mxu2 %v3050_v15  ;;  %v3610_v15 = vor.u32 %v4286_v8, %v3609_v7  ;;  %v4218_v17 = vld [vmem:[%s6206_s1 + $0x4d4] sm:$0xf0]  ;;  %v3465_v18 = vld [vmem:[%s6206_s1 + $0x5c8] sm:$0xf] }
  0x9b   :  { %1858 = vmatpush.bf16.msra.mxu3 %v3178_v19  ;;  %v3738_v19 = vor.u32 %v4318_v11, %v3737_v10  ;;  %v4250_v23 = vld [vmem:[%s6206_s1 + $0x5d4] sm:$0xf0]  ;;  %v3593_v24 = vld [vmem:[%s6206_s1 + $0x6c8] sm:$0xf] }
  0x9c   :  { %1820 = vmatpush.bf16.msra.mxu0 %v2778_v30  ;;  %v4282_v25 = vld [vmem:[%s6206_s1 + $0x6d4] sm:$0xf0]  ;;  %v3721_v27 = vld [vmem:[%s6206_s1 + $0x7c8] sm:$0xf]  ;;  %v3338_v30 = vor.u32 %v4218_v17, %v3337_v16 }
  0x9d   :  { %1833 = vmatpush.bf16.msra.mxu1 %v2906_v33  ;;  %v4314_v28 = vld [vmem:[%s6206_s1 + $0x7d4] sm:$0xf0]  ;;  %v3466_v33 = vor.u32 %v4250_v23, %v3465_v18  ;;  %v3321_v35 = vld [vmem:[%s6206_s1 + $0x4a8] sm:$0xf] }
  0x9e   :  { %1846 = vmatpush.bf16.msra.mxu2 %v3034_v34  ;;  %v3594_v34 = vor.u32 %v4282_v25, %v3593_v24  ;;  %v4214_v36 = vld [vmem:[%s6206_s1 + $0x4b4] sm:$0xf0]  ;;  %v3449_v37 = vld [vmem:[%s6206_s1 + $0x5a8] sm:$0xf] }
  0x9f   :  { %1859 = vmatpush.bf16.msra.mxu3 %v3162_v39  ;;  %v3722_v39 = vor.u32 %v4314_v28, %v3721_v27  ;;  %v4246_v40 = vld [vmem:[%s6206_s1 + $0x5b4] sm:$0xf0]  ;;  %v3577_v41 = vld [vmem:[%s6206_s1 + $0x6a8] sm:$0xf] }
  0xa0   :  { %1821 = vmatpush.bf16.msra.mxu0 %v2762_v45  ;;  %v4278_v42 = vld [vmem:[%s6206_s1 + $0x6b4] sm:$0xf0]  ;;  %v3705_v43 = vld [vmem:[%s6206_s1 + $0x7a8] sm:$0xf]  ;;  %v3322_v45 = vor.u32 %v4214_v36, %v3321_v35 }
  0xa1   :  { %1834 = vmatpush.bf16.msra.mxu1 %v2890_v46  ;;  %v4310_v44 = vld [vmem:[%s6206_s1 + $0x7b4] sm:$0xf0]  ;;  %v3450_v46 = vor.u32 %v4246_v40, %v3449_v37  ;;  %v3561_v49 = vld [vmem:[%s6206_s1 + $0x688] sm:$0xf] }
  0xa2   :  { %1847 = vmatpush.bf16.msra.mxu2 %v3018_v47  ;;  %v3305_v47 = vld [vmem:[%s6206_s1 + $0x488] sm:$0xf]  ;;  %v4210_v48 = vld [vmem:[%s6206_s1 + $0x494] sm:$0xf0] }
  0xa3   :  { %1860 = vmatpush.bf16.msra.mxu3 %v3146_v51  ;;  %v4274_v50 = vld [vmem:[%s6206_s1 + $0x694] sm:$0xf0]  ;;  %v3689_v51 = vld [vmem:[%s6206_s1 + $0x788] sm:$0xf]  ;;  %v3306_v53 = vor.u32 %v4210_v48, %v3305_v47 }
  0xa4   :  { %1822 = vmatpush.bf16.msra.mxu0 %v2746_v57  ;;  %v4306_v52 = vld [vmem:[%s6206_s1 + $0x794] sm:$0xf0]  ;;  %v3289_v54 = vld [vmem:[%s6206_s1 + $0x468] sm:$0xf]  ;;  %v3562_v56 = vor.u32 %v4274_v50, %v3561_v49  ;;  %v2971_v50 = vld [vmem:[%s6206_s1 + $0x1f8] sm:$0xf0] }
  0xa5   :  { %1835 = vmatpush.bf16.msra.mxu1 %v2874_v60  ;;  %v4206_v57 = vld [vmem:[%s6206_s1 + $0x474] sm:$0xf0]  ;;  %v3417_v58 = vld [vmem:[%s6206_s1 + $0x568] sm:$0xf]  ;;  %v3690_v60 = vor.u32 %v4306_v52, %v3689_v51  ;;  %v4156_v51 = vld [vmem:[%s6206_s1 + $0x2ec] sm:$0xf] }
  0xa6   :  { %1848 = vmatpush.bf16.msra.mxu2 %v3002_v61  ;;  %v4238_v59 = vld [vmem:[%s6206_s1 + $0x574] sm:$0xf0]  ;;  %v3545_v61 = vld [vmem:[%s6206_s1 + $0x668] sm:$0xf]  ;;  %v3290_v2 = vor.u32 %v4206_v57, %v3289_v54  ;;  %v3099_v52 = vld [vmem:[%s6206_s1 + $0x2f8] sm:$0xf0] }
  0xa7   :  { %1861 = vmatpush.bf16.msra.mxu3 %v3130_v1  ;;  %v4270_v62 = vld [vmem:[%s6206_s1 + $0x674] sm:$0xf0]  ;;  %v3673_v0 = vld [vmem:[%s6206_s1 + $0x768] sm:$0xf]  ;;  %v3418_v3 = vor.u32 %v4238_v59, %v3417_v58  ;;  %v4188_v57 = vld [vmem:[%s6206_s1 + $0x3ec] sm:$0xf] }
  0xa8   :  { %1823 = vmatpush.bf16.msra.mxu0 %v2730_v31  ;;  %v4302_v1 = vld [vmem:[%s6206_s1 + $0x774] sm:$0xf0]  ;;  %v3273_v29 = vld [vmem:[%s6206_s1 + $0x448] sm:$0xf]  ;;  %v3546_v4 = vor.u32 %v4270_v62, %v3545_v61  ;;  %v302_v31 = vperm.slane %v5628_v63, 0 }
  0xa9   :  { %1836 = vmatpush.bf16.msra.mxu1 %v2858_v38  ;;  %v4202_v5 = vld [vmem:[%s6206_s1 + $0x454] sm:$0xf0]  ;;  %v3401_v6 = vld [vmem:[%s6206_s1 + $0x548] sm:$0xf]  ;;  %v3674_v32 = vor.u32 %v4302_v1, %v3673_v0  ;;  %v3227_v58 = vld [vmem:[%s6206_s1 + $0x3f8] sm:$0xf0]  ;;  %v3102_v0 = vor.u32 %v4156_v51, %v3099_v52 }
  0xaa   :  { %1849 = vmatpush.bf16.msra.mxu2 %v2986_v9  ;;  %v4234_v7 = vld [vmem:[%s6206_s1 + $0x554] sm:$0xf0]  ;;  %v3529_v8 = vld [vmem:[%s6206_s1 + $0x648] sm:$0xf]  ;;  %v3274_v11 = vor.u32 %v4202_v5, %v3273_v29  ;;  %v4088_v1 = vld [vmem:[%s6206_s1 + $0xcc] sm:$0xf] }
  0xab   :  { %1862 = vmatpush.bf16.msra.mxu3 %v3114_v12  ;;  %1824 = vmatmul.bf16.vlgmr.msra.gmra.mxu0 %v4817_v21  ;;  %v3433_v21 = vld [vmem:[%s6206_s1 + $0x588] sm:$0xf]  ;;  %v4266_v38 = vld [vmem:[%s6206_s1 + $0x654] sm:$0xf0]  ;;  %v4120_v29 = vld [vmem:[%s6206_s1 + $0x1cc] sm:$0xf] }
  0xac   :  { %1868 = vmatpush.bf16.msrb.mxu0 %v3354_v13  ;;  %1837 = vmatmul.bf16.vlgmr.msra.gmra.mxu1 %v4828_v26  ;;  %v4242_v26 = vld [vmem:[%s6206_s1 + $0x594] sm:$0xf0]  ;;  %v3657_v9 = vld [vmem:[%s6206_s1 + $0x748] sm:$0xf]  ;;  %v3402_v13 = vor.u32 %v4234_v7, %v3401_v6  ;;  %v4152_v5 = vld [vmem:[%s6206_s1 + $0x2cc] sm:$0xf] }
  0xad   :  { %1881 = vmatpush.bf16.msrb.mxu1 %v3482_v14  ;;  %1850 = vmatmul.bf16.vlgmr.msra.gmra.mxu2 %v4815_v20  ;;  %v3578_v20 = vor.u32 %v4278_v42, %v3577_v41  ;;  %v3434_v55 = vor.u32 %v4242_v26, %v3433_v21  ;;  %v4298_v10 = vld [vmem:[%s6206_s1 + $0x754] sm:$0xf0]  ;;  %v3530_v14 = vor.u32 %v4266_v38, %v3529_v8  ;;  %v3385_v17 = vld [vmem:[%s6206_s1 + $0x528] sm:$0xf]  ;;  %v4092_v21 = vld [vmem:[%s6206_s1 + $0xec] sm:$0xf] }
  0xae   :  { %1894 = vmatpush.bf16.msrb.mxu2 %v3610_v15  ;;  %1863 = vmatmul.bf16.vlgmr.msra.gmra.mxu3 %v4819_v22  ;;  %v3706_v22 = vor.u32 %v4310_v44, %v3705_v43  ;;  %v3257_v15 = vld [vmem:[%s6206_s1 + $0x428] sm:$0xf]  ;;  %v4198_v16 = vld [vmem:[%s6206_s1 + $0x434] sm:$0xf0]  ;;  %v3658_v23 = vor.u32 %v4298_v10, %v3657_v9  ;;  %v4124_v26 = vld [vmem:[%s6206_s1 + $0x1ec] sm:$0xf] }
  0xaf   :  { %1907 = vmatpush.bf16.msrb.mxu3 %v3738_v19  ;;  %v4230_v24 = vld [vmem:[%s6206_s1 + $0x534] sm:$0xf0]  ;;  %v3513_v25 = vld [vmem:[%s6206_s1 + $0x628] sm:$0xf]  ;;  %v2974_v62 = vor.u32 %v4124_v26, %v2971_v50  ;;  %v3083_v6 = vld [vmem:[%s6206_s1 + $0x2d8] sm:$0xf0] }
  0xb0   :  { %1869 = vmatpush.bf16.msrb.mxu0 %v3338_v30  ;;  %v4262_v27 = vld [vmem:[%s6206_s1 + $0x634] sm:$0xf0]  ;;  %v3641_v28 = vld [vmem:[%s6206_s1 + $0x728] sm:$0xf]  ;;  %v3386_v37 = vor.u32 %v4230_v24, %v3385_v17  ;;  %v3086_v10 = vor.u32 %v4152_v5, %v3083_v6  ;;  %v4148_v17 = vld [vmem:[%s6206_s1 + $0x2ac] sm:$0xf] }
  0xb1   :  { %1882 = vmatpush.bf16.msrb.mxu1 %v3466_v33  ;;  %v4294_v30 = vld [vmem:[%s6206_s1 + $0x734] sm:$0xf0]  ;;  %v3241_v35 = vld [vmem:[%s6206_s1 + $0x408] sm:$0xf]  ;;  %v4180_v24 = vld [vmem:[%s6206_s1 + $0x3ac] sm:$0xf] }
  0xb2   :  { %1895 = vmatpush.bf16.msrb.mxu2 %v3594_v34  ;;  %v3258_v34 = vor.u32 %v4198_v16, %v3257_v15  ;;  %v4194_v36 = vld [vmem:[%s6206_s1 + $0x414] sm:$0xf0]  ;;  %v3369_v40 = vld [vmem:[%s6206_s1 + $0x508] sm:$0xf]  ;;  %v3642_v44 = vor.u32 %v4294_v30, %v3641_v28  ;;  %v2939_v16 = vld [vmem:[%s6206_s1 + $0x1b8] sm:$0xf0] }
  0xb3   :  { %1908 = vmatpush.bf16.msrb.mxu3 %v3722_v39  ;;  %v3514_v39 = vor.u32 %v4262_v27, %v3513_v25  ;;  %v4226_v41 = vld [vmem:[%s6206_s1 + $0x514] sm:$0xf0]  ;;  %v3497_v42 = vld [vmem:[%s6206_s1 + $0x608] sm:$0xf]  ;;  %v3242_v49 = vor.u32 %v4194_v36, %v3241_v35  ;;  %v3195_v25 = vld [vmem:[%s6206_s1 + $0x3b8] sm:$0xf0] }
  0xb4   :  { %1870 = vmatpush.bf16.msrb.mxu0 %v3322_v45  ;;  %v4258_v45 = vld [vmem:[%s6206_s1 + $0x614] sm:$0xf0]  ;;  %v5792_v27 = vld [vmem:[#allocation1 + $0x2d] sm:$0xff]  ;;  %v2795_v35 = vld [vmem:[%s6206_s1 + $0x98] sm:$0xf0] }
  0xb5   :  { %1883 = vmatpush.bf16.msrb.mxu1 %v3450_v46  ;;  %v3625_v46 = vld [vmem:[%s6206_s1 + $0x708] sm:$0xf]  ;;  %v4112_v36 = vld [vmem:[%s6206_s1 + $0x18c] sm:$0xf]  ;;  %v2907_v50 = vld [vmem:[%s6206_s1 + $0x178] sm:$0xf0] }
  0xb6   :  { %1896 = vmatpush.bf16.msrb.mxu2 %v3578_v20  ;;  %v1630_v19 = vpop.f32.mrf.mxu1  ;;  %v4290_v20 = vld [vmem:[%s6206_s1 + $0x714] sm:$0xf0]  ;;  %v4140_v51 = vld [vmem:[%s6206_s1 + $0x26c] sm:$0xf]  ;;  %v3035_v52 = vld [vmem:[%s6206_s1 + $0x278] sm:$0xf0] }
  0xb7   :  { %1909 = vmatpush.bf16.msrb.mxu3 %v3706_v22  ;;  %v1617_v12 = vpop.f32.mrf.mxu0  ;;  %v2843_v22 = vld [vmem:[%s6206_s1 + $0xf8] sm:$0xf0]  ;;  %v4168_v5 = vld [vmem:[%s6206_s1 + $0x34c] sm:$0xf] }
  0xb8   :  { %1871 = vmatpush.bf16.msrb.mxu0 %v3306_v53  ;;  %v1618_v18 = vadd.f32 %v1617_v12, %v302_v31  ;;  %v2846_v61 = vor.u32 %v4092_v21, %v2843_v22  ;;  %v4184_v31 = vld [vmem:[%s6206_s1 + $0x3cc] sm:$0xf]  ;;  %v2811_v12 = vld [vmem:[%s6206_s1 + $0xb8] sm:$0xf0] }
  0xb9   :  { %1884 = vmatpush.bf16.msrb.mxu1 %v3434_v55  ;;  %v3370_v55 = vor.u32 %v4226_v41, %v3369_v40  ;;  %v4144_v40 = vld [vmem:[%s6206_s1 + $0x28c] sm:$0xf]  ;;  %v3051_v41 = vld [vmem:[%s6206_s1 + $0x298] sm:$0xf0] }
  0xba   :  { %1897 = vmatpush.bf16.msrb.mxu2 %v3562_v56  ;;  %v1631_v33 = vadd.f32 %v1630_v19, %v1618_v18  ;;  %v3498_v56 = vor.u32 %v4258_v45, %v3497_v42  ;;  %v3067_v18 = vld [vmem:[%s6206_s1 + $0x2b8] sm:$0xf0]  ;;  %v5780_v19 = vld [vmem:[#allocation1 + $0x24] sm:$0xff]  ;;  %v4176_v42 = vld [vmem:[%s6206_s1 + $0x38c] sm:$0xf] }
  0xbb   :  { %1910 = vmatpush.bf16.msrb.mxu3 %v3690_v60  ;;  %v3626_v60 = vor.u32 %v4290_v20, %v3625_v46  ;;  %v3054_v20 = vor.u32 %v4144_v40, %v3051_v41  ;;  %v4108_v21 = vld [vmem:[%s6206_s1 + $0x16c] sm:$0xf]  ;;  %v3147_v6 = vld [vmem:[%s6206_s1 + $0x358] sm:$0xf0] }
  0xbc   :  { %1872 = vmatpush.bf16.msrb.mxu0 %v3290_v2  ;;  %v1643_v43 = vpop.f32.mrf.mxu2  ;;  %v2827_v2 = vld [vmem:[%s6206_s1 + $0xd8] sm:$0xf0] }
  0xbd   :  { %1885 = vmatpush.bf16.msrb.mxu1 %v3418_v3  ;;  %v1644_v47 = vadd.f32 %v1643_v43, %v1631_v33  ;;  %v3230_v3 = vor.u32 %v4188_v57, %v3227_v58  ;;  %v2830_v8 = vor.u32 %v4088_v1, %v2827_v2  ;;  %v3070_v33 = vor.u32 %v4148_v17, %v3067_v18  ;;  %v3179_v43 = vld [vmem:[%s6206_s1 + $0x398] sm:$0xf0]  ;;  %v4136_v2 = vld [vmem:[%s6206_s1 + $0x24c] sm:$0xf] }
  0xbe   :  { %1898 = vmatpush.bf16.msrb.mxu2 %v3546_v4  ;;  %v1656_v48 = vpop.f32.mrf.mxu3  ;;  %v1632_v59 = vpop.f32.mrf.mxu1  ;;  %v2955_v4 = vld [vmem:[%s6206_s1 + $0x1d8] sm:$0xf0]  ;;  %v2910_v57 = vor.u32 %v4108_v21, %v2907_v50  ;;  %v3038_v58 = vor.u32 %v4140_v51, %v3035_v52  ;;  %v4164_v18 = vld [vmem:[%s6206_s1 + $0x32c] sm:$0xf] }
  0xbf   :  { %1911 = vmatpush.bf16.msrb.mxu3 %v3674_v32  ;;  %v5727_v53 = vadd.f32 %v1656_v48, %v1644_v47  ;;  %v1619_v54 = vpop.f32.mrf.mxu0  ;;  %v3211_v32 = vld [vmem:[%s6206_s1 + $0x3d8] sm:$0xf0]  ;;  %v2958_v9 = vor.u32 %v4120_v29, %v2955_v4  ;;  %v4076_v47 = vld [vmem:[%s6206_s1 + $0x6c] sm:$0xf] }
  0xc0   :  { %1873 = vmatpush.bf16.msrb.mxu0 %v3274_v11  ;;  %v4084_v11 = vld [vmem:[%s6206_s1 + $0xac] sm:$0xf]  ;;  %v3214_v15 = vor.u32 %v4184_v31, %v3211_v32  ;;  %v2779_v48 = vld [vmem:[%s6206_s1 + $0x78] sm:$0xf0] }
  0xc1   :  { %1886 = vmatpush.bf16.msrb.mxu1 %v3402_v13  ;;  %v4116_v13 = vld [vmem:[%s6206_s1 + $0x1ac] sm:$0xf]  ;;  %v2814_v28 = vor.u32 %v4084_v11, %v2811_v12  ;;  %v2891_v1 = vld [vmem:[%s6206_s1 + $0x158] sm:$0xf0] }
  0xc2   :  { %1899 = vmatpush.bf16.msrb.mxu2 %v3530_v14  ;;  %v5768_v14 = vld [vmem:[#allocation1 + $0x36] sm:$0xff]  ;;  %v2942_v30 = vor.u32 %v4116_v13, %v2939_v16  ;;  %v4172_v54 = vld [vmem:[%s6206_s1 + $0x36c] sm:$0xf]  ;;  %v3150_v13 = vor.u32 %v4168_v5, %v3147_v6 }
  0xc3   :  { %1912 = vmatpush.bf16.msrb.mxu3 %v3658_v23  ;;  %v5783_v23 = vld [vmem:[#allocation1 + $0x3f] sm:$0xff]  ;;  %v4072_v59 = vld [vmem:[%s6206_s1 + $0x4c] sm:$0xf] }
  0xc4   :  { %1874 = vmatpush.bf16.msrb.mxu0 %v3258_v34  ;;  %v1645_v7 = vpop.f32.mrf.mxu2  ;;  %v4080_v34 = vld [vmem:[%s6206_s1 + $0x8c] sm:$0xf]  ;;  %v3019_v29 = vld [vmem:[%s6206_s1 + $0x258] sm:$0xf0] }
  0xc5   :  { %1887 = vmatpush.bf16.msrb.mxu1 %v3386_v37  ;;  %v3198_v37 = vor.u32 %v4180_v24, %v3195_v25  ;;  %v4100_v11 = vld [vmem:[%s6206_s1 + $0x12c] sm:$0xf]  ;;  %v3003_v17 = vld [vmem:[%s6206_s1 + $0x238] sm:$0xf0] }
  0xc6   :  { %1900 = vmatpush.bf16.msrb.mxu2 %v3514_v39  ;;  %v1658_v38 = vpop.f32.mrf.mxu3  ;;  %v2923_v39 = vld [vmem:[%s6206_s1 + $0x198] sm:$0xf0]  ;;  %v4132_v16 = vld [vmem:[%s6206_s1 + $0x22c] sm:$0xf] }
  0xc7   :  { %1913 = vmatpush.bf16.msrb.mxu3 %v3642_v44  ;;  %v2798_v44 = vor.u32 %v4080_v34, %v2795_v35  ;;  %v2926_v46 = vor.u32 %v4112_v36, %v2923_v39  ;;  %v3022_v38 = vor.u32 %v4136_v2, %v3019_v29  ;;  %v3131_v24 = vld [vmem:[%s6206_s1 + $0x338] sm:$0xf0]  ;;  %v3006_v34 = vor.u32 %v4132_v16, %v3003_v17  ;;  %v4096_v35 = vld [vmem:[%s6206_s1 + $0x10c] sm:$0xf] }
  0xc8   :  { %1875 = vmatpush.bf16.msrb.mxu0 %v3242_v49  ;;  %v1669_v45 = vpop.f32.mrf.mxu0  ;;  %v3182_v49 = vor.u32 %v4176_v42, %v3179_v43  ;;  %v2859_v36 = vld [vmem:[%s6206_s1 + $0x118] sm:$0xf0]  ;;  %v3134_v40 = vor.u32 %v4164_v18, %v3131_v24  ;;  %v4160_v42 = vld [vmem:[%s6206_s1 + $0x30c] sm:$0xf] }
  0xc9   :  { %1888 = vmatpush.bf16.msrb.mxu1 %v3370_v55  ;;  %v1670_v22 = vadd.f32 %v1669_v45, %v5727_v53  ;;  %v1682_v26 = vpop.f32.mrf.mxu1  ;;  %v3163_v53 = vld [vmem:[%s6206_s1 + $0x378] sm:$0xf0]  ;;  %v4220_v45 = vld [vmem:[%s6206_s1 + $0x4ec] sm:$0xf] }
  0xca   :  { %1901 = vmatpush.bf16.msrb.mxu2 %v3498_v56  ;;  %v2782_v56 = vor.u32 %v4076_v47, %v2779_v48  ;;  %v2987_v41 = vld [vmem:[%s6206_s1 + $0x218] sm:$0xf0]  ;;  %v4284_v21 = vld [vmem:[%s6206_s1 + $0x6ec] sm:$0xf] }
  0xcb   :  { %1914 = vmatpush.bf16.msrb.mxu3 %v3626_v60  ;;  %1876 = vmatmul.bf16.vlgmr.msrb.gmra.mxu0 %v5780_v19  ;;  %v1683_v55 = vadd.f32 %v1682_v26, %v1670_v22  ;;  %v2763_v60 = vld [vmem:[%s6206_s1 + $0x58] sm:$0xf0]  ;;  %v2862_v26 = vor.u32 %v4096_v35, %v2859_v36  ;;  %v4316_v50 = vld [vmem:[%s6206_s1 + $0x7ec] sm:$0xf] }
  0xcc   :  { %1920 = vmatpush.bf16.msra.mxu0 %v2846_v61  ;;  %1889 = vmatmul.bf16.vlgmr.msrb.gmra.mxu1 %v5792_v27  ;;  %v4104_v61 = vld [vmem:[%s6206_s1 + $0x14c] sm:$0xf]  ;;  %v2766_v31 = vor.u32 %v4072_v59, %v2763_v60  ;;  %v3115_v43 = vld [vmem:[%s6206_s1 + $0x318] sm:$0xf0] }
  0xcd   :  { %1933 = vmatpush.bf16.msra.mxu1 %v2974_v62  ;;  %1902 = vmatmul.bf16.vlgmr.msrb.gmra.mxu2 %v5768_v14  ;;  %v3483_v48 = vld [vmem:[%s6206_s1 + $0x5f8] sm:$0xf0]  ;;  %v3118_v52 = vor.u32 %v4160_v42, %v3115_v43  ;;  %v4244_v6 = vld [vmem:[%s6206_s1 + $0x5ac] sm:$0xf] }
  0xce   :  { %1946 = vmatpush.bf16.msra.mxu2 %v3102_v0  ;;  %1915 = vmatmul.bf16.vlgmr.msrb.gmra.mxu3 %v5783_v23  ;;  %v3166_v0 = vor.u32 %v4172_v54, %v3163_v53  ;;  %v3611_v22 = vld [vmem:[%s6206_s1 + $0x6f8] sm:$0xf0]  ;;  %v4411_v16 = vld [vmem:[#allocation1 + $0x9] sm:$0xff] }
  0xcf   :  { %1959 = vmatpush.bf16.msra.mxu3 %v3230_v3  ;;  %v3739_v51 = vld [vmem:[%s6206_s1 + $0x7f8] sm:$0xf0]  ;;  %v4208_v24 = vld [vmem:[%s6206_s1 + $0x48c] sm:$0xf] }
  0xd0   :  { %1921 = vmatpush.bf16.msra.mxu0 %v2830_v8  ;;  %v1695_v62 = vpop.f32.mrf.mxu2  ;;  %v1671_v7 = vpop.f32.mrf.mxu0  ;;  %v2894_v8 = vor.u32 %v4104_v61, %v2891_v1  ;;  %v3742_v59 = vor.u32 %v4316_v50, %v3739_v51  ;;  %v3467_v60 = vld [vmem:[%s6206_s1 + $0x5d8] sm:$0xf0]  ;;  %v4280_v61 = vld [vmem:[%s6206_s1 + $0x6cc] sm:$0xf] }
  0xd1   :  { %1934 = vmatpush.bf16.msra.mxu1 %v2958_v9  ;;  %v1696_v3 = vadd.f32 %v1695_v62, %v1683_v55  ;;  %v1708_v4 = vpop.f32.mrf.mxu3  ;;  %v4068_v9 = vld [vmem:[%s6206_s1 + $0x2c] sm:$0xf]  ;;  %v1684_v12 = vpop.f32.mrf.mxu1  ;;  %v3614_v55 = vor.u32 %v4284_v21, %v3611_v22  ;;  %v3595_v62 = vld [vmem:[%s6206_s1 + $0x6d8] sm:$0xf0]  ;;  %v4408_v7 = vld [vmem:[#allocation1 + $0x12] sm:$0xff] }
  0xd2   :  { %1947 = vmatpush.bf16.msra.mxu2 %v3086_v10  ;;  %v2747_v10 = vld [vmem:[%s6206_s1 + $0x38] sm:$0xf0]  ;;  %v4409_v12 = vld [vmem:[#allocation1] sm:$0xff]  ;;  %v4304_v36 = vld [vmem:[%s6206_s1 + $0x78c] sm:$0xf] }
  0xd3   :  { %1960 = vmatpush.bf16.msra.mxu3 %v3214_v15  ;;  %v5868_v32 = vadd.f32 %v1708_v4, %v1696_v3  ;;  %v2875_v15 = vld [vmem:[%s6206_s1 + $0x138] sm:$0xf0]  ;;  %v2750_v25 = vor.u32 %v4068_v9, %v2747_v10  ;;  %v3598_v3 = vor.u32 %v4280_v61, %v3595_v62  ;;  %v4212_v4 = vld [vmem:[%s6206_s1 + $0x4ac] sm:$0xf] }
  0xd4   :  { %1922 = vmatpush.bf16.msra.mxu0 %v2814_v28  ;;  %v4064_v28 = vld [vmem:[%s6206_s1 + $0xc] sm:$0xf]  ;;  %v3723_v1 = vld [vmem:[%s6206_s1 + $0x7d8] sm:$0xf0] }
  0xd5   :  { %1935 = vmatpush.bf16.msra.mxu1 %v2942_v30  ;;  %v2731_v30 = vld [vmem:[%s6206_s1 + $0x18] sm:$0xf0]  ;;  %v4308_v10 = vld [vmem:[%s6206_s1 + $0x7ac] sm:$0xf]  ;;  %vm2024_vm1 = vcmp.gt.f32.partialorder %v5868_v32, 0.0 }
  0xd6   :  { %1948 = vmatpush.bf16.msra.mxu2 %v3070_v33  ;;  %v2878_v33 = vor.u32 %v4100_v11, %v2875_v15  ;;  %v2734_v47 = vor.u32 %v4064_v28, %v2731_v30  ;;  %v3323_v5 = vld [vmem:[%s6206_s1 + $0x4b8] sm:$0xf0]  ;;  %v4240_v28 = vld [vmem:[%s6206_s1 + $0x58c] sm:$0xf] }
  0xd7   :  { %1961 = vmatpush.bf16.msra.mxu3 %v3198_v37  ;;  %v4128_v37 = vld [vmem:[%s6206_s1 + $0x20c] sm:$0xf]  ;;  %v3579_v9 = vld [vmem:[%s6206_s1 + $0x6b8] sm:$0xf0]  ;;  %v3326_v15 = vor.u32 %v4212_v4, %v3323_v5 }
  0xd8   :  { %1923 = vmatpush.bf16.msra.mxu0 %v2798_v44  ;;  %v1697_v39 = vpop.f32.mrf.mxu2  ;;  %v3707_v11 = vld [vmem:[%s6206_s1 + $0x7b8] sm:$0xf0]  ;;  %v4204_v43 = vld [vmem:[%s6206_s1 + $0x46c] sm:$0xf] }
  0xd9   :  { %1936 = vmatpush.bf16.msra.mxu1 %v2926_v46  ;;  %v1710_v44 = vpop.f32.mrf.mxu3  ;;  %v3355_v46 = vld [vmem:[%s6206_s1 + $0x4f8] sm:$0xf0]  ;;  %v3710_v30 = vor.u32 %v4308_v10, %v3707_v11  ;;  %v4300_v22 = vld [vmem:[%s6206_s1 + $0x76c] sm:$0xf]  ;;  %v303_v11 = vperm.slane %v5628_v63, 1 }
  0xda   :  { %1949 = vmatpush.bf16.msra.mxu2 %v3054_v20  ;;  %v4252_v20 = vld [vmem:[%s6206_s1 + $0x5ec] sm:$0xf]  ;;  %v3358_v54 = vor.u32 %v4220_v45, %v3355_v46  ;;  %v3563_v35 = vld [vmem:[%s6206_s1 + $0x698] sm:$0xf0] }
  0xdb   :  { %1962 = vmatpush.bf16.msra.mxu3 %v3182_v49  ;;  %v2990_v49 = vor.u32 %v4128_v37, %v2987_v41  ;;  %v3486_v53 = vor.u32 %v4252_v20, %v3483_v48  ;;  %v3691_v37 = vld [vmem:[%s6206_s1 + $0x798] sm:$0xf0]  ;;  %v4236_v45 = vld [vmem:[%s6206_s1 + $0x56c] sm:$0xf] }
  0xdc   :  { %1924 = vmatpush.bf16.msra.mxu0 %v2782_v56  ;;  %v4216_v56 = vld [vmem:[%s6206_s1 + $0x4cc] sm:$0xf]  ;;  %v3291_v44 = vld [vmem:[%s6206_s1 + $0x478] sm:$0xf0]  ;;  %v3694_v20 = vor.u32 %v4304_v36, %v3691_v37  ;;  %v3801_v36 = vld [vmem:[#allocation2 + $0x70] sm:$0xf] }
  0xdd   :  { %1937 = vmatpush.bf16.msra.mxu1 %v2910_v57  ;;  %v3339_v57 = vld [vmem:[%s6206_s1 + $0x4d8] sm:$0xf0]  ;;  %v4268_v48 = vld [vmem:[%s6206_s1 + $0x66c] sm:$0xf]  ;;  %v4334_v37 = vld [vmem:[#allocation2 + $0x74] sm:$0xf0] }
  0xde   :  { %1950 = vmatpush.bf16.msra.mxu2 %v3038_v58  ;;  %v4248_v58 = vld [vmem:[%s6206_s1 + $0x5cc] sm:$0xf]  ;;  %v3342_v2 = vor.u32 %v4216_v56, %v3339_v57  ;;  %v3547_v21 = vld [vmem:[%s6206_s1 + $0x678] sm:$0xf0] }
  0xdf   :  { %1963 = vmatpush.bf16.msra.mxu3 %v3166_v0  ;;  %v4312_v0 = vld [vmem:[%s6206_s1 + $0x7cc] sm:$0xf]  ;;  %v3470_v29 = vor.u32 %v4248_v58, %v3467_v60  ;;  %v3550_v51 = vor.u32 %v4268_v48, %v3547_v21  ;;  %v3403_v57 = vld [vmem:[%s6206_s1 + $0x558] sm:$0xf0] }
  0xe0   :  { %1925 = vmatpush.bf16.msra.mxu0 %v2766_v31  ;;  %v3726_v31 = vor.u32 %v4312_v0, %v3723_v1  ;;  %v4264_v58 = vld [vmem:[%s6206_s1 + $0x64c] sm:$0xf]  ;;  %v3659_v62 = vld [vmem:[%s6206_s1 + $0x758] sm:$0xf0] }
  0xe1   :  { %1938 = vmatpush.bf16.msra.mxu1 %v2894_v8  ;;  %v3451_v8 = vld [vmem:[%s6206_s1 + $0x5b8] sm:$0xf0]  ;;  %v4296_v61 = vld [vmem:[%s6206_s1 + $0x74c] sm:$0xf] }
  0xe2   :  { %1951 = vmatpush.bf16.msra.mxu2 %v3022_v38  ;;  %v4276_v38 = vld [vmem:[%s6206_s1 + $0x6ac] sm:$0xf]  ;;  %v3454_v17 = vor.u32 %v4244_v6, %v3451_v8  ;;  %v3259_v4 = vld [vmem:[%s6206_s1 + $0x438] sm:$0xf0] }
  0xe3   :  { %1964 = vmatpush.bf16.msra.mxu3 %v3150_v13  ;;  %v4410_v13 = vld [vmem:[#allocation1 + $0x1b] sm:$0xff]  ;;  %v3582_v18 = vor.u32 %v4276_v38, %v3579_v9  ;;  %v4228_v5 = vld [vmem:[%s6206_s1 + $0x52c] sm:$0xf] }
  0xe4   :  { %1926 = vmatpush.bf16.msra.mxu0 %v2750_v25  ;;  %v3307_v25 = vld [vmem:[%s6206_s1 + $0x498] sm:$0xf0]  ;;  %v4260_v8 = vld [vmem:[%s6206_s1 + $0x62c] sm:$0xf] }
  0xe5   :  { %1939 = vmatpush.bf16.msra.mxu1 %v2878_v33  ;;  %v3435_v33 = vld [vmem:[%s6206_s1 + $0x598] sm:$0xf0]  ;;  %v3310_v39 = vor.u32 %v4208_v24, %v3307_v25  ;;  %v4292_v9 = vld [vmem:[%s6206_s1 + $0x72c] sm:$0xf] }
  0xe6   :  { %1952 = vmatpush.bf16.msra.mxu2 %v3006_v34  ;;  %v4272_v34 = vld [vmem:[%s6206_s1 + $0x68c] sm:$0xf]  ;;  %v3438_v41 = vor.u32 %v4240_v28, %v3435_v33  ;;  %v3515_v38 = vld [vmem:[%s6206_s1 + $0x638] sm:$0xf0] }
  0xe7   :  { %1965 = vmatpush.bf16.msra.mxu3 %v3134_v40  ;;  %v3566_v42 = vor.u32 %v4272_v34, %v3563_v35  ;;  %v3643_v10 = vld [vmem:[%s6206_s1 + $0x738] sm:$0xf0]  ;;  %v4256_v28 = vld [vmem:[%s6206_s1 + $0x60c] sm:$0xf] }
  0xe8   :  { %1927 = vmatpush.bf16.msra.mxu0 %v2734_v47  ;;  %v6014_v40 = vpop.f32.mrf.mxu0  ;;  %v3419_v47 = vld [vmem:[%s6206_s1 + $0x578] sm:$0xf0]  ;;  %v3646_v25 = vor.u32 %v4292_v9, %v3643_v10  ;;  %v4288_v33 = vld [vmem:[%s6206_s1 + $0x70c] sm:$0xf] }
  0xe9   :  { %1940 = vmatpush.bf16.msra.mxu1 %v2862_v26  ;;  %v6025_v46 = vpop.f32.mrf.mxu1  ;;  %v3675_v26 = vld [vmem:[%s6206_s1 + $0x778] sm:$0xf0]  ;;  %v3422_v50 = vor.u32 %v4236_v45, %v3419_v47  ;;  %v3802_v47 = vor.u32 %v4334_v37, %v3801_v36  ;;  %v4322_v36 = vld [vmem:[#allocation2 + $0x14] sm:$0xf0] }
  0xea   :  { %1953 = vmatpush.bf16.msra.mxu2 %v2990_v49  ;;  %v3294_v49 = vor.u32 %v4204_v43, %v3291_v44  ;;  %v3678_v56 = vor.u32 %v4300_v22, %v3675_v26  ;;  %v3371_v63 = vld [vmem:[%s6206_s1 + $0x518] sm:$0xf0]  ;;  %v4350_v43 = vld [vmem:[#allocation2 + $0xf4] sm:$0xf0]  ;;  %v3793_v22 = vld [vmem:[#allocation2 + $0x60] sm:$0xf] }
  0xeb   :  { %1966 = vmatpush.bf16.msra.mxu3 %v3118_v52  ;;  %1928 = vmatmul.bf16.vlgmr.msra.gmra.mxu0 %v4409_v12  ;;  %v4200_v52 = vld [vmem:[%s6206_s1 + $0x44c] sm:$0xf]  ;;  %v3627_v35 = vld [vmem:[%s6206_s1 + $0x718] sm:$0xf0]  ;;  %v4332_v26 = vld [vmem:[#allocation2 + $0x64] sm:$0xf0] }
  0xec   :  { %1972 = vmatpush.bf16.msrb.mxu0 %v3358_v54  ;;  %1941 = vmatmul.bf16.vlgmr.msra.gmra.mxu1 %v4411_v16  ;;  %v3275_v54 = vld [vmem:[%s6206_s1 + $0x458] sm:$0xf0]  ;;  %v3518_v16 = vor.u32 %v4260_v8, %v3515_v38 }
  0xed   :  { %1985 = vmatpush.bf16.msrb.mxu1 %v3486_v53  ;;  %1954 = vmatmul.bf16.vlgmr.msra.gmra.mxu2 %v4408_v7  ;;  %v4232_v53 = vld [vmem:[%s6206_s1 + $0x54c] sm:$0xf]  ;;  %v3278_v0 = vor.u32 %v4200_v52, %v3275_v54  ;;  %v3387_v7 = vld [vmem:[%s6206_s1 + $0x538] sm:$0xf0]  ;;  %v3785_v54 = vld [vmem:[#allocation2 + $0x50] sm:$0xf] }
  0xee   :  { %1998 = vmatpush.bf16.msrb.mxu2 %v3614_v55  ;;  %1967 = vmatmul.bf16.vlgmr.msra.gmra.mxu3 %v4410_v13  ;;  %v4192_v13 = vld [vmem:[%s6206_s1 + $0x40c] sm:$0xf] }
  0xef   :  { %2011 = vmatpush.bf16.msrb.mxu3 %v3742_v59  ;;  %v3531_v59 = vld [vmem:[%s6206_s1 + $0x658] sm:$0xf0] }
  0xf0   :  { %1973 = vmatpush.bf16.msrb.mxu0 %v3342_v2  ;;  %v6051_v55 = vpop.f32.mrf.mxu2  ;;  %v1723_v1 = vpop.f32.mrf.mxu0  ;;  %v3406_v2 = vor.u32 %v4232_v53, %v3403_v57  ;;  %v4330_v53 = vld [vmem:[#allocation2 + $0x54] sm:$0xf0] }
  0xf1   :  { %1986 = vmatpush.bf16.msrb.mxu1 %v3470_v29  ;;  %v6062_v60 = vpop.f32.mrf.mxu3  ;;  %v3534_v29 = vor.u32 %v4264_v58, %v3531_v59  ;;  %v1736_v6 = vpop.f32.mrf.mxu1  ;;  %v3786_v57 = vor.u32 %v4330_v53, %v3785_v54  ;;  %v4366_v1 = vld [vmem:[#allocation2 + $0x174] sm:$0xf0]  ;;  %v3897_v54 = vld [vmem:[#allocation2 + $0x130] sm:$0xf] }
  0xf2   :  { %1999 = vmatpush.bf16.msrb.mxu2 %v3598_v3  ;;  %v4196_v3 = vld [vmem:[%s6206_s1 + $0x42c] sm:$0xf]  ;;  %v4358_v53 = vld [vmem:[#allocation2 + $0x134] sm:$0xf0] }
  0xf3   :  { %2012 = vmatpush.bf16.msrb.mxu3 %v3726_v31  ;;  %v3662_v31 = vor.u32 %v4296_v61, %v3659_v62  ;;  %v3262_v12 = vor.u32 %v4196_v3, %v3259_v4  ;;  %v4328_v61 = vld [vmem:[#allocation2 + $0x44] sm:$0xf0]  ;;  %v3841_v62 = vld [vmem:[#allocation2 + $0xc0] sm:$0xf]  ;;  %v3769_v3 = vld [vmem:[#allocation2 + $0x30] sm:$0xf] }
  0xf4   :  { %1974 = vmatpush.bf16.msrb.mxu0 %v3326_v15  ;;  %v3390_v15 = vor.u32 %v4228_v5, %v3387_v7  ;;  %v3833_v4 = vld [vmem:[#allocation2 + $0xb0] sm:$0xf]  ;;  %v4364_v7 = vld [vmem:[#allocation2 + $0x164] sm:$0xf0] }
  0xf5   :  { %1987 = vmatpush.bf16.msrb.mxu1 %v3454_v17  ;;  %v3243_v17 = vld [vmem:[%s6206_s1 + $0x418] sm:$0xf0] }
  0xf6   :  { %2000 = vmatpush.bf16.msrb.mxu2 %v3582_v18  ;;  %v4224_v18 = vld [vmem:[%s6206_s1 + $0x50c] sm:$0xf] }
  0xf7   :  { %2013 = vmatpush.bf16.msrb.mxu3 %v3710_v30  ;;  %v3499_v30 = vld [vmem:[%s6206_s1 + $0x618] sm:$0xf0]  ;;  %v3374_v44 = vor.u32 %v4224_v18, %v3371_v63  ;;  %v3913_v63 = vld [vmem:[#allocation2 + $0x150] sm:$0xf] }
  0xf8   :  { %1975 = vmatpush.bf16.msrb.mxu0 %v3310_v39  ;;  %v1749_v24 = vpop.f32.mrf.mxu2  ;;  %v1722_v39 = vadd.f32 %v6014_v40, %v303_v11  ;;  %v3502_v45 = vor.u32 %v4256_v28, %v3499_v30  ;;  %v3794_v40 = vor.u32 %v4332_v26, %v3793_v22  ;;  %v3761_v11 = vld [vmem:[#allocation2 + $0x20] sm:$0xf] }
  0xf9   :  { %1988 = vmatpush.bf16.msrb.mxu1 %v3438_v41  ;;  %v1762_v34 = vpop.f32.mrf.mxu3  ;;  %v3246_v41 = vor.u32 %v4192_v13, %v3243_v17  ;;  %v3825_v13 = vld [vmem:[#allocation2 + $0xa0] sm:$0xf]  ;;  %v4362_v24 = vld [vmem:[#allocation2 + $0x154] sm:$0xf0] }
  0xfa   :  { %2001 = vmatpush.bf16.msrb.mxu2 %v3566_v42  ;;  %v3865_v42 = vld [vmem:[#allocation2 + $0xf0] sm:$0xf]  ;;  %v1735_v21 = vadd.f32 %v6025_v46, %v1722_v39 }
  0xfb   :  { %2014 = vmatpush.bf16.msrb.mxu3 %v3694_v20  ;;  %v3630_v20 = vor.u32 %v4288_v33, %v3627_v35  ;;  %v3866_v48 = vor.u32 %v4350_v43, %v3865_v42  ;;  %v3849_v46 = vld [vmem:[#allocation2 + $0xd0] sm:$0xf]  ;;  %v3905_v42 = vld [vmem:[#allocation2 + $0x140] sm:$0xf]  ;;  %v2028_v43 = vmul.f32 0.2, %v5868_v32 }
  0xfc   :  { %1976 = vmatpush.bf16.msrb.mxu0 %v3294_v49  ;;  %v3857_v49 = vld [vmem:[#allocation2 + $0xe0] sm:$0xf]  ;;  %v1748_v52 = vadd.f32 %v6051_v55, %v1735_v21  ;;  %v4344_v55 = vld [vmem:[#allocation2 + $0xc4] sm:$0xf0]  ;;  %v3753_v35 = vld [vmem:[#allocation2 + $0x10] sm:$0xf] }
  0xfd   :  { %1989 = vmatpush.bf16.msrb.mxu1 %v3422_v50  ;;  %v4348_v50 = vld [vmem:[#allocation2 + $0xe4] sm:$0xf0]  ;;  %v3817_v39 = vld [vmem:[#allocation2 + $0x90] sm:$0xf] }
  0xfe   :  { %2002 = vmatpush.bf16.msrb.mxu2 %v3550_v51  ;;  %v3858_v51 = vor.u32 %v4348_v50, %v3857_v49  ;;  %v1761_v58 = vadd.f32 %v6062_v60, %v1748_v52  ;;  %v4342_v60 = vld [vmem:[#allocation2 + $0xb4] sm:$0xf0]  ;;  %v4336_v21 = vld [vmem:[#allocation2 + $0x84] sm:$0xf0]  ;;  %v4333_v50 = vld [vmem:[#allocation2 + $0x74] sm:$0xf] }
  0xff   :  { %2015 = vmatpush.bf16.msrb.mxu3 %v3678_v56  ;;  %v4346_v56 = vld [vmem:[#allocation2 + $0xd4] sm:$0xf0]  ;;  %v3834_v10 = vor.u32 %v4342_v60, %v3833_v4 }
 0x100   :  { %1977 = vmatpush.bf16.msrb.mxu0 %v3278_v0  ;;  %v3850_v59 = vor.u32 %v4346_v56, %v3849_v46  ;;  %v3929_v0 = vld [vmem:[#allocation2 + $0x170] sm:$0xf]  ;;  %v4349_v46 = vld [vmem:[#allocation2 + $0xf4] sm:$0xf]  ;;  %v3867_v56 = vld [vmem:[#allocation2 + $0xf8] sm:$0xf0] }
 0x101   :  { %1990 = vmatpush.bf16.msrb.mxu1 %v3406_v2  ;;  %v3930_v2 = vor.u32 %v4366_v1, %v3929_v0  ;;  %v4331_v0 = vld [vmem:[#allocation2 + $0x64] sm:$0xf]  ;;  %v3795_v1 = vld [vmem:[#allocation2 + $0x68] sm:$0xf0]  ;;  %v4354_v60 = vld [vmem:[#allocation2 + $0x114] sm:$0xf0] }
 0x102   :  { %2003 = vmatpush.bf16.msrb.mxu2 %v3534_v29  ;;  %v3842_v29 = vor.u32 %v4344_v55, %v3841_v62  ;;  %v2032_v62 = vsel %vm2024_vm1, %v5868_v32, %v2028_v43  ;;  %v3870_v55 = vor.u32 %v4349_v46, %v3867_v56  ;;  %v3923_v43 = vld [vmem:[#allocation2 + $0x168] sm:$0xf0]  ;;  %v3755_v46 = vld [vmem:[#allocation2 + $0x18] sm:$0xf0] }
 0x103   :  { %2016 = vmatpush.bf16.msrb.mxu3 %v3662_v31  ;;  %v3921_v31 = vld [vmem:[#allocation2 + $0x160] sm:$0xf]  ;;  %v6132_v4 = vpack.c.bf16 %v2032_v62, %v2032_v62 }
 0x104   :  { %1978 = vmatpush.bf16.msrb.mxu0 %v3262_v12  ;;  %v3922_v38 = vor.u32 %v4364_v7, %v3921_v31  ;;  %v4324_v12 = vld [vmem:[#allocation2 + $0x24] sm:$0xf0]  ;;  %v4329_v31 = vld [vmem:[#allocation2 + $0x54] sm:$0xf]  ;;  %v3787_v7 = vld [vmem:[#allocation2 + $0x58] sm:$0xf0] }
 0x105   :  { %1991 = vmatpush.bf16.msrb.mxu1 %v3390_v15  ;;  %v3762_v28 = vor.u32 %v4324_v12, %v3761_v11  ;;  %v4352_v11 = vld [vmem:[#allocation2 + $0x104] sm:$0xf0]  ;;  %v4365_v12 = vld [vmem:[#allocation2 + $0x174] sm:$0xf] }
 0x106   :  { %2004 = vmatpush.bf16.msrb.mxu2 %v3518_v16  ;;  %v4340_v16 = vld [vmem:[#allocation2 + $0xa4] sm:$0xf0] }
 0x107   :  { %2017 = vmatpush.bf16.msrb.mxu3 %v3646_v25  ;;  %v3914_v25 = vor.u32 %v4362_v24, %v3913_v63  ;;  %v3826_v33 = vor.u32 %v4340_v16, %v3825_v13  ;;  %v3931_v13 = vld [vmem:[#allocation2 + $0x178] sm:$0xf0]  ;;  %v4343_v24 = vld [vmem:[#allocation2 + $0xc4] sm:$0xf] }
 0x108   :  { %1979 = vmatpush.bf16.msrb.mxu0 %v3246_v41  ;;  %v4338_v41 = vld [vmem:[#allocation2 + $0x94] sm:$0xf0] }
 0x109   :  { %1992 = vmatpush.bf16.msrb.mxu1 %v3374_v44  ;;  %v1786_v6 = vpop.f32.mrf.mxu1  ;;  %v3745_v44 = vld [vmem:[#allocation2] sm:$0xf]  ;;  %v3818_v49 = vor.u32 %v4338_v41, %v3817_v39  ;;  %v3835_v39 = vld [vmem:[#allocation2 + $0xb8] sm:$0xf0] }
 0x10a   :  { %2005 = vmatpush.bf16.msrb.mxu2 %v3502_v45  ;;  %v4360_v45 = vld [vmem:[#allocation2 + $0x144] sm:$0xf0] }
 0x10b   :  { %2018 = vmatpush.bf16.msrb.mxu3 %v3630_v20  ;;  %1980 = vmatmul.bf16.vlgmr.msrb.gmra.mxu0 %v5780_v19  ;;  %v3777_v19 = vld [vmem:[#allocation2 + $0x40] sm:$0xf]  ;;  %v3754_v20 = vor.u32 %v4322_v36, %v3753_v35  ;;  %v3906_v22 = vor.u32 %v4360_v45, %v3905_v42  ;;  %v3771_v35 = vld [vmem:[#allocation2 + $0x38] sm:$0xf0]  ;;  %v4341_v36 = vld [vmem:[#allocation2 + $0xb4] sm:$0xf] }
 0x10c   :  { %2430 = vmatpush.bf16.msra.mxu0 %v3802_v47  ;;  %1993 = vmatmul.bf16.vlgmr.msrb.gmra.mxu1 %v5792_v27  ;;  %v3778_v27 = vor.u32 %v4328_v61, %v3777_v19  ;;  %v4320_v47 = vld [vmem:[#allocation2 + $0x4] sm:$0xf0]  ;;  %v4363_v42 = vld [vmem:[#allocation2 + $0x164] sm:$0xf] }
 0x10d   :  { %2443 = vmatpush.bf16.msra.mxu1 %v3866_v48  ;;  %2006 = vmatmul.bf16.vlgmr.msrb.gmra.mxu2 %v5768_v14  ;;  %v1773_v14 = vpop.f32.mrf.mxu0  ;;  %v3809_v48 = vld [vmem:[#allocation2 + $0x80] sm:$0xf] }
 0x10e   :  { %2019 = vmatmul.bf16.vlgmr.msrb.gmra.mxu3 %v5783_v23  ;;  %v4326_v23 = vld [vmem:[#allocation2 + $0x34] sm:$0xf0]  ;;  %v1774_v5 = vadd.f32 %v1773_v14, %v1761_v58  ;;  %2456 = vmatpush.bf16.msra.mxu2 %v3930_v2  ;;  %v3746_v58 = vor.u32 %v4320_v47, %v3745_v44  ;;  %v3810_v19 = vor.u32 %v4336_v21, %v3809_v48  ;;  %v4347_v2 = vld [vmem:[#allocation2 + $0xe4] sm:$0xf]  ;;  %v3889_v14 = vld [vmem:[#allocation2 + $0x120] sm:$0xf] }
 0x10f   :  { %v3770_v9 = vor.u32 %v4326_v23, %v3769_v3  ;;  %v3926_v44 = vor.u32 %v4363_v42, %v3923_v43  ;;  %v4323_v47 = vld [vmem:[#allocation2 + $0x24] sm:$0xf]  ;;  %v3763_v48 = vld [vmem:[#allocation2 + $0x28] sm:$0xf0]  ;;  %v3977_v42 = vld [vmem:[#allocation2 + $0x1d0] sm:$0xf] }
 0x110   :  { %2431 = vmatpush.bf16.msra.mxu0 %v3794_v40  ;;  %v1787_v8 = vadd.f32 %v1786_v6, %v1774_v5  ;;  %v1799_v15 = vpop.f32.mrf.mxu2  ;;  %v3803_v40 = vld [vmem:[#allocation2 + $0x78] sm:$0xf0]  ;;  %v3798_v5 = vor.u32 %v4331_v0, %v3795_v1  ;;  %v3881_v6 = vld [vmem:[#allocation2 + $0x110] sm:$0xf]  ;;  %v4339_v21 = vld [vmem:[#allocation2 + $0xa4] sm:$0xf] }
 0x111   :  { %2444 = vmatpush.bf16.msra.mxu1 %v3858_v51  ;;  %v1812_v18 = vpop.f32.mrf.mxu3  ;;  %v1788_v37 = vpop.f32.mrf.mxu1  ;;  %v3806_v61 = vor.u32 %v4333_v50, %v3803_v40  ;;  %v4361_v50 = vld [vmem:[#allocation2 + $0x154] sm:$0xf]  ;;  %v3915_v40 = vld [vmem:[#allocation2 + $0x158] sm:$0xf0]  ;;  %v4378_v43 = vld [vmem:[#allocation2 + $0x1d4] sm:$0xf0] }
 0x112   :  { %2457 = vmatpush.bf16.msra.mxu2 %v3922_v38  ;;  %v1800_v17 = vadd.f32 %v1799_v15, %v1787_v8  ;;  %v4345_v8 = vld [vmem:[#allocation2 + $0xd4] sm:$0xf]  ;;  %v3882_v38 = vor.u32 %v4354_v60, %v3881_v6  ;;  %v3790_v15 = vor.u32 %v4329_v31, %v3787_v7  ;;  %v3899_v60 = vld [vmem:[#allocation2 + $0x138] sm:$0xf0]  ;;  %v4355_v7 = vld [vmem:[#allocation2 + $0x124] sm:$0xf] }
 0x113   :  { %v4357_v6 = vld [vmem:[#allocation2 + $0x134] sm:$0xf] }
 0x114   :  { %2432 = vmatpush.bf16.msra.mxu0 %v3786_v57  ;;  %v1813_v34 = vadd.f32 %v1812_v18, %v1800_v17  ;;  %v3898_v57 = vor.u32 %v4358_v53, %v3897_v54  ;;  %v4327_v17 = vld [vmem:[#allocation2 + $0x44] sm:$0xf]  ;;  %v3779_v18 = vld [vmem:[#allocation2 + $0x48] sm:$0xf0]  ;;  %v4321_v53 = vld [vmem:[#allocation2 + $0x14] sm:$0xf]  ;;  %v3902_v31 = vor.u32 %v4357_v6, %v3899_v60 }
 0x115   :  { %2445 = vmatpush.bf16.msra.mxu1 %v3850_v59  ;;  %v1775_v30 = vpop.f32.mrf.mxu0  ;;  %v3758_v62 = vor.u32 %v4321_v53, %v3755_v46  ;;  %v3953_v53 = vld [vmem:[#allocation2 + $0x1a0] sm:$0xf]  ;;  %v4372_v46 = vld [vmem:[#allocation2 + $0x1a4] sm:$0xf0] }
 0x116   :  { %2458 = vmatpush.bf16.msra.mxu2 %v3914_v25  ;;  %v2029_v26 = vmul.f32 0.2, %v1813_v34  ;;  %vm2025_vm0 = vcmp.gt.f32.partialorder %v1813_v34, 0.0  ;;  %v3843_v25 = vld [vmem:[#allocation2 + $0xc8] sm:$0xf0]  ;;  %v3782_v30 = vor.u32 %v4327_v17, %v3779_v18 }
 0x117   :  { %v3883_v17 = vld [vmem:[#allocation2 + $0x118] sm:$0xf0] }
 0x118   :  { %2433 = vmatpush.bf16.msra.mxu0 %v3778_v27  ;;  %v1801_v51 = vpop.f32.mrf.mxu2  ;;  %v2033_v59 = vsel %vm2025_vm0, %v1813_v34, %v2029_v26  ;;  %v3859_v27 = vld [vmem:[#allocation2 + $0xe8] sm:$0xf0]  ;;  %v4325_v34 = vld [vmem:[#allocation2 + $0x34] sm:$0xf] }
 0x119   :  { %2446 = vmatpush.bf16.msra.mxu1 %v3842_v29  ;;  %v1814_v52 = vpop.f32.mrf.mxu3  ;;  %v4356_v29 = vld [vmem:[#allocation2 + $0x124] sm:$0xf0]  ;;  %v6130_v3 = vpack.c.bf16 %v2033_v59, %v2033_v59  ;;  %v3862_v32 = vor.u32 %v4347_v2, %v3859_v27  ;;  %v3774_v45 = vor.u32 %v4325_v34, %v3771_v35  ;;  %v3766_v51 = vor.u32 %v4323_v47, %v3763_v48  ;;  %v4319_v27 = vld [vmem:[#allocation2 + $0x4] sm:$0xf]  ;;  %v3985_v34 = vld [vmem:[#allocation2 + $0x1e0] sm:$0xf] }
 0x11a   :  { %2459 = vmatpush.bf16.msra.mxu2 %v3906_v22  ;;  %v3890_v23 = vor.u32 %v4356_v29, %v3889_v14  ;;  %v3827_v22 = vld [vmem:[#allocation2 + $0xa8] sm:$0xf0]  ;;  %v3918_v52 = vor.u32 %v4361_v50, %v3915_v40  ;;  %v4335_v29 = vld [vmem:[#allocation2 + $0x84] sm:$0xf]  ;;  %v4380_v35 = vld [vmem:[#allocation2 + $0x1e4] sm:$0xf0] }
 0x11b   :  { %v3830_v54 = vor.u32 %v4339_v21, %v3827_v22  ;;  %v3747_v14 = vld [vmem:[#allocation2 + $0x8] sm:$0xf0]  ;;  %v4376_v48 = vld [vmem:[#allocation2 + $0x1c4] sm:$0xf0]  ;;  %v3961_v22 = vld [vmem:[#allocation2 + $0x1b0] sm:$0xf] }
 0x11c   :  { %2434 = vmatpush.bf16.msra.mxu0 %v3770_v9  ;;  %v3851_v9 = vld [vmem:[#allocation2 + $0xd8] sm:$0xf0] }
 0x11d   :  { %2447 = vmatpush.bf16.msra.mxu1 %v3834_v10  ;;  %v3873_v10 = vld [vmem:[#allocation2 + $0x100] sm:$0xf]  ;;  %v3854_v16 = vor.u32 %v4345_v8, %v3851_v9  ;;  %v3891_v8 = vld [vmem:[#allocation2 + $0x128] sm:$0xf0]  ;;  %v3750_v9 = vor.u32 %v4319_v27, %v3747_v14  ;;  %v4381_v27 = vld [vmem:[#allocation2 + $0x1f4] sm:$0xf] }
 0x11e   :  { %2460 = vmatpush.bf16.msra.mxu2 %v3898_v57  ;;  %v3874_v63 = vor.u32 %v4352_v11, %v3873_v10  ;;  %v4337_v57 = vld [vmem:[#allocation2 + $0x94] sm:$0xf]  ;;  %v3993_v10 = vld [vmem:[#allocation2 + $0x1f0] sm:$0xf]  ;;  %v3995_v14 = vld [vmem:[#allocation2 + $0x1f8] sm:$0xf0] }
 0x120   :  { %2435 = vmatpush.bf16.msra.mxu0 %v3762_v28  ;;  %v3934_v28 = vor.u32 %v4365_v12, %v3931_v13  ;;  %v4382_v12 = vld [vmem:[#allocation2 + $0x1f4] sm:$0xf0]  ;;  %v3894_v13 = vor.u32 %v4355_v7, %v3891_v8  ;;  %v3979_v7 = vld [vmem:[#allocation2 + $0x1d8] sm:$0xf0] }
 0x121   :  { %2448 = vmatpush.bf16.msra.mxu1 %v3826_v33  ;;  %v3846_v33 = vor.u32 %v4343_v24, %v3843_v25  ;;  %v4351_v24 = vld [vmem:[#allocation2 + $0x104] sm:$0xf]  ;;  %v3875_v25 = vld [vmem:[#allocation2 + $0x108] sm:$0xf0] }
 0x122   :  { %2461 = vmatpush.bf16.msra.mxu2 %v3890_v23  ;;  %v3811_v23 = vld [vmem:[#allocation2 + $0x88] sm:$0xf0] }
 0x123   :  { %v3814_v11 = vor.u32 %v4335_v29, %v3811_v23  ;;  %v3998_v29 = vor.u32 %v4381_v27, %v3995_v14  ;;  %v4379_v23 = vld [vmem:[#allocation2 + $0x1e4] sm:$0xf] }
 0x124   :  { %2436 = vmatpush.bf16.msra.mxu0 %v3754_v20  ;;  %v3838_v20 = vor.u32 %v4341_v36, %v3835_v39 }
 0x125   :  { %2449 = vmatpush.bf16.msra.mxu1 %v3818_v49 }
 0x126   :  { %2462 = vmatpush.bf16.msra.mxu2 %v3882_v38 }
 0x128   :  { %2437 = vmatpush.bf16.msra.mxu0 %v3746_v58  ;;  %v1825_v37 = vpop.f32.mrf.mxu0  ;;  %v3819_v58 = vld [vmem:[#allocation2 + $0x98] sm:$0xf0] }
 0x129   :  { %2450 = vmatpush.bf16.msra.mxu1 %v3810_v19  ;;  %v6136_v41 = vpop.f32.mrf.mxu1  ;;  %v4359_v19 = vld [vmem:[#allocation2 + $0x144] sm:$0xf]  ;;  %v3822_v2 = vor.u32 %v4337_v57, %v3819_v58 }
 0x12a   :  { %2463 = vmatpush.bf16.msra.mxu2 %v3874_v63 }
 0x12b   :  { %2438 = vmatmul.bf16.vlgmr.msra.gmra.mxu0 %v6132_v4 }
 0x12c   :  { %2482 = vmatpush.bf16.msrb.mxu0 %v3806_v61  ;;  %2451 = vmatmul.bf16.vlgmr.msra.gmra.mxu1 %v6130_v3  ;;  %v3907_v61 = vld [vmem:[#allocation2 + $0x148] sm:$0xf0] }
 0x12d   :  { %2495 = vmatpush.bf16.msrb.mxu1 %v3870_v55  ;;  %v6141_v55 = vld [vmem:[%s6207_s2] sm:$0xf]  ;;  %v3910_v1 = vor.u32 %v4359_v19, %v3907_v61  ;;  %v3945_v19 = vld [vmem:[#allocation2 + $0x190] sm:$0xf] }
 0x12e   :  { %2508 = vmatpush.bf16.msrb.mxu2 %v3934_v28  ;;  %v304_v0 = vperm.slane %v6141_v55, 2  ;;  %v4370_v61 = vld [vmem:[#allocation2 + $0x194] sm:$0xf0] }
 0x130   :  { %2483 = vmatpush.bf16.msrb.mxu0 %v3798_v5  ;;  %v1851_v26 = vpop.f32.mrf.mxu2  ;;  %v1827_v56 = vpop.f32.mrf.mxu0  ;;  %v1826_v38 = vadd.f32 %v1825_v37, %v304_v0  ;;  %v3986_v37 = vor.u32 %v4380_v35, %v3985_v34  ;;  %v3937_v0 = vld [vmem:[#allocation2 + $0x180] sm:$0xf]  ;;  %v4369_v35 = vld [vmem:[#allocation2 + $0x194] sm:$0xf] }
 0x131   :  { %2496 = vmatpush.bf16.msrb.mxu1 %v3862_v32  ;;  %v1864_v49 = vpop.f32.mrf.mxu3  ;;  %v1840_v59 = vpop.f32.mrf.mxu1 }
 0x132   :  { %2509 = vmatpush.bf16.msrb.mxu2 %v3926_v44  ;;  %v1839_v18 = vadd.f32 %v6136_v41, %v1826_v38  ;;  %v3978_v44 = vor.u32 %v4378_v43, %v3977_v42  ;;  %v3954_v59 = vor.u32 %v4372_v46, %v3953_v53  ;;  %v4367_v42 = vld [vmem:[#allocation2 + $0x184] sm:$0xf]  ;;  %v3939_v43 = vld [vmem:[#allocation2 + $0x188] sm:$0xf0]  ;;  %v2104_v53 = vld [vmem:[%s6209_s4] sm:$0x3] }
 0x133   :  { %v2106_v46 = vperm.slane %v2104_v53, 0 }
 0x134   :  { %2484 = vmatpush.bf16.msrb.mxu0 %v3790_v15  ;;  %v3994_v15 = vor.u32 %v4382_v12, %v3993_v10  ;;  %v1852_v28 = vadd.f32 %v1851_v26, %v1839_v18  ;;  %v4374_v26 = vld [vmem:[#allocation2 + $0x1b4] sm:$0xf0]  ;;  %v3971_v12 = vld [vmem:[#allocation2 + $0x1c8] sm:$0xf0]  ;;  %v3963_v18 = vld [vmem:[#allocation2 + $0x1b8] sm:$0xf0] }
 0x135   :  { %2497 = vmatpush.bf16.msrb.mxu1 %v3854_v16  ;;  %v4353_v16 = vld [vmem:[#allocation2 + $0x114] sm:$0xf] }
 0x136   :  { %2510 = vmatpush.bf16.msrb.mxu2 %v3918_v52  ;;  %2469 = vmatpush.bf16.msra.mxu3 %v3994_v15  ;;  %v3886_v63 = vor.u32 %v4353_v16, %v3883_v17  ;;  %v3962_v52 = vor.u32 %v4374_v26, %v3961_v22  ;;  %v305_v16 = vperm.slane %v6141_v55, 3  ;;  %v4373_v17 = vld [vmem:[#allocation2 + $0x1b4] sm:$0xf]  ;;  %v3942_v55 = vor.u32 %v4367_v42, %v3939_v43 }
 0x138   :  { %2485 = vmatpush.bf16.msrb.mxu0 %v3782_v30  ;;  %v1853_v5 = vpop.f32.mrf.mxu2  ;;  %v3878_v30 = vor.u32 %v4351_v24, %v3875_v25  ;;  %v3966_v24 = vor.u32 %v4373_v17, %v3963_v18  ;;  %v4371_v25 = vld [vmem:[#allocation2 + $0x1a4] sm:$0xf]  ;;  %v4394_v17 = vld [vmem:[%s6210_s5 + $0x58] sm:$0xff]  ;;  %v4393_v18 = vld [vmem:[%s6210_s5 + $0x50] sm:$0xff] }
 0x139   :  { %2498 = vmatpush.bf16.msrb.mxu1 %v3846_v33  ;;  %v1866_v32 = vpop.f32.mrf.mxu3  ;;  %v1865_v33 = vadd.f32 %v1864_v49, %v1852_v28  ;;  %v3987_v5 = vld [vmem:[#allocation2 + $0x1e8] sm:$0xf0] }
 0x13a   :  { %2511 = vmatpush.bf16.msrb.mxu2 %v3910_v1  ;;  %2470 = vmatpush.bf16.msra.mxu3 %v3986_v37  ;;  %v4368_v1 = vld [vmem:[#allocation2 + $0x184] sm:$0xf0]  ;;  %v3990_v60 = vor.u32 %v4379_v23, %v3987_v5  ;;  %v3955_v28 = vld [vmem:[#allocation2 + $0x1a8] sm:$0xf0]  ;;  %v4390_v23 = vld [vmem:[%s6210_s5 + $0x38] sm:$0xff] }
 0x13b   :  { %v4398_v5 = vld [vmem:[%s6210_s5 + $0x78] sm:$0xff] }
 0x13c   :  { %2486 = vmatpush.bf16.msrb.mxu0 %v3774_v45 }
 0x13d   :  { %2499 = vmatpush.bf16.msrb.mxu1 %v3838_v20 }
 0x13e   :  { %2512 = vmatpush.bf16.msrb.mxu2 %v3902_v31  ;;  %2471 = vmatpush.bf16.msra.mxu3 %v3978_v44  ;;  %v4377_v31 = vld [vmem:[#allocation2 + $0x1d4] sm:$0xf] }
 0x13f   :  { %v3982_v38 = vor.u32 %v4377_v31, %v3979_v7  ;;  %v4387_v7 = vld [vmem:[%s6210_s5 + $0x20] sm:$0xff] }
 0x140   :  { %2487 = vmatpush.bf16.msrb.mxu0 %v3766_v51 }
 0x141   :  { %2500 = vmatpush.bf16.msrb.mxu1 %v3830_v54 }
 0x142   :  { %2513 = vmatpush.bf16.msrb.mxu2 %v3894_v13 }
 0x144   :  { %2488 = vmatpush.bf16.msrb.mxu0 %v3758_v62  ;;  %v3946_v62 = vor.u32 %v4370_v61, %v3945_v19 }
 0x145   :  { %2501 = vmatpush.bf16.msrb.mxu1 %v3822_v2  ;;  %v3938_v2 = vor.u32 %v4368_v1, %v3937_v0 }
 0x146   :  { %2514 = vmatpush.bf16.msrb.mxu2 %v3886_v63 }
 0x148   :  { %2489 = vmatpush.bf16.msrb.mxu0 %v3750_v9  ;;  %v1877_v36 = vpop.f32.mrf.mxu0 }
 0x149   :  { %2502 = vmatpush.bf16.msrb.mxu1 %v3814_v11  ;;  %v1878_v39 = vadd.f32 %v1877_v36, %v1865_v33  ;;  %v1890_v41 = vpop.f32.mrf.mxu1  ;;  %v4375_v11 = vld [vmem:[#allocation2 + $0x1c4] sm:$0xf]  ;;  %v3958_v33 = vor.u32 %v4371_v25, %v3955_v28  ;;  %v3947_v36 = vld [vmem:[#allocation2 + $0x198] sm:$0xf0] }
 0x14a   :  { %2515 = vmatpush.bf16.msrb.mxu2 %v3878_v30  ;;  %v3974_v15 = vor.u32 %v4375_v11, %v3971_v12  ;;  %v3950_v37 = vor.u32 %v4369_v35, %v3947_v36  ;;  %v4384_v12 = vld [vmem:[%s6210_s5 + $0x8] sm:$0xff] }
 0x14b   :  { %2490 = vmatmul.bf16.vlgmr.msrb.gmra.mxu0 %v6132_v4  ;;  %v1891_v4 = vadd.f32 %v1890_v41, %v1878_v39 }
 0x14c   :  { %2503 = vmatmul.bf16.vlgmr.msrb.gmra.mxu1 %v6130_v3  ;;  %v3969_v3 = vld [vmem:[#allocation2 + $0x1c0] sm:$0xf]  ;;  %2674 = vmatpush.bf16.msra.mxu0 %v4390_v23 }
 0x14d   :  { %v3970_v21 = vor.u32 %v4376_v48, %v3969_v3  ;;  %2687 = vmatpush.bf16.msra.mxu1 %v4398_v5 }
 0x14f   :  { %2472 = vmatpush.bf16.msra.mxu3 %v3970_v21 }
 0x150   :  { %v1903_v45 = vpop.f32.mrf.mxu2  ;;  %v1879_v50 = vpop.f32.mrf.mxu0 }
 0x151   :  { %v1904_v20 = vadd.f32 %v1903_v45, %v1891_v4  ;;  %v1916_v47 = vpop.f32.mrf.mxu3  ;;  %v1892_v40 = vpop.f32.mrf.mxu1 }
 0x153   :  { %v1917_v49 = vadd.f32 %v1916_v47, %v1904_v20  ;;  %2473 = vmatpush.bf16.msra.mxu3 %v3962_v52 }
 0x155   :  { %vm2026_vm2 = vcmp.gt.f32.partialorder %v1917_v49, 0.0  ;;  %v2030_v51 = vmul.f32 0.2, %v1917_v49 }
 0x157   :  { %v2034_v54 = vsel %vm2026_vm2, %v1917_v49, %v2030_v51  ;;  %2474 = vmatpush.bf16.msra.mxu3 %v3954_v59 }
 0x158   :  { %v2038_v56 = vpack.c.bf16 %v2034_v54, %v2034_v54  ;;  %v1905_v57 = vpop.f32.mrf.mxu2 }
 0x159   :  { %v1918_v58 = vpop.f32.mrf.mxu3 }
 0x15a   :  { %2464 = vmatmul.bf16.vlgmr.msra.gmra.mxu2 %v2038_v56 }
 0x15b   :  { %2475 = vmatpush.bf16.msra.mxu3 %v3946_v62  ;;  %v2107_v62 = vperm.slane %v2104_v53, 1 }
 0x15f   :  { %2476 = vmatpush.bf16.msra.mxu3 %v3938_v2 }
 0x163   :  { %2521 = vmatpush.bf16.msrb.mxu3 %v3998_v29 }
 0x167   :  { %2522 = vmatpush.bf16.msrb.mxu3 %v3990_v60  ;;  %v4397_v60 = vld [vmem:[%s6210_s5 + $0x70] sm:$0xff] }
 0x168   :  { %v1929_v6 = vpop.f32.mrf.mxu0  ;;  %2688 = vmatpush.bf16.msra.mxu1 %v4397_v60 }
 0x169   :  { %v1942_v32 = vpop.f32.mrf.mxu1  ;;  %v1930_v34 = vadd.f32 %v1929_v6, %v305_v16  ;;  %v4389_v6 = vld [vmem:[%s6210_s5 + $0x30] sm:$0xff]  ;;  %v4395_v16 = vld [vmem:[%s6210_s5 + $0x60] sm:$0xff] }
 0x16a   :  { %2516 = vmatmul.bf16.vlgmr.msrb.gmra.mxu2 %v2038_v56  ;;  %2675 = vmatpush.bf16.msra.mxu0 %v4389_v6 }
 0x16b   :  { %2523 = vmatpush.bf16.msrb.mxu3 %v3982_v38  ;;  %v1943_v39 = vadd.f32 %v1942_v32, %v1930_v34  ;;  %v4388_v32 = vld [vmem:[%s6210_s5 + $0x28] sm:$0xff] }
 0x16e   :  { %2676 = vmatpush.bf16.msra.mxu0 %v4388_v32 }
 0x16f   :  { %2524 = vmatpush.bf16.msrb.mxu3 %v3974_v15  ;;  %v4383_v15 = vld [vmem:[%s6210_s5] sm:$0xff] }
 0x170   :  { %v1955_v8 = vpop.f32.mrf.mxu2  ;;  %v1931_v10 = vpop.f32.mrf.mxu0 }
 0x171   :  { %v1968_v9 = vpop.f32.mrf.mxu3  ;;  %v1944_v13 = vpop.f32.mrf.mxu1  ;;  %v1956_v41 = vadd.f32 %v1955_v8, %v1943_v39  ;;  %v4386_v8 = vld [vmem:[%s6210_s5 + $0x18] sm:$0xff] }
 0x172   :  { %2677 = vmatpush.bf16.msra.mxu0 %v4387_v7  ;;  %v4396_v13 = vld [vmem:[%s6210_s5 + $0x68] sm:$0xff] }
 0x173   :  { %2525 = vmatpush.bf16.msrb.mxu3 %v3966_v24  ;;  %v1969_v44 = vadd.f32 %v1968_v9, %v1956_v41  ;;  %v4385_v9 = vld [vmem:[%s6210_s5 + $0x10] sm:$0xff]  ;;  %2689 = vmatpush.bf16.msra.mxu1 %v4396_v13  ;;  %v4391_v24 = vld [vmem:[%s6210_s5 + $0x40] sm:$0xff] }
 0x176   :  { %2678 = vmatpush.bf16.msra.mxu0 %v4386_v8 }
 0x177   :  { %2526 = vmatpush.bf16.msrb.mxu3 %v3958_v33  ;;  %2690 = vmatpush.bf16.msra.mxu1 %v4395_v16 }
 0x178   :  { %v1957_v63 = vpop.f32.mrf.mxu2 }
 0x179   :  { %v1970_v30 = vpop.f32.mrf.mxu3  ;;  %v4392_v63 = vld [vmem:[%s6210_s5 + $0x48] sm:$0xff] }
 0x17a   :  { %2679 = vmatpush.bf16.msra.mxu0 %v4385_v9 }
 0x17b   :  { %2527 = vmatpush.bf16.msrb.mxu3 %v3950_v37  ;;  %2691 = vmatpush.bf16.msra.mxu1 %v4394_v17 }
 0x17e   :  { %2680 = vmatpush.bf16.msra.mxu0 %v4384_v12 }
 0x17f   :  { %2528 = vmatpush.bf16.msrb.mxu3 %v3942_v55  ;;  %2692 = vmatpush.bf16.msra.mxu1 %v4393_v18 }
 0x182   :  { %2681 = vmatpush.bf16.msra.mxu0 %v4383_v15 }
 0x183   :  { %2693 = vmatpush.bf16.msra.mxu1 %v4392_v63 }
 0x187   :  { %2694 = vmatpush.bf16.msra.mxu1 %v4391_v24 }
 0x188   :  { %v1981_v4 = vpop.f32.mrf.mxu0 }
 0x189   :  { %v1994_v45 = vpop.f32.mrf.mxu1  ;;  %v1982_v20 = vadd.f32 %v1981_v4, %v1969_v44 }
 0x18b   :  { %v1995_v47 = vadd.f32 %v1994_v45, %v1982_v20  ;;  %v4403_v20 = vld [vmem:[%s6211_s6] ss:$0 sm:$0xff] }
 0x190   :  { %v2007_v3 = vpop.f32.mrf.mxu2  ;;  %v1983_v22 = vpop.f32.mrf.mxu0 }
 0x191   :  { %v2008_v48 = vadd.f32 %v2007_v3, %v1995_v47  ;;  %v2020_v21 = vpop.f32.mrf.mxu3  ;;  %v1996_v26 = vpop.f32.mrf.mxu1 }
 0x193   :  { %v2021_v49 = vadd.f32 %v2020_v21, %v2008_v48 }
 0x195   :  { %vm2027_vm3 = vcmp.gt.f32.partialorder %v2021_v49, 0.0  ;;  %v2031_v50 = vmul.f32 0.2, %v2021_v49 }
 0x197   :  { %v2035_v40 = vsel %vm2027_vm3, %v2021_v49, %v2031_v50 }
 0x198   :  { %v2039_v51 = vpack.c.bf16 %v2035_v40, %v2035_v40  ;;  %v2009_v52 = vpop.f32.mrf.mxu2 }
 0x199   :  { %v2022_v54 = vpop.f32.mrf.mxu3 }
 0x19a   :  { %2477 = vmatmul.bf16.vlgmr.msra.gmra.mxu3 %v2039_v51 }
 0x1a8   :  { %v2439_v56 = vpop.f32.mrf.mxu0 }
 0x1a9   :  { %v2440_v57 = vadd.f32 %v2439_v56, %v2106_v46  ;;  %v2452_v58 = vpop.f32.mrf.mxu1 }
 0x1aa   :  { %2529 = vmatmul.bf16.vlgmr.msrb.gmra.mxu3 %v2039_v51 }
 0x1ab   :  { %v2453_v59 = vadd.f32 %v2452_v58, %v2440_v57 }
 0x1b0   :  { %v2441_v19 = vpop.f32.mrf.mxu0 }
 0x1b1   :  { %v2454_v61 = vpop.f32.mrf.mxu1 }
 0x1c8   :  { %v2491_v0 = vpop.f32.mrf.mxu0 }
 0x1c9   :  { %v2492_v1 = vadd.f32 %v2491_v0, %v2107_v62  ;;  %v2504_v2 = vpop.f32.mrf.mxu1 }
 0x1cb   :  { %v2505_v27 = vadd.f32 %v2504_v2, %v2492_v1 }
 0x1d0   :  { %v2493_v14 = vpop.f32.mrf.mxu0 }
 0x1d1   :  { %v2506_v29 = vpop.f32.mrf.mxu1 }
 0x1dd   :  { %v2465_v31 = vpop.f32.mrf.mxu2 }
 0x1de   :  { %v2466_v25 = vadd.f32 %v2465_v31, %v2453_v59 }
 0x1e5   :  { %v2467_v38 = vpop.f32.mrf.mxu2 }
 0x1ed   :  { %v2517_v10 = vpop.f32.mrf.mxu2 }
 0x1ee   :  { %v2518_v37 = vadd.f32 %v2517_v10, %v2505_v27 }
 0x1f5   :  { %v2519_v11 = vpop.f32.mrf.mxu2 }
 0x21d   :  { %v2478_v28 = vpop.f32.mrf.mxu3 }
 0x21e   :  { %v2479_v30 = vadd.f32 %v2478_v28, %v2466_v25 }
 0x220   :  { %vm2534_vm4 = vcmp.gt.f32.partialorder %v2479_v30, 0.0  ;;  %v2536_v33 = vmul.f32 0.2, %v2479_v30 }
 0x222   :  { %v2538_v34 = vsel %vm2534_vm4, %v2479_v30, %v2536_v33 }
 0x223   :  { %v2540_v35 = vpack.c.bf16 %v2538_v34, %v2538_v34 }
 0x225   :  { %v2480_v36 = vpop.f32.mrf.mxu3  ;;  %2682 = vmatmul.bf16.vlgmr.msra.gmra.mxu0 %v2540_v35 }
 0x22d   :  { %v2530_v39 = vpop.f32.mrf.mxu3 }
 0x22e   :  { %v2531_v41 = vadd.f32 %v2530_v39, %v2518_v37 }
 0x230   :  { %vm2535_vm5 = vcmp.gt.f32.partialorder %v2531_v41, 0.0  ;;  %v2537_v42 = vmul.f32 0.2, %v2531_v41 }
 0x232   :  { %v2539_v43 = vsel %vm2535_vm5, %v2531_v41, %v2537_v42 }
 0x233   :  { %v2541_v55 = vpack.c.bf16 %v2539_v43, %v2539_v43 }
 0x235   :  { %v2532_v44 = vpop.f32.mrf.mxu3  ;;  %2695 = vmatmul.bf16.vlgmr.msra.gmra.mxu1 %v2541_v55 }
 0x2a2   :  { %v2683_v4 = vpop.f32.mrf.mxu0 }
 0x2a3   :  { %v2684_v47 = vadd.f32 %v4403_v20, %v2683_v4 }
 0x2aa   :  { %v2685_v45 = vpop.f32.mrf.mxu0 }
 0x2b2   :  { %v2696_v3 = vpop.f32.mrf.mxu1 }
 0x2b3   :  { %v2697_v48 = vadd.f32 %v2696_v3, %v2684_v47 }
 0x2b5   :  { %2701 = vst.msk [vmem:[#allocation5] sm:$0x3] %vm2700_vm6, %v2697_v48 }
 0x2b6   :  { %2712 = dma.vmem_to_hbm [thread:$0]  %s2708_s23, 32, %s2710_s26, [#allocation4]  }
 0x2ba   :  { %v2698_v21 = vpop.f32.mrf.mxu1 }
 0x2bb   :  { %4463 = dma.done.wait [#allocation4], 32  }
 0x2bc   :  { %4464 = vsyncadd [#allocation4], 4294967264 }
 0x2bd   :  { %2717 = vsyncpa [#allocation3], 1 }
 0x2be   :  { %2718 = vsyncpa [#allocation4], 1 }

</bundles_post_ra>
